<compile_context>
chip_gen: v6e
topology: v6e:2x2x1
jax: 0.10.0
libtpu: 0.0.40
codegen_flags: <defaults>
</compile_context>

<pallas_src>
import functools

import jax
import jax.numpy as jnp
from jax.experimental import pallas as pl
from jax.experimental.pallas import tpu as pltpu

_BT_MAX = 64   # images per grid step (capped for v7x's 64 MiB VMEM)


def _round_up(x, m):
    return (x + m - 1) // m * m


# ----------------------------- fused kernel -----------------------------

def _fused_kernel(x_ref, m1_ref, b1_ref, m2_ref, b2_ref,
                  fw1_ref, fb1_ref, fw2_ref, fb2_ref, fw3_ref, fb3_ref,
                  o_ref):
    bt = x_ref.shape[0]
    f32 = jnp.float32
    bf16 = jnp.bfloat16

    def conv_colpool(xin, rows, row_step, m_ref, b_ref):
        # xin: [bt, >= rows + 4*row_step, lanes] bf16.  One matmul produces the
        # conv output AND its column-shifted copy (second half of the weight);
        # max of the two 256-lane halves == 2x1 max-pool along W, lane-dense.
        lanes = xin.shape[-1]
        xs = jnp.concatenate(
            [xin[:, kh * row_step: kh * row_step + rows, :] for kh in range(5)],
            axis=-1)                                    # [bt, rows, 5*lanes]
        xs = xs.reshape(bt * rows, 5 * lanes)
        y = jnp.dot(xs, m_ref[...], preferred_element_type=f32) + b_ref[...]
        y = y.reshape(bt, rows, y.shape[-1])
        half = y.shape[-1] // 2
        return jnp.maximum(jnp.maximum(y[..., :half], y[..., half:]), 0.0)

    x = x_ref[...]                                      # [bt, 44, 128] bf16
    # conv1 + relu + W-pool (valid rows 0..27, pooled values at even columns)
    h1 = conv_colpool(x, 40, 1, m1_ref, b1_ref)         # [bt, 40, 256] f32
    # H-pool: keep every row; even rows hold the pooled values
    h1 = jnp.maximum(h1[:, 0:32, :], h1[:, 1:33, :])    # [bt, 32, 256]
    # conv2 + relu + W-pool (H-dilation 2 -> valid at even rows 0..18);
    # the even-column selection of pool1 is folded into m2 (zero rows).
    h2 = conv_colpool(h1.astype(bf16), 24, 2, m2_ref, b2_ref)   # [bt, 24, 256]
    # H-pool of conv2 (partners are 2 rows apart); rows 0,4,8,12,16 hold results
    h2 = jnp.maximum(h2[:, 0:17, :], h2[:, 2:19, :])    # [bt, 17, 256]

    # fc1: the (h, w, c) -> torch (c, h, w) permutation and pool2's even-column
    # selection are folded into fw1 (zero rows elsewhere).
    z = fb1_ref[...]
    for i in range(5):
        z = z + jnp.dot(h2[:, 4 * i, :].astype(bf16), fw1_ref[i],
                        preferred_element_type=f32)
    z = jnp.maximum(z, 0.0)
    z = jnp.maximum(
        jnp.dot(z.astype(bf16), fw2_ref[...], preferred_element_type=f32)
        + fb2_ref[...], 0.0)
    out = (jnp.dot(z.astype(bf16), fw3_ref[...], preferred_element_type=f32)
           + fb3_ref[...])
    o_ref[...] = out.astype(o_ref.dtype)


# -------------------------- host-side weight prep --------------------------

def _conv_toeplitz(w, in_w, in_lanes, out_lanes, stride_in):
    """w: [cout, cin, kh, kw] (torch layout). Block-Toeplitz matrix with
    M[kh*in_lanes + wi*cin + c, ow*cout + co] = w[co, c, kh, kw]
    where wi == stride_in*(ow + kw); zero elsewhere (incl. lane padding)."""
    cout, cin, KH, KW = w.shape
    out_w = in_w // stride_in - KW + 1
    wi = jnp.arange(in_w)[:, None, None]
    ow = jnp.arange(out_w)[None, :, None]
    kw = jnp.arange(KW)[None, None, :]
    sel = (wi == stride_in * (ow + kw)).astype(w.dtype)       # [in_w, out_w, KW]
    m = jnp.einsum('woq,ackq->kwcoa', sel, w)                 # [KH,in_w,cin,out_w,cout]
    m = m.reshape(KH, in_w * cin, out_w * cout)
    m = jnp.pad(m, ((0, 0), (0, in_lanes - in_w * cin),
                    (0, out_lanes - out_w * cout)))
    return m.reshape(KH * in_lanes, out_lanes)


def _conv_bias(b, out_w, out_lanes):
    v = jnp.tile(b, out_w)                                    # v[ow*cout+co] = b[co]
    return jnp.pad(v, (0, out_lanes - v.shape[0])).reshape(1, out_lanes)


def _shift_cols(m, shift):
    # Columns shifted left by `shift` (the "next output column" W-pool partner).
    return jnp.pad(m[:, shift:], ((0, 0), (0, shift)))


def prepare_params(params):
    """One-time repack of torch-layout params into the kernel layout."""
    (w1, b1, w2, b2, fw1, fb1, fw2, fb2, fw3, fb3) = params
    nc = fw3.shape[0]
    assert nc <= 128
    f32, bf16 = jnp.float32, jnp.bfloat16

    m1 = _conv_toeplitz(w1.astype(f32), in_w=32, in_lanes=128, out_lanes=256,
                        stride_in=1)                          # (640, 256)
    m2 = _conv_toeplitz(w2.astype(f32), in_w=28, in_lanes=256, out_lanes=256,
                        stride_in=2)                          # (1280, 256)
    b1v = _conv_bias(b1.astype(f32), 28, 256)
    b2v = _conv_bias(b2.astype(f32), 10, 256)

    # Conv weight and its column-shifted copy share one matmul (N = 512).
    m1cat = jnp.concatenate([m1, _shift_cols(m1, 6)], axis=1).astype(bf16)
    b1cat = jnp.concatenate([b1v, _shift_cols(b1v, 6)], axis=1)
    m2cat = jnp.concatenate([m2, _shift_cols(m2, 16)], axis=1).astype(bf16)
    b2cat = jnp.concatenate([b2v, _shift_cols(b2v, 16)], axis=1)

    # fc1: torch flattens NCHW (c, h, w); kernel activations are (h rows,
    # (w, c) lanes with only even w valid) -> permute + zero rows, pad to 128.
    w4 = jnp.transpose(fw1.reshape(120, 16, 5, 5).astype(f32), (2, 3, 1, 0))
    fw1p = jnp.zeros((5, 10, 16, 120), f32).at[:, 0::2, :, :].set(w4)
    fw1p = fw1p.reshape(5, 160, 120)
    fw1p = jnp.pad(fw1p, ((0, 0), (0, 96), (0, 8))).astype(bf16)   # (5, 256, 128)
    fb1p = jnp.pad(fb1.astype(f32), (0, 8)).reshape(1, 128)

    fw2p = jnp.pad(fw2.T.astype(f32), ((0, 8), (0, 44))).astype(bf16)      # (128,128)
    fb2p = jnp.pad(fb2.astype(f32), (0, 44)).reshape(1, 128)
    fw3p = jnp.pad(fw3.T.astype(f32), ((0, 44), (0, 128 - nc))).astype(bf16)
    fb3p = jnp.pad(fb3.astype(f32), (0, 128 - nc)).reshape(1, 128)

    return (m1cat, b1cat, m2cat, b2cat, fw1p, fb1p, fw2p, fb2p, fw3p, fb3p)


# ------------------------------- forward -------------------------------

@functools.partial(jax.jit, static_argnames=("num_classes",))
def cnn_cifar_forward(x, prepped, num_classes=10):
    (m1cat, b1cat, m2cat, b2cat, fw1p, fb1p, fw2p, fb2p, fw3p, fb3p) = prepped
    b = x.shape[0]
    assert x.shape[1:] == (3, 32, 32)

    # NCHW -> [B, H, W*C] with (w, c) on lanes, zero-padded to 44 rows / 128
    # lanes, cast to bf16 (one fused XLA pass; no gathers inside the kernel).
    xh = jnp.transpose(x, (0, 2, 3, 1)).reshape(b, 32, 96)
    xh = jnp.pad(xh, ((0, 0), (0, 12), (0, 32))).astype(jnp.bfloat16)

    # Batch tile: large enough to fill MXU rows, small enough for v7x VMEM,
    # and >= 2 grid steps (megacore sharding) once the batch allows it.
    bt = max(8, min(_BT_MAX, _round_up(-(-b // 2), 8)))
    bpad = _round_up(b, bt)
    if bpad != b:
        xh = jnp.pad(xh, ((0, bpad - b), (0, 0), (0, 0)))
    grid = (bpad // bt,)

    flops = 2 * bpad * (40 * 640 * 512 + 24 * 1280 * 512
                        + 5 * 256 * 128 + 2 * 128 * 128)
    bytes_accessed = (2 * xh.size + 4 * bpad * 128
                      + 2 * (m1cat.size + m2cat.size + fw1p.size
                             + fw2p.size + fw3p.size)
                      + 4 * (b1cat.size + b2cat.size + fb1p.size
                             + fb2p.size + fb3p.size))

    out = pl.pallas_call(
        _fused_kernel,
        out_shape=jax.ShapeDtypeStruct((bpad, 128), jnp.float32),
        grid_spec=pltpu.PrefetchScalarGridSpec(
            num_scalar_prefetch=0,
            grid=grid,
            in_specs=[
                pl.BlockSpec((bt, 44, 128), lambda i: (i, 0, 0)),   # input tile
                pl.BlockSpec((640, 512), lambda i: (0, 0)),         # conv1 W|Wshift
                pl.BlockSpec((1, 512), lambda i: (0, 0)),
                pl.BlockSpec((1280, 512), lambda i: (0, 0)),        # conv2 W|Wshift
                pl.BlockSpec((1, 512), lambda i: (0, 0)),
                pl.BlockSpec((5, 256, 128), lambda i: (0, 0, 0)),   # fc1 (per row)
                pl.BlockSpec((1, 128), lambda i: (0, 0)),
                pl.BlockSpec((128, 128), lambda i: (0, 0)),         # fc2
                pl.BlockSpec((1, 128), lambda i: (0, 0)),
                pl.BlockSpec((128, 128), lambda i: (0, 0)),         # fc3
                pl.BlockSpec((1, 128), lambda i: (0, 0)),
            ],
            out_specs=pl.BlockSpec((bt, 128), lambda i: (i, 0)),
        ),
        compiler_params=pltpu.CompilerParams(
            dimension_semantics=("parallel",),
            vmem_limit_bytes=40 * 1024 * 1024),
        cost_estimate=pl.CostEstimate(flops=int(flops), transcendentals=0,
                                      bytes_accessed=int(bytes_accessed)),
    )(xh, m1cat, b1cat, m2cat, b2cat, fw1p, fb1p, fw2p, fb2p, fw3p, fb3p)
    return out[:b, :num_classes]


# ----------------------------- reference & init -----------------------------

def _reference_forward(x, params):
    (w1, b1, w2, b2, fw1, fb1, fw2, fb2, fw3, fb3) = params
    hp = jax.lax.Precision.HIGHEST

    def conv(t, w, bias):
        y = jax.lax.conv_general_dilated(
            t, w, window_strides=(1, 1), padding='VALID',
            dimension_numbers=('NCHW', 'OIHW', 'NCHW'), precision=hp)
        return y + bias[None, :, None, None]

    def pool(t):
        return jax.lax.reduce_window(t, -jnp.inf, jax.lax.max,
                                     (1, 1, 2, 2), (1, 1, 2, 2), 'VALID')

    y = pool(jax.nn.relu(conv(x, w1, b1)))
    y = pool(jax.nn.relu(conv(y, w2, b2)))
    y = y.reshape(y.shape[0], 16 * 5 * 5)
    y = jax.nn.relu(jnp.dot(y, fw1.T, precision=hp) + fb1)
    y = jax.nn.relu(jnp.dot(y, fw2.T, precision=hp) + fb2)
    return jnp.dot(y, fw3.T, precision=hp) + fb3


def init_params(key, num_classes=10):
    ks = jax.random.split(key, 10)

    def u(k, shape, fan_in):
        bound = 1.0 / jnp.sqrt(jnp.float32(fan_in))
        return jax.random.uniform(k, shape, jnp.float32, -bound, bound)

    w1 = u(ks[0], (6, 3, 5, 5), 3 * 25)
    b1 = u(ks[1], (6,), 3 * 25)
    w2 = u(ks[2], (16, 6, 5, 5), 6 * 25)
    b2 = u(ks[3], (16,), 6 * 25)
    fw1 = u(ks[4], (120, 400), 400)
    fb1 = u(ks[5], (120,), 400)
    fw2 = u(ks[6], (84, 120), 120)
    fb2 = u(ks[7], (84,), 120)
    fw3 = u(ks[8], (num_classes, 84), 84)
    fb3 = u(ks[9], (num_classes,), 84)
    return (w1, b1, w2, b2, fw1, fb1, fw2, fb2, fw3, fb3)


if __name__ == "__main__":
    key = jax.random.PRNGKey(0)
    k_x, k_p = jax.random.split(key)
    num_classes = 10
    # CIFAR geometry is forced by the module (16*5*5 flatten): 3x32x32 input.
    x = jax.random.normal(k_x, (2, 3, 32, 32), dtype=jnp.float32)
    params = init_params(k_p, num_classes=num_classes)
    prepped = prepare_params(params)       # one-time host-side weight repack

    out = cnn_cifar_forward(x, prepped, num_classes=num_classes)
    out = jax.block_until_ready(out)
    assert out.shape == (2, num_classes)
    assert out.dtype == jnp.float32

    ref = _reference_forward(x, params)
    err = float(jnp.max(jnp.abs(out - ref)))
    assert err < 5e-2, f"kernel/reference mismatch: max abs err = {err}"
    print("KERNEL_OK")
</pallas_src>

<mosaic_0001>
module attributes {stable_mosaic.version = 11 : i64} {
  func.func @_fused_kernel(%arg0: i32, %arg1: memref<8x44x128xbf16, #tpu.memory_space<vmem>>, %arg2: memref<640x512xbf16, #tpu.memory_space<vmem>>, %arg3: memref<1x512xf32, #tpu.memory_space<vmem>>, %arg4: memref<1280x512xbf16, #tpu.memory_space<vmem>>, %arg5: memref<1x512xf32, #tpu.memory_space<vmem>>, %arg6: memref<5x256x128xbf16, #tpu.memory_space<vmem>>, %arg7: memref<1x128xf32, #tpu.memory_space<vmem>>, %arg8: memref<128x128xbf16, #tpu.memory_space<vmem>>, %arg9: memref<1x128xf32, #tpu.memory_space<vmem>>, %arg10: memref<128x128xbf16, #tpu.memory_space<vmem>>, %arg11: memref<1x128xf32, #tpu.memory_space<vmem>>, %arg12: memref<8x128xf32, #tpu.memory_space<vmem>>) attributes {dimension_semantics = [#tpu.dimension_semantics<parallel>], iteration_bounds = array<i64: 1>, scalar_prefetch = 0 : i64, scratch_operands = 0 : i64, tpu.core_type = #tpu.core_type<tc>, window_params = [{transform_indices = @transform_0, window_bounds = array<i64: 8, 44, 128>}, {pipeline_mode = #tpu.pipeline_mode<synchronous>, transform_indices = @transform_1, window_bounds = array<i64: 640, 512>}, {pipeline_mode = #tpu.pipeline_mode<synchronous>, transform_indices = @transform_2, window_bounds = array<i64: 1, 512>}, {pipeline_mode = #tpu.pipeline_mode<synchronous>, transform_indices = @transform_3, window_bounds = array<i64: 1280, 512>}, {pipeline_mode = #tpu.pipeline_mode<synchronous>, transform_indices = @transform_4, window_bounds = array<i64: 1, 512>}, {pipeline_mode = #tpu.pipeline_mode<synchronous>, transform_indices = @transform_5, window_bounds = array<i64: 5, 256, 128>}, {pipeline_mode = #tpu.pipeline_mode<synchronous>, transform_indices = @transform_6, window_bounds = array<i64: 1, 128>}, {pipeline_mode = #tpu.pipeline_mode<synchronous>, transform_indices = @transform_7, window_bounds = array<i64: 128, 128>}, {pipeline_mode = #tpu.pipeline_mode<synchronous>, transform_indices = @transform_8, window_bounds = array<i64: 1, 128>}, {pipeline_mode = #tpu.pipeline_mode<synchronous>, transform_indices = @transform_9, window_bounds = array<i64: 128, 128>}, {pipeline_mode = #tpu.pipeline_mode<synchronous>, transform_indices = @transform_10, window_bounds = array<i64: 1, 128>}, {transform_indices = @transform_11, window_bounds = array<i64: 8, 128>}]} {
    %c0 = arith.constant 0 : index
    %c0_0 = arith.constant 0 : index
    %c0_1 = arith.constant 0 : index
    %0 = vector.load %arg1[%c0, %c0_0, %c0_1] : memref<8x44x128xbf16, #tpu.memory_space<vmem>>, vector<8x44x128xbf16>
    %1 = vector.extract_strided_slice %0 {offsets = [0, 0, 0], sizes = [8, 40, 128], strides = [1, 1, 1]} : vector<8x44x128xbf16> to vector<8x40x128xbf16>
    %2 = vector.extract_strided_slice %0 {offsets = [0, 1, 0], sizes = [8, 40, 128], strides = [1, 1, 1]} : vector<8x44x128xbf16> to vector<8x40x128xbf16>
    %3 = vector.extract_strided_slice %0 {offsets = [0, 2, 0], sizes = [8, 40, 128], strides = [1, 1, 1]} : vector<8x44x128xbf16> to vector<8x40x128xbf16>
    %4 = vector.extract_strided_slice %0 {offsets = [0, 3, 0], sizes = [8, 40, 128], strides = [1, 1, 1]} : vector<8x44x128xbf16> to vector<8x40x128xbf16>
    %5 = vector.extract_strided_slice %0 {offsets = [0, 4, 0], sizes = [8, 40, 128], strides = [1, 1, 1]} : vector<8x44x128xbf16> to vector<8x40x128xbf16>
    %6 = tpu.concatenate %1, %2, %3, %4, %5 in 2 : vector<8x40x128xbf16>, vector<8x40x128xbf16>, vector<8x40x128xbf16>, vector<8x40x128xbf16>, vector<8x40x128xbf16> -> vector<8x40x640xbf16>
    %7 = vector.shape_cast %6 : vector<8x40x640xbf16> to vector<320x640xbf16>
    %c0_2 = arith.constant 0 : index
    %c0_3 = arith.constant 0 : index
    %8 = vector.load %arg2[%c0_2, %c0_3] : memref<640x512xbf16, #tpu.memory_space<vmem>>, vector<640x512xbf16>
    %cst = arith.constant dense<0.000000e+00> : vector<320x512xf32>
    %9 = tpu.matmul %7, %8, %cst {dimension_numbers = #tpu.dot_dimension_numbers<[1], [0], [0], [1], [0, 0, 1, 1], [], []>} : vector<320x640xbf16>, vector<640x512xbf16>, vector<320x512xf32> -> vector<320x512xf32>
    %c0_4 = arith.constant 0 : index
    %c0_5 = arith.constant 0 : index
    %10 = vector.load %arg3[%c0_4, %c0_5] : memref<1x512xf32, #tpu.memory_space<vmem>>, vector<1x512xf32>
    %11 = vector.broadcast %10 : vector<1x512xf32> to vector<320x512xf32>
    %12 = arith.addf %9, %11 : vector<320x512xf32>
    %13 = vector.shape_cast %12 : vector<320x512xf32> to vector<8x40x512xf32>
    %14 = vector.extract_strided_slice %13 {offsets = [0, 0, 0], sizes = [8, 40, 256], strides = [1, 1, 1]} : vector<8x40x512xf32> to vector<8x40x256xf32>
    %15 = vector.extract_strided_slice %13 {offsets = [0, 0, 256], sizes = [8, 40, 256], strides = [1, 1, 1]} : vector<8x40x512xf32> to vector<8x40x256xf32>
    %16 = arith.maximumf %14, %15 : vector<8x40x256xf32>
    %cst_6 = arith.constant 0.000000e+00 : f32
    %17 = vector.broadcast %cst_6 : f32 to vector<8x40x256xf32>
    %18 = arith.maximumf %16, %17 : vector<8x40x256xf32>
    %19 = vector.extract_strided_slice %18 {offsets = [0, 0, 0], sizes = [8, 32, 256], strides = [1, 1, 1]} : vector<8x40x256xf32> to vector<8x32x256xf32>
    %20 = vector.extract_strided_slice %18 {offsets = [0, 1, 0], sizes = [8, 32, 256], strides = [1, 1, 1]} : vector<8x40x256xf32> to vector<8x32x256xf32>
    %21 = arith.maximumf %19, %20 : vector<8x32x256xf32>
    %22 = arith.truncf %21 : vector<8x32x256xf32> to vector<8x32x256xbf16>
    %23 = vector.extract_strided_slice %22 {offsets = [0, 0, 0], sizes = [8, 24, 256], strides = [1, 1, 1]} : vector<8x32x256xbf16> to vector<8x24x256xbf16>
    %24 = vector.extract_strided_slice %22 {offsets = [0, 2, 0], sizes = [8, 24, 256], strides = [1, 1, 1]} : vector<8x32x256xbf16> to vector<8x24x256xbf16>
    %25 = vector.extract_strided_slice %22 {offsets = [0, 4, 0], sizes = [8, 24, 256], strides = [1, 1, 1]} : vector<8x32x256xbf16> to vector<8x24x256xbf16>
    %26 = vector.extract_strided_slice %22 {offsets = [0, 6, 0], sizes = [8, 24, 256], strides = [1, 1, 1]} : vector<8x32x256xbf16> to vector<8x24x256xbf16>
    %27 = vector.extract_strided_slice %22 {offsets = [0, 8, 0], sizes = [8, 24, 256], strides = [1, 1, 1]} : vector<8x32x256xbf16> to vector<8x24x256xbf16>
    %28 = tpu.concatenate %23, %24, %25, %26, %27 in 2 : vector<8x24x256xbf16>, vector<8x24x256xbf16>, vector<8x24x256xbf16>, vector<8x24x256xbf16>, vector<8x24x256xbf16> -> vector<8x24x1280xbf16>
    %29 = vector.shape_cast %28 : vector<8x24x1280xbf16> to vector<192x1280xbf16>
    %c0_7 = arith.constant 0 : index
    %c0_8 = arith.constant 0 : index
    %30 = vector.load %arg4[%c0_7, %c0_8] : memref<1280x512xbf16, #tpu.memory_space<vmem>>, vector<1280x512xbf16>
    %cst_9 = arith.constant dense<0.000000e+00> : vector<192x512xf32>
    %31 = tpu.matmul %29, %30, %cst_9 {dimension_numbers = #tpu.dot_dimension_numbers<[1], [0], [0], [1], [0, 0, 1, 1], [], []>} : vector<192x1280xbf16>, vector<1280x512xbf16>, vector<192x512xf32> -> vector<192x512xf32>
    %c0_10 = arith.constant 0 : index
    %c0_11 = arith.constant 0 : index
    %32 = vector.load %arg5[%c0_10, %c0_11] : memref<1x512xf32, #tpu.memory_space<vmem>>, vector<1x512xf32>
    %33 = vector.broadcast %32 : vector<1x512xf32> to vector<192x512xf32>
    %34 = arith.addf %31, %33 : vector<192x512xf32>
    %35 = vector.shape_cast %34 : vector<192x512xf32> to vector<8x24x512xf32>
    %36 = vector.extract_strided_slice %35 {offsets = [0, 0, 0], sizes = [8, 24, 256], strides = [1, 1, 1]} : vector<8x24x512xf32> to vector<8x24x256xf32>
    %37 = vector.extract_strided_slice %35 {offsets = [0, 0, 256], sizes = [8, 24, 256], strides = [1, 1, 1]} : vector<8x24x512xf32> to vector<8x24x256xf32>
    %38 = arith.maximumf %36, %37 : vector<8x24x256xf32>
    %cst_12 = arith.constant 0.000000e+00 : f32
    %39 = vector.broadcast %cst_12 : f32 to vector<8x24x256xf32>
    %40 = arith.maximumf %38, %39 : vector<8x24x256xf32>
    %41 = vector.extract_strided_slice %40 {offsets = [0, 0, 0], sizes = [8, 17, 256], strides = [1, 1, 1]} : vector<8x24x256xf32> to vector<8x17x256xf32>
    %42 = vector.extract_strided_slice %40 {offsets = [0, 2, 0], sizes = [8, 17, 256], strides = [1, 1, 1]} : vector<8x24x256xf32> to vector<8x17x256xf32>
    %43 = arith.maximumf %41, %42 : vector<8x17x256xf32>
    %c0_13 = arith.constant 0 : index
    %c0_14 = arith.constant 0 : index
    %44 = vector.load %arg7[%c0_13, %c0_14] : memref<1x128xf32, #tpu.memory_space<vmem>>, vector<1x128xf32>
    %45 = vector.extract_strided_slice %43 {offsets = [0, 0, 0], sizes = [8, 1, 256], strides = [1, 1, 1]} : vector<8x17x256xf32> to vector<8x1x256xf32>
    %46 = vector.shape_cast %45 : vector<8x1x256xf32> to vector<8x256xf32>
    %47 = arith.truncf %46 : vector<8x256xf32> to vector<8x256xbf16>
    %c0_15 = arith.constant 0 : index
    %c0_16 = arith.constant 0 : index
    %c0_17 = arith.constant 0 : index
    %48 = vector.load %arg6[%c0_15, %c0_16, %c0_17] : memref<5x256x128xbf16, #tpu.memory_space<vmem>>, vector<1x256x128xbf16>
    %49 = vector.shape_cast %48 : vector<1x256x128xbf16> to vector<256x128xbf16>
    %cst_18 = arith.constant dense<0.000000e+00> : vector<8x128xf32>
    %50 = tpu.matmul %47, %49, %cst_18 {dimension_numbers = #tpu.dot_dimension_numbers<[1], [0], [0], [1], [0, 0, 1, 1], [], []>} : vector<8x256xbf16>, vector<256x128xbf16>, vector<8x128xf32> -> vector<8x128xf32>
    %51 = vector.broadcast %44 : vector<1x128xf32> to vector<8x128xf32>
    %52 = arith.addf %51, %50 : vector<8x128xf32>
    %53 = vector.extract_strided_slice %43 {offsets = [0, 4, 0], sizes = [8, 1, 256], strides = [1, 1, 1]} : vector<8x17x256xf32> to vector<8x1x256xf32>
    %54 = vector.shape_cast %53 : vector<8x1x256xf32> to vector<8x256xf32>
    %55 = arith.truncf %54 : vector<8x256xf32> to vector<8x256xbf16>
    %c1 = arith.constant 1 : index
    %c0_19 = arith.constant 0 : index
    %c0_20 = arith.constant 0 : index
    %56 = vector.load %arg6[%c1, %c0_19, %c0_20] : memref<5x256x128xbf16, #tpu.memory_space<vmem>>, vector<1x256x128xbf16>
    %57 = vector.shape_cast %56 : vector<1x256x128xbf16> to vector<256x128xbf16>
    %cst_21 = arith.constant dense<0.000000e+00> : vector<8x128xf32>
    %58 = tpu.matmul %55, %57, %cst_21 {dimension_numbers = #tpu.dot_dimension_numbers<[1], [0], [0], [1], [0, 0, 1, 1], [], []>} : vector<8x256xbf16>, vector<256x128xbf16>, vector<8x128xf32> -> vector<8x128xf32>
    %59 = arith.addf %52, %58 : vector<8x128xf32>
    %60 = vector.extract_strided_slice %43 {offsets = [0, 8, 0], sizes = [8, 1, 256], strides = [1, 1, 1]} : vector<8x17x256xf32> to vector<8x1x256xf32>
    %61 = vector.shape_cast %60 : vector<8x1x256xf32> to vector<8x256xf32>
    %62 = arith.truncf %61 : vector<8x256xf32> to vector<8x256xbf16>
    %c2 = arith.constant 2 : index
    %c0_22 = arith.constant 0 : index
    %c0_23 = arith.constant 0 : index
    %63 = vector.load %arg6[%c2, %c0_22, %c0_23] : memref<5x256x128xbf16, #tpu.memory_space<vmem>>, vector<1x256x128xbf16>
    %64 = vector.shape_cast %63 : vector<1x256x128xbf16> to vector<256x128xbf16>
    %cst_24 = arith.constant dense<0.000000e+00> : vector<8x128xf32>
    %65 = tpu.matmul %62, %64, %cst_24 {dimension_numbers = #tpu.dot_dimension_numbers<[1], [0], [0], [1], [0, 0, 1, 1], [], []>} : vector<8x256xbf16>, vector<256x128xbf16>, vector<8x128xf32> -> vector<8x128xf32>
    %66 = arith.addf %59, %65 : vector<8x128xf32>
    %67 = vector.extract_strided_slice %43 {offsets = [0, 12, 0], sizes = [8, 1, 256], strides = [1, 1, 1]} : vector<8x17x256xf32> to vector<8x1x256xf32>
    %68 = vector.shape_cast %67 : vector<8x1x256xf32> to vector<8x256xf32>
    %69 = arith.truncf %68 : vector<8x256xf32> to vector<8x256xbf16>
    %c3 = arith.constant 3 : index
    %c0_25 = arith.constant 0 : index
    %c0_26 = arith.constant 0 : index
    %70 = vector.load %arg6[%c3, %c0_25, %c0_26] : memref<5x256x128xbf16, #tpu.memory_space<vmem>>, vector<1x256x128xbf16>
    %71 = vector.shape_cast %70 : vector<1x256x128xbf16> to vector<256x128xbf16>
    %cst_27 = arith.constant dense<0.000000e+00> : vector<8x128xf32>
    %72 = tpu.matmul %69, %71, %cst_27 {dimension_numbers = #tpu.dot_dimension_numbers<[1], [0], [0], [1], [0, 0, 1, 1], [], []>} : vector<8x256xbf16>, vector<256x128xbf16>, vector<8x128xf32> -> vector<8x128xf32>
    %73 = arith.addf %66, %72 : vector<8x128xf32>
    %74 = vector.extract_strided_slice %43 {offsets = [0, 16, 0], sizes = [8, 1, 256], strides = [1, 1, 1]} : vector<8x17x256xf32> to vector<8x1x256xf32>
    %75 = vector.shape_cast %74 : vector<8x1x256xf32> to vector<8x256xf32>
    %76 = arith.truncf %75 : vector<8x256xf32> to vector<8x256xbf16>
    %c4 = arith.constant 4 : index
    %c0_28 = arith.constant 0 : index
    %c0_29 = arith.constant 0 : index
    %77 = vector.load %arg6[%c4, %c0_28, %c0_29] : memref<5x256x128xbf16, #tpu.memory_space<vmem>>, vector<1x256x128xbf16>
    %78 = vector.shape_cast %77 : vector<1x256x128xbf16> to vector<256x128xbf16>
    %cst_30 = arith.constant dense<0.000000e+00> : vector<8x128xf32>
    %79 = tpu.matmul %76, %78, %cst_30 {dimension_numbers = #tpu.dot_dimension_numbers<[1], [0], [0], [1], [0, 0, 1, 1], [], []>} : vector<8x256xbf16>, vector<256x128xbf16>, vector<8x128xf32> -> vector<8x128xf32>
    %80 = arith.addf %73, %79 : vector<8x128xf32>
    %cst_31 = arith.constant 0.000000e+00 : f32
    %81 = vector.broadcast %cst_31 : f32 to vector<8x128xf32>
    %82 = arith.maximumf %80, %81 : vector<8x128xf32>
    %83 = arith.truncf %82 : vector<8x128xf32> to vector<8x128xbf16>
    %c0_32 = arith.constant 0 : index
    %c0_33 = arith.constant 0 : index
    %84 = vector.load %arg8[%c0_32, %c0_33] : memref<128x128xbf16, #tpu.memory_space<vmem>>, vector<128x128xbf16>
    %cst_34 = arith.constant dense<0.000000e+00> : vector<8x128xf32>
    %85 = tpu.matmul %83, %84, %cst_34 {dimension_numbers = #tpu.dot_dimension_numbers<[1], [0], [0], [1], [0, 0, 1, 1], [], []>} : vector<8x128xbf16>, vector<128x128xbf16>, vector<8x128xf32> -> vector<8x128xf32>
    %c0_35 = arith.constant 0 : index
    %c0_36 = arith.constant 0 : index
    %86 = vector.load %arg9[%c0_35, %c0_36] : memref<1x128xf32, #tpu.memory_space<vmem>>, vector<1x128xf32>
    %87 = vector.broadcast %86 : vector<1x128xf32> to vector<8x128xf32>
    %88 = arith.addf %85, %87 : vector<8x128xf32>
    %cst_37 = arith.constant 0.000000e+00 : f32
    %89 = vector.broadcast %cst_37 : f32 to vector<8x128xf32>
    %90 = arith.maximumf %88, %89 : vector<8x128xf32>
    %91 = arith.truncf %90 : vector<8x128xf32> to vector<8x128xbf16>
    %c0_38 = arith.constant 0 : index
    %c0_39 = arith.constant 0 : index
    %92 = vector.load %arg10[%c0_38, %c0_39] : memref<128x128xbf16, #tpu.memory_space<vmem>>, vector<128x128xbf16>
    %cst_40 = arith.constant dense<0.000000e+00> : vector<8x128xf32>
    %93 = tpu.matmul %91, %92, %cst_40 {dimension_numbers = #tpu.dot_dimension_numbers<[1], [0], [0], [1], [0, 0, 1, 1], [], []>} : vector<8x128xbf16>, vector<128x128xbf16>, vector<8x128xf32> -> vector<8x128xf32>
    %c0_41 = arith.constant 0 : index
    %c0_42 = arith.constant 0 : index
    %94 = vector.load %arg11[%c0_41, %c0_42] : memref<1x128xf32, #tpu.memory_space<vmem>>, vector<1x128xf32>
    %95 = vector.broadcast %94 : vector<1x128xf32> to vector<8x128xf32>
    %96 = arith.addf %93, %95 : vector<8x128xf32>
    %c0_43 = arith.constant 0 : index
    %c0_44 = arith.constant 0 : index
    %97 = vector.load %arg12[%c0_43, %c0_44] : memref<8x128xf32, #tpu.memory_space<vmem>>, vector<8x128xf32>
    tpu.vector_store %arg12[%c0_43, %c0_44], %96 {strides = array<i32>} : memref<8x128xf32, #tpu.memory_space<vmem>>, vector<8x128xf32>,
    return
  }
  func.func @transform_0(%arg0: i32) -> (i32, i32, i32) {
    %c0_i32 = arith.constant 0 : i32
    %c0_i32_0 = arith.constant 0 : i32
    %c0_i32_1 = arith.constant 0 : i32
    return %arg0, %c0_i32, %c0_i32_0 : i32, i32, i32
  }
  func.func @transform_1(%arg0: i32) -> (i32, i32) {
    %c0_i32 = arith.constant 0 : i32
    %c0_i32_0 = arith.constant 0 : i32
    %c0_i32_1 = arith.constant 0 : i32
    return %c0_i32, %c0_i32_0 : i32, i32
  }
  func.func @transform_2(%arg0: i32) -> (i32, i32) {
    %c0_i32 = arith.constant 0 : i32
    %c0_i32_0 = arith.constant 0 : i32
    %c0_i32_1 = arith.constant 0 : i32
    return %c0_i32, %c0_i32_0 : i32, i32
  }
  func.func @transform_3(%arg0: i32) -> (i32, i32) {
    %c0_i32 = arith.constant 0 : i32
    %c0_i32_0 = arith.constant 0 : i32
    %c0_i32_1 = arith.constant 0 : i32
    return %c0_i32, %c0_i32_0 : i32, i32
  }
  func.func @transform_4(%arg0: i32) -> (i32, i32) {
    %c0_i32 = arith.constant 0 : i32
    %c0_i32_0 = arith.constant 0 : i32
    %c0_i32_1 = arith.constant 0 : i32
    return %c0_i32, %c0_i32_0 : i32, i32
  }
  func.func @transform_5(%arg0: i32) -> (i32, i32, i32) {
    %c0_i32 = arith.constant 0 : i32
    %c0_i32_0 = arith.constant 0 : i32
    %c0_i32_1 = arith.constant 0 : i32
    %c0_i32_2 = arith.constant 0 : i32
    return %c0_i32, %c0_i32_0, %c0_i32_1 : i32, i32, i32
  }
  func.func @transform_6(%arg0: i32) -> (i32, i32) {
    %c0_i32 = arith.constant 0 : i32
    %c0_i32_0 = arith.constant 0 : i32
    %c0_i32_1 = arith.constant 0 : i32
    return %c0_i32, %c0_i32_0 : i32, i32
  }
  func.func @transform_7(%arg0: i32) -> (i32, i32) {
    %c0_i32 = arith.constant 0 : i32
    %c0_i32_0 = arith.constant 0 : i32
    %c0_i32_1 = arith.constant 0 : i32
    return %c0_i32, %c0_i32_0 : i32, i32
  }
  func.func @transform_8(%arg0: i32) -> (i32, i32) {
    %c0_i32 = arith.constant 0 : i32
    %c0_i32_0 = arith.constant 0 : i32
    %c0_i32_1 = arith.constant 0 : i32
    return %c0_i32, %c0_i32_0 : i32, i32
  }
  func.func @transform_9(%arg0: i32) -> (i32, i32) {
    %c0_i32 = arith.constant 0 : i32
    %c0_i32_0 = arith.constant 0 : i32
    %c0_i32_1 = arith.constant 0 : i32
    return %c0_i32, %c0_i32_0 : i32, i32
  }
  func.func @transform_10(%arg0: i32) -> (i32, i32) {
    %c0_i32 = arith.constant 0 : i32
    %c0_i32_0 = arith.constant 0 : i32
    %c0_i32_1 = arith.constant 0 : i32
    return %c0_i32, %c0_i32_0 : i32, i32
  }
  func.func @transform_11(%arg0: i32) -> (i32, i32) {
    %c0_i32 = arith.constant 0 : i32
    %c0_i32_0 = arith.constant 0 : i32
    return %arg0, %c0_i32 : i32, i32
  }
}

</mosaic_0001>

<bundles_post_ra>
// kernel: cnn_cifar_forward.1
= control target key start
LH: loop header
LB: loop body
LE: loop exit
PB: predicated region body
PF: predicated region fallthrough
CT: control target
= control target key end

     0   :  { %16 = vsyncpa [#allocation3], 0  ;;  %s16513_s0 = inlined_call_operand.vmem [shape: bf16[8,44,128], index: 0, kind: input, shape index: {}]   ;;  %s16514_s1 = inlined_call_operand.hbm [shape: bf16[640,512], index: 1, kind: input, shape index: {}]   ;;  %s16515_s2 = inlined_call_operand.hbm [shape: f32[1,512], index: 2, kind: input, shape index: {}]   ;;  %s16516_s3 = inlined_call_operand.hbm [shape: bf16[1280,512], index: 3, kind: input, shape index: {}]   ;;  %s16517_s4 = inlined_call_operand.hbm [shape: f32[1,512], index: 4, kind: input, shape index: {}]   ;;  %s16518_s5 = inlined_call_operand.hbm [shape: bf16[5,256,128], index: 5, kind: input, shape index: {}]   ;;  %s16519_s6 = inlined_call_operand.hbm [shape: f32[1,128], index: 6, kind: input, shape index: {}]   ;;  %s16520_s7 = inlined_call_operand.hbm [shape: bf16[128,128], index: 7, kind: input, shape index: {}]   ;;  %s16521_s8 = inlined_call_operand.hbm [shape: f32[1,128], index: 8, kind: input, shape index: {}]   ;;  %s16522_s9 = inlined_call_operand.hbm [shape: bf16[128,128], index: 9, kind: input, shape index: {}]   ;;  %s16523_s10 = inlined_call_operand.hbm [shape: f32[1,128], index: 10, kind: input, shape index: {}]   ;;  %s16524_s11 = inlined_call_operand.vmem [shape: f32[8,128], index: 11, kind: output, shape index: {}]  }
   0x1   :  { %17 = vsyncpa [#allocation5], 0 }
   0x2   :  { %18 = vsyncpa [#allocation8], 0 }
   0x3   :  { %19 = vsyncpa [#allocation11], 0 }
   0x4   :  { %20 = vsyncpa [#allocation14], 0 }
   0x5   :  { %21 = vsyncpa [#allocation17], 0  ;;  %s11807_s17 = smov [#allocation4]   ;;  %s11808_s19 = smov [#allocation7]  }
   0x6   :  { %s42_s18 = sshll.u32 %s11807_s17, 4  ;;  %s64_s20 = sshll.u32 %s11808_s19, 4  ;;  %s43_s18 = int_to_ptr.vmem [resolvable:$true] %s42_s18  ;;  %s65_s20 = int_to_ptr.vmem [resolvable:$true] %s64_s20 }
   0x7   :  { %s11603_s21 = scalar_lea.vmem %s43_s18, 64  ;;  %p11608_p1 = scmp.lt.s32.totalorder %s43_s18, %s43_s18 }
   0x8   :  { %p11604_p0 = scmp.ne.s32.totalorder %s43_s18, %s11603_s21  ;;  %p11609_p2 = scmp.lt.s32.totalorder %s11603_s21, %s11603_s21 }
   0xa   :  { %p11610_p3 = por %p11609_p2, %p11608_p1 }
   0xc   :  { %p11611_p4 = pnand %p11610_p3, %p11604_p0 }
   0xe   :  { %11614 = shalt.err (!%p11611_p4)
}
   0xf   :  { %45 = dma.hbm_to_vmem [thread:$0]  %s16515_s2, 64, %s43_s18, [#allocation5]  }
  0x10   :  { %s11623_s24 = scalar_lea.vmem %s65_s20, 64  ;;  %p11628_p6 = scmp.lt.s32.totalorder %s65_s20, %s65_s20 }
  0x11   :  { %p11624_p5 = scmp.ne.s32.totalorder %s65_s20, %s11623_s24  ;;  %p11629_p7 = scmp.lt.s32.totalorder %s11623_s24, %s11623_s24 }
  0x13   :  { %p11630_p8 = por %p11629_p7, %p11628_p6 }
  0x15   :  { %p11631_p9 = pnand %p11630_p8, %p11624_p5 }
  0x17   :  { %11634 = shalt.err (!%p11631_p9)
}
  0x18   :  { %67 = dma.hbm_to_vmem [thread:$0]  %s16517_s4, 64, %s65_s20, [#allocation8]  }
  0x19   :  { %s11809_s27 = smov [#allocation10]   ;;  %s11810_s29 = smov [#allocation13]  }
  0x1a   :  { %s86_s28 = sshll.u32 %s11809_s27, 4  ;;  %s108_s30 = sshll.u32 %s11810_s29, 4  ;;  %s87_s28 = int_to_ptr.vmem [resolvable:$true] %s86_s28  ;;  %s109_s30 = int_to_ptr.vmem [resolvable:$true] %s108_s30 }
  0x1b   :  { %s11643_s12 = scalar_lea.vmem %s87_s28, 16  ;;  %s11647_s2 = scalar_lea.vmem %s87_s28, 32 }
  0x1c   :  { %p11644_p10 = scmp.ne.s32.totalorder %s87_s28, %s11643_s12  ;;  %p11648_p11 = scmp.lt.s32.totalorder %s87_s28, %s87_s28 }
  0x1d   :  { %p11649_p12 = scmp.lt.s32.totalorder %s11647_s2, %s11643_s12 }
  0x1f   :  { %p11650_p13 = por %p11649_p12, %p11648_p11 }
  0x21   :  { %p11651_p0 = pnand %p11650_p13, %p11644_p10 }
  0x23   :  { %11654 = shalt.err (!%p11651_p0)
}
  0x24   :  { %89 = dma.hbm_to_vmem [thread:$0]  %s16519_s6, 16, %s87_s28, [#allocation11]  }
  0x25   :  { %s11663_s15 = scalar_lea.vmem %s109_s30, 16  ;;  %s11667_s4 = scalar_lea.vmem %s109_s30, 32 }
  0x26   :  { %p11664_p1 = scmp.ne.s32.totalorder %s109_s30, %s11663_s15  ;;  %p11668_p2 = scmp.lt.s32.totalorder %s109_s30, %s109_s30 }
  0x27   :  { %p11669_p3 = scmp.lt.s32.totalorder %s11667_s4, %s11663_s15 }
  0x29   :  { %p11670_p4 = por %p11669_p3, %p11668_p2 }
  0x2b   :  { %p11671_p5 = pnand %p11670_p4, %p11664_p1 }
  0x2d   :  { %11674 = shalt.err (!%p11671_p5)
}
  0x2e   :  { %111 = dma.hbm_to_vmem [thread:$0]  %s16521_s8, 16, %s109_s30, [#allocation14]  }
  0x2f   :  { %s11811_s18 = smov [#allocation2]  }
  0x30   :  { %s29_s19 = sshll.u32 %s11811_s18, 4  ;;  %s30_s19 = int_to_ptr.vmem [resolvable:$true] %s29_s19 }
  0x31   :  { %s11683_s20 = scalar_lea.vmem %s30_s19, 20480  ;;  %p11688_p7 = scmp.lt.s32.totalorder %s30_s19, %s30_s19 }
  0x32   :  { %p11684_p6 = scmp.ne.s32.totalorder %s30_s19, %s11683_s20  ;;  %p11689_p8 = scmp.lt.s32.totalorder %s11683_s20, %s11683_s20 }
  0x34   :  { %p11690_p9 = por %p11689_p8, %p11688_p7 }
  0x36   :  { %p11691_p10 = pnand %p11690_p9, %p11684_p6 }
  0x38   :  { %11694 = shalt.err (!%p11691_p10)
}
  0x39   :  { %s11812_s6 = smov 256   ;;  %s11813_s21 = smov 16  }
  0x3a   :  { %35 = dma.hbm_to_vmem [thread:$0]  %s16514_s1, 20480, %s30_s19, [#allocation3], %s11812_s6, %s11812_s6, %s11813_s21  }
  0x3b   :  { %s11814_s24 = smov [#allocation6]   ;;  %s11815_s8 = smov [#allocation9]  }
  0x3c   :  { %s51_s25 = sshll.u32 %s11814_s24, 4  ;;  %s73_s26 = sshll.u32 %s11815_s8, 4  ;;  %s52_s25 = int_to_ptr.vmem [resolvable:$true] %s51_s25  ;;  %s74_s26 = int_to_ptr.vmem [resolvable:$true] %s73_s26 }
  0x3d   :  { %s11703_s27 = scalar_lea.vmem %s52_s25, 40960  ;;  %p11708_p12 = scmp.lt.s32.totalorder %s52_s25, %s52_s25 }
  0x3e   :  { %p11704_p11 = scmp.ne.s32.totalorder %s52_s25, %s11703_s27  ;;  %p11709_p13 = scmp.lt.s32.totalorder %s11703_s27, %s11703_s27 }
  0x40   :  { %p11710_p0 = por %p11709_p13, %p11708_p12 }
  0x42   :  { %p11711_p1 = pnand %p11710_p0, %p11704_p11 }
  0x44   :  { %11714 = shalt.err (!%p11711_p1)
}
  0x45   :  { %57 = dma.hbm_to_vmem [thread:$0]  %s16516_s3, 40960, %s52_s25, [#allocation5], %s11812_s6, %s11812_s6, %s11813_s21  }
  0x46   :  { %s11723_s30 = scalar_lea.vmem %s74_s26, 10240  ;;  %p11728_p3 = scmp.lt.s32.totalorder %s74_s26, %s74_s26 }
  0x47   :  { %p11724_p2 = scmp.ne.s32.totalorder %s74_s26, %s11723_s30  ;;  %p11729_p4 = scmp.lt.s32.totalorder %s11723_s30, %s11723_s30 }
  0x49   :  { %p11730_p5 = por %p11729_p4, %p11728_p3 }
  0x4b   :  { %p11731_p6 = pnand %p11730_p5, %p11724_p2 }
  0x4d   :  { %11734 = shalt.err (!%p11731_p6)
}
  0x4e   :  { %s11816_s1 = smov 64   ;;  %s11817_s12 = smov 4  }
  0x4f   :  { %79 = dma.hbm_to_vmem [thread:$0]  %s16518_s5, 10240, %s74_s26, [#allocation8], %s11816_s1, %s11816_s1, %s11817_s12  }
  0x50   :  { %s11818_s14 = smov [#allocation12]   ;;  %s11819_s4 = smov [#allocation15]  }
  0x51   :  { %s95_s15 = sshll.u32 %s11818_s14, 4  ;;  %s117_s16 = sshll.u32 %s11819_s4, 4  ;;  %s96_s15 = int_to_ptr.vmem [resolvable:$true] %s95_s15  ;;  %s118_s16 = int_to_ptr.vmem [resolvable:$true] %s117_s16 }
  0x52   :  { %s11743_s3 = scalar_lea.vmem %s96_s15, 1024  ;;  %p11748_p8 = scmp.lt.s32.totalorder %s96_s15, %s96_s15 }
  0x53   :  { %p11744_p7 = scmp.ne.s32.totalorder %s96_s15, %s11743_s3  ;;  %p11749_p9 = scmp.lt.s32.totalorder %s11743_s3, %s11743_s3 }
  0x55   :  { %p11750_p10 = por %p11749_p9, %p11748_p8 }
  0x57   :  { %p11751_p11 = pnand %p11750_p10, %p11744_p7 }
  0x59   :  { %11754 = shalt.err (!%p11751_p11)
}
  0x5a   :  { %101 = dma.hbm_to_vmem [thread:$0]  %s16520_s7, 1024, %s96_s15, [#allocation11], %s11816_s1, %s11816_s1, %s11817_s12  }
  0x5b   :  { %s11763_s19 = scalar_lea.vmem %s118_s16, 1024  ;;  %p11768_p13 = scmp.lt.s32.totalorder %s118_s16, %s118_s16 }
  0x5c   :  { %p11764_p12 = scmp.ne.s32.totalorder %s118_s16, %s11763_s19  ;;  %p11769_p0 = scmp.lt.s32.totalorder %s11763_s19, %s11763_s19 }
  0x5e   :  { %p11770_p1 = por %p11769_p0, %p11768_p13 }
  0x60   :  { %p11771_p2 = pnand %p11770_p1, %p11764_p12 }
  0x62   :  { %11774 = shalt.err (!%p11771_p2)
}
  0x63   :  { %123 = dma.hbm_to_vmem [thread:$0]  %s16522_s9, 1024, %s118_s16, [#allocation14], %s11816_s1, %s11816_s1, %s11817_s12  }
  0x64   :  { %s11820_s6 = smov [#allocation16]  }
  0x65   :  { %s130_s21 = sshll.u32 %s11820_s6, 4  ;;  %s131_s21 = int_to_ptr.vmem [resolvable:$true] %s130_s21 }
  0x66   :  { %s11783_s22 = scalar_lea.vmem %s131_s21, 16  ;;  %s11787_s23 = scalar_lea.vmem %s131_s21, 32 }
  0x67   :  { %p11784_p3 = scmp.ne.s32.totalorder %s131_s21, %s11783_s22  ;;  %p11788_p4 = scmp.lt.s32.totalorder %s131_s21, %s131_s21 }
  0x68   :  { %p11789_p5 = scmp.lt.s32.totalorder %s11787_s23, %s11783_s22 }
  0x6a   :  { %p11790_p6 = por %p11789_p5, %p11788_p4 }
  0x6c   :  { %p11791_p7 = pnand %p11790_p6, %p11784_p3 }
  0x6e   :  { %11794 = shalt.err (!%p11791_p7)
}
  0x6f   :  { %133 = dma.hbm_to_vmem [thread:$0]  %s16523_s10, 16, %s131_s21, [#allocation17]  }
  0x70   :  { %11795 = dma.done.wait [#allocation3], 20480  }
  0x71   :  { %11796 = vsyncadd [#allocation3], 4294946816 }
  0x72   :  { %11797 = dma.done.wait [#allocation5], 41024  }
  0x73   :  { %11798 = vsyncadd [#allocation5], 4294926272 }
  0x74   :  { %11799 = dma.done.wait [#allocation8], 10304  }
  0x75   :  { %11800 = vsyncadd [#allocation8], 4294956992 }
  0x76   :  { %11801 = dma.done.wait [#allocation11], 1040  }
  0x77   :  { %11802 = vsyncadd [#allocation11], 4294966256 }
  0x78   :  { %11803 = dma.done.wait [#allocation14], 1040  }
  0x79   :  { %11804 = vsyncadd [#allocation14], 4294966256 }
  0x7a   :  { %11805 = dma.done.wait [#allocation17], 16  }
  0x7b   :  { %11806 = vsyncadd [#allocation17], 4294967280  ;;  %v10733_v0 = vld [vmem:[#allocation2 + $0xe4] ss:$16 sps:$4 sm:$0xff]   ;;  %v10737_v2 = vld [vmem:[#allocation2 + $0xe0] ss:$16 sps:$4 sm:$0xff]  }
  0x7c   :  { %v10735_v1 = vld [vmem:[#allocation2 + $0x2e4] ss:$16 sps:$4 sm:$0xff]   ;;  %2023 = vmatprep.subr.bf16.mxu0 %v10733_v0  ;;  %v10738_v3 = vld [vmem:[#allocation2 + $0x2e0] ss:$16 sps:$4 sm:$0xff]   ;;  %vm333_vm0 = vsmask.f32 7424 }
  0x7d   :  { %2256 = vmatprep.subr.bf16.mxu1 %v10735_v1  ;;  %v10739_v4 = vld [vmem:[#allocation2 + $0xc4] ss:$16 sps:$4 sm:$0xff]   ;;  %2024 = vmatpush1.bf16.msra.mxu0 %v10737_v2  ;;  %v10743_v6 = vld [vmem:[#allocation2 + $0xc0] ss:$16 sps:$4 sm:$0xff]   ;;  %v11922_v49 = vld [vmem:[%s16513_s0 + $0x8] sm:$0xff]   ;;  %vm518_vm2 = vcmask 1046528  }
  0x7e   :  { %2257 = vmatpush1.bf16.msra.mxu1 %v10738_v3  ;;  %v10741_v5 = vld [vmem:[#allocation2 + $0x2c4] ss:$16 sps:$4 sm:$0xff]   ;;  %2025 = vmatprep.subr.bf16.mxu0 %v10739_v4  ;;  %v10744_v7 = vld [vmem:[#allocation2 + $0x2c0] ss:$16 sps:$4 sm:$0xff]   ;;  %vm559_vm1 = vsmask.f32 6400 }
  0x7f   :  { %2258 = vmatprep.subr.bf16.mxu1 %v10741_v5  ;;  %v10745_v8 = vld [vmem:[#allocation2 + $0xa4] ss:$16 sps:$4 sm:$0xff]   ;;  %v10749_v10 = vld [vmem:[#allocation2 + $0xa0] ss:$16 sps:$4 sm:$0xff]   ;;  %v342_v55 = vshll.u32 %v11922_v49, 16  ;;  %v346_v56 = vshrl.u32 %v11922_v49, 16 }
  0x80   :  { %v10747_v9 = vld [vmem:[#allocation2 + $0x2a4] ss:$16 sps:$4 sm:$0xff]   ;;  %v10750_v11 = vld [vmem:[#allocation2 + $0x2a0] ss:$16 sps:$4 sm:$0xff]   ;;  %vm648_vm3 = vcmask 1045504   ;;  %vm4094_vm4 = vcmask 1044480  }
  0x81   :  { %2026 = vmatpush1.bf16.msra.mxu0 %v10743_v6  ;;  %v10751_v12 = vld [vmem:[#allocation2 + $0x84] ss:$16 sps:$4 sm:$0xff]   ;;  %v10755_v14 = vld [vmem:[#allocation2 + $0x80] ss:$16 sps:$4 sm:$0xff]   ;;  %v11928_v61 = vrot.slane %v342_v55, 1  ;;  %v563_v1 = vrot.slane %v346_v56, 1 }
  0x82   :  { %2259 = vmatpush1.bf16.msra.mxu1 %v10744_v7  ;;  %2027 = vmatprep.subr.bf16.mxu0 %v10745_v8  ;;  %v10753_v13 = vld [vmem:[#allocation2 + $0x284] ss:$16 sps:$4 sm:$0xff]   ;;  %v10756_v15 = vld [vmem:[#allocation2 + $0x280] ss:$16 sps:$4 sm:$0xff]   ;;  %v564_v2 = vrot.slane %v342_v55, 2  ;;  %vm4143_vm5 = vcmask 1043456  }
  0x83   :  { %2260 = vmatprep.subr.bf16.mxu1 %v10747_v9  ;;  %v10757_v16 = vld [vmem:[#allocation2 + $0x64] ss:$16 sps:$4 sm:$0xff]   ;;  %v10761_v18 = vld [vmem:[#allocation2 + $0x60] ss:$16 sps:$4 sm:$0xff]   ;;  %v11946_v9 = vld [vmem:[%s16513_s0 + $0x18] sm:$0xf] }
  0x84   :  { %v10759_v17 = vld [vmem:[#allocation2 + $0x264] ss:$16 sps:$4 sm:$0xff]   ;;  %v10762_v19 = vld [vmem:[#allocation2 + $0x260] ss:$16 sps:$4 sm:$0xff]   ;;  %v10834_v55 = vld [vmem:[#allocation2 + $0xe8] ss:$16 sps:$4 sm:$0xff]  }
  0x85   :  { %2028 = vmatpush1.bf16.msra.mxu0 %v10749_v10  ;;  %v10763_v20 = vld [vmem:[#allocation2 + $0x44] ss:$16 sps:$4 sm:$0xff]   ;;  %v10767_v22 = vld [vmem:[#allocation2 + $0x40] ss:$16 sps:$4 sm:$0xff]   ;;  %v11948_v10 = vor.u32 %v564_v2, %v563_v1  ;;  %v10840_v1 = vld [vmem:[#allocation2 + $0xcc] ss:$16 sps:$4 sm:$0xff]  }
  0x86   :  { %2261 = vmatpush1.bf16.msra.mxu1 %v10750_v11  ;;  %2029 = vmatprep.subr.bf16.mxu0 %v10751_v12  ;;  %v10765_v21 = vld [vmem:[#allocation2 + $0x244] ss:$16 sps:$4 sm:$0xff]   ;;  %v10768_v23 = vld [vmem:[#allocation2 + $0x240] ss:$16 sps:$4 sm:$0xff]   ;;  %v11953_v11 = vld [vmem:[%s16513_s0 + $0x1c] sm:$0xf] }
  0x87   :  { %2262 = vmatprep.subr.bf16.mxu1 %v10753_v13  ;;  %v10769_v24 = vld [vmem:[#allocation2 + $0x24] ss:$16 sps:$4 sm:$0xff]   ;;  %v10773_v26 = vld [vmem:[#allocation2 + $0x20] ss:$16 sps:$4 sm:$0xff]   ;;  %vm8547_vm6 = vcmask 1041409   ;;  %vm8550_vm7 = vcmask 1042434  }
  0x88   :  { %v10771_v25 = vld [vmem:[#allocation2 + $0x224] ss:$16 sps:$4 sm:$0xff]   ;;  %v10774_v27 = vld [vmem:[#allocation2 + $0x220] ss:$16 sps:$4 sm:$0xff]   ;;  %vm8553_vm8 = vcmask 1043459   ;;  %vm8556_vm9 = vcmask 1044484  }
  0x89   :  { %2030 = vmatpush1.bf16.msra.mxu0 %v10755_v14  ;;  %v10775_v28 = vld [vmem:[#allocation2 + $0x4] ss:$16 sps:$4 sm:$0xff]   ;;  %v10779_v30 = vld [vmem:[#allocation2] ss:$16 sps:$4 sm:$0xff]   ;;  %vm8559_vm10 = vcmask 1045509   ;;  %vm8562_vm11 = vcmask 1046534  }
  0x8a   :  { %2263 = vmatpush1.bf16.msra.mxu1 %v10756_v15  ;;  %2031 = vmatprep.subr.bf16.mxu0 %v10757_v16  ;;  %v10777_v29 = vld [vmem:[#allocation2 + $0x204] ss:$16 sps:$4 sm:$0xff]   ;;  %v10780_v31 = vld [vmem:[#allocation2 + $0x200] ss:$16 sps:$4 sm:$0xff]   ;;  %vm8565_vm12 = vcmask 1047559   ;;  %vm11823_vm13 = vmmov 0  }
  0x8b   :  { %2264 = vmatprep.subr.bf16.mxu1 %v10759_v17  ;;  %v10781_v32 = vld [vmem:[#allocation2 + $0x1e4] ss:$16 sps:$4 sm:$0xff]   ;;  %v10785_v34 = vld [vmem:[#allocation2 + $0x1e0] ss:$16 sps:$4 sm:$0xff]  }
  0x8c   :  { %v10783_v33 = vld [vmem:[#allocation2 + $0x3e4] ss:$16 sps:$4 sm:$0xff]   ;;  %v10786_v35 = vld [vmem:[#allocation2 + $0x3e0] ss:$16 sps:$4 sm:$0xff]  }
  0x8d   :  { %2032 = vmatpush1.bf16.msra.mxu0 %v10761_v18  ;;  %v10787_v36 = vld [vmem:[#allocation2 + $0x1c4] ss:$16 sps:$4 sm:$0xff]   ;;  %v10791_v38 = vld [vmem:[#allocation2 + $0x1c0] ss:$16 sps:$4 sm:$0xff]   ;;  %v11975_v18 = vcombine.low %v11946_v9, %v11953_v11 }
  0x8e   :  { %2265 = vmatpush1.bf16.msra.mxu1 %v10762_v19  ;;  %2033 = vmatprep.subr.bf16.mxu0 %v10763_v20  ;;  %v10789_v37 = vld [vmem:[#allocation2 + $0x3c4] ss:$16 sps:$4 sm:$0xff]   ;;  %v10792_v39 = vld [vmem:[#allocation2 + $0x3c0] ss:$16 sps:$4 sm:$0xff]  }
  0x8f   :  { %2266 = vmatprep.subr.bf16.mxu1 %v10765_v21  ;;  %v10793_v40 = vld [vmem:[#allocation2 + $0x1a4] ss:$16 sps:$4 sm:$0xff]   ;;  %v10797_v42 = vld [vmem:[#allocation2 + $0x1a0] ss:$16 sps:$4 sm:$0xff]  }
  0x90   :  { %v10795_v41 = vld [vmem:[#allocation2 + $0x3a4] ss:$16 sps:$4 sm:$0xff]   ;;  %v10798_v43 = vld [vmem:[#allocation2 + $0x3a0] ss:$16 sps:$4 sm:$0xff]  }
  0x91   :  { %2034 = vmatpush1.bf16.msra.mxu0 %v10767_v22  ;;  %v10799_v44 = vld [vmem:[#allocation2 + $0x184] ss:$16 sps:$4 sm:$0xff]   ;;  %v10803_v46 = vld [vmem:[#allocation2 + $0x180] ss:$16 sps:$4 sm:$0xff]  }
  0x92   :  { %2267 = vmatpush1.bf16.msra.mxu1 %v10768_v23  ;;  %2035 = vmatprep.subr.bf16.mxu0 %v10769_v24  ;;  %v10801_v45 = vld [vmem:[#allocation2 + $0x384] ss:$16 sps:$4 sm:$0xff]   ;;  %v10804_v47 = vld [vmem:[#allocation2 + $0x380] ss:$16 sps:$4 sm:$0xff]   ;;  %v358_v24 = vshrl.u32 %v11975_v18, 16 }
  0x93   :  { %2268 = vmatprep.subr.bf16.mxu1 %v10771_v25  ;;  %v11917_v48 = vld [vmem:[%s16513_s0] sm:$0xff]   ;;  %v11933_v0 = vld [vmem:[%s16513_s0 + $0x10] sm:$0xf]  ;;  %v170_v3 = vld [vmem:[%s16513_s0 + $0x14] sm:$0x3]  ;;  %v360_v25 = vshll.u32 %v11975_v18, 16 }
  0x94   :  { %v10805_v50 = vld [vmem:[#allocation2 + $0x164] ss:$16 sps:$4 sm:$0xff]   ;;  %v10809_v52 = vld [vmem:[#allocation2 + $0x160] ss:$16 sps:$4 sm:$0xff]   ;;  %v335_v53 = vshrl.u32 %v11917_v48, 16  ;;  %v337_v54 = vshll.u32 %v11917_v48, 16  ;;  %v11941_v8 = vcombine.low %v11933_v0, %v170_v3 }
  0x95   :  { %2036 = vmatpush1.bf16.msra.mxu0 %v10773_v26  ;;  %v10807_v51 = vld [vmem:[#allocation2 + $0x364] ss:$16 sps:$4 sm:$0xff]   ;;  %v10810_v57 = vld [vmem:[#allocation2 + $0x360] ss:$16 sps:$4 sm:$0xff]   ;;  %v11990_v26 = vld [vmem:[%s16513_s0 + $0x28] sm:$0xf] }
  0x96   :  { %2269 = vmatpush1.bf16.msra.mxu1 %v10774_v27  ;;  %2037 = vmatprep.subr.bf16.mxu0 %v10775_v28  ;;  %v10811_v58 = vld [vmem:[#allocation2 + $0x144] ss:$16 sps:$4 sm:$0xff]   ;;  %v339_v60 = vrot.slane %v337_v54, 1  ;;  %v560_v62 = vrot.slane %v335_v53, 1  ;;  %v561_v63 = vrot.slane %v337_v54, 2  ;;  %v350_v20 = vshll.u32 %v11941_v8, 16 }
  0x97   :  { %2270 = vmatprep.subr.bf16.mxu1 %v10777_v29  ;;  %v10813_v59 = vld [vmem:[#allocation2 + $0x344] ss:$16 sps:$4 sm:$0xff]   ;;  %v10815_v4 = vld [vmem:[#allocation2 + $0x140] ss:$16 sps:$4 sm:$0xff]   ;;  %v354_v21 = vshrl.u32 %v11941_v8, 16 }
  0x98   :  { %v10816_v5 = vld [vmem:[#allocation2 + $0x340] ss:$16 sps:$4 sm:$0xff]   ;;  %v340_v6 = vor.u32 %v339_v60, %v335_v53  ;;  %v562_v7 = vor.u32 %v561_v63, %v560_v62  ;;  %v11963_v13 = vld [vmem:[%s16513_s0 + $0x24] sm:$0xf]  ;;  %v176_v27 = vld [vmem:[%s16513_s0 + $0x2c] sm:$0x3] }
  0x99   :  { %2038 = vmatpush1.bf16.msra.mxu0 %v10779_v30  ;;  %v11958_v12 = vld [vmem:[%s16513_s0 + $0x20] sm:$0xf]  ;;  %v10817_v15 = vld [vmem:[#allocation2 + $0x124] ss:$16 sps:$4 sm:$0xff]   ;;  %v10838_v3 = vld [vmem:[#allocation2 + $0xc8] ss:$16 sps:$4 sm:$0xff]  }
  0x9a   :  { %2271 = vmatpush1.bf16.msra.mxu1 %v10780_v31  ;;  %2039 = vmatprep.subr.bf16.mxu0 %v10781_v32  ;;  %v11967_v14 = vsel %vm333_vm0, %v340_v6, %v11928_v61  ;;  %v10819_v16 = vld [vmem:[#allocation2 + $0x324] ss:$16 sps:$4 sm:$0xff]   ;;  %v11971_v17 = vsel %vm559_vm1, %v562_v7, %v11948_v10  ;;  %v11979_v19 = vcombine.low %v11958_v12, %v11963_v13  ;;  %v10821_v22 = vld [vmem:[#allocation2 + $0x120] ss:$16 sps:$4 sm:$0xff]  }
  0x9b   :  { %2272 = vmatprep.subr.bf16.mxu1 %v10783_v33  ;;  %16740 = vst [vmem:[#allocation24_spill] sm:$0xff] %v11971_v17  ;;  %2055 = vmatprep.mubr.bf16.mxu0 %v11967_v14  ;;  %v10822_v23 = vld [vmem:[#allocation2 + $0x320] ss:$16 sps:$4 sm:$0xff]   ;;  %v10823_v28 = vld [vmem:[#allocation2 + $0x104] ss:$16 sps:$4 sm:$0xff]  }
  0x9c   :  { %2288 = vmatprep.mubr.bf16.mxu1 %v11971_v17  ;;  %v10825_v29 = vld [vmem:[#allocation2 + $0x304] ss:$16 sps:$4 sm:$0xff]   ;;  %v365_v30 = vshll.u32 %v11979_v19, 16  ;;  %v369_v31 = vshrl.u32 %v11979_v19, 16  ;;  %v10827_v32 = vld [vmem:[#allocation2 + $0x100] ss:$16 sps:$4 sm:$0xff]  }
  0x9d   :  { %2040 = vmatpush2.bf16.msra.mxu0 %v10785_v34  ;;  %v10828_v33 = vld [vmem:[#allocation2 + $0x300] ss:$16 sps:$4 sm:$0xff]   ;;  %v519_v34 = vrot.slane %v11917_v48, 1  ;;  %v10846_v2 = vld [vmem:[#allocation2 + $0x4c4] ss:$16 sps:$4 sm:$0xff]  }
  0x9e   :  { %2273 = vmatpush2.bf16.msra.mxu1 %v10786_v35  ;;  %2041 = vmatprep.subr.bf16.mxu0 %v10787_v36  ;;  %v520_v35 = vrot.slane %v11922_v49, 1  ;;  %v567_v36 = vrot.slane %v354_v21, 1  ;;  %v10831_v54 = vld [vmem:[#allocation2 + $0x4e0] ss:$16 sps:$4 sm:$0xff]  }
  0x9f   :  { %2274 = vmatprep.subr.bf16.mxu1 %v10789_v37  ;;  %v568_v37 = vrot.slane %v350_v20, 2  ;;  %v10844_v6 = vld [vmem:[#allocation2 + $0x4c0] ss:$16 sps:$4 sm:$0xff]  }
  0xa0   :  { %v12008_v53 = vsel %vm518_vm2, %v519_v34, %v520_v35 }
  0xa1   :  { %2042 = vmatpush2.bf16.msra.mxu0 %v10791_v38  ;;  %v10833_v38 = vld [vmem:[#allocation2 + $0x4e4] ss:$16 sps:$4 sm:$0xff]   ;;  %16741 = vst [vmem:[#allocation25_spill] sm:$0xff] %v12008_v53 }
  0xa2   :  { %2275 = vmatpush2.bf16.msra.mxu1 %v10792_v39  ;;  %2043 = vmatprep.subr.bf16.mxu0 %v10793_v40  ;;  %v10836_v39 = vld [vmem:[#allocation2 + $0xec] ss:$16 sps:$4 sm:$0xff]   ;;  %v12000_v40 = vcombine.low %v11990_v26, %v176_v27 }
  0xa3   :  { %2276 = vmatprep.subr.bf16.mxu1 %v10795_v41  ;;  %v362_v41 = vrot.slane %v360_v25, 1 }
  0xa5   :  { %2044 = vmatpush2.bf16.msra.mxu0 %v10797_v42  ;;  %v571_v42 = vrot.slane %v358_v24, 1 }
  0xa6   :  { %2277 = vmatpush2.bf16.msra.mxu1 %v10798_v43  ;;  %2045 = vmatprep.subr.bf16.mxu0 %v10799_v44  ;;  %v572_v43 = vrot.slane %v360_v25, 2  ;;  %v574_v44 = vrot.slane %v369_v31, 1 }
  0xa7   :  { %2278 = vmatprep.subr.bf16.mxu1 %v10801_v45  ;;  %v575_v45 = vrot.slane %v365_v30, 2 }
  0xa9   :  { %2046 = vmatpush2.bf16.msra.mxu0 %v10803_v46  ;;  %v373_v46 = vshll.u32 %v12000_v40, 16  ;;  %v576_v60 = vor.u32 %v575_v45, %v574_v44  ;;  %v12061_v45 = vld [vmem:[%s16513_s0 + $0x30] sm:$0xff]  }
  0xaa   :  { %2279 = vmatpush2.bf16.msra.mxu1 %v10804_v47  ;;  %2047 = vmatprep.subr.bf16.mxu0 %v10805_v50  ;;  %v377_v47 = vshrl.u32 %v12000_v40, 16  ;;  %v348_v50 = vor.u32 %v346_v56, %v11928_v61 }
  0xab   :  { %2280 = vmatprep.subr.bf16.mxu1 %v10807_v51  ;;  %v352_v51 = vrot.slane %v350_v20, 1  ;;  %v579_v63 = vrot.slane %v373_v46, 2 }
  0xac   :  { %v578_v62 = vrot.slane %v377_v47, 1 }
  0xad   :  { %2048 = vmatpush2.bf16.msra.mxu0 %v10809_v52  ;;  %v569_v52 = vor.u32 %v568_v37, %v567_v36  ;;  %v12013_v56 = vsel %vm333_vm0, %v348_v50, %v352_v51 }
  0xae   :  { %2281 = vmatpush2.bf16.msra.mxu1 %v10810_v57  ;;  %2049 = vmatprep.subr.bf16.mxu0 %v10811_v58  ;;  %v363_v57 = vor.u32 %v362_v41, %v358_v24  ;;  %v367_v58 = vrot.slane %v365_v30, 1  ;;  %v12026_v20 = vor.u32 %v579_v63, %v578_v62  ;;  %v10853_v41 = vld [vmem:[#allocation2 + $0x88] ss:$16 sps:$4 sm:$0xff]   ;;  %v12087_v62 = vld [vmem:[%s16513_s0 + $0x40] sm:$0xf] }
  0xaf   :  { %2282 = vmatprep.subr.bf16.mxu1 %v10813_v59  ;;  %v573_v59 = vor.u32 %v572_v43, %v571_v42  ;;  %v12017_v61 = vsel %vm559_vm1, %v11948_v10, %v569_v52  ;;  %v10863_v42 = vld [vmem:[#allocation2 + $0x6c] ss:$16 sps:$4 sm:$0xff]   ;;  %v12054_v43 = vcombine.low %v11933_v0, %v11946_v9  ;;  %v182_v63 = vld [vmem:[%s16513_s0 + $0x44] sm:$0x3] }
  0xb0   :  { %16742 = vst [vmem:[#allocation26_spill] sm:$0xff] %v12017_v61  ;;  %v371_v7 = vor.u32 %v369_v31, %v367_v58  ;;  %v368_v10 = vsel %vm333_vm0, %v363_v57, %v367_v58  ;;  %v12042_v31 = vsel %vm559_vm1, %v576_v60, %v12026_v20  ;;  %v12077_v9 = vld [vmem:[%s16513_s0 + $0x38] sm:$0xff]   ;;  %v10885_v57 = vld [vmem:[#allocation2 + $0x460] ss:$16 sps:$4 sm:$0xff]  }
  0xb1   :  { %2050 = vmatpush2.bf16.msra.mxu0 %v10815_v4  ;;  %v522_v4 = vrot.slane %v11941_v8, 1 }
  0xb2   :  { %2283 = vmatpush2.bf16.msra.mxu1 %v10816_v5  ;;  %2051 = vmatprep.subr.bf16.mxu0 %v10817_v15  ;;  %v356_v5 = vor.u32 %v354_v21, %v352_v51  ;;  %v577_v15 = vsel %vm559_vm1, %v573_v59, %v576_v60  ;;  %v525_v21 = vrot.slane %v11979_v19, 1  ;;  %v381_v60 = vshrl.u32 %v12061_v45, 16 }
  0xb3   :  { %2284 = vmatprep.subr.bf16.mxu1 %v10819_v16  ;;  %v10849_v16 = vld [vmem:[#allocation2 + $0xac] ss:$16 sps:$4 sm:$0xff]   ;;  %v12031_v24 = vsel %vm518_vm2, %v520_v35, %v522_v4  ;;  %v12035_v27 = vcombine.low %v569_v52, %v577_v15  ;;  %v713_v35 = vunpack.c.h.b16 %v368_v10  ;;  %v715_v37 = vunpack.c.h.b16 %v577_v15  ;;  %v10861_v52 = vld [vmem:[#allocation2 + $0x68] ss:$16 sps:$4 sm:$0xff]  }
  0xb4   :  { %16743 = vst [vmem:[#allocation27_spill] sm:$0xff] %v12031_v24  ;;  %v12033_v25 = vcombine.low %v356_v5, %v368_v10  ;;  %v10900_v5 = vld [vmem:[#allocation2 + $0x444] ss:$16 sps:$4 sm:$0xff]   ;;  %v10865_v10 = vld [vmem:[#allocation2 + $0x48] ss:$16 sps:$4 sm:$0xff]  }
  0xb5   :  { %2052 = vmatpush2.bf16.msra.mxu0 %v10821_v22  ;;  %v10860_v22 = vld [vmem:[#allocation2 + $0x4a4] ss:$16 sps:$4 sm:$0xff]   ;;  %16744 = vst [vmem:[#allocation28_spill] sm:$0xff] %v12035_v27  ;;  %v10876_v15 = vld [vmem:[#allocation2 + $0x2c] ss:$16 sps:$4 sm:$0xff]  }
  0xb6   :  { %2285 = vmatpush2.bf16.msra.mxu1 %v10822_v23  ;;  %2053 = vmatprep.subr.bf16.mxu0 %v10823_v28  ;;  %v524_v23 = vrot.slane %v11975_v18, 1  ;;  %v10847_v28 = vld [vmem:[#allocation2 + $0xa8] ss:$16 sps:$4 sm:$0xff]  }
  0xb7   :  { %2286 = vmatprep.subr.bf16.mxu1 %v10825_v29  ;;  %v10855_v29 = vld [vmem:[#allocation2 + $0x8c] ss:$16 sps:$4 sm:$0xff]  }
  0xb8   :  { %v526_v34 = vsel %vm518_vm2, %v524_v23, %v525_v21  ;;  %v12106_v23 = vcombine.low %v12087_v62, %v182_v63  ;;  %v12161_v63 = vcombine.low %v11963_v13, %v11990_v26 }
  0xb9   :  { %2054 = vmatpush2.bf16.msra.mxu0 %v10827_v32  ;;  %v10858_v32 = vld [vmem:[#allocation2 + $0x4a0] ss:$16 sps:$4 sm:$0xff]   ;;  %v12056_v44 = vcombine.low %v522_v4, %v526_v34  ;;  %v714_v58 = vunpack.c.h.b16 %v526_v34  ;;  %v383_v4 = vshll.u32 %v12061_v45, 16 }
  0xba   :  { %2287 = vmatpush2.bf16.msra.mxu1 %v10828_v33  ;;  %2489 = vmatprep.subr.bf16.mxu0 %v10833_v38  ;;  %v10873_v33 = vld [vmem:[#allocation2 + $0x484] ss:$16 sps:$4 sm:$0xff]   ;;  %v719_v38 = vunpack.c.l.b16 %v12042_v31 }
  0xbb   :  { %2722 = vmatprep.subr.bf16.mxu1 %v10836_v39  ;;  %v527_v39 = vrot.slane %v12000_v40, 1  ;;  %16745 = vst [vmem:[#allocation29_spill] sm:$0xff] %v12056_v44 }
  0xbc   :  { %2056 = vmatmul.mubr.bf16.vlgmr.msra.gmra.mxu0 %v11917_v48  ;;  %v375_v48 = vrot.slane %v373_v46, 1  ;;  %v12065_v50 = vpack.c.b16 %v719_v38, %v715_v37 }
  0xbd   :  { %2289 = vmatmul.mubr.bf16.vlgmr.msra.gmra.mxu1 %v12008_v53  ;;  %2490 = vmatpush1.bf16.msra.mxu0 %v10831_v54  ;;  %v12070_v51 = vsel %vm518_vm2, %v525_v21, %v527_v39  ;;  %v10887_v54 = vld [vmem:[#allocation2 + $0x464] ss:$16 sps:$4 sm:$0xff]   ;;  %v12111_v21 = vld [vmem:[%s16513_s0 + $0x48] sm:$0xf]  ;;  %v726_v38 = vunpack.c.l.b16 %v527_v39 }
  0xbe   :  { %2723 = vmatpush1.bf16.msra.mxu1 %v10834_v55  ;;  %2065 = vmatprep.mubr.bf16.mxu0 %v12013_v56  ;;  %v12038_v30 = vsel %vm333_vm0, %v371_v7, %v375_v48  ;;  %16746 = vst [vmem:[#allocation30_spill] sm:$0xff] %v12065_v50  ;;  %v379_v0 = vor.u32 %v377_v47, %v375_v48  ;;  %v10867_v55 = vld [vmem:[#allocation2 + $0x4c] ss:$16 sps:$4 sm:$0xff]   ;;  %v718_v59 = vunpack.c.l.b16 %v12070_v51  ;;  %v392_v7 = vshrl.u32 %v12077_v9, 16 }
  0xbf   :  { %2298 = vmatprep.mubr.bf16.mxu1 %v12017_v61  ;;  %2724 = vmatprep.subr.bf16.mxu1 %v10840_v1  ;;  %v717_v36 = vunpack.c.l.b16 %v12038_v30  ;;  %v721_v47 = vunpack.c.h.b16 %v12038_v30  ;;  %v12101_v48 = vcombine.low %v11953_v11, %v11958_v12  ;;  %v385_v30 = vrot.slane %v383_v4, 1 }
  0xc0   :  { %2491 = vmatprep.subr.bf16.mxu0 %v10846_v2  ;;  %v725_v1 = vunpack.c.l.b16 %v379_v0  ;;  %v723_v2 = vunpack.c.h.b16 %v12042_v31  ;;  %v583_v31 = vrot.slane %v383_v4, 2  ;;  %v585_v34 = vrot.slane %v392_v7, 1  ;;  %v10914_v0 = vld [vmem:[#allocation2 + $0x424] ss:$16 sps:$4 sm:$0xff]  }
  0xc1   :  { %2492 = vmatpush1.bf16.msra.mxu0 %v10844_v6  ;;  %v12063_v46 = vpack.c.b16 %v717_v36, %v713_v35  ;;  %v388_v6 = vshll.u32 %v12077_v9, 16  ;;  %v10882_v36 = vld [vmem:[#allocation2 + $0xc] ss:$16 sps:$4 sm:$0xff]   ;;  %v722_v37 = vunpack.c.h.b16 %v12070_v51  ;;  %v12150_v51 = vld [vmem:[%s16513_s0 + $0x58] sm:$0xf] }
  0xc2   :  { %2725 = vmatpush1.bf16.msra.mxu1 %v10838_v3  ;;  %2493 = vmatprep.subr.bf16.mxu0 %v10860_v22  ;;  %v727_v3 = vunpack.c.l.b16 %v12026_v20  ;;  %v12103_v22 = vpack.c.b16 %v718_v59, %v714_v58  ;;  %v582_v20 = vrot.slane %v381_v60, 1  ;;  %v12118_v11 = vpack.c.b16 %v725_v1, %v721_v47  ;;  %v188_v59 = vld [vmem:[%s16513_s0 + $0x5c] sm:$0x3]  ;;  %v10880_v47 = vld [vmem:[#allocation2 + $0x8] ss:$16 sps:$4 sm:$0xff]  }
  0xc3   :  { %2726 = vmatprep.subr.bf16.mxu1 %v10849_v16  ;;  %v10898_v16 = vld [vmem:[#allocation2 + $0x440] ss:$16 sps:$4 sm:$0xff]   ;;  %v586_v35 = vrot.slane %v388_v6, 2  ;;  %v390_v39 = vrot.slane %v388_v6, 1  ;;  %v12163_v1 = vpack.c.b16 %v726_v38, %v722_v37  ;;  %v12170_v6 = vcombine.low %v12150_v51, %v188_v59 }
  0xc4   :  { %2066 = vmatmul.mubr.bf16.gmra.mxu0 %v11922_v49  ;;  %v10871_v49 = vld [vmem:[#allocation2 + $0x480] ss:$16 sps:$4 sm:$0xff]   ;;  %16747 = vst [vmem:[#allocation31_spill] sm:$0xff] %v12103_v22  ;;  %v12120_v12 = vpack.c.b16 %v727_v3, %v723_v2 }
  0xc5   :  { %2299 = vmatmul.mubr.bf16.gmra.mxu1 %v12031_v24  ;;  %2075 = vmatprep.mubr.bf16.mxu0 %v12033_v25  ;;  %16749 = vst [vmem:[#allocation33_spill] sm:$0xff] %v12163_v1 }
  0xc6   :  { %2308 = vmatprep.mubr.bf16.mxu1 %v12035_v27  ;;  %2727 = vmatpush1.bf16.msra.mxu1 %v10847_v28  ;;  %v12116_v28 = vld [vmem:[%s16513_s0 + $0x4c] sm:$0xf]  ;;  %16748 = vst [vmem:[#allocation32_spill] sm:$0xff] %v12120_v12 }
  0xc7   :  { %2494 = vmatpush1.bf16.msra.mxu0 %v10858_v32  ;;  %2728 = vmatprep.subr.bf16.mxu1 %v10855_v29  ;;  %v10874_v29 = vld [vmem:[#allocation2 + $0x28] ss:$16 sps:$4 sm:$0xff]   ;;  %v12125_v32 = vld [vmem:[%s16513_s0 + $0x50] sm:$0xf] }
  0xc8   :  { %2495 = vmatprep.subr.bf16.mxu0 %v10873_v33  ;;  %v12130_v33 = vld [vmem:[%s16513_s0 + $0x54] sm:$0xf] }
  0xc9   :  { %v12154_v58 = vcombine.low %v12125_v32, %v12130_v33 }
  0xca   :  { %2729 = vmatpush1.bf16.msra.mxu1 %v10853_v41  ;;  %v396_v41 = vshll.u32 %v12106_v23, 16 }
  0xcb   :  { %2496 = vmatpush1.bf16.msra.mxu0 %v10871_v49  ;;  %2730 = vmatprep.subr.bf16.mxu1 %v10863_v42  ;;  %v16525_v49 = vshrl.u32 %v12106_v23, 16  ;;  %v10912_v42 = vld [vmem:[#allocation2 + $0x420] ss:$16 sps:$4 sm:$0xff]   ;;  %v411_v13 = vshll.u32 %v12154_v58, 16  ;;  %v415_v26 = vshrl.u32 %v12154_v58, 16 }
  0xcc   :  { %2076 = vmatmul.mubr.bf16.gmra.mxu0 %v12054_v43  ;;  %2497 = vmatprep.subr.bf16.mxu0 %v10887_v54  ;;  %v12145_v54 = vcombine.low %v12111_v21, %v12116_v28  ;;  %v590_v3 = vrot.slane %v396_v41, 2 }
  0xcd   :  { %2309 = vmatmul.mubr.bf16.gmra.mxu1 %v12056_v44  ;;  %2085 = vmatprep.mubr.bf16.mxu0 %v12063_v46  ;;  %v589_v2 = vrot.slane %v16525_v49, 1  ;;  %v597_v59 = vrot.slane %v411_v13, 2 }
  0xce   :  { %2318 = vmatprep.mubr.bf16.mxu1 %v12065_v50  ;;  %2731 = vmatpush1.bf16.msra.mxu1 %v10861_v52  ;;  %v386_v52 = vor.u32 %v385_v30, %v381_v60  ;;  %v10890_v60 = vld [vmem:[#allocation2 + $0x1ec] ss:$16 sps:$4 sm:$0xff]   ;;  %v404_v4 = vshrl.u32 %v12145_v54, 16  ;;  %v530_v30 = vrot.slane %v12077_v9, 1 }
  0xcf   :  { %2732 = vmatprep.subr.bf16.mxu1 %v10867_v55  ;;  %2498 = vmatpush1.bf16.msra.mxu0 %v10885_v57  ;;  %v584_v55 = vor.u32 %v583_v31, %v582_v20  ;;  %v587_v57 = vor.u32 %v586_v35, %v585_v34  ;;  %v529_v20 = vrot.slane %v12061_v45, 1  ;;  %v394_v31 = vor.u32 %v392_v7, %v390_v39  ;;  %v10903_v7 = vld [vmem:[#allocation2 + $0x1ac] ss:$16 sps:$4 sm:$0xff]  }
  0xd0   :  { %2499 = vmatprep.subr.bf16.mxu0 %v10900_v5  ;;  %v406_v5 = vshll.u32 %v12145_v54, 16  ;;  %v398_v34 = vrot.slane %v396_v41, 1  ;;  %v591_v35 = vor.u32 %v590_v3, %v589_v2  ;;  %v593_v38 = vrot.slane %v404_v4, 1 }
  0xd1   :  { %v12191_v41 = vsel %vm518_vm2, %v529_v20, %v530_v30  ;;  %v413_v3 = vrot.slane %v411_v13, 1  ;;  %v10909_v20 = vld [vmem:[#allocation2 + $0x18c] ss:$16 sps:$4 sm:$0xff]  }
  0xd2   :  { %2733 = vmatpush1.bf16.msra.mxu1 %v10865_v10  ;;  %v12173_v10 = vsel %vm333_vm0, %v386_v52, %v390_v39  ;;  %v408_v37 = vrot.slane %v406_v5, 1  ;;  %v10927_v52 = vld [vmem:[#allocation2 + $0x404] ss:$16 sps:$4 sm:$0xff]   ;;  %16751 = vst [vmem:[#allocation35_spill] sm:$0xff] %v12191_v41  ;;  %v12194_v39 = vsel %vm333_vm0, %v394_v31, %v398_v34  ;;  %v12197_v2 = vsel %vm559_vm1, %v587_v57, %v591_v35 }
  0xd3   :  { %2734 = vmatprep.subr.bf16.mxu1 %v10876_v15  ;;  %2500 = vmatpush1.bf16.msra.mxu0 %v10898_v16  ;;  %v12176_v15 = vsel %vm559_vm1, %v584_v55, %v587_v57  ;;  %v10888_v16 = vld [vmem:[#allocation2 + $0x1e8] ss:$16 sps:$4 sm:$0xff]   ;;  %v596_v55 = vrot.slane %v415_v26, 1  ;;  %16752 = vst [vmem:[#allocation36_spill] sm:$0xff] %v12197_v2  ;;  %v532_v57 = vrot.slane %v12106_v23, 1  ;;  %v417_v31 = vor.u32 %v415_v26, %v413_v3 }
  0xd4   :  { %2086 = vmatmul.mubr.bf16.gmra.mxu0 %v12101_v48  ;;  %2501 = vmatprep.subr.bf16.mxu0 %v10914_v0  ;;  %16750 = vst [vmem:[#allocation34_spill] sm:$0xff] %v12176_v15  ;;  %v423_v0 = vshrl.u32 %v12170_v6, 16  ;;  %v409_v49 = vor.u32 %v408_v37, %v404_v4  ;;  %v16753_v4 = vshrl.u32 %v12106_v23, 16  ;;  %v10917_v37 = vld [vmem:[#allocation2 + $0x16c] ss:$16 sps:$4 sm:$0xff]  }
  0xd5   :  { %2319 = vmatmul.mubr.bf16.gmra.mxu1 %v12103_v22  ;;  %2095 = vmatprep.mubr.bf16.mxu0 %v12118_v11 }
  0xd6   :  { %2328 = vmatprep.mubr.bf16.mxu1 %v12120_v12  ;;  %2735 = vmatpush1.bf16.msra.mxu1 %v10874_v29  ;;  %v10894_v29 = vld [vmem:[#allocation2 + $0x1cc] ss:$16 sps:$4 sm:$0xff]   ;;  %v402_v13 = vor.u32 %v16753_v4, %v398_v34  ;;  %v12215_v34 = vsel %vm518_vm2, %v530_v30, %v532_v57 }
  0xd7   :  { %2736 = vmatprep.subr.bf16.mxu1 %v10882_v36  ;;  %2502 = vmatpush1.bf16.msra.mxu0 %v10912_v42  ;;  %v10925_v36 = vld [vmem:[#allocation2 + $0x400] ss:$16 sps:$4 sm:$0xff]   ;;  %v594_v42 = vrot.slane %v406_v5, 2  ;;  %v600_v5 = vrot.slane %v423_v0, 1  ;;  %16754 = vst [vmem:[#allocation37_spill] sm:$0xff] %v12215_v34 }
  0xd8   :  { %2503 = vmatprep.subr.bf16.mxu0 %v10927_v52  ;;  %v10901_v52 = vld [vmem:[#allocation2 + $0x1a8] ss:$16 sps:$4 sm:$0xff]  }
  0xda   :  { %2737 = vmatpush1.bf16.msra.mxu1 %v10880_v47  ;;  %v419_v47 = vshll.u32 %v12170_v6, 16 }
  0xdb   :  { %2738 = vmatprep.subr.bf16.mxu1 %v10890_v60  ;;  %v10892_v60 = vld [vmem:[#allocation2 + $0x1c8] ss:$16 sps:$4 sm:$0xff]   ;;  %2504 = vmatpush1.bf16.msra.mxu0 %v10925_v36 }
  0xdc   :  { %2096 = vmatmul.mubr.bf16.gmra.mxu0 %v12161_v63  ;;  %v10907_v36 = vld [vmem:[#allocation2 + $0x188] ss:$16 sps:$4 sm:$0xff]  }
  0xdd   :  { %2329 = vmatmul.mubr.bf16.gmra.mxu1 %v12163_v1  ;;  %2105 = vmatprep.mubr.bf16.mxu0 %v12173_v10  ;;  %v10939_v1 = vld [vmem:[#allocation2 + $0x2ec] ss:$16 sps:$4 sm:$0xff]  }
  0xde   :  { %2338 = vmatprep.mubr.bf16.mxu1 %v12176_v15  ;;  %2739 = vmatpush2.bf16.msra.mxu1 %v10888_v16  ;;  %v595_v16 = vor.u32 %v594_v42, %v593_v38  ;;  %v598_v15 = vor.u32 %v597_v59, %v596_v55  ;;  %v414_v38 = vsel %vm333_vm0, %v409_v49, %v413_v3  ;;  %v421_v55 = vrot.slane %v419_v47, 1 }
  0xdf   :  { %2740 = vmatprep.subr.bf16.mxu1 %v10894_v29  ;;  %v601_v29 = vrot.slane %v419_v47, 2  ;;  %2955 = vmatprep.subr.bf16.mxu0 %v10939_v1  ;;  %v534_v59 = vrot.slane %v12145_v54, 1  ;;  %v12217_v26 = vcombine.low %v402_v13, %v414_v38  ;;  %v10921_v1 = vld [vmem:[#allocation2 + $0x14c] ss:$16 sps:$4 sm:$0xff]   ;;  %v753_v30 = vunpack.c.h.b16 %v414_v38 }
  0xe0   :  { %v599_v42 = vsel %vm559_vm1, %v595_v16, %v598_v15  ;;  %v422_v49 = vsel %vm333_vm0, %v417_v31, %v421_v55  ;;  %v425_v31 = vor.u32 %v423_v0, %v421_v55 }
  0xe1   :  { %v12219_v4 = vcombine.low %v591_v35, %v599_v42  ;;  %v757_v35 = vunpack.c.l.b16 %v422_v49 }
  0xe2   :  { %2741 = vmatpush2.bf16.msra.mxu1 %v10892_v60  ;;  %v535_v60 = vrot.slane %v12154_v58, 1  ;;  %v765_v55 = vunpack.c.l.b16 %v425_v31 }
  0xe3   :  { %2742 = vmatprep.subr.bf16.mxu1 %v10903_v7  ;;  %v10915_v7 = vld [vmem:[#allocation2 + $0x168] ss:$16 sps:$4 sm:$0xff]   ;;  %16755 = vst [vmem:[#allocation38_spill] sm:$0xff] %v12219_v4  ;;  %v12248_v38 = vpack.c.b16 %v757_v35, %v753_v30 }
  0xe4   :  { %2106 = vmatmul.mubr.bf16.gmra.mxu0 %v12061_v45  ;;  %v12210_v45 = vor.u32 %v601_v29, %v600_v5  ;;  %v536_v3 = vsel %vm518_vm2, %v534_v59, %v535_v60  ;;  %v755_v5 = vunpack.c.h.b16 %v599_v42  ;;  %v537_v29 = vrot.slane %v12170_v6, 1  ;;  %v10934_v35 = vld [vmem:[#allocation2 + $0x108] ss:$16 sps:$4 sm:$0xff]  }
  0xe5   :  { %2339 = vmatmul.mubr.bf16.gmra.mxu1 %v12191_v41  ;;  %2115 = vmatprep.mubr.bf16.mxu0 %v12194_v39  ;;  %v12239_v13 = vcombine.low %v532_v57, %v536_v3  ;;  %v761_v57 = vunpack.c.h.b16 %v422_v49 }
  0xe6   :  { %2348 = vmatprep.mubr.bf16.mxu1 %v12197_v2  ;;  %2743 = vmatpush2.bf16.msra.mxu1 %v10901_v52  ;;  %v603_v47 = vsel %vm559_vm1, %v598_v15, %v12210_v45  ;;  %v10919_v15 = vld [vmem:[#allocation2 + $0x148] ss:$16 sps:$4 sm:$0xff]   ;;  %v12233_v52 = vld [vmem:[%s16513_s0 + $0x60] sm:$0xff]   ;;  %v538_v59 = vsel %vm518_vm2, %v535_v60, %v537_v29  ;;  %v194_v60 = vld [vmem:[%s16513_s0 + $0x74] sm:$0x3]  ;;  %v767_v30 = vunpack.c.l.b16 %v12210_v45  ;;  %v12282_v45 = vcombine.low %v12116_v28, %v12125_v32 }
  0xe7   :  { %2744 = vmatprep.subr.bf16.mxu1 %v10909_v20  ;;  %v759_v16 = vunpack.c.l.b16 %v603_v47  ;;  %v12237_v20 = vcombine.low %v12087_v62, %v12111_v21  ;;  %16756 = vst [vmem:[#allocation39_spill] sm:$0xff] %v12239_v13  ;;  %v754_v62 = vunpack.c.h.b16 %v536_v3  ;;  %v10936_v21 = vld [vmem:[#allocation2 + $0x10c] ss:$16 sps:$4 sm:$0xff]   ;;  %v758_v0 = vunpack.c.l.b16 %v538_v59 }
  0xe8   :  { %v763_v3 = vunpack.c.h.b16 %v603_v47  ;;  %v429_v49 = vshll.u32 %v12233_v52, 16  ;;  %v12278_v47 = vld [vmem:[%s16513_s0 + $0x7c] sm:$0xf]  ;;  %v12327_v2 = vcombine.low %v12130_v33, %v12150_v51  ;;  %v539_v51 = vrot.slane %v12233_v52, 1 }
  0xe9   :  { %v12250_v42 = vpack.c.b16 %v759_v16, %v755_v5  ;;  %v10942_v5 = vld [vmem:[#allocation2 + $0x4ec] ss:$16 sps:$4 sm:$0xff]   ;;  %v12284_v31 = vpack.c.b16 %v758_v0, %v754_v62 }
  0xea   :  { %2745 = vmatpush2.bf16.msra.mxu1 %v10907_v36  ;;  %v12246_v36 = vld [vmem:[%s16513_s0 + $0x68] sm:$0xff]   ;;  %v605_v32 = vrot.slane %v429_v49, 2 }
  0xeb   :  { %2746 = vmatprep.subr.bf16.mxu1 %v10917_v37  ;;  %v10928_v37 = vld [vmem:[#allocation2 + $0x128] ss:$16 sps:$4 sm:$0xff]   ;;  %16757 = vst [vmem:[#allocation40_spill] sm:$0xff] %v12250_v42  ;;  %v434_v16 = vshll.u32 %v12246_v36, 16  ;;  %16758 = vst [vmem:[#allocation41_spill] sm:$0xff] %v12284_v31 }
  0xec   :  { %2116 = vmatmul.mubr.bf16.gmra.mxu0 %v12077_v9  ;;  %v10930_v9 = vld [vmem:[#allocation2 + $0x12c] ss:$16 sps:$4 sm:$0xff]  }
  0xed   :  { %2349 = vmatmul.mubr.bf16.gmra.mxu1 %v12215_v34  ;;  %2125 = vmatprep.mubr.bf16.mxu0 %v12217_v26  ;;  %v608_v0 = vrot.slane %v434_v16, 2 }
  0xee   :  { %2358 = vmatprep.mubr.bf16.mxu1 %v12219_v4  ;;  %2747 = vmatpush2.bf16.msra.mxu1 %v10915_v7  ;;  %v427_v7 = vshrl.u32 %v12233_v52, 16  ;;  %v12298_v4 = vpack.c.b16 %v767_v30, %v763_v3 }
  0xef   :  { %2748 = vmatprep.subr.bf16.mxu1 %v10921_v1  ;;  %v12259_v1 = vld [vmem:[%s16513_s0 + $0x70] sm:$0xf] }
  0xf0   :  { %16759 = vst [vmem:[#allocation42_spill] sm:$0xff] %v12298_v4  ;;  %v604_v34 = vrot.slane %v427_v7, 1  ;;  %v12301_v28 = vcombine.low %v12259_v1, %v194_v60 }
  0xf2   :  { %2749 = vmatpush2.bf16.msra.mxu1 %v10919_v15  ;;  %v438_v15 = vshrl.u32 %v12246_v36, 16  ;;  %v442_v60 = vshll.u32 %v12301_v28, 16  ;;  %v446_v30 = vshrl.u32 %v12301_v28, 16 }
  0xf3   :  { %2750 = vmatprep.subr.bf16.mxu1 %v10930_v9  ;;  %v12273_v9 = vld [vmem:[%s16513_s0 + $0x78] sm:$0xf] }
  0xf4   :  { %2126 = vmatmul.mubr.bf16.gmra.mxu0 %v12237_v20  ;;  %v607_v62 = vrot.slane %v438_v15, 1  ;;  %v12307_v3 = vcombine.low %v12273_v9, %v12278_v47  ;;  %v611_v22 = vrot.slane %v446_v30, 1  ;;  %v612_v50 = vrot.slane %v442_v60, 2 }
  0xf5   :  { %2359 = vmatmul.mubr.bf16.gmra.mxu1 %v12239_v13  ;;  %2135 = vmatprep.mubr.bf16.mxu0 %v12248_v38  ;;  %v12296_v13 = vld [vmem:[%s16513_s0 + $0x84] sm:$0xf] }
  0xf6   :  { %2368 = vmatprep.mubr.bf16.mxu1 %v12250_v42  ;;  %2751 = vmatpush2.bf16.msra.mxu1 %v10928_v37  ;;  %v12286_v42 = vpack.c.b16 %v765_v55, %v761_v57  ;;  %v12291_v37 = vld [vmem:[%s16513_s0 + $0x80] sm:$0xf]  ;;  %v762_v57 = vunpack.c.h.b16 %v538_v59  ;;  %v766_v55 = vunpack.c.l.b16 %v537_v29  ;;  %16760 = vst [vmem:[#allocation43_spill] sm:$0xff] %v12307_v3  ;;  %v12320_v29 = vld [vmem:[%s16513_s0 + $0x88] sm:$0xf]  ;;  %v452_v12 = vshll.u32 %v12307_v3, 16 }
  0xf7   :  { %2752 = vmatprep.subr.bf16.mxu1 %v10936_v21  ;;  %v431_v21 = vrot.slane %v429_v49, 1  ;;  %v12315_v49 = vcombine.low %v12291_v37, %v12296_v13  ;;  %v200_v59 = vld [vmem:[%s16513_s0 + $0x8c] sm:$0x3]  ;;  %v450_v44 = vshrl.u32 %v12307_v3, 16 }
  0xf8   :  { %v12329_v41 = vpack.c.b16 %v766_v55, %v762_v57  ;;  %v12342_v33 = vcombine.low %v12320_v29, %v200_v59  ;;  %v616_v57 = vrot.slane %v452_v12, 2 }
  0xf9   :  { %16761 = vst [vmem:[#allocation44_spill] sm:$0xff] %v12315_v49  ;;  %v461_v27 = vshrl.u32 %v12315_v49, 16 }
  0xfa   :  { %2753 = vmatpush2.bf16.msra.mxu1 %v10934_v35  ;;  %v432_v35 = vor.u32 %v431_v21, %v427_v7  ;;  %16762 = vst [vmem:[#allocation45_spill] sm:$0xff] %v12329_v41  ;;  %v457_v7 = vshll.u32 %v12315_v49, 16  ;;  %16764 = vst [vmem:[#allocation47_spill] sm:$0xff] %v12342_v33  ;;  %v469_v61 = vshrl.u32 %v12342_v33, 16 }
  0xfb   :  { %3188 = vmatprep.subr.bf16.mxu1 %v10942_v5  ;;  %v436_v5 = vrot.slane %v434_v16, 1  ;;  %v540_v16 = vrot.slane %v12246_v36, 1  ;;  %v618_v55 = vrot.slane %v461_v27, 1 }
  0xfc   :  { %2136 = vmatmul.mubr.bf16.gmra.mxu0 %v12282_v45  ;;  %v619_v59 = vrot.slane %v457_v7, 2 }
  0xfd   :  { %2369 = vmatmul.mubr.bf16.gmra.mxu1 %v12284_v31  ;;  %2145 = vmatprep.mubr.bf16.mxu0 %v12286_v42  ;;  %v609_v31 = vor.u32 %v608_v0, %v607_v62  ;;  %v12335_v24 = vsel %vm333_vm0, %v432_v35, %v436_v5  ;;  %v440_v21 = vor.u32 %v438_v15, %v436_v5  ;;  %v454_v62 = vrot.slane %v452_v12, 1 }
  0xfe   :  { %2378 = vmatprep.mubr.bf16.mxu1 %v12298_v4  ;;  %v606_v4 = vor.u32 %v605_v32, %v604_v34  ;;  %v444_v32 = vrot.slane %v442_v60, 1  ;;  %v615_v0 = vrot.slane %v450_v44, 1  ;;  %v465_v35 = vshll.u32 %v12342_v33, 16 }
  0xff   :  { %v455_v5 = vor.u32 %v454_v62, %v450_v44  ;;  %v622_v12 = vrot.slane %v469_v61, 1 }
 0x100   :  { %v12338_v34 = vsel %vm559_vm1, %v606_v4, %v609_v31  ;;  %v613_v4 = vor.u32 %v612_v50, %v611_v22  ;;  %v12356_v15 = vsel %vm333_vm0, %v440_v21, %v444_v32  ;;  %v617_v50 = vor.u32 %v616_v57, %v615_v0 }
 0x101   :  { %16763 = vst [vmem:[#allocation46_spill] sm:$0xff] %v12338_v34  ;;  %16766 = vst [vmem:[#allocation49_spill] sm:$0xff] %v12356_v15  ;;  %v620_v22 = vor.u32 %v619_v59, %v618_v55  ;;  %v623_v53 = vrot.slane %v465_v35, 2  ;;  %v448_v21 = vor.u32 %v446_v30, %v444_v32  ;;  %v467_v62 = vrot.slane %v465_v35, 1 }
 0x102   :  { %v12359_v60 = vsel %vm559_vm1, %v609_v31, %v613_v4  ;;  %v544_v57 = vrot.slane %v12307_v3, 1 }
 0x103   :  { %16767 = vst [vmem:[#allocation50_spill] sm:$0xff] %v12359_v60  ;;  %v621_v44 = vsel %vm559_vm1, %v617_v50, %v620_v22  ;;  %v624_v0 = vor.u32 %v623_v53, %v622_v12  ;;  %v12399_v12 = vld [vmem:[%s16513_s0 + $0x98] sm:$0xff]  }
 0x104   :  { %2146 = vmatmul.mubr.bf16.gmra.mxu0 %v12327_v2 }
 0x105   :  { %2379 = vmatmul.mubr.bf16.gmra.mxu1 %v12329_v41  ;;  %2155 = vmatprep.mubr.bf16.mxu0 %v12335_v24  ;;  %v12353_v41 = vsel %vm518_vm2, %v539_v51, %v540_v16  ;;  %v542_v51 = vrot.slane %v12301_v28, 1  ;;  %v625_v32 = vsel %vm559_vm1, %v620_v22, %v624_v0  ;;  %v471_v22 = vor.u32 %v469_v61, %v467_v62  ;;  %v12411_v61 = vld [vmem:[%s16513_s0 + $0xa0] sm:$0xf] }
 0x106   :  { %2388 = vmatprep.mubr.bf16.mxu1 %v12338_v34  ;;  %16765 = vst [vmem:[#allocation48_spill] sm:$0xff] %v12353_v41  ;;  %v459_v34 = vrot.slane %v457_v7, 1  ;;  %v799_v35 = vunpack.c.l.b16 %v625_v32 }
 0x107   :  { %v12371_v55 = vsel %vm518_vm2, %v540_v16, %v542_v51  ;;  %v795_v16 = vunpack.c.h.b16 %v621_v44 }
 0x108   :  { %v460_v31 = vsel %vm333_vm0, %v455_v5, %v459_v34  ;;  %v463_v7 = vor.u32 %v461_v27, %v459_v34  ;;  %16768 = vst [vmem:[#allocation51_spill] sm:$0xff] %v12371_v55  ;;  %v12388_v5 = vld [vmem:[%s16513_s0 + $0x90] sm:$0xff]  }
 0x109   :  { %v12373_v59 = vcombine.low %v448_v21, %v460_v31  ;;  %v793_v27 = vunpack.c.h.b16 %v460_v31  ;;  %v12403_v31 = vpack.c.b16 %v799_v35, %v795_v16  ;;  %v12425_v16 = vld [vmem:[%s16513_s0 + $0xa8] sm:$0xf] }
 0x10a   :  { %v468_v30 = vsel %vm333_vm0, %v463_v7, %v467_v62  ;;  %v805_v7 = vunpack.c.l.b16 %v471_v22  ;;  %v803_v62 = vunpack.c.h.b16 %v625_v32  ;;  %v12434_v32 = vcombine.low %v12278_v47, %v12291_v37 }
 0x10b   :  { %16769 = vst [vmem:[#allocation52_spill] sm:$0xff] %v12373_v59  ;;  %v797_v34 = vunpack.c.l.b16 %v468_v30  ;;  %16774 = vst [vmem:[#allocation57_spill] sm:$0xff] %v12403_v31 }
 0x10c   :  { %2156 = vmatmul.mubr.bf16.gmra.mxu0 %v12233_v52  ;;  %v545_v52 = vrot.slane %v12315_v49, 1  ;;  %16775 = vst [vmem:[#allocation58_spill] sm:$0xff] %v12434_v32 }
 0x10d   :  { %2389 = vmatmul.mubr.bf16.gmra.mxu1 %v12353_v41  ;;  %2165 = vmatprep.mubr.bf16.mxu0 %v12356_v15  ;;  %v12401_v21 = vpack.c.b16 %v797_v34, %v793_v27  ;;  %v475_v27 = vshll.u32 %v12388_v5, 16  ;;  %v484_v34 = vshrl.u32 %v12399_v12, 16 }
 0x10e   :  { %2398 = vmatprep.mubr.bf16.mxu1 %v12359_v60  ;;  %v12375_v60 = vcombine.low %v613_v4, %v621_v44  ;;  %v546_v53 = vsel %vm518_vm2, %v544_v57, %v545_v52  ;;  %v547_v4 = vrot.slane %v12342_v33, 1  ;;  %v807_v57 = vunpack.c.l.b16 %v624_v0  ;;  %v12430_v0 = vld [vmem:[%s16513_s0 + $0xac] sm:$0xf] }
 0x10f   :  { %v12394_v50 = vcombine.low %v542_v51, %v546_v53  ;;  %16773 = vst [vmem:[#allocation56_spill] sm:$0xff] %v12401_v21  ;;  %v801_v51 = vunpack.c.h.b16 %v468_v30  ;;  %v206_v30 = vld [vmem:[%s16513_s0 + $0xa4] sm:$0x3]  ;;  %v627_v37 = vrot.slane %v475_v27, 2  ;;  %v12459_v17 = vcombine.low %v12425_v16, %v12430_v0 }
 0x110   :  { %16770 = vst [vmem:[#allocation53_spill] sm:$0xff] %v12375_v60  ;;  %v548_v44 = vsel %vm518_vm2, %v545_v52, %v547_v4  ;;  %v473_v52 = vshrl.u32 %v12388_v5, 16  ;;  %v12453_v47 = vcombine.low %v12411_v61, %v206_v30 }
 0x111   :  { %16772 = vst [vmem:[#allocation55_spill] sm:$0xff] %v12394_v50  ;;  %v12438_v22 = vpack.c.b16 %v805_v7, %v801_v51  ;;  %v802_v51 = vunpack.c.h.b16 %v548_v44  ;;  %v806_v7 = vunpack.c.l.b16 %v547_v4  ;;  %v12472_v4 = vld [vmem:[%s16513_s0 + $0xb8] sm:$0xf]  ;;  %v498_v33 = vshll.u32 %v12459_v17, 16 }
 0x112   :  { %v626_v41 = vrot.slane %v473_v52, 1 }
 0x113   :  { %16777 = vst [vmem:[#allocation60_spill] sm:$0xff] %v12438_v22 }
 0x114   :  { %2166 = vmatmul.mubr.bf16.gmra.mxu0 %v12246_v36  ;;  %v12392_v36 = vcombine.low %v12259_v1, %v12273_v9  ;;  %v794_v1 = vunpack.c.h.b16 %v546_v53  ;;  %v798_v9 = vunpack.c.l.b16 %v548_v44  ;;  %v480_v53 = vshll.u32 %v12399_v12, 16  ;;  %v212_v44 = vld [vmem:[%s16513_s0 + $0xbc] sm:$0x3] }
 0x115   :  { %2399 = vmatmul.mubr.bf16.gmra.mxu1 %v12371_v55  ;;  %2175 = vmatprep.mubr.bf16.mxu0 %v12373_v59  ;;  %v477_v55 = vrot.slane %v475_v27, 1 }
 0x116   :  { %2408 = vmatprep.mubr.bf16.mxu1 %v12375_v60  ;;  %16771 = vst [vmem:[#allocation54_spill] sm:$0xff] %v12392_v36  ;;  %v12436_v35 = vpack.c.b16 %v798_v9, %v794_v1  ;;  %v12450_v60 = vpack.c.b16 %v807_v57, %v803_v62  ;;  %v629_v1 = vrot.slane %v484_v34, 1  ;;  %v630_v9 = vrot.slane %v480_v53, 2 }
 0x117   :  { %v488_v62 = vshll.u32 %v12453_v47, 16  ;;  %v492_v57 = vshrl.u32 %v12453_v47, 16  ;;  %v478_v30 = vor.u32 %v477_v55, %v473_v52  ;;  %v550_v52 = vrot.slane %v12399_v12, 1 }
 0x118   :  { %16776 = vst [vmem:[#allocation59_spill] sm:$0xff] %v12436_v35  ;;  %16778 = vst [vmem:[#allocation61_spill] sm:$0xff] %v12450_v60 }
 0x119   :  { %v633_v59 = vrot.slane %v492_v57, 1  ;;  %v634_v49 = vrot.slane %v488_v62, 2 }
 0x11c   :  { %2176 = vmatmul.mubr.bf16.gmra.mxu0 %v12392_v36  ;;  %v496_v36 = vshrl.u32 %v12459_v17, 16 }
 0x11d   :  { %2409 = vmatmul.mubr.bf16.gmra.mxu1 %v12394_v50  ;;  %2185 = vmatprep.mubr.bf16.mxu0 %v12401_v21  ;;  %v12448_v50 = vld [vmem:[%s16513_s0 + $0xb4] sm:$0xf]  ;;  %v12481_v21 = vpack.c.b16 %v806_v7, %v802_v51  ;;  %v638_v51 = vrot.slane %v498_v33, 2 }
 0x11e   :  { %2418 = vmatprep.mubr.bf16.mxu1 %v12403_v31  ;;  %v12443_v31 = vld [vmem:[%s16513_s0 + $0xb0] sm:$0xf] }
 0x11f   :  { %v12467_v27 = vcombine.low %v12443_v31, %v12448_v50  ;;  %16780 = vst [vmem:[#allocation63_spill] sm:$0xff] %v12481_v21 }
 0x121   :  { %v507_v3 = vshrl.u32 %v12467_v27, 16  ;;  %v503_v55 = vshll.u32 %v12467_v27, 16 }
 0x123   :  { %v640_v7 = vrot.slane %v507_v3, 1 }
 0x124   :  { %2186 = vmatmul.mubr.bf16.gmra.mxu0 %v12434_v32  ;;  %v12479_v32 = vcombine.low %v12296_v13, %v12320_v29  ;;  %v12494_v13 = vcombine.low %v12472_v4, %v212_v44  ;;  %v549_v29 = vrot.slane %v12388_v5, 1  ;;  %v641_v44 = vrot.slane %v503_v55, 2 }
 0x125   :  { %2419 = vmatmul.mubr.bf16.gmra.mxu1 %v12436_v35  ;;  %2195 = vmatprep.mubr.bf16.mxu0 %v12438_v22  ;;  %v482_v35 = vrot.slane %v480_v53, 1  ;;  %v631_v22 = vor.u32 %v630_v9, %v629_v1  ;;  %v500_v1 = vrot.slane %v498_v33, 1  ;;  %v637_v9 = vrot.slane %v496_v36, 1 }
 0x126   :  { %2428 = vmatprep.mubr.bf16.mxu1 %v12450_v60  ;;  %v628_v60 = vor.u32 %v627_v37, %v626_v41  ;;  %16779 = vst [vmem:[#allocation62_spill] sm:$0xff] %v12479_v32  ;;  %v490_v37 = vrot.slane %v488_v62, 1 }
 0x127   :  { %v12487_v15 = vsel %vm333_vm0, %v478_v30, %v482_v35  ;;  %v486_v53 = vor.u32 %v484_v34, %v482_v35  ;;  %v511_v30 = vshll.u32 %v12494_v13, 16  ;;  %v501_v62 = vor.u32 %v500_v1, %v496_v36 }
 0x128   :  { %16781 = vst [vmem:[#allocation64_spill] sm:$0xff] %v12487_v15  ;;  %v12490_v41 = vsel %vm559_vm1, %v628_v60, %v631_v22  ;;  %v635_v60 = vor.u32 %v634_v49, %v633_v59  ;;  %v639_v49 = vor.u32 %v638_v51, %v637_v9  ;;  %v642_v59 = vor.u32 %v641_v44, %v640_v7 }
 0x129   :  { %16782 = vst [vmem:[#allocation65_spill] sm:$0xff] %v12490_v41  ;;  %v12508_v34 = vsel %vm333_vm0, %v486_v53, %v490_v37  ;;  %v494_v53 = vor.u32 %v492_v57, %v490_v37  ;;  %v513_v1 = vrot.slane %v511_v30, 1  ;;  %v554_v51 = vrot.slane %v12459_v17, 1 }
 0x12a   :  { %v12511_v35 = vsel %vm559_vm1, %v631_v22, %v635_v60  ;;  %v643_v36 = vsel %vm559_vm1, %v639_v49, %v642_v59 }
 0x12b   :  { %16784 = vst [vmem:[#allocation67_spill] sm:$0xff] %v12511_v35 }
 0x12c   :  { %2196 = vmatmul.mubr.bf16.gmra.mxu0 %v12479_v32  ;;  %v515_v32 = vshrl.u32 %v12494_v13, 16 }
 0x12d   :  { %2429 = vmatmul.mubr.bf16.gmra.mxu1 %v12481_v21  ;;  %2205 = vmatprep.mubr.bf16.mxu0 %v12487_v15  ;;  %v12505_v21 = vsel %vm518_vm2, %v549_v29, %v550_v52  ;;  %v645_v15 = vrot.slane %v511_v30, 2  ;;  %v552_v29 = vrot.slane %v12453_v47, 1 }
 0x12e   :  { %2438 = vmatprep.mubr.bf16.mxu1 %v12490_v41  ;;  %16783 = vst [vmem:[#allocation66_spill] sm:$0xff] %v12505_v21  ;;  %v505_v41 = vrot.slane %v503_v55, 1  ;;  %v644_v33 = vrot.slane %v515_v32, 1 }
 0x12f   :  { %v12523_v7 = vsel %vm518_vm2, %v550_v52, %v552_v29  ;;  %v835_v52 = vunpack.c.h.b16 %v643_v36 }
 0x130   :  { %v506_v22 = vsel %vm333_vm0, %v501_v62, %v505_v41  ;;  %v509_v55 = vor.u32 %v507_v3, %v505_v41  ;;  %v646_v9 = vor.u32 %v645_v15, %v644_v33  ;;  %16785 = vst [vmem:[#allocation68_spill] sm:$0xff] %v12523_v7  ;;  %v12539_v62 = vcombine.low %v12411_v61, %v12425_v16 }
 0x131   :  { %v12525_v44 = vcombine.low %v494_v53, %v506_v22  ;;  %v833_v15 = vunpack.c.h.b16 %v506_v22  ;;  %v517_v53 = vor.u32 %v515_v32, %v513_v1 }
 0x132   :  { %v514_v57 = vsel %vm333_vm0, %v509_v55, %v513_v1  ;;  %v647_v37 = vsel %vm559_vm1, %v642_v59, %v646_v9  ;;  %v847_v55 = vunpack.c.l.b16 %v646_v9  ;;  %v16570_v9 = vmov 0  }
 0x133   :  { %v837_v41 = vunpack.c.l.b16 %v514_v57  ;;  %v839_v30 = vunpack.c.l.b16 %v647_v37  ;;  %v841_v61 = vunpack.c.h.b16 %v514_v57  ;;  %v845_v16 = vunpack.c.l.b16 %v517_v53  ;;  %v11585_v57 = vld [vmem:[%s16513_s0] sm:$0xff]   ;;  %v10943_v53 = vld [vmem:[#allocation2 + $0x2c8] ss:$16 sps:$4 sm:$0xff]  }
 0x134   :  { %2206 = vmatmul.mubr.bf16.gmra.mxu0 %v12388_v5  ;;  %v555_v5 = vrot.slane %v12467_v27, 1 }
 0x135   :  { %2439 = vmatmul.mubr.bf16.gmra.mxu1 %v12505_v21  ;;  %2215 = vmatprep.mubr.bf16.mxu0 %v12508_v34  ;;  %v12545_v59 = vpack.c.b16 %v839_v30, %v835_v52  ;;  %v12558_v32 = vpack.c.b16 %v845_v16, %v841_v61  ;;  %v10940_v52 = vld [vmem:[#allocation2 + $0x4e8] ss:$16 sps:$4 sm:$0xff]   ;;  %v652_v61 = vrot.slane %v11941_v8, 2  ;;  %v654_v16 = vrot.slane %v11975_v18, 2  ;;  %v10969_v8 = vld [vmem:[#allocation2 + $0x48c] ss:$16 sps:$4 sm:$0xff]  }
 0x136   :  { %2448 = vmatprep.mubr.bf16.mxu1 %v12511_v35  ;;  %v12527_v35 = vcombine.low %v635_v60, %v643_v36  ;;  %v556_v3 = vsel %vm518_vm2, %v554_v51, %v555_v5  ;;  %v557_v60 = vrot.slane %v12494_v13, 1  ;;  %v12554_v51 = vcombine.low %v12430_v0, %v12443_v31 }
 0x137   :  { %v12541_v49 = vcombine.low %v552_v29, %v556_v3  ;;  %16788 = vst [vmem:[#allocation71_spill] sm:$0xff] %v12545_v59  ;;  %v834_v22 = vunpack.c.h.b16 %v556_v3  ;;  %v843_v29 = vunpack.c.h.b16 %v647_v37  ;;  %v12568_v31 = vcombine.low %v12448_v50, %v12472_v4  ;;  %v11586_v50 = vld [vmem:[%s16513_s0 + $0x8] sm:$0xff]  }
 0x138   :  { %16786 = vst [vmem:[#allocation69_spill] sm:$0xff] %v12527_v35  ;;  %v558_v33 = vsel %vm518_vm2, %v555_v5, %v557_v60  ;;  %v649_v37 = vrot.slane %v11585_v57, 2  ;;  %v650_v4 = vrot.slane %v11586_v50, 2 }
 0x139   :  { %16787 = vst [vmem:[#allocation70_spill] sm:$0xff] %v12541_v49  ;;  %v838_v36 = vunpack.c.l.b16 %v558_v33  ;;  %v12560_v1 = vpack.c.b16 %v847_v55, %v843_v29  ;;  %v842_v3 = vunpack.c.h.b16 %v558_v33  ;;  %v10951_v33 = vld [vmem:[#allocation2 + $0x4cc] ss:$16 sps:$4 sm:$0xff]   ;;  %v10946_v29 = vld [vmem:[#allocation2 + $0x2a8] ss:$16 sps:$4 sm:$0xff]  }
 0x13a   :  { %v12583_v30 = vsel %vm648_vm3, %v649_v37, %v650_v4  ;;  %v12591_v55 = vsel %vm648_vm3, %v650_v4, %v652_v61  ;;  %v10958_v37 = vld [vmem:[#allocation2 + $0x4a8] ss:$16 sps:$4 sm:$0xff]  }
 0x13b   :  { %v12556_v5 = vpack.c.b16 %v838_v36, %v834_v22  ;;  %16790 = vst [vmem:[#allocation73_spill] sm:$0xff] %v12560_v1  ;;  %v10948_v22 = vld [vmem:[#allocation2 + $0x2ac] ss:$16 sps:$4 sm:$0xff]  }
 0x13c   :  { %2216 = vmatmul.mubr.bf16.gmra.mxu0 %v12399_v12  ;;  %v12543_v12 = vpack.c.b16 %v837_v41, %v833_v15  ;;  %v846_v15 = vunpack.c.l.b16 %v557_v60  ;;  %v10937_v41 = vld [vmem:[#allocation2 + $0x2e8] ss:$16 sps:$4 sm:$0xff]   ;;  %v10945_v60 = vld [vmem:[#allocation2 + $0x2cc] ss:$16 sps:$4 sm:$0xff]  }
 0x13d   :  { %2449 = vmatmul.mubr.bf16.gmra.mxu1 %v12523_v7  ;;  %2225 = vmatprep.mubr.bf16.mxu0 %v12525_v44  ;;  %16789 = vst [vmem:[#allocation72_spill] sm:$0xff] %v12556_v5  ;;  %v10960_v36 = vld [vmem:[#allocation2 + $0x4ac] ss:$16 sps:$4 sm:$0xff]  }
 0x13e   :  { %2458 = vmatprep.mubr.bf16.mxu1 %v12527_v35  ;;  %v12570_v0 = vpack.c.b16 %v846_v15, %v842_v3  ;;  %v655_v3 = vrot.slane %v11979_v19, 2  ;;  %v10954_v15 = vld [vmem:[#allocation2 + $0x28c] ss:$16 sps:$4 sm:$0xff]   ;;  %v657_v19 = vrot.slane %v12000_v40, 2  ;;  %v12608_v40 = vld [vmem:[%s16513_s0 + $0x30] sm:$0xff]  }
 0x140   :  { %16791 = vst [vmem:[#allocation74_spill] sm:$0xff] %v12570_v0  ;;  %v656_v18 = vsel %vm648_vm3, %v654_v16, %v655_v3  ;;  %v11005_v16 = vld [vmem:[#allocation2 + $0x40c] ss:$16 sps:$4 sm:$0xff]  }
 0x144   :  { %2226 = vmatmul.mubr.bf16.gmra.mxu0 %v12539_v62 }
 0x145   :  { %2459 = vmatmul.mubr.bf16.gmra.mxu1 %v12541_v49  ;;  %2235 = vmatprep.mubr.bf16.mxu0 %v12543_v12 }
 0x146   :  { %2468 = vmatprep.mubr.bf16.mxu1 %v12545_v59 }
 0x14c   :  { %2236 = vmatmul.mubr.bf16.gmra.mxu0 %v12554_v51 }
 0x14d   :  { %2469 = vmatmul.mubr.bf16.gmra.mxu1 %v12556_v5  ;;  %2245 = vmatprep.mubr.bf16.mxu0 %v12558_v32  ;;  %v11000_v5 = vld [vmem:[#allocation2 + $0x328] ss:$16 sps:$4 sm:$0xff]  }
 0x14e   :  { %2478 = vmatprep.mubr.bf16.mxu1 %v12560_v1  ;;  %v16801_v1 = vrot.slane %v12106_v23, 2 }
 0x154   :  { %2246 = vmatmul.mubr.bf16.gmra.mxu0 %v12568_v31 }
 0x155   :  { %2479 = vmatmul.mubr.bf16.gmra.mxu1 %v12570_v0  ;;  %2521 = vmatprep.mubr.bf16.mxu0 %v16570_v9 }
 0x156   :  { %2754 = vmatprep.mubr.bf16.mxu1 %v11967_v14  ;;  %v10949_v14 = vld [vmem:[#allocation2 + $0x4c8] ss:$16 sps:$4 sm:$0xff]  }
 0x15c   :  { %2522 = vmatmul.mubr.bf16.vlgmr.msra.gmra.mxu0 %v12583_v30 }
 0x15d   :  { %2755 = vmatmul.mubr.bf16.vlgmr.msra.gmra.mxu1 %v11585_v57  ;;  %2956 = vmatpush1.bf16.msra.mxu0 %v10937_v41  ;;  %v1011_v57 = vlaneseq  ;;  %v10967_v41 = vld [vmem:[#allocation2 + $0x488] ss:$16 sps:$4 sm:$0xff]  }
 0x15e   :  { %3189 = vmatpush1.bf16.msra.mxu1 %v10940_v52  ;;  %2531 = vmatprep.mubr.bf16.mxu0 %v16570_v9  ;;  %v10957_v52 = vld [vmem:[#allocation2 + $0x26c] ss:$16 sps:$4 sm:$0xff]  }
 0x15f   :  { %2764 = vmatprep.mubr.bf16.mxu1 %v12013_v56  ;;  %2957 = vmatprep.subr.bf16.mxu0 %v10945_v60  ;;  %v10952_v56 = vld [vmem:[#allocation2 + $0x288] ss:$16 sps:$4 sm:$0xff]   ;;  %v12599_v4 = vshrl.u32 %v1011_v57, 7  ;;  %v10978_v60 = vld [vmem:[#allocation2 + $0x46c] ss:$16 sps:$4 sm:$0xff]  }
 0x160   :  { %3190 = vmatprep.subr.bf16.mxu1 %v10951_v33  ;;  %v12601_v33 = vcombine.low %v652_v61, %v656_v18  ;;  %v10996_v57 = vld [vmem:[#allocation2 + $0x42c] ss:$16 sps:$4 sm:$0xff]   ;;  %v10994_v61 = vld [vmem:[#allocation2 + $0x428] ss:$16 sps:$4 sm:$0xff]  }
 0x161   :  { %2958 = vmatpush1.bf16.msra.mxu0 %v10943_v53  ;;  %16792 = vst [vmem:[#allocation75_spill] sm:$0xff] %v12599_v4  ;;  %v10976_v53 = vld [vmem:[#allocation2 + $0x468] ss:$16 sps:$4 sm:$0xff]  }
 0x162   :  { %3191 = vmatpush1.bf16.msra.mxu1 %v10949_v14  ;;  %2959 = vmatprep.subr.bf16.mxu0 %v10948_v22  ;;  %v658_v14 = vsel %vm648_vm3, %v655_v3, %v657_v19  ;;  %v12627_v3 = vld [vmem:[%s16513_s0 + $0x60] sm:$0xff]  }
 0x163   :  { %3192 = vmatprep.subr.bf16.mxu1 %v10960_v36  ;;  %v12614_v36 = vld [vmem:[%s16513_s0 + $0x38] sm:$0xff]   ;;  %v720_v22 = vunpack.c.l.b16 %v658_v14 }
 0x164   :  { %2532 = vmatmul.mubr.bf16.gmra.mxu0 %v12591_v55 }
 0x165   :  { %2765 = vmatmul.mubr.bf16.gmra.mxu1 %v11586_v50  ;;  %2541 = vmatprep.mubr.bf16.mxu0 %v16570_v9  ;;  %v10955_v50 = vld [vmem:[#allocation2 + $0x268] ss:$16 sps:$4 sm:$0xff]  }
 0x166   :  { %2774 = vmatprep.mubr.bf16.mxu1 %v12033_v25  ;;  %2960 = vmatpush1.bf16.msra.mxu0 %v10946_v29  ;;  %v16569_v25 = vsub.s32 0, %v12599_v4  ;;  %v10972_v29 = vld [vmem:[#allocation2 + $0x20c] ss:$16 sps:$4 sm:$0xff]  }
 0x167   :  { %3193 = vmatpush1.bf16.msra.mxu1 %v10958_v37  ;;  %2961 = vmatprep.subr.bf16.mxu0 %v10954_v15  ;;  %v10963_v15 = vld [vmem:[#allocation2 + $0x24c] ss:$16 sps:$4 sm:$0xff]  }
 0x168   :  { %3194 = vmatprep.subr.bf16.mxu1 %v10969_v8  ;;  %v10987_v37 = vld [vmem:[#allocation2 + $0x44c] ss:$16 sps:$4 sm:$0xff]   ;;  %v716_v8 = vunpack.c.h.b16 %v656_v18  ;;  %v10964_v18 = vld [vmem:[#allocation2 + $0x228] ss:$16 sps:$4 sm:$0xff]  }
 0x16a   :  { %2962 = vmatpush1.bf16.msra.mxu0 %v10952_v56  ;;  %v10961_v56 = vld [vmem:[#allocation2 + $0x248] ss:$16 sps:$4 sm:$0xff]  }
 0x16b   :  { %3195 = vmatpush1.bf16.msra.mxu1 %v10967_v41  ;;  %2963 = vmatprep.subr.bf16.mxu0 %v10957_v52  ;;  %v10966_v52 = vld [vmem:[#allocation2 + $0x22c] ss:$16 sps:$4 sm:$0xff]   ;;  %v724_v41 = vunpack.c.h.b16 %v658_v14 }
 0x16c   :  { %3196 = vmatprep.subr.bf16.mxu1 %v10978_v60  ;;  %2542 = vmatmul.mubr.bf16.gmra.mxu0 %v12601_v33  ;;  %v10985_v60 = vld [vmem:[#allocation2 + $0x448] ss:$16 sps:$4 sm:$0xff]   ;;  %v10981_v14 = vld [vmem:[#allocation2 + $0x3cc] ss:$16 sps:$4 sm:$0xff]  }
 0x16d   :  { %2775 = vmatmul.mubr.bf16.gmra.mxu1 %v12054_v43  ;;  %2551 = vmatprep.mubr.bf16.mxu0 %v16570_v9  ;;  %v12632_v43 = vpack.c.b16 %v720_v22, %v716_v8  ;;  %v10975_v22 = vld [vmem:[#allocation2 + $0x3ec] ss:$16 sps:$4 sm:$0xff]  }
 0x16e   :  { %2784 = vmatprep.mubr.bf16.mxu1 %v12063_v46  ;;  %2964 = vmatpush1.bf16.msra.mxu0 %v10955_v50  ;;  %v1009_v46 = vld [vmem:[#allocation4] sm:$0xf]  ;;  %v728_v50 = vunpack.c.l.b16 %v657_v19  ;;  %v16793_v19 = vsub.s32 1, %v12599_v4 }
 0x16f   :  { %3197 = vmatpush1.bf16.msra.mxu1 %v10976_v53  ;;  %2965 = vmatprep.subr.bf16.mxu0 %v10963_v15  ;;  %v10970_v53 = vld [vmem:[#allocation2 + $0x208] ss:$16 sps:$4 sm:$0xff]  }
 0x170   :  { %3198 = vmatprep.subr.bf16.mxu1 %v10987_v37  ;;  %v11003_v15 = vld [vmem:[#allocation2 + $0x408] ss:$16 sps:$4 sm:$0xff]   ;;  %v12638_v37 = vpack.c.b16 %v728_v50, %v724_v41  ;;  %v12646_v8 = vrot.slane %v1009_v46, %v16793_v19 }
 0x172   :  { %2966 = vmatpush1.bf16.msra.mxu0 %v10961_v56 }
 0x173   :  { %3199 = vmatpush1.bf16.msra.mxu1 %v10985_v60  ;;  %2967 = vmatprep.subr.bf16.mxu0 %v10966_v52 }
 0x174   :  { %3200 = vmatprep.subr.bf16.mxu1 %v10996_v57  ;;  %2552 = vmatmul.mubr.bf16.gmra.mxu0 %v12632_v43  ;;  %v10973_v57 = vld [vmem:[#allocation2 + $0x3e8] ss:$16 sps:$4 sm:$0xff]  }
 0x175   :  { %2785 = vmatmul.mubr.bf16.gmra.mxu1 %v12101_v48  ;;  %2561 = vmatprep.mubr.bf16.mxu0 %v16570_v9  ;;  %v12642_v48 = vrot.slane %v1009_v46, %v16569_v25  ;;  %v10991_v25 = vld [vmem:[#allocation2 + $0x368] ss:$16 sps:$4 sm:$0xff]  }
 0x176   :  { %2794 = vmatprep.mubr.bf16.mxu1 %v12118_v11  ;;  %2968 = vmatpush1.bf16.msra.mxu0 %v10964_v18 }
 0x177   :  { %3201 = vmatpush1.bf16.msra.mxu1 %v10994_v61  ;;  %2969 = vmatprep.subr.bf16.mxu0 %v10972_v29  ;;  %v10979_v61 = vld [vmem:[#allocation2 + $0x3c8] ss:$16 sps:$4 sm:$0xff]   ;;  %v10984_v29 = vld [vmem:[#allocation2 + $0x3ac] ss:$16 sps:$4 sm:$0xff]  }
 0x178   :  { %3202 = vmatprep.subr.bf16.mxu1 %v11005_v16 }
 0x17a   :  { %2970 = vmatpush1.bf16.msra.mxu0 %v10970_v53  ;;  %v10982_v53 = vld [vmem:[#allocation2 + $0x3a8] ss:$16 sps:$4 sm:$0xff]  }
 0x17b   :  { %3203 = vmatpush1.bf16.msra.mxu1 %v11003_v15  ;;  %2971 = vmatprep.subr.bf16.mxu0 %v10975_v22  ;;  %v16794_v15 = vrot.slane %v12614_v36, 2 }
 0x17c   :  { %v2057_v11 = vpop.f32.mrf.mxu0  ;;  %2562 = vmatmul.mubr.bf16.gmra.mxu0 %v12638_v37 }
 0x17d   :  { %v2290_v56 = vpop.f32.mrf.mxu1  ;;  %2795 = vmatmul.mubr.bf16.gmra.mxu1 %v12161_v63  ;;  %v2058_v16 = vadd.f32 %v2057_v11, %v12642_v48  ;;  %2571 = vmatprep.mubr.bf16.mxu0 %v16570_v9 }
 0x17e   :  { %2804 = vmatprep.mubr.bf16.mxu1 %v12173_v10  ;;  %v2059_v41 = vpop.f32.mrf.mxu0  ;;  %2972 = vmatpush2.bf16.msra.mxu0 %v10973_v57  ;;  %v16795_v10 = vrot.slane %v12608_v40, 2  ;;  %v10990_v57 = vld [vmem:[#allocation2 + $0x38c] ss:$16 sps:$4 sm:$0xff]  }
 0x17f   :  { %v2292_v52 = vpop.f32.mrf.mxu1  ;;  %v12653_v60 = vadd.f32 %v2290_v56, %v2058_v16  ;;  %v2060_v18 = vadd.f32 %v2059_v41, %v12646_v8  ;;  %2973 = vmatprep.subr.bf16.mxu0 %v10981_v14 }
 0x180   :  { %v2061_v46 = vpop.f32.mrf.mxu0  ;;  %v12664_v19 = vsel %vm648_vm3, %v16795_v10, %v16794_v15 }
 0x181   :  { %v2294_v50 = vpop.f32.mrf.mxu1  ;;  %v12656_v63 = vadd.f32 %v2292_v52, %v2060_v18  ;;  %v2062_v22 = vadd.f32 %v2061_v46, %v12642_v48  ;;  %v10988_v18 = vld [vmem:[#allocation2 + $0x388] ss:$16 sps:$4 sm:$0xff]  }
 0x182   :  { %v2063_v11 = vpop.f32.mrf.mxu0  ;;  %2974 = vmatpush2.bf16.msra.mxu0 %v10979_v61  ;;  %v10993_v61 = vld [vmem:[#allocation2 + $0x36c] ss:$16 sps:$4 sm:$0xff]  }
 0x183   :  { %v2296_v56 = vpop.f32.mrf.mxu1  ;;  %v12666_v16 = vadd.f32 %v2294_v50, %v2062_v22  ;;  %v2064_v14 = vadd.f32 %v2063_v11, %v12646_v8  ;;  %2975 = vmatprep.subr.bf16.mxu0 %v10984_v29 }
 0x184   :  { %v2067_v41 = vpop.f32.mrf.mxu0  ;;  %2572 = vmatmul.mubr.bf16.gmra.mxu0 %v12664_v19 }
 0x185   :  { %v2300_v52 = vpop.f32.mrf.mxu1  ;;  %2805 = vmatmul.mubr.bf16.gmra.mxu1 %v12608_v40  ;;  %v12671_v46 = vadd.f32 %v2296_v56, %v2064_v14  ;;  %v2068_v15 = vadd.f32 %v2067_v41, %v12642_v48  ;;  %2581 = vmatprep.mubr.bf16.mxu0 %v16570_v9  ;;  %v16796_v41 = vrot.slane %v12106_v23, 2 }
 0x186   :  { %2814 = vmatprep.mubr.bf16.mxu1 %v12194_v39  ;;  %v2069_v50 = vpop.f32.mrf.mxu0  ;;  %2976 = vmatpush2.bf16.msra.mxu0 %v10982_v53  ;;  %v16797_v39 = vrot.slane %v12614_v36, 2  ;;  %v10999_v53 = vld [vmem:[#allocation2 + $0x34c] ss:$16 sps:$4 sm:$0xff]  }
 0x187   :  { %v2302_v22 = vpop.f32.mrf.mxu1  ;;  %v12676_v29 = vadd.f32 %v2300_v52, %v2068_v15  ;;  %v2070_v10 = vadd.f32 %v2069_v50, %v12646_v8  ;;  %2977 = vmatprep.subr.bf16.mxu0 %v10990_v57 }
 0x188   :  { %v2071_v11 = vpop.f32.mrf.mxu0  ;;  %v12687_v9 = vsel %vm648_vm3, %v16797_v39, %v16796_v41  ;;  %v16798_v39 = vmov 0  }
 0x189   :  { %v2304_v40 = vpop.f32.mrf.mxu1  ;;  %v12679_v56 = vadd.f32 %v2302_v22, %v2070_v10  ;;  %v2072_v14 = vadd.f32 %v2071_v11, %v12642_v48  ;;  %v10997_v11 = vld [vmem:[#allocation2 + $0x348] ss:$16 sps:$4 sm:$0xff]  }
 0x18a   :  { %v2073_v52 = vpop.f32.mrf.mxu0  ;;  %2978 = vmatpush2.bf16.msra.mxu0 %v10988_v18  ;;  %v16799_v18 = vrot.slane %v12154_v58, 2 }
 0x18b   :  { %v2306_v15 = vpop.f32.mrf.mxu1  ;;  %v12689_v50 = vadd.f32 %v2304_v40, %v2072_v14  ;;  %v2074_v57 = vadd.f32 %v2073_v52, %v12646_v8  ;;  %2979 = vmatprep.subr.bf16.mxu0 %v10993_v61  ;;  %v16800_v40 = vrot.slane %v12145_v54, 2  ;;  %v11002_v14 = vld [vmem:[#allocation2 + $0x32c] ss:$16 sps:$4 sm:$0xff]  }
 0x18c   :  { %v2077_v22 = vpop.f32.mrf.mxu0  ;;  %2582 = vmatmul.mubr.bf16.gmra.mxu0 %v12687_v9 }
 0x18d   :  { %v2310_v10 = vpop.f32.mrf.mxu1  ;;  %2815 = vmatmul.mubr.bf16.gmra.mxu1 %v12614_v36  ;;  %v12694_v4 = vadd.f32 %v2306_v15, %v2074_v57  ;;  %v2078_v41 = vadd.f32 %v2077_v22, %v12642_v48  ;;  %2591 = vmatprep.mubr.bf16.mxu0 %v16798_v39  ;;  %v666_v61 = vsel %vm648_vm3, %v16800_v40, %v16799_v18  ;;  %v16802_v18 = vrot.slane %v12170_v6, 2 }
 0x18e   :  { %2824 = vmatprep.mubr.bf16.mxu1 %v12217_v26  ;;  %v2079_v52 = vpop.f32.mrf.mxu0  ;;  %2980 = vmatpush2.bf16.msra.mxu0 %v10991_v25  ;;  %v12709_v26 = vcombine.low %v16801_v1, %v666_v61  ;;  %v16803_v25 = vrot.slane %v12154_v58, 2  ;;  %v11006_v58 = vld [vmem:[#allocation2 + $0x308] ss:$16 sps:$4 sm:$0xff]  }
 0x18f   :  { %v2312_v0 = vpop.f32.mrf.mxu1  ;;  %v12704_v36 = vadd.f32 %v2310_v10, %v2078_v41  ;;  %v2080_v15 = vadd.f32 %v2079_v52, %v12646_v8  ;;  %2981 = vmatprep.subr.bf16.mxu0 %v10999_v53  ;;  %v11008_v41 = vld [vmem:[#allocation2 + $0x30c] ss:$16 sps:$4 sm:$0xff]  }
 0x190   :  { %v2081_v57 = vpop.f32.mrf.mxu0  ;;  %v668_v10 = vsel %vm648_vm3, %v16803_v25, %v16802_v18 }
 0x191   :  { %v2314_v22 = vpop.f32.mrf.mxu1  ;;  %v12711_v59 = vadd.f32 %v2312_v0, %v2080_v15  ;;  %v2082_v54 = vadd.f32 %v2081_v57, %v12642_v48  ;;  %v756_v15 = vunpack.c.h.b16 %v666_v61  ;;  %v760_v57 = vunpack.c.l.b16 %v668_v10 }
 0x192   :  { %v2083_v40 = vpop.f32.mrf.mxu0  ;;  %2982 = vmatpush2.bf16.msra.mxu0 %v10997_v11 }
 0x193   :  { %v2316_v53 = vpop.f32.mrf.mxu1  ;;  %v12719_v52 = vadd.f32 %v2314_v22, %v2082_v54  ;;  %v2084_v23 = vadd.f32 %v2083_v40, %v12646_v8  ;;  %2983 = vmatprep.subr.bf16.mxu0 %v11002_v14  ;;  %v12732_v25 = vpack.c.b16 %v760_v57, %v756_v15 }
 0x194   :  { %v2087_v1 = vpop.f32.mrf.mxu0  ;;  %2592 = vmatmul.mubr.bf16.gmra.mxu0 %v12709_v26 }
 0x195   :  { %v2320_v0 = vpop.f32.mrf.mxu1  ;;  %2825 = vmatmul.mubr.bf16.gmra.mxu1 %v12237_v20  ;;  %v12724_v49 = vadd.f32 %v2316_v53, %v2084_v23  ;;  %v2088_v18 = vadd.f32 %v2087_v1, %v12642_v48  ;;  %2601 = vmatprep.mubr.bf16.mxu0 %v16798_v39 }
 0x196   :  { %2834 = vmatprep.mubr.bf16.mxu1 %v12248_v38  ;;  %v2089_v11 = vpop.f32.mrf.mxu0  ;;  %2984 = vmatpush2.bf16.msra.mxu0 %v11000_v5 }
 0x197   :  { %v2322_v22 = vpop.f32.mrf.mxu1  ;;  %v12729_v14 = vadd.f32 %v2320_v0, %v2088_v18  ;;  %v2090_v61 = vadd.f32 %v2089_v11, %v12646_v8  ;;  %2985 = vmatprep.subr.bf16.mxu0 %v11008_v41  ;;  %v12743_v0 = vld [vmem:[%s16513_s0 + $0x68] sm:$0xff]   ;;  %v16804_v11 = vrot.slane %v12170_v6, 2 }
 0x198   :  { %v2091_v54 = vpop.f32.mrf.mxu0  ;;  %v670_v41 = vrot.slane %v12743_v0, 2 }
 0x199   :  { %v2324_v20 = vpop.f32.mrf.mxu1  ;;  %v12734_v40 = vadd.f32 %v2322_v22, %v2090_v61  ;;  %v2092_v53 = vadd.f32 %v2091_v54, %v12642_v48  ;;  %v768_v22 = vunpack.c.l.b16 %v16804_v11 }
 0x19a   :  { %v2093_v23 = vpop.f32.mrf.mxu0  ;;  %2986 = vmatpush2.bf16.msra.mxu0 %v11006_v58  ;;  %v764_v58 = vunpack.c.h.b16 %v668_v10 }
 0x19b   :  { %v2326_v1 = vpop.f32.mrf.mxu1  ;;  %v12737_v38 = vadd.f32 %v2324_v20, %v2092_v53  ;;  %v2094_v5 = vadd.f32 %v2093_v23, %v12646_v8 }
 0x19c   :  { %v2097_v57 = vpop.f32.mrf.mxu0  ;;  %2602 = vmatmul.mubr.bf16.gmra.mxu0 %v12732_v25  ;;  %v12759_v10 = vpack.c.b16 %v768_v22, %v764_v58 }
 0x19d   :  { %v2330_v18 = vpop.f32.mrf.mxu1  ;;  %2835 = vmatmul.mubr.bf16.gmra.mxu1 %v12282_v45  ;;  %v12751_v61 = vadd.f32 %v2326_v1, %v2094_v5  ;;  %v2098_v54 = vadd.f32 %v2097_v57, %v12642_v48  ;;  %2611 = vmatprep.mubr.bf16.mxu0 %v16798_v39 }
 0x19e   :  { %2844 = vmatprep.mubr.bf16.mxu1 %v12286_v42  ;;  %v2099_v20 = vpop.f32.mrf.mxu0  ;;  %16805 = vst [vmem:[#allocation76_spill] sm:$0xff] %v12759_v10 }
 0x19f   :  { %v2332_v53 = vpop.f32.mrf.mxu1  ;;  %v12756_v23 = vadd.f32 %v2330_v18, %v2098_v54  ;;  %v2100_v15 = vadd.f32 %v2099_v20, %v12646_v8 }
 0x1a0   :  { %v2101_v35 = vpop.f32.mrf.mxu0 }
 0x1a1   :  { %v2334_v45 = vpop.f32.mrf.mxu1  ;;  %v12761_v6 = vadd.f32 %v2332_v53, %v2100_v15  ;;  %v2102_v1 = vadd.f32 %v2101_v35, %v12642_v48 }
 0x1a2   :  { %v2103_v5 = vpop.f32.mrf.mxu0 }
 0x1a3   :  { %v2336_v57 = vpop.f32.mrf.mxu1  ;;  %v12764_v11 = vadd.f32 %v2334_v45, %v2102_v1  ;;  %v2104_v42 = vadd.f32 %v2103_v5, %v12646_v8  ;;  %v16808_v1 = vrot.slane %v12627_v3, 2 }
 0x1a4   :  { %v2107_v7 = vpop.f32.mrf.mxu0  ;;  %2612 = vmatmul.mubr.bf16.gmra.mxu0 %v12759_v10 }
 0x1a5   :  { %v2340_v21 = vpop.f32.mrf.mxu1  ;;  %2845 = vmatmul.mubr.bf16.gmra.mxu1 %v12327_v2  ;;  %v12769_v18 = vadd.f32 %v2336_v57, %v2104_v42  ;;  %v2108_v58 = vadd.f32 %v2107_v7, %v12642_v48  ;;  %2621 = vmatprep.mubr.bf16.mxu0 %v16798_v39  ;;  %v12783_v7 = vsel %vm648_vm3, %v16808_v1, %v670_v41 }
 0x1a6   :  { %2854 = vmatprep.mubr.bf16.mxu1 %v12335_v24  ;;  %v2109_v35 = vpop.f32.mrf.mxu0  ;;  %16809 = vst [vmem:[#allocation79_spill] sm:$0xff] %v12783_v7 }
 0x1a7   :  { %v2342_v15 = vpop.f32.mrf.mxu1  ;;  %v12774_v22 = vadd.f32 %v2340_v21, %v2108_v58  ;;  %v2110_v54 = vadd.f32 %v2109_v35, %v12646_v8 }
 0x1a8   :  { %v2111_v20 = vpop.f32.mrf.mxu0 }
 0x1a9   :  { %16806 = vst [vmem:[#allocation77_spill] sm:$0xff] %v12774_v22  ;;  %v2344_v53 = vpop.f32.mrf.mxu1  ;;  %v12777_v45 = vadd.f32 %v2342_v15, %v2110_v54  ;;  %v2112_v2 = vadd.f32 %v2111_v20, %v12642_v48  ;;  %v16812_v54 = vld [vmem:[#allocation49_spill] sm:$0xff] }
 0x1aa   :  { %v2113_v5 = vpop.f32.mrf.mxu0 }
 0x1ab   :  { %16807 = vst [vmem:[#allocation78_spill] sm:$0xff] %v12777_v45  ;;  %v2346_v57 = vpop.f32.mrf.mxu1  ;;  %v12785_v24 = vadd.f32 %v2344_v53, %v2112_v2  ;;  %v2114_v21 = vadd.f32 %v2113_v5, %v12646_v8 }
 0x1ac   :  { %v2117_v42 = vpop.f32.mrf.mxu0  ;;  %2622 = vmatmul.mubr.bf16.gmra.mxu0 %v12783_v7  ;;  %v16814_v7 = vrot.slane %v12301_v28, 2 }
 0x1ad   :  { %16810 = vst [vmem:[#allocation80_spill] sm:$0xff] %v12785_v24  ;;  %v2350_v58 = vpop.f32.mrf.mxu1  ;;  %2855 = vmatmul.mubr.bf16.gmra.mxu1 %v12627_v3  ;;  %v12790_v35 = vadd.f32 %v2346_v57, %v2114_v21  ;;  %v2118_v15 = vadd.f32 %v2117_v42, %v12642_v48  ;;  %2631 = vmatprep.mubr.bf16.mxu0 %v16798_v39  ;;  %v16817_v42 = vld [vmem:[#allocation43_spill] sm:$0xff] }
 0x1ae   :  { %2864 = vmatprep.mubr.bf16.mxu1 %v16812_v54  ;;  %v2119_v20 = vpop.f32.mrf.mxu0  ;;  %v12801_v3 = vsel %vm648_vm3, %v670_v41, %v16814_v7  ;;  %v16818_v54 = vld [vmem:[#allocation44_spill] sm:$0xff] }
 0x1af   :  { %16811 = vst [vmem:[#allocation81_spill] sm:$0xff] %v12790_v35  ;;  %v2352_v1 = vpop.f32.mrf.mxu1  ;;  %v12795_v53 = vadd.f32 %v2350_v58, %v2118_v15  ;;  %v2120_v2 = vadd.f32 %v2119_v20, %v12646_v8  ;;  %16815 = vst [vmem:[#allocation82_spill] sm:$0xff] %v12801_v3  ;;  %v674_v35 = vrot.slane %v16817_v42, 2  ;;  %v675_v45 = vrot.slane %v16818_v54, 2 }
 0x1b0   :  { %v2121_v5 = vpop.f32.mrf.mxu0 }
 0x1b1   :  { %16813 = vst [vmem:[#allocation49_spill] sm:$0xff] %v12795_v53  ;;  %v2354_v24 = vpop.f32.mrf.mxu1  ;;  %v12803_v57 = vadd.f32 %v2352_v1, %v2120_v2  ;;  %v2122_v21 = vadd.f32 %v2121_v5, %v12642_v48  ;;  %v16821_v1 = vld [vmem:[#allocation52_spill] sm:$0xff]  ;;  %v676_v2 = vsel %vm648_vm3, %v674_v35, %v675_v45 }
 0x1b2   :  { %v2123_v22 = vpop.f32.mrf.mxu0 }
 0x1b3   :  { %16816 = vst [vmem:[#allocation83_spill] sm:$0xff] %v12803_v57  ;;  %v2356_v58 = vpop.f32.mrf.mxu1  ;;  %v12808_v15 = vadd.f32 %v2354_v24, %v2122_v21  ;;  %v2124_v20 = vadd.f32 %v2123_v22, %v12646_v8  ;;  %v16822_v24 = vld [vmem:[#allocation47_spill] sm:$0xff] }
 0x1b4   :  { %v2127_v53 = vpop.f32.mrf.mxu0  ;;  %2632 = vmatmul.mubr.bf16.gmra.mxu0 %v12801_v3  ;;  %v677_v5 = vrot.slane %v16822_v24, 2 }
 0x1b5   :  { %16819 = vst [vmem:[#allocation43_spill] sm:$0xff] %v12808_v15  ;;  %v2360_v10 = vpop.f32.mrf.mxu1  ;;  %2865 = vmatmul.mubr.bf16.gmra.mxu1 %v12743_v0  ;;  %v12813_v41 = vadd.f32 %v2356_v58, %v2124_v20  ;;  %v2128_v7 = vadd.f32 %v2127_v53, %v12642_v48  ;;  %2641 = vmatprep.mubr.bf16.mxu0 %v16798_v39  ;;  %v16824_v58 = vrot.slane %v12301_v28, 2  ;;  %v796_v28 = vunpack.c.h.b16 %v676_v2 }
 0x1b6   :  { %2874 = vmatprep.mubr.bf16.mxu1 %v16821_v1  ;;  %v2129_v21 = vpop.f32.mrf.mxu0  ;;  %v678_v35 = vsel %vm648_vm3, %v675_v45, %v677_v5  ;;  %v16830_v45 = vld [vmem:[#allocation56_spill] sm:$0xff] }
 0x1b7   :  { %16820 = vst [vmem:[#allocation44_spill] sm:$0xff] %v12813_v41  ;;  %v2362_v22 = vpop.f32.mrf.mxu1  ;;  %v12820_v42 = vadd.f32 %v2360_v10, %v2128_v7  ;;  %v2130_v54 = vadd.f32 %v2129_v21, %v12646_v8  ;;  %v12825_v20 = vcombine.low %v16824_v58, %v676_v2  ;;  %v800_v58 = vunpack.c.l.b16 %v678_v35 }
 0x1b8   :  { %v2131_v3 = vpop.f32.mrf.mxu0 }
 0x1b9   :  { %16823 = vst [vmem:[#allocation52_spill] sm:$0xff] %v12820_v42  ;;  %v2364_v0 = vpop.f32.mrf.mxu1  ;;  %16825 = vst [vmem:[#allocation47_spill] sm:$0xff] %v12825_v20  ;;  %v12827_v53 = vadd.f32 %v2362_v22, %v2130_v54  ;;  %v2132_v1 = vadd.f32 %v2131_v3, %v12642_v48  ;;  %v16828_v42 = vld [vmem:[#allocation54_spill] sm:$0xff] }
 0x1ba   :  { %v2133_v41 = vpop.f32.mrf.mxu0 }
 0x1bb   :  { %16826 = vst [vmem:[#allocation84_spill] sm:$0xff] %v12827_v53  ;;  %v2366_v24 = vpop.f32.mrf.mxu1  ;;  %v12831_v15 = vadd.f32 %v2364_v0, %v2132_v1  ;;  %v2134_v10 = vadd.f32 %v2133_v41, %v12646_v8  ;;  %v12844_v53 = vpack.c.b16 %v800_v58, %v796_v28 }
 0x1bc   :  { %v2137_v7 = vpop.f32.mrf.mxu0  ;;  %2642 = vmatmul.mubr.bf16.gmra.mxu0 %v12825_v20 }
 0x1bd   :  { %16827 = vst [vmem:[#allocation85_spill] sm:$0xff] %v12831_v15  ;;  %v2370_v21 = vpop.f32.mrf.mxu1  ;;  %2875 = vmatmul.mubr.bf16.gmra.mxu1 %v16828_v42  ;;  %v12836_v22 = vadd.f32 %v2366_v24, %v2134_v10  ;;  %v2138_v3 = vadd.f32 %v2137_v7, %v12642_v48  ;;  %2651 = vmatprep.mubr.bf16.mxu0 %v16798_v39  ;;  %16831 = vst [vmem:[#allocation56_spill] sm:$0xff] %v12844_v53 }
 0x1be   :  { %2884 = vmatprep.mubr.bf16.mxu1 %v16830_v45  ;;  %v2139_v54 = vpop.f32.mrf.mxu0 }
 0x1bf   :  { %16829 = vst [vmem:[#allocation54_spill] sm:$0xff] %v12836_v22  ;;  %v2372_v0 = vpop.f32.mrf.mxu1  ;;  %v12841_v1 = vadd.f32 %v2370_v21, %v2138_v3  ;;  %v2140_v41 = vadd.f32 %v2139_v54, %v12646_v8  ;;  %v16834_v21 = vld [vmem:[#allocation58_spill] sm:$0xff]  ;;  %v804_v3 = vunpack.c.h.b16 %v678_v35  ;;  %v808_v54 = vunpack.c.l.b16 %v677_v5 }
 0x1c0   :  { %v2141_v15 = vpop.f32.mrf.mxu0 }
 0x1c1   :  { %v2374_v20 = vpop.f32.mrf.mxu1  ;;  %v12846_v2 = vadd.f32 %v2372_v0, %v2140_v41  ;;  %v2142_v42 = vadd.f32 %v2141_v15, %v12642_v48  ;;  %v16836_v15 = vld [vmem:[#allocation60_spill] sm:$0xff] }
 0x1c2   :  { %v2143_v24 = vpop.f32.mrf.mxu0 }
 0x1c3   :  { %16832 = vst [vmem:[#allocation86_spill] sm:$0xff] %v12846_v2  ;;  %v2376_v10 = vpop.f32.mrf.mxu1  ;;  %v12849_v7 = vadd.f32 %v2374_v20, %v2142_v42  ;;  %v2144_v45 = vadd.f32 %v2143_v24, %v12646_v8 }
 0x1c4   :  { %v2147_v22 = vpop.f32.mrf.mxu0  ;;  %2652 = vmatmul.mubr.bf16.gmra.mxu0 %v12844_v53 }
 0x1c5   :  { %16833 = vst [vmem:[#allocation87_spill] sm:$0xff] %v12849_v7  ;;  %v2380_v57 = vpop.f32.mrf.mxu1  ;;  %2885 = vmatmul.mubr.bf16.gmra.mxu1 %v16834_v21  ;;  %v12854_v28 = vadd.f32 %v2376_v10, %v2144_v45  ;;  %v2148_v58 = vadd.f32 %v2147_v22, %v12642_v48  ;;  %2661 = vmatprep.mubr.bf16.mxu0 %v16798_v39 }
 0x1c6   :  { %2894 = vmatprep.mubr.bf16.mxu1 %v16836_v15  ;;  %v2149_v20 = vpop.f32.mrf.mxu0  ;;  %v12862_v7 = vpack.c.b16 %v808_v54, %v804_v3  ;;  %v16843_v54 = vld [vmem:[#allocation64_spill] sm:$0xff] }
 0x1c7   :  { %16835 = vst [vmem:[#allocation58_spill] sm:$0xff] %v12854_v28  ;;  %v2382_v0 = vpop.f32.mrf.mxu1  ;;  %v12859_v41 = vadd.f32 %v2380_v57, %v2148_v58  ;;  %v2150_v42 = vadd.f32 %v2149_v20, %v12646_v8  ;;  %v16841_v57 = vld [vmem:[#allocation62_spill] sm:$0xff] }
 0x1c8   :  { %v2151_v24 = vpop.f32.mrf.mxu0  ;;  %16838 = vst [vmem:[#allocation88_spill] sm:$0xff] %v12862_v7 }
 0x1c9   :  { %16837 = vst [vmem:[#allocation60_spill] sm:$0xff] %v12859_v41  ;;  %v2384_v53 = vpop.f32.mrf.mxu1  ;;  %v12864_v35 = vadd.f32 %v2382_v0, %v2150_v42  ;;  %v2152_v5 = vadd.f32 %v2151_v24, %v12642_v48  ;;  %v11592_v0 = vld [vmem:[%s16513_s0 + $0x98] sm:$0xff]  }
 0x1ca   :  { %v2153_v10 = vpop.f32.mrf.mxu0  ;;  %v680_v42 = vrot.slane %v11592_v0, 2 }
 0x1cb   :  { %16839 = vst [vmem:[#allocation89_spill] sm:$0xff] %v12864_v35  ;;  %v2386_v22 = vpop.f32.mrf.mxu1  ;;  %v12867_v45 = vadd.f32 %v2384_v53, %v2152_v5  ;;  %v2154_v21 = vadd.f32 %v2153_v10, %v12646_v8  ;;  %v11591_v53 = vld [vmem:[%s16513_s0 + $0x90] sm:$0xff]  }
 0x1cc   :  { %v2157_v15 = vpop.f32.mrf.mxu0  ;;  %2662 = vmatmul.mubr.bf16.gmra.mxu0 %v12862_v7  ;;  %v679_v20 = vrot.slane %v11591_v53, 2 }
 0x1cd   :  { %16840 = vst [vmem:[#allocation90_spill] sm:$0xff] %v12867_v45  ;;  %v2390_v28 = vpop.f32.mrf.mxu1  ;;  %2895 = vmatmul.mubr.bf16.gmra.mxu1 %v16841_v57  ;;  %v12872_v58 = vadd.f32 %v2386_v22, %v2154_v21  ;;  %v2158_v3 = vadd.f32 %v2157_v15, %v12642_v48  ;;  %2671 = vmatprep.mubr.bf16.mxu0 %v16798_v39 }
 0x1ce   :  { %2904 = vmatprep.mubr.bf16.mxu1 %v16843_v54  ;;  %v2159_v24 = vpop.f32.mrf.mxu0  ;;  %v12890_v7 = vsel %vm648_vm3, %v679_v20, %v680_v42 }
 0x1cf   :  { %16842 = vst [vmem:[#allocation62_spill] sm:$0xff] %v12872_v58  ;;  %v2392_v5 = vpop.f32.mrf.mxu1  ;;  %v12883_v10 = vadd.f32 %v2390_v28, %v2158_v3  ;;  %v2160_v22 = vadd.f32 %v2159_v24, %v12646_v8  ;;  %16844 = vst [vmem:[#allocation64_spill] sm:$0xff] %v12890_v7  ;;  %v682_v3 = vrot.slane %v12453_v47, 2 }
 0x1d0   :  { %v2161_v21 = vpop.f32.mrf.mxu0 }
 0x1d1   :  { %v2394_v15 = vpop.f32.mrf.mxu1  ;;  %v12886_v57 = vadd.f32 %v2392_v5, %v2160_v22  ;;  %v2162_v54 = vadd.f32 %v2161_v21, %v12642_v48 }
 0x1d2   :  { %v2163_v58 = vpop.f32.mrf.mxu0 }
 0x1d3   :  { %v2396_v45 = vpop.f32.mrf.mxu1  ;;  %v12892_v35 = vadd.f32 %v2394_v15, %v2162_v54  ;;  %v2164_v41 = vadd.f32 %v2163_v58, %v12646_v8 }
 0x1d4   :  { %v2167_v2 = vpop.f32.mrf.mxu0  ;;  %2672 = vmatmul.mubr.bf16.gmra.mxu0 %v12890_v7 }
 0x1d5   :  { %v2400_v28 = vpop.f32.mrf.mxu1  ;;  %2905 = vmatmul.mubr.bf16.gmra.mxu1 %v11591_v53  ;;  %v12897_v24 = vadd.f32 %v2396_v45, %v2164_v41  ;;  %v2168_v5 = vadd.f32 %v2167_v2, %v12642_v48  ;;  %2681 = vmatprep.mubr.bf16.mxu0 %v16798_v39  ;;  %v12906_v53 = vsel %vm648_vm3, %v680_v42, %v682_v3  ;;  %v684_v2 = vrot.slane %v12459_v17, 2 }
 0x1d6   :  { %2914 = vmatprep.mubr.bf16.mxu1 %v12508_v34  ;;  %v2169_v20 = vpop.f32.mrf.mxu0  ;;  %16846 = vst [vmem:[#allocation92_spill] sm:$0xff] %v12906_v53  ;;  %v685_v45 = vrot.slane %v12467_v27, 2  ;;  %v687_v27 = vrot.slane %v12494_v13, 2 }
 0x1d7   :  { %16845 = vst [vmem:[#allocation91_spill] sm:$0xff] %v12897_v24  ;;  %v2402_v22 = vpop.f32.mrf.mxu1  ;;  %v12902_v21 = vadd.f32 %v2400_v28, %v2168_v5  ;;  %v2170_v58 = vadd.f32 %v2169_v20, %v12646_v8 }
 0x1d8   :  { %v2171_v15 = vpop.f32.mrf.mxu0  ;;  %v686_v17 = vsel %vm648_vm3, %v684_v2, %v685_v45 }
 0x1d9   :  { %v2404_v54 = vpop.f32.mrf.mxu1  ;;  %v12908_v47 = vadd.f32 %v2402_v22, %v2170_v58  ;;  %v2172_v41 = vadd.f32 %v2171_v15, %v12642_v48 }
 0x1da   :  { %v2173_v34 = vpop.f32.mrf.mxu0 }
 0x1db   :  { %v2406_v7 = vpop.f32.mrf.mxu1  ;;  %v12913_v24 = vadd.f32 %v2404_v54, %v2172_v41  ;;  %v2174_v28 = vadd.f32 %v2173_v34, %v12646_v8 }
 0x1dc   :  { %v2177_v5 = vpop.f32.mrf.mxu0  ;;  %2682 = vmatmul.mubr.bf16.gmra.mxu0 %v12906_v53 }
 0x1dd   :  { %v2410_v20 = vpop.f32.mrf.mxu1  ;;  %2915 = vmatmul.mubr.bf16.gmra.mxu1 %v11592_v0  ;;  %v12917_v42 = vadd.f32 %v2406_v7, %v2174_v28  ;;  %v2178_v22 = vadd.f32 %v2177_v5, %v12642_v48  ;;  %2691 = vmatprep.mubr.bf16.mxu0 %v16798_v39  ;;  %v12927_v7 = vcombine.low %v682_v3, %v686_v17  ;;  %v836_v3 = vunpack.c.h.b16 %v686_v17 }
 0x1de   :  { %2924 = vmatprep.mubr.bf16.mxu1 %v12525_v44  ;;  %v2179_v58 = vpop.f32.mrf.mxu0  ;;  %v688_v44 = vsel %vm648_vm3, %v685_v45, %v687_v27 }
 0x1df   :  { %16847 = vst [vmem:[#allocation93_spill] sm:$0xff] %v12917_v42  ;;  %v2412_v15 = vpop.f32.mrf.mxu1  ;;  %v12924_v54 = vadd.f32 %v2410_v20, %v2178_v22  ;;  %v2180_v41 = vadd.f32 %v2179_v58, %v12646_v8  ;;  %16848 = vst [vmem:[#allocation94_spill] sm:$0xff] %v12927_v7  ;;  %v840_v58 = vunpack.c.l.b16 %v688_v44 }
 0x1e0   :  { %v2181_v34 = vpop.f32.mrf.mxu0 }
 0x1e1   :  { %v2414_v0 = vpop.f32.mrf.mxu1  ;;  %v12929_v28 = vadd.f32 %v2412_v15, %v2180_v41  ;;  %v2182_v5 = vadd.f32 %v2181_v34, %v12642_v48 }
 0x1e2   :  { %v2183_v53 = vpop.f32.mrf.mxu0 }
 0x1e3   :  { %16849 = vst [vmem:[#allocation95_spill] sm:$0xff] %v12929_v28  ;;  %v2416_v2 = vpop.f32.mrf.mxu1  ;;  %v12933_v42 = vadd.f32 %v2414_v0, %v2182_v5  ;;  %v2184_v13 = vadd.f32 %v2183_v53, %v12646_v8 }
 0x1e4   :  { %v2187_v20 = vpop.f32.mrf.mxu0  ;;  %2692 = vmatmul.mubr.bf16.gmra.mxu0 %v12927_v7 }
 0x1e5   :  { %16850 = vst [vmem:[#allocation96_spill] sm:$0xff] %v12933_v42  ;;  %v2420_v22 = vpop.f32.mrf.mxu1  ;;  %2925 = vmatmul.mubr.bf16.gmra.mxu1 %v12539_v62  ;;  %v12938_v15 = vadd.f32 %v2416_v2, %v2184_v13  ;;  %v2188_v41 = vadd.f32 %v2187_v20, %v12642_v48  ;;  %2701 = vmatprep.mubr.bf16.mxu0 %v16798_v39 }
 0x1e6   :  { %2934 = vmatprep.mubr.bf16.mxu1 %v12543_v12  ;;  %v2189_v45 = vpop.f32.mrf.mxu0  ;;  %v12946_v42 = vpack.c.b16 %v840_v58, %v836_v3 }
 0x1e7   :  { %16851 = vst [vmem:[#allocation97_spill] sm:$0xff] %v12938_v15  ;;  %v2422_v34 = vpop.f32.mrf.mxu1  ;;  %v12943_v0 = vadd.f32 %v2420_v22, %v2188_v41  ;;  %v2190_v53 = vadd.f32 %v2189_v45, %v12646_v8  ;;  %v844_v22 = vunpack.c.h.b16 %v688_v44  ;;  %v848_v41 = vunpack.c.l.b16 %v687_v27 }
 0x1e8   :  { %v2191_v5 = vpop.f32.mrf.mxu0 }
 0x1e9   :  { %v2424_v7 = vpop.f32.mrf.mxu1  ;;  %v12948_v62 = vadd.f32 %v2422_v34, %v2190_v53  ;;  %v2192_v17 = vadd.f32 %v2191_v5, %v12642_v48 }
 0x1ea   :  { %v2193_v2 = vpop.f32.mrf.mxu0 }
 0x1eb   :  { %v2426_v13 = vpop.f32.mrf.mxu1  ;;  %v12951_v20 = vadd.f32 %v2424_v7, %v2192_v17  ;;  %v2194_v12 = vadd.f32 %v2193_v2, %v12646_v8  ;;  %v12964_v2 = vpack.c.b16 %v848_v41, %v844_v22  ;;  %v16855_v41 = vld [vmem:[#allocation24_spill] sm:$0xff] }
 0x1ec   :  { %v2197_v15 = vpop.f32.mrf.mxu0  ;;  %2702 = vmatmul.mubr.bf16.gmra.mxu0 %v12946_v42 }
 0x1ed   :  { %v2430_v28 = vpop.f32.mrf.mxu1  ;;  %2935 = vmatmul.mubr.bf16.gmra.mxu1 %v12554_v51  ;;  %v12956_v3 = vadd.f32 %v2426_v13, %v2194_v12  ;;  %v2198_v58 = vadd.f32 %v2197_v15, %v12642_v48  ;;  %2711 = vmatprep.mubr.bf16.mxu0 %v16798_v39  ;;  %16853 = vst [vmem:[#allocation99_spill] sm:$0xff] %v12964_v2 }
 0x1ee   :  { %2944 = vmatprep.mubr.bf16.mxu1 %v12558_v32  ;;  %v2199_v7 = vpop.f32.mrf.mxu0 }
 0x1ef   :  { %16852 = vst [vmem:[#allocation98_spill] sm:$0xff] %v12956_v3  ;;  %v2432_v45 = vpop.f32.mrf.mxu1  ;;  %v12961_v34 = vadd.f32 %v2430_v28, %v2198_v58  ;;  %v2200_v53 = vadd.f32 %v2199_v7, %v12646_v8 }
 0x1f0   :  { %v2201_v5 = vpop.f32.mrf.mxu0 }
 0x1f1   :  { %v2434_v17 = vpop.f32.mrf.mxu1  ;;  %v12966_v51 = vadd.f32 %v2432_v45, %v2200_v53  ;;  %v2202_v27 = vadd.f32 %v2201_v5, %v12642_v48 }
 0x1f2   :  { %v2203_v44 = vpop.f32.mrf.mxu0 }
 0x1f3   :  { %v2436_v15 = vpop.f32.mrf.mxu1  ;;  %v12969_v13 = vadd.f32 %v2434_v17, %v2202_v27  ;;  %v2204_v32 = vadd.f32 %v2203_v44, %v12646_v8 }
 0x1f4   :  { %v2207_v12 = vpop.f32.mrf.mxu0  ;;  %2712 = vmatmul.mubr.bf16.gmra.mxu0 %v12964_v2  ;;  %v16858_v2 = vld [vmem:[#allocation25_spill] sm:$0xff] }
 0x1f5   :  { %v2440_v3 = vpop.f32.mrf.mxu1  ;;  %2945 = vmatmul.mubr.bf16.gmra.mxu1 %v12568_v31  ;;  %v12974_v28 = vadd.f32 %v2436_v15, %v2204_v32  ;;  %v2208_v22 = vadd.f32 %v2207_v12, %v12642_v48  ;;  %2987 = vmatprep.mubr.bf16.mxu0 %v16855_v41 }
 0x1f6   :  { %3220 = vmatprep.mubr.bf16.mxu1 %v16798_v39  ;;  %v2209_v58 = vpop.f32.mrf.mxu0 }
 0x1f7   :  { %16854 = vst [vmem:[#allocation100_spill] sm:$0xff] %v12974_v28  ;;  %v2442_v7 = vpop.f32.mrf.mxu1  ;;  %v12979_v45 = vadd.f32 %v2440_v3, %v2208_v22  ;;  %v2210_v53 = vadd.f32 %v2209_v58, %v12646_v8  ;;  %v16860_v58 = vld [vmem:[#allocation26_spill] sm:$0xff] }
 0x1f8   :  { %v2211_v5 = vpop.f32.mrf.mxu0 }
 0x1f9   :  { %v2444_v17 = vpop.f32.mrf.mxu1  ;;  %v12982_v27 = vadd.f32 %v2442_v7, %v2210_v53  ;;  %v2212_v31 = vadd.f32 %v2211_v5, %v12642_v48 }
 0x1fa   :  { %v2213_v44 = vpop.f32.mrf.mxu0 }
 0x1fb   :  { %16856 = vst [vmem:[#allocation24_spill] sm:$0xff] %v12982_v27  ;;  %v2446_v15 = vpop.f32.mrf.mxu1  ;;  %v12985_v32 = vadd.f32 %v2444_v17, %v2212_v31  ;;  %v2214_v12 = vadd.f32 %v2213_v44, %v12646_v8  ;;  %v11009_v31 = vld [vmem:[#allocation6 + $0xe0] ss:$16 sps:$4 sm:$0xff]   ;;  %v11011_v44 = vld [vmem:[#allocation6 + $0xe4] ss:$16 sps:$4 sm:$0xff]  }
 0x1fc   :  { %v2217_v41 = vpop.f32.mrf.mxu0  ;;  %2988 = vmatmul.mubr.bf16.vlgmr.msra.gmra.mxu0 %v16858_v2  ;;  %6614 = vmatprep.subr.bf16.mxu0 %v11011_v44 }
 0x1fd   :  { %16857 = vst [vmem:[#allocation101_spill] sm:$0xff] %v12985_v32  ;;  %v2450_v28 = vpop.f32.mrf.mxu1  ;;  %3221 = vmatmul.mubr.bf16.vlgmr.msra.gmra.mxu1 %v12583_v30  ;;  %v12990_v3 = vadd.f32 %v2446_v15, %v2214_v12  ;;  %v2218_v22 = vadd.f32 %v2217_v41, %v12642_v48  ;;  %2997 = vmatprep.mubr.bf16.mxu0 %v16860_v58  ;;  %v11014_v15 = vld [vmem:[#allocation6 + $0x2e4] ss:$16 sps:$4 sm:$0xff]   ;;  %v11012_v58 = vld [vmem:[#allocation6 + $0x2e0] ss:$16 sps:$4 sm:$0xff]  }
 0x1fe   :  { %3230 = vmatprep.mubr.bf16.mxu1 %v16798_v39  ;;  %v2219_v7 = vpop.f32.mrf.mxu0  ;;  %6615 = vmatpush1.bf16.msra.mxu0 %v11009_v31 }
 0x1ff   :  { %16859 = vst [vmem:[#allocation25_spill] sm:$0xff] %v12990_v3  ;;  %v2452_v53 = vpop.f32.mrf.mxu1  ;;  %v12995_v5 = vadd.f32 %v2450_v28, %v2218_v22  ;;  %v2220_v17 = vadd.f32 %v2219_v7, %v12646_v8  ;;  %6767 = vmatprep.subr.bf16.mxu1 %v11014_v15 }
 0x200   :  { %v2221_v32 = vpop.f32.mrf.mxu0  ;;  %6768 = vmatpush1.bf16.msra.mxu1 %v11012_v58  ;;  %v11018_v58 = vld [vmem:[#allocation6 + $0x2c0] ss:$16 sps:$4 sm:$0xff]  }
 0x201   :  { %16861 = vst [vmem:[#allocation26_spill] sm:$0xff] %v12995_v5  ;;  %v2454_v2 = vpop.f32.mrf.mxu1  ;;  %v12998_v27 = vadd.f32 %v2452_v53, %v2220_v17  ;;  %v2222_v30 = vadd.f32 %v2221_v32, %v12642_v48  ;;  %v16863_v5 = vld [vmem:[#allocation27_spill] sm:$0xff]  ;;  %v16865_v17 = vld [vmem:[#allocation28_spill] sm:$0xff] }
 0x202   :  { %v2223_v12 = vpop.f32.mrf.mxu0 }
 0x203   :  { %v2456_v41 = vpop.f32.mrf.mxu1  ;;  %v13001_v3 = vadd.f32 %v2454_v2, %v2222_v30  ;;  %v2224_v28 = vadd.f32 %v2223_v12, %v12646_v8 }
 0x204   :  { %v2227_v22 = vpop.f32.mrf.mxu0  ;;  %2998 = vmatmul.mubr.bf16.gmra.mxu0 %v16863_v5 }
 0x205   :  { %16862 = vst [vmem:[#allocation102_spill] sm:$0xff] %v13001_v3  ;;  %v2460_v7 = vpop.f32.mrf.mxu1  ;;  %3231 = vmatmul.mubr.bf16.gmra.mxu1 %v12591_v55  ;;  %v13006_v53 = vadd.f32 %v2456_v41, %v2224_v28  ;;  %v2228_v32 = vadd.f32 %v2227_v22, %v12642_v48  ;;  %3007 = vmatprep.mubr.bf16.mxu0 %v16865_v17  ;;  %v11017_v41 = vld [vmem:[#allocation6 + $0xc4] ss:$16 sps:$4 sm:$0xff]  }
 0x206   :  { %3240 = vmatprep.mubr.bf16.mxu1 %v16798_v39  ;;  %v2229_v31 = vpop.f32.mrf.mxu0  ;;  %6616 = vmatprep.subr.bf16.mxu0 %v11017_v41 }
 0x207   :  { %16864 = vst [vmem:[#allocation27_spill] sm:$0xff] %v13006_v53  ;;  %v2462_v44 = vpop.f32.mrf.mxu1  ;;  %v13011_v2 = vadd.f32 %v2460_v7, %v2228_v32  ;;  %v2230_v30 = vadd.f32 %v2229_v31, %v12646_v8  ;;  %v11015_v53 = vld [vmem:[#allocation6 + $0xc0] ss:$16 sps:$4 sm:$0xff]   ;;  %v11020_v7 = vld [vmem:[#allocation6 + $0x2c4] ss:$16 sps:$4 sm:$0xff]  }
 0x208   :  { %v2231_v15 = vpop.f32.mrf.mxu0  ;;  %v16869_v31 = vld [vmem:[#allocation29_spill] sm:$0xff]  ;;  %6617 = vmatpush1.bf16.msra.mxu0 %v11015_v53  ;;  %6769 = vmatprep.subr.bf16.mxu1 %v11020_v7 }
 0x209   :  { %16866 = vst [vmem:[#allocation28_spill] sm:$0xff] %v13011_v2  ;;  %v2464_v12 = vpop.f32.mrf.mxu1  ;;  %v13014_v5 = vadd.f32 %v2462_v44, %v2230_v30  ;;  %v2232_v55 = vadd.f32 %v2231_v15, %v12642_v48  ;;  %v16871_v15 = vld [vmem:[#allocation30_spill] sm:$0xff]  ;;  %6770 = vmatpush1.bf16.msra.mxu1 %v11018_v58  ;;  %v11023_v53 = vld [vmem:[#allocation6 + $0xa4] ss:$16 sps:$4 sm:$0xff]  }
 0x20a   :  { %v2233_v28 = vpop.f32.mrf.mxu0  ;;  %6618 = vmatprep.subr.bf16.mxu0 %v11023_v53 }
 0x20b   :  { %16867 = vst [vmem:[#allocation103_spill] sm:$0xff] %v13014_v5  ;;  %v2466_v22 = vpop.f32.mrf.mxu1  ;;  %v13017_v17 = vadd.f32 %v2464_v12, %v2232_v55  ;;  %v2234_v3 = vadd.f32 %v2233_v28, %v12646_v8  ;;  %v11021_v5 = vld [vmem:[#allocation6 + $0xa0] ss:$16 sps:$4 sm:$0xff]  }
 0x20c   :  { %v2237_v32 = vpop.f32.mrf.mxu0  ;;  %3008 = vmatmul.mubr.bf16.gmra.mxu0 %v16869_v31 }
 0x20d   :  { %16868 = vst [vmem:[#allocation104_spill] sm:$0xff] %v13017_v17  ;;  %v2470_v2 = vpop.f32.mrf.mxu1  ;;  %3241 = vmatmul.mubr.bf16.gmra.mxu1 %v12601_v33  ;;  %v13022_v44 = vadd.f32 %v2466_v22, %v2234_v3  ;;  %v2238_v30 = vadd.f32 %v2237_v32, %v12642_v48  ;;  %3017 = vmatprep.mubr.bf16.mxu0 %v16871_v15 }
 0x20e   :  { %3250 = vmatprep.mubr.bf16.mxu1 %v16798_v39  ;;  %v2239_v12 = vpop.f32.mrf.mxu0  ;;  %6619 = vmatpush1.bf16.msra.mxu0 %v11021_v5 }
 0x20f   :  { %16870 = vst [vmem:[#allocation29_spill] sm:$0xff] %v13022_v44  ;;  %v2472_v55 = vpop.f32.mrf.mxu1  ;;  %v13027_v41 = vadd.f32 %v2470_v2, %v2238_v30  ;;  %v2240_v28 = vadd.f32 %v2239_v12, %v12646_v8  ;;  %v16874_v30 = vld [vmem:[#allocation31_spill] sm:$0xff] }
 0x210   :  { %v2241_v31 = vpop.f32.mrf.mxu0 }
 0x211   :  { %v2474_v17 = vpop.f32.mrf.mxu1  ;;  %v13030_v33 = vadd.f32 %v2472_v55, %v2240_v28  ;;  %v2242_v3 = vadd.f32 %v2241_v31, %v12642_v48  ;;  %v16876_v55 = vld [vmem:[#allocation32_spill] sm:$0xff]  ;;  %v11026_v28 = vld [vmem:[#allocation6 + $0x2a4] ss:$16 sps:$4 sm:$0xff]  }
 0x212   :  { %v2243_v22 = vpop.f32.mrf.mxu0  ;;  %6771 = vmatprep.subr.bf16.mxu1 %v11026_v28  ;;  %v11029_v28 = vld [vmem:[#allocation6 + $0x84] ss:$16 sps:$4 sm:$0xff]  }
 0x213   :  { %16872 = vst [vmem:[#allocation30_spill] sm:$0xff] %v13030_v33  ;;  %v2476_v32 = vpop.f32.mrf.mxu1  ;;  %v13033_v15 = vadd.f32 %v2474_v17, %v2242_v3  ;;  %v2244_v44 = vadd.f32 %v2243_v22, %v12646_v8  ;;  %v11024_v17 = vld [vmem:[#allocation6 + $0x2a0] ss:$16 sps:$4 sm:$0xff]   ;;  %6620 = vmatprep.subr.bf16.mxu0 %v11029_v28 }
 0x214   :  { %v2247_v7 = vpop.f32.mrf.mxu0  ;;  %3018 = vmatmul.mubr.bf16.gmra.mxu0 %v16874_v30  ;;  %6772 = vmatpush1.bf16.msra.mxu1 %v11024_v17  ;;  %v16882_v17 = vld [vmem:[#allocation34_spill] sm:$0xff] }
 0x215   :  { %16873 = vst [vmem:[#allocation105_spill] sm:$0xff] %v13033_v15  ;;  %v2480_v2 = vpop.f32.mrf.mxu1  ;;  %3251 = vmatmul.mubr.bf16.gmra.mxu1 %v12632_v43  ;;  %v13038_v58 = vadd.f32 %v2476_v32, %v2244_v44  ;;  %v2248_v12 = vadd.f32 %v2247_v7, %v12642_v48  ;;  %3027 = vmatprep.mubr.bf16.mxu0 %v16876_v55 }
 0x216   :  { %3260 = vmatprep.mubr.bf16.mxu1 %v16798_v39  ;;  %v2249_v31 = vpop.f32.mrf.mxu0 }
 0x217   :  { %16875 = vst [vmem:[#allocation31_spill] sm:$0xff] %v13038_v58  ;;  %v2482_v3 = vpop.f32.mrf.mxu1  ;;  %v13043_v22 = vadd.f32 %v2480_v2, %v2248_v12  ;;  %v2250_v15 = vadd.f32 %v2249_v31, %v12646_v8  ;;  %v16879_v12 = vld [vmem:[#allocation33_spill] sm:$0xff] }
 0x218   :  { %v2251_v43 = vpop.f32.mrf.mxu0 }
 0x219   :  { %v2484_v44 = vpop.f32.mrf.mxu1  ;;  %v13046_v32 = vadd.f32 %v2482_v3, %v2250_v15  ;;  %v2252_v7 = vadd.f32 %v2251_v43, %v12642_v48  ;;  %v11027_v48 = vld [vmem:[#allocation6 + $0x80] ss:$16 sps:$4 sm:$0xff]  }
 0x21a   :  { %v2253_v30 = vpop.f32.mrf.mxu0  ;;  %v11030_v43 = vld [vmem:[#allocation6 + $0x280] ss:$16 sps:$4 sm:$0xff]   ;;  %6621 = vmatpush1.bf16.msra.mxu0 %v11027_v48  ;;  %v11035_v48 = vld [vmem:[#allocation6 + $0x64] ss:$16 sps:$4 sm:$0xff]  }
 0x21b   :  { %16877 = vst [vmem:[#allocation32_spill] sm:$0xff] %v13046_v32  ;;  %v2486_v55 = vpop.f32.mrf.mxu1  ;;  %v13049_v58 = vadd.f32 %v2484_v44, %v2252_v7  ;;  %v2254_v33 = vadd.f32 %v2253_v30, %v12646_v8  ;;  %6622 = vmatprep.subr.bf16.mxu0 %v11035_v48  ;;  %v16937_v32 = vld [vmem:[#allocation53_spill] sm:$0xff] }
 0x21c   :  { %v2523_v53 = vpop.f32.mrf.mxu0  ;;  %3028 = vmatmul.mubr.bf16.gmra.mxu0 %v16879_v12  ;;  %v16886_v12 = vld [vmem:[#allocation35_spill] sm:$0xff] }
 0x21d   :  { %16878 = vst [vmem:[#allocation106_spill] sm:$0xff] %v13049_v58  ;;  %v13052_v2 = vpop.f32.mrf.mxu1  ;;  %3261 = vmatmul.mubr.bf16.gmra.mxu1 %v12638_v37  ;;  %v13056_v5 = vadd.f32 %v2486_v55, %v2254_v33  ;;  %v13059_v15 = vadd.f32 %v2523_v53, %v12653_v60  ;;  %3037 = vmatprep.mubr.bf16.mxu0 %v16882_v17  ;;  %v11032_v37 = vld [vmem:[#allocation6 + $0x284] ss:$16 sps:$4 sm:$0xff]  }
 0x21e   :  { %3270 = vmatprep.mubr.bf16.mxu1 %v16798_v39  ;;  %v2525_v31 = vpop.f32.mrf.mxu0  ;;  %6773 = vmatprep.subr.bf16.mxu1 %v11032_v37 }
 0x21f   :  { %16880 = vst [vmem:[#allocation33_spill] sm:$0xff] %v13056_v5  ;;  %16881 = vst [vmem:[#allocation107_spill] sm:$0xff] %v13059_v15  ;;  %v13063_v8 = vpop.f32.mrf.mxu1  ;;  %v13066_v3 = vadd.f32 %v2525_v31, %v12656_v63  ;;  %6774 = vmatpush1.bf16.msra.mxu1 %v11030_v43  ;;  %v11039_v5 = vld [vmem:[#allocation6 + $0x40] ss:$16 sps:$4 sm:$0xff]  }
 0x220   :  { %v2527_v33 = vpop.f32.mrf.mxu0 }
 0x221   :  { %16883 = vst [vmem:[#allocation34_spill] sm:$0xff] %v13066_v3  ;;  %v13068_v44 = vpop.f32.mrf.mxu1  ;;  %v13071_v60 = vadd.f32 %v2527_v33, %v12666_v16  ;;  %v16888_v16 = vld [vmem:[#allocation36_spill] sm:$0xff] }
 0x222   :  { %v2529_v7 = vpop.f32.mrf.mxu0 }
 0x223   :  { %16884 = vst [vmem:[#allocation108_spill] sm:$0xff] %v13071_v60  ;;  %v13073_v30 = vpop.f32.mrf.mxu1  ;;  %v13076_v55 = vadd.f32 %v2529_v7, %v12671_v46  ;;  %v11033_v46 = vld [vmem:[#allocation6 + $0x60] ss:$16 sps:$4 sm:$0xff]   ;;  %v11041_v7 = vld [vmem:[#allocation6 + $0x44] ss:$16 sps:$4 sm:$0xff]  }
 0x224   :  { %v2533_v63 = vpop.f32.mrf.mxu0  ;;  %3038 = vmatmul.mubr.bf16.gmra.mxu0 %v16886_v12 }
 0x225   :  { %16885 = vst [vmem:[#allocation109_spill] sm:$0xff] %v13076_v55  ;;  %v13078_v53 = vpop.f32.mrf.mxu1  ;;  %3271 = vmatmul.mubr.bf16.gmra.mxu1 %v12664_v19  ;;  %v13083_v17 = vadd.f32 %v2533_v63, %v12676_v29  ;;  %3047 = vmatprep.mubr.bf16.mxu0 %v16888_v16  ;;  %v11038_v29 = vld [vmem:[#allocation6 + $0x264] ss:$16 sps:$4 sm:$0xff]   ;;  %v11036_v16 = vld [vmem:[#allocation6 + $0x260] ss:$16 sps:$4 sm:$0xff]  }
 0x226   :  { %3280 = vmatprep.mubr.bf16.mxu1 %v16798_v39  ;;  %v2535_v28 = vpop.f32.mrf.mxu0  ;;  %6623 = vmatpush1.bf16.msra.mxu0 %v11033_v46  ;;  %v16894_v46 = vld [vmem:[#allocation38_spill] sm:$0xff]  ;;  %v16919_v55 = vld [vmem:[#allocation81_spill] sm:$0xff] }
 0x227   :  { %16887 = vst [vmem:[#allocation35_spill] sm:$0xff] %v13083_v17  ;;  %v13087_v31 = vpop.f32.mrf.mxu1  ;;  %v13090_v43 = vadd.f32 %v2535_v28, %v12679_v56  ;;  %6775 = vmatprep.subr.bf16.mxu1 %v11038_v29  ;;  %6624 = vmatprep.subr.bf16.mxu0 %v11041_v7  ;;  %v16892_v28 = vld [vmem:[#allocation37_spill] sm:$0xff] }
 0x228   :  { %v2537_v37 = vpop.f32.mrf.mxu0  ;;  %6776 = vmatpush1.bf16.msra.mxu1 %v11036_v16  ;;  %v11042_v29 = vld [vmem:[#allocation6 + $0x20] ss:$16 sps:$4 sm:$0xff]  }
 0x229   :  { %16889 = vst [vmem:[#allocation36_spill] sm:$0xff] %v13090_v43  ;;  %v13092_v33 = vpop.f32.mrf.mxu1  ;;  %v13095_v19 = vadd.f32 %v2537_v37, %v12689_v50  ;;  %v11044_v37 = vld [vmem:[#allocation6 + $0x24] ss:$16 sps:$4 sm:$0xff]  }
 0x22a   :  { %v2539_v63 = vpop.f32.mrf.mxu0  ;;  %6625 = vmatpush1.bf16.msra.mxu0 %v11039_v5  ;;  %v11045_v5 = vld [vmem:[#allocation6 + $0x240] ss:$16 sps:$4 sm:$0xff]   ;;  %v11083_v43 = vld [vmem:[#allocation6 + $0x144] ss:$16 sps:$4 sm:$0xff]  }
 0x22b   :  { %16890 = vst [vmem:[#allocation110_spill] sm:$0xff] %v13095_v19  ;;  %v13097_v12 = vpop.f32.mrf.mxu1  ;;  %v13100_v17 = vadd.f32 %v2539_v63, %v12694_v4  ;;  %6626 = vmatprep.subr.bf16.mxu0 %v11044_v37  ;;  %v16898_v37 = vld [vmem:[#allocation39_spill] sm:$0xff] }
 0x22c   :  { %v2543_v56 = vpop.f32.mrf.mxu0  ;;  %3048 = vmatmul.mubr.bf16.gmra.mxu0 %v16892_v28 }
 0x22d   :  { %16891 = vst [vmem:[#allocation111_spill] sm:$0xff] %v13100_v17  ;;  %v13102_v48 = vpop.f32.mrf.mxu1  ;;  %3281 = vmatmul.mubr.bf16.gmra.mxu1 %v12687_v9  ;;  %v13107_v50 = vadd.f32 %v2543_v56, %v12704_v36  ;;  %3057 = vmatprep.mubr.bf16.mxu0 %v16894_v46  ;;  %v11050_v56 = vld [vmem:[#allocation6 + $0x4] ss:$16 sps:$4 sm:$0xff]  }
 0x22e   :  { %3290 = vmatprep.mubr.bf16.mxu1 %v16798_v39  ;;  %v2545_v19 = vpop.f32.mrf.mxu0  ;;  %6627 = vmatpush1.bf16.msra.mxu0 %v11042_v29  ;;  %v11047_v17 = vld [vmem:[#allocation6 + $0x244] ss:$16 sps:$4 sm:$0xff]  }
 0x22f   :  { %16893 = vst [vmem:[#allocation37_spill] sm:$0xff] %v13107_v50  ;;  %v13111_v4 = vpop.f32.mrf.mxu1  ;;  %v13114_v7 = vadd.f32 %v2545_v19, %v12711_v59  ;;  %v11048_v50 = vld [vmem:[#allocation6] ss:$16 sps:$4 sm:$0xff]   ;;  %6628 = vmatprep.subr.bf16.mxu0 %v11050_v56  ;;  %v11053_v29 = vld [vmem:[#allocation6 + $0x1e4] ss:$16 sps:$4 sm:$0xff]   ;;  %6777 = vmatprep.subr.bf16.mxu1 %v11047_v17 }
 0x230   :  { %v2547_v63 = vpop.f32.mrf.mxu0  ;;  %v11051_v56 = vld [vmem:[#allocation6 + $0x1e0] ss:$16 sps:$4 sm:$0xff]   ;;  %6778 = vmatpush1.bf16.msra.mxu1 %v11045_v5 }
 0x231   :  { %16895 = vst [vmem:[#allocation38_spill] sm:$0xff] %v13114_v7  ;;  %v13116_v9 = vpop.f32.mrf.mxu1  ;;  %v13119_v36 = vadd.f32 %v2547_v63, %v12719_v52  ;;  %v16900_v63 = vld [vmem:[#allocation40_spill] sm:$0xff] }
 0x232   :  { %v2549_v28 = vpop.f32.mrf.mxu0  ;;  %6629 = vmatpush1.bf16.msra.mxu0 %v11048_v50  ;;  %v11057_v17 = vld [vmem:[#allocation6 + $0x1c0] ss:$16 sps:$4 sm:$0xff]  }
 0x233   :  { %16896 = vst [vmem:[#allocation112_spill] sm:$0xff] %v13119_v36  ;;  %v13121_v46 = vpop.f32.mrf.mxu1  ;;  %v13124_v16 = vadd.f32 %v2549_v28, %v12724_v49  ;;  %6630 = vmatprep.subr.bf16.mxu0 %v11053_v29  ;;  %v16904_v29 = vld [vmem:[#allocation41_spill] sm:$0xff] }
 0x234   :  { %v2553_v59 = vpop.f32.mrf.mxu0  ;;  %3058 = vmatmul.mubr.bf16.gmra.mxu0 %v16898_v37 }
 0x235   :  { %16897 = vst [vmem:[#allocation113_spill] sm:$0xff] %v13124_v16  ;;  %v13126_v19 = vpop.f32.mrf.mxu1  ;;  %3291 = vmatmul.mubr.bf16.gmra.mxu1 %v12709_v26  ;;  %v13131_v52 = vadd.f32 %v2553_v59, %v12729_v14  ;;  %3067 = vmatprep.mubr.bf16.mxu0 %v16900_v63  ;;  %v11056_v14 = vld [vmem:[#allocation6 + $0x224] ss:$16 sps:$4 sm:$0xff]   ;;  %v11054_v63 = vld [vmem:[#allocation6 + $0x220] ss:$16 sps:$4 sm:$0xff]  }
 0x236   :  { %3300 = vmatprep.mubr.bf16.mxu1 %v16798_v39  ;;  %v2555_v49 = vpop.f32.mrf.mxu0  ;;  %6631 = vmatpush2.bf16.msra.mxu0 %v11051_v56  ;;  %v11060_v56 = vld [vmem:[#allocation6 + $0x200] ss:$16 sps:$4 sm:$0xff]  }
 0x237   :  { %16899 = vst [vmem:[#allocation39_spill] sm:$0xff] %v13131_v52  ;;  %v13135_v28 = vpop.f32.mrf.mxu1  ;;  %v13138_v16 = vadd.f32 %v2555_v49, %v12734_v40  ;;  %v11059_v52 = vld [vmem:[#allocation6 + $0x1c4] ss:$16 sps:$4 sm:$0xff]   ;;  %6779 = vmatprep.subr.bf16.mxu1 %v11056_v14  ;;  %v11063_v14 = vld [vmem:[#allocation6 + $0x1a0] ss:$16 sps:$4 sm:$0xff]  }
 0x238   :  { %v2557_v26 = vpop.f32.mrf.mxu0  ;;  %6632 = vmatprep.subr.bf16.mxu0 %v11059_v52  ;;  %6780 = vmatpush1.bf16.msra.mxu1 %v11054_v63 }
 0x239   :  { %16901 = vst [vmem:[#allocation40_spill] sm:$0xff] %v13138_v16  ;;  %v13140_v37 = vpop.f32.mrf.mxu1  ;;  %v13143_v59 = vadd.f32 %v2557_v26, %v12737_v38  ;;  %v11062_v38 = vld [vmem:[#allocation6 + $0x204] ss:$16 sps:$4 sm:$0xff]   ;;  %v16906_v26 = vld [vmem:[#allocation42_spill] sm:$0xff] }
 0x23a   :  { %v2559_v36 = vpop.f32.mrf.mxu0  ;;  %6633 = vmatpush2.bf16.msra.mxu0 %v11057_v17  ;;  %6781 = vmatprep.subr.bf16.mxu1 %v11062_v38  ;;  %v11069_v17 = vld [vmem:[#allocation6 + $0x180] ss:$16 sps:$4 sm:$0xff]  }
 0x23b   :  { %16902 = vst [vmem:[#allocation114_spill] sm:$0xff] %v13143_v59  ;;  %v13145_v7 = vpop.f32.mrf.mxu1  ;;  %v13148_v40 = vadd.f32 %v2559_v36, %v12751_v61  ;;  %v11065_v61 = vld [vmem:[#allocation6 + $0x1a4] ss:$16 sps:$4 sm:$0xff]  }
 0x23c   :  { %v2563_v50 = vpop.f32.mrf.mxu0  ;;  %3068 = vmatmul.mubr.bf16.gmra.mxu0 %v16904_v29  ;;  %6634 = vmatprep.subr.bf16.mxu0 %v11065_v61  ;;  %v16910_v61 = vld [vmem:[#allocation45_spill] sm:$0xff] }
 0x23d   :  { %16903 = vst [vmem:[#allocation115_spill] sm:$0xff] %v13148_v40  ;;  %v13150_v5 = vpop.f32.mrf.mxu1  ;;  %3301 = vmatmul.mubr.bf16.gmra.mxu1 %v12732_v25  ;;  %v13155_v49 = vadd.f32 %v2563_v50, %v12756_v23  ;;  %3077 = vmatprep.mubr.bf16.mxu0 %v16906_v26  ;;  %v11068_v50 = vld [vmem:[#allocation6 + $0x3e4] ss:$16 sps:$4 sm:$0xff]   ;;  %v11066_v26 = vld [vmem:[#allocation6 + $0x3e0] ss:$16 sps:$4 sm:$0xff]  }
 0x23e   :  { %3310 = vmatprep.mubr.bf16.mxu1 %v16798_v39  ;;  %v2565_v36 = vpop.f32.mrf.mxu0  ;;  %6782 = vmatpush1.bf16.msra.mxu1 %v11060_v56 }
 0x23f   :  { %16905 = vst [vmem:[#allocation41_spill] sm:$0xff] %v13155_v49  ;;  %v13159_v52 = vpop.f32.mrf.mxu1  ;;  %v13162_v63 = vadd.f32 %v2565_v36, %v12761_v6  ;;  %v11071_v49 = vld [vmem:[#allocation6 + $0x184] ss:$16 sps:$4 sm:$0xff]   ;;  %6635 = vmatpush2.bf16.msra.mxu0 %v11063_v14  ;;  %6783 = vmatprep.subr.bf16.mxu1 %v11068_v50 }
 0x240   :  { %v2567_v25 = vpop.f32.mrf.mxu0  ;;  %6636 = vmatprep.subr.bf16.mxu0 %v11071_v49  ;;  %v16912_v36 = vld [vmem:[#allocation77_spill] sm:$0xff] }
 0x241   :  { %16907 = vst [vmem:[#allocation42_spill] sm:$0xff] %v13162_v63  ;;  %v13164_v23 = vpop.f32.mrf.mxu1  ;;  %v13167_v29 = vadd.f32 %v2567_v25, %v12764_v11  ;;  %v16911_v11 = vld [vmem:[#allocation76_spill] sm:$0xff]  ;;  %v11074_v14 = vld [vmem:[#allocation6 + $0x3c4] ss:$16 sps:$4 sm:$0xff]  }
 0x242   :  { %v2569_v40 = vpop.f32.mrf.mxu0  ;;  %6784 = vmatpush2.bf16.msra.mxu1 %v11066_v26  ;;  %v11077_v49 = vld [vmem:[#allocation6 + $0x164] ss:$16 sps:$4 sm:$0xff]   ;;  %v16915_v26 = vld [vmem:[#allocation78_spill] sm:$0xff] }
 0x243   :  { %16908 = vst [vmem:[#allocation116_spill] sm:$0xff] %v13167_v29  ;;  %v13169_v59 = vpop.f32.mrf.mxu1  ;;  %v13172_v6 = vadd.f32 %v2569_v40, %v12769_v18  ;;  %v16914_v29 = vld [vmem:[#allocation46_spill] sm:$0xff]  ;;  %6637 = vmatpush2.bf16.msra.mxu0 %v11069_v17  ;;  %6785 = vmatprep.subr.bf16.mxu1 %v11074_v14 }
 0x244   :  { %v2573_v38 = vpop.f32.mrf.mxu0  ;;  %3078 = vmatmul.mubr.bf16.gmra.mxu0 %v16910_v61  ;;  %v11072_v40 = vld [vmem:[#allocation6 + $0x3c0] ss:$16 sps:$4 sm:$0xff]   ;;  %6638 = vmatprep.subr.bf16.mxu0 %v11077_v49 }
 0x245   :  { %16909 = vst [vmem:[#allocation117_spill] sm:$0xff] %v13172_v6  ;;  %v13174_v56 = vpop.f32.mrf.mxu1  ;;  %3311 = vmatmul.mubr.bf16.gmra.mxu1 %v16911_v11  ;;  %v13179_v25 = vadd.f32 %v2573_v38, %v16912_v36  ;;  %3087 = vmatprep.mubr.bf16.mxu0 %v16914_v29  ;;  %v11075_v61 = vld [vmem:[#allocation6 + $0x160] ss:$16 sps:$4 sm:$0xff]   ;;  %v11080_v36 = vld [vmem:[#allocation6 + $0x3a4] ss:$16 sps:$4 sm:$0xff]  }
 0x246   :  { %3320 = vmatprep.mubr.bf16.mxu1 %v16798_v39  ;;  %v2575_v50 = vpop.f32.mrf.mxu0  ;;  %6786 = vmatpush2.bf16.msra.mxu1 %v11072_v40  ;;  %v16917_v29 = vld [vmem:[#allocation80_spill] sm:$0xff]  ;;  %v16922_v40 = vld [vmem:[#allocation79_spill] sm:$0xff] }
 0x247   :  { %16913 = vst [vmem:[#allocation45_spill] sm:$0xff] %v13179_v25  ;;  %v13183_v18 = vpop.f32.mrf.mxu1  ;;  %v13186_v6 = vadd.f32 %v2575_v50, %v16915_v26  ;;  %6639 = vmatpush2.bf16.msra.mxu0 %v11075_v61  ;;  %v11078_v17 = vld [vmem:[#allocation6 + $0x3a0] ss:$16 sps:$4 sm:$0xff]   ;;  %6787 = vmatprep.subr.bf16.mxu1 %v11080_v36  ;;  %v11086_v61 = vld [vmem:[#allocation6 + $0x384] ss:$16 sps:$4 sm:$0xff]  }
 0x248   :  { %v2577_v11 = vpop.f32.mrf.mxu0  ;;  %v11081_v14 = vld [vmem:[#allocation6 + $0x140] ss:$16 sps:$4 sm:$0xff]   ;;  %6640 = vmatprep.subr.bf16.mxu0 %v11083_v43  ;;  %v11089_v36 = vld [vmem:[#allocation6 + $0x124] ss:$16 sps:$4 sm:$0xff]  }
 0x249   :  { %16916 = vst [vmem:[#allocation76_spill] sm:$0xff] %v13186_v6  ;;  %v13188_v63 = vpop.f32.mrf.mxu1  ;;  %v13191_v38 = vadd.f32 %v2577_v11, %v16917_v29  ;;  %v16921_v49 = vld [vmem:[#allocation48_spill] sm:$0xff]  ;;  %v16923_v11 = vld [vmem:[#allocation49_spill] sm:$0xff] }
 0x24a   :  { %v2579_v25 = vpop.f32.mrf.mxu0  ;;  %6788 = vmatpush2.bf16.msra.mxu1 %v11078_v17  ;;  %v11092_v43 = vld [vmem:[#allocation6 + $0x364] ss:$16 sps:$4 sm:$0xff]   ;;  %v16930_v17 = vld [vmem:[#allocation44_spill] sm:$0xff] }
 0x24b   :  { %16918 = vst [vmem:[#allocation77_spill] sm:$0xff] %v13191_v38  ;;  %v13193_v16 = vpop.f32.mrf.mxu1  ;;  %v13196_v50 = vadd.f32 %v2579_v25, %v16919_v55  ;;  %v16925_v38 = vld [vmem:[#allocation50_spill] sm:$0xff]  ;;  %6641 = vmatpush2.bf16.msra.mxu0 %v11081_v14  ;;  %6789 = vmatprep.subr.bf16.mxu1 %v11086_v61 }
 0x24c   :  { %v2583_v26 = vpop.f32.mrf.mxu0  ;;  %3088 = vmatmul.mubr.bf16.gmra.mxu0 %v16921_v49  ;;  %v11084_v25 = vld [vmem:[#allocation6 + $0x380] ss:$16 sps:$4 sm:$0xff]   ;;  %6642 = vmatprep.subr.bf16.mxu0 %v11089_v36 }
 0x24d   :  { %16920 = vst [vmem:[#allocation46_spill] sm:$0xff] %v13196_v50  ;;  %v13198_v6 = vpop.f32.mrf.mxu1  ;;  %3321 = vmatmul.mubr.bf16.gmra.mxu1 %v16922_v40  ;;  %v13203_v29 = vadd.f32 %v2583_v26, %v16923_v11  ;;  %3097 = vmatprep.mubr.bf16.mxu0 %v16925_v38  ;;  %v16926_v50 = vld [vmem:[#allocation83_spill] sm:$0xff]  ;;  %v16934_v36 = vld [vmem:[#allocation82_spill] sm:$0xff] }
 0x24e   :  { %3330 = vmatprep.mubr.bf16.mxu1 %v16798_v39  ;;  %v2585_v60 = vpop.f32.mrf.mxu0  ;;  %v11087_v49 = vld [vmem:[#allocation6 + $0x120] ss:$16 sps:$4 sm:$0xff]   ;;  %6790 = vmatpush2.bf16.msra.mxu1 %v11084_v25 }
 0x24f   :  { %16924 = vst [vmem:[#allocation78_spill] sm:$0xff] %v13203_v29  ;;  %v13207_v55 = vpop.f32.mrf.mxu1  ;;  %v13210_v3 = vadd.f32 %v2585_v60, %v16926_v50  ;;  %v16928_v38 = vld [vmem:[#allocation43_spill] sm:$0xff]  ;;  %6643 = vmatpush2.bf16.msra.mxu0 %v11087_v49  ;;  %6791 = vmatprep.subr.bf16.mxu1 %v11092_v43  ;;  %v16944_v43 = vld [vmem:[#allocation54_spill] sm:$0xff] }
 0x250   :  { %v2587_v26 = vpop.f32.mrf.mxu0  ;;  %v11090_v60 = vld [vmem:[#allocation6 + $0x360] ss:$16 sps:$4 sm:$0xff]   ;;  %v11095_v50 = vld [vmem:[#allocation6 + $0x104] ss:$16 sps:$4 sm:$0xff]  }
 0x251   :  { %16927 = vst [vmem:[#allocation80_spill] sm:$0xff] %v13210_v3  ;;  %v13212_v40 = vpop.f32.mrf.mxu1  ;;  %v13215_v11 = vadd.f32 %v2587_v26, %v16928_v38  ;;  %v16933_v3 = vld [vmem:[#allocation51_spill] sm:$0xff]  ;;  %v16935_v38 = vld [vmem:[#allocation52_spill] sm:$0xff]  ;;  %6644 = vmatprep.subr.bf16.mxu0 %v11095_v50 }
 0x252   :  { %v2589_v29 = vpop.f32.mrf.mxu0  ;;  %v11093_v26 = vld [vmem:[#allocation6 + $0x100] ss:$16 sps:$4 sm:$0xff]   ;;  %v11098_v49 = vld [vmem:[#allocation6 + $0x344] ss:$16 sps:$4 sm:$0xff]   ;;  %6792 = vmatpush2.bf16.msra.mxu1 %v11090_v60 }
 0x253   :  { %16929 = vst [vmem:[#allocation81_spill] sm:$0xff] %v13215_v11  ;;  %v13217_v15 = vpop.f32.mrf.mxu1  ;;  %v13220_v58 = vadd.f32 %v2589_v29, %v16930_v17  ;;  %v16939_v17 = vld [vmem:[#allocation84_spill] sm:$0xff]  ;;  %6645 = vmatpush2.bf16.msra.mxu0 %v11093_v26  ;;  %6793 = vmatprep.subr.bf16.mxu1 %v11098_v49  ;;  %v16947_v26 = vld [vmem:[#allocation55_spill] sm:$0xff] }
 0x254   :  { %v2593_v14 = vpop.f32.mrf.mxu0  ;;  %3098 = vmatmul.mubr.bf16.gmra.mxu0 %v16933_v3  ;;  %v11096_v3 = vld [vmem:[#allocation6 + $0x340] ss:$16 sps:$4 sm:$0xff]  }
 0x255   :  { %16931 = vst [vmem:[#allocation48_spill] sm:$0xff] %v13220_v58  ;;  %v13222_v61 = vpop.f32.mrf.mxu1  ;;  %3331 = vmatmul.mubr.bf16.gmra.mxu1 %v16934_v36  ;;  %v13227_v11 = vadd.f32 %v2593_v14, %v16935_v38  ;;  %3107 = vmatprep.mubr.bf16.mxu0 %v16937_v32  ;;  %v16941_v14 = vld [vmem:[#allocation85_spill] sm:$0xff] }
 0x256   :  { %16932 = vst [vmem:[#allocation79_spill] sm:$0xff] %v13222_v61  ;;  %3340 = vmatprep.mubr.bf16.mxu1 %v16798_v39  ;;  %v2595_v29 = vpop.f32.mrf.mxu0  ;;  %6794 = vmatpush2.bf16.msra.mxu1 %v11096_v3  ;;  %v11104_v3 = vld [vmem:[#allocation6 + $0x304] ss:$16 sps:$4 sm:$0xff]  }
 0x257   :  { %16936 = vst [vmem:[#allocation49_spill] sm:$0xff] %v13227_v11  ;;  %v13231_v25 = vpop.f32.mrf.mxu1  ;;  %v13234_v58 = vadd.f32 %v2595_v29, %v16939_v17  ;;  %v11099_v29 = vld [vmem:[#allocation6 + $0x320] ss:$16 sps:$4 sm:$0xff]  }
 0x258   :  { %16938 = vst [vmem:[#allocation50_spill] sm:$0xff] %v13231_v25  ;;  %v2597_v36 = vpop.f32.mrf.mxu0  ;;  %v11101_v25 = vld [vmem:[#allocation6 + $0x324] ss:$16 sps:$4 sm:$0xff]  }
 0x259   :  { %16940 = vst [vmem:[#allocation83_spill] sm:$0xff] %v13234_v58  ;;  %v13236_v61 = vpop.f32.mrf.mxu1  ;;  %v13239_v32 = vadd.f32 %v2597_v36, %v16941_v14  ;;  %v16948_v58 = vld [vmem:[#allocation47_spill] sm:$0xff]  ;;  %v16950_v36 = vld [vmem:[#allocation57_spill] sm:$0xff]  ;;  %6795 = vmatprep.subr.bf16.mxu1 %v11101_v25 }
 0x25a   :  { %v2599_v38 = vpop.f32.mrf.mxu0  ;;  %6796 = vmatpush2.bf16.msra.mxu1 %v11099_v29  ;;  %v16961_v29 = vld [vmem:[#allocation56_spill] sm:$0xff] }
 0x25b   :  { %16942 = vst [vmem:[#allocation43_spill] sm:$0xff] %v13239_v32  ;;  %v13241_v11 = vpop.f32.mrf.mxu1  ;;  %v13244_v50 = vadd.f32 %v2599_v38, %v16944_v43  ;;  %v16952_v38 = vld [vmem:[#allocation86_spill] sm:$0xff]  ;;  %6797 = vmatprep.subr.bf16.mxu1 %v11104_v3  ;;  %v16964_v3 = vld [vmem:[#allocation61_spill] sm:$0xff] }
 0x25c   :  { %16943 = vst [vmem:[#allocation44_spill] sm:$0xff] %v13241_v11  ;;  %v2603_v17 = vpop.f32.mrf.mxu0  ;;  %3108 = vmatmul.mubr.bf16.gmra.mxu0 %v16947_v26 }
 0x25d   :  { %16945 = vst [vmem:[#allocation51_spill] sm:$0xff] %v13244_v50  ;;  %v13246_v60 = vpop.f32.mrf.mxu1  ;;  %3341 = vmatmul.mubr.bf16.gmra.mxu1 %v16948_v58  ;;  %v13251_v49 = vadd.f32 %v2603_v17, %v12841_v1  ;;  %3117 = vmatprep.mubr.bf16.mxu0 %v16950_v36  ;;  %v11102_v50 = vld [vmem:[#allocation6 + $0x300] ss:$16 sps:$4 sm:$0xff]  }
 0x25e   :  { %16946 = vst [vmem:[#allocation82_spill] sm:$0xff] %v13246_v60  ;;  %3350 = vmatprep.mubr.bf16.mxu1 %v16798_v39  ;;  %v2605_v14 = vpop.f32.mrf.mxu0  ;;  %v16954_v1 = vld [vmem:[#allocation87_spill] sm:$0xff]  ;;  %6798 = vmatpush2.bf16.msra.mxu1 %v11102_v50 }
 0x25f   :  { %16949 = vst [vmem:[#allocation52_spill] sm:$0xff] %v13251_v49  ;;  %v13255_v32 = vpop.f32.mrf.mxu1  ;;  %v13258_v43 = vadd.f32 %v2605_v14, %v16952_v38  ;;  %v16957_v49 = vld [vmem:[#allocation58_spill] sm:$0xff]  ;;  %v16960_v14 = vld [vmem:[#allocation59_spill] sm:$0xff]  ;;  %v16962_v38 = vld [vmem:[#allocation60_spill] sm:$0xff] }
 0x260   :  { %16951 = vst [vmem:[#allocation53_spill] sm:$0xff] %v13255_v32  ;;  %v2607_v26 = vpop.f32.mrf.mxu0 }
 0x261   :  { %16953 = vst [vmem:[#allocation84_spill] sm:$0xff] %v13258_v43  ;;  %v13260_v60 = vpop.f32.mrf.mxu1  ;;  %v13263_v58 = vadd.f32 %v2607_v26, %v16954_v1 }
 0x262   :  { %v2609_v17 = vpop.f32.mrf.mxu0 }
 0x263   :  { %16955 = vst [vmem:[#allocation85_spill] sm:$0xff] %v13263_v58  ;;  %v13265_v36 = vpop.f32.mrf.mxu1  ;;  %v13268_v11 = vadd.f32 %v2609_v17, %v16957_v49  ;;  %v16966_v49 = vld [vmem:[#allocation89_spill] sm:$0xff]  ;;  %v16968_v58 = vld [vmem:[#allocation90_spill] sm:$0xff] }
 0x264   :  { %16956 = vst [vmem:[#allocation54_spill] sm:$0xff] %v13265_v36  ;;  %v2613_v25 = vpop.f32.mrf.mxu0  ;;  %3118 = vmatmul.mubr.bf16.gmra.mxu0 %v16960_v14  ;;  %v16972_v36 = vld [vmem:[#allocation63_spill] sm:$0xff] }
 0x265   :  { %16958 = vst [vmem:[#allocation55_spill] sm:$0xff] %v13268_v11  ;;  %v13270_v32 = vpop.f32.mrf.mxu1  ;;  %3351 = vmatmul.mubr.bf16.gmra.mxu1 %v16961_v29  ;;  %v13275_v43 = vadd.f32 %v2613_v25, %v16962_v38  ;;  %3127 = vmatprep.mubr.bf16.mxu0 %v16964_v3  ;;  %v16970_v25 = vld [vmem:[#allocation62_spill] sm:$0xff] }
 0x266   :  { %16959 = vst [vmem:[#allocation47_spill] sm:$0xff] %v13270_v32  ;;  %3360 = vmatprep.mubr.bf16.mxu1 %v16798_v39  ;;  %v2615_v26 = vpop.f32.mrf.mxu0 }
 0x267   :  { %16963 = vst [vmem:[#allocation57_spill] sm:$0xff] %v13275_v43  ;;  %v13279_v1 = vpop.f32.mrf.mxu1  ;;  %v13282_v17 = vadd.f32 %v2615_v26, %v16966_v49  ;;  %v16975_v49 = vld [vmem:[#allocation65_spill] sm:$0xff] }
 0x268   :  { %16965 = vst [vmem:[#allocation86_spill] sm:$0xff] %v13279_v1  ;;  %v2617_v50 = vpop.f32.mrf.mxu0  ;;  %v16973_v1 = vld [vmem:[#allocation88_spill] sm:$0xff] }
 0x269   :  { %16967 = vst [vmem:[#allocation87_spill] sm:$0xff] %v13282_v17  ;;  %v13284_v11 = vpop.f32.mrf.mxu1  ;;  %v13287_v14 = vadd.f32 %v2617_v50, %v16968_v58  ;;  %v16981_v17 = vld [vmem:[#allocation66_spill] sm:$0xff] }
 0x26a   :  { %v2619_v29 = vpop.f32.mrf.mxu0 }
 0x26b   :  { %16969 = vst [vmem:[#allocation58_spill] sm:$0xff] %v13287_v14  ;;  %v13289_v32 = vpop.f32.mrf.mxu1  ;;  %v13292_v38 = vadd.f32 %v2619_v29, %v16970_v25 }
 0x26c   :  { %v2623_v3 = vpop.f32.mrf.mxu0  ;;  %3128 = vmatmul.mubr.bf16.gmra.mxu0 %v16972_v36 }
 0x26d   :  { %16971 = vst [vmem:[#allocation59_spill] sm:$0xff] %v13292_v38  ;;  %v13294_v43 = vpop.f32.mrf.mxu1  ;;  %3361 = vmatmul.mubr.bf16.gmra.mxu1 %v16973_v1  ;;  %v13299_v26 = vadd.f32 %v2623_v3, %v12883_v10  ;;  %3137 = vmatprep.mubr.bf16.mxu0 %v16975_v49  ;;  %v16979_v10 = vld [vmem:[#allocation91_spill] sm:$0xff] }
 0x26e   :  { %3370 = vmatprep.mubr.bf16.mxu1 %v16798_v39  ;;  %v2625_v58 = vpop.f32.mrf.mxu0 }
 0x26f   :  { %16974 = vst [vmem:[#allocation56_spill] sm:$0xff] %v13299_v26  ;;  %v13303_v50 = vpop.f32.mrf.mxu1  ;;  %v13306_v29 = vadd.f32 %v2625_v58, %v12886_v57  ;;  %v16984_v58 = vld [vmem:[#allocation67_spill] sm:$0xff] }
 0x270   :  { %16976 = vst [vmem:[#allocation60_spill] sm:$0xff] %v13303_v50  ;;  %v2627_v25 = vpop.f32.mrf.mxu0  ;;  %v16982_v50 = vld [vmem:[#allocation64_spill] sm:$0xff] }
 0x271   :  { %16977 = vst [vmem:[#allocation61_spill] sm:$0xff] %v13306_v29  ;;  %v13308_v38 = vpop.f32.mrf.mxu1  ;;  %v13311_v36 = vadd.f32 %v2627_v25, %v12892_v35  ;;  %v16991_v29 = vld [vmem:[#allocation68_spill] sm:$0xff] }
 0x272   :  { %v2629_v1 = vpop.f32.mrf.mxu0 }
 0x273   :  { %16978 = vst [vmem:[#allocation89_spill] sm:$0xff] %v13311_v36  ;;  %v13313_v14 = vpop.f32.mrf.mxu1  ;;  %v13316_v3 = vadd.f32 %v2629_v1, %v16979_v10 }
 0x274   :  { %v2633_v49 = vpop.f32.mrf.mxu0  ;;  %3138 = vmatmul.mubr.bf16.gmra.mxu0 %v16981_v17 }
 0x275   :  { %16980 = vst [vmem:[#allocation90_spill] sm:$0xff] %v13316_v3  ;;  %v13318_v26 = vpop.f32.mrf.mxu1  ;;  %3371 = vmatmul.mubr.bf16.gmra.mxu1 %v16982_v50  ;;  %v13323_v57 = vadd.f32 %v2633_v49, %v12902_v21  ;;  %3147 = vmatprep.mubr.bf16.mxu0 %v16984_v58  ;;  %v16988_v21 = vld [vmem:[#allocation93_spill] sm:$0xff] }
 0x276   :  { %3380 = vmatprep.mubr.bf16.mxu1 %v16798_v39  ;;  %v2635_v35 = vpop.f32.mrf.mxu0 }
 0x277   :  { %16983 = vst [vmem:[#allocation62_spill] sm:$0xff] %v13323_v57  ;;  %v13327_v25 = vpop.f32.mrf.mxu1  ;;  %v13330_v1 = vadd.f32 %v2635_v35, %v12908_v47  ;;  %v16994_v35 = vld [vmem:[#allocation69_spill] sm:$0xff] }
 0x278   :  { %16985 = vst [vmem:[#allocation63_spill] sm:$0xff] %v13327_v25  ;;  %v2637_v10 = vpop.f32.mrf.mxu0  ;;  %v16992_v25 = vld [vmem:[#allocation92_spill] sm:$0xff] }
 0x279   :  { %16986 = vst [vmem:[#allocation88_spill] sm:$0xff] %v13330_v1  ;;  %v13332_v3 = vpop.f32.mrf.mxu1  ;;  %v13335_v17 = vadd.f32 %v2637_v10, %v12913_v24  ;;  %v16997_v1 = vld [vmem:[#allocation96_spill] sm:$0xff] }
 0x27a   :  { %v2639_v50 = vpop.f32.mrf.mxu0 }
 0x27b   :  { %16987 = vst [vmem:[#allocation65_spill] sm:$0xff] %v13335_v17  ;;  %v13337_v36 = vpop.f32.mrf.mxu1  ;;  %v13340_v49 = vadd.f32 %v2639_v50, %v16988_v21  ;;  %v16995_v17 = vld [vmem:[#allocation95_spill] sm:$0xff] }
 0x27c   :  { %v2643_v58 = vpop.f32.mrf.mxu0  ;;  %3148 = vmatmul.mubr.bf16.gmra.mxu0 %v16991_v29 }
 0x27d   :  { %16989 = vst [vmem:[#allocation91_spill] sm:$0xff] %v13340_v49  ;;  %v13342_v57 = vpop.f32.mrf.mxu1  ;;  %3381 = vmatmul.mubr.bf16.gmra.mxu1 %v16992_v25  ;;  %v13347_v47 = vadd.f32 %v2643_v58, %v12924_v54  ;;  %3157 = vmatprep.mubr.bf16.mxu0 %v16994_v35 }
 0x27e   :  { %16990 = vst [vmem:[#allocation66_spill] sm:$0xff] %v13342_v57  ;;  %3390 = vmatprep.mubr.bf16.mxu1 %v16798_v39  ;;  %v2645_v24 = vpop.f32.mrf.mxu0  ;;  %v17001_v57 = vld [vmem:[#allocation94_spill] sm:$0xff] }
 0x27f   :  { %16993 = vst [vmem:[#allocation64_spill] sm:$0xff] %v13347_v47  ;;  %v13351_v10 = vpop.f32.mrf.mxu1  ;;  %v13354_v50 = vadd.f32 %v2645_v24, %v16995_v17  ;;  %v17000_v47 = vld [vmem:[#allocation70_spill] sm:$0xff]  ;;  %v17003_v24 = vld [vmem:[#allocation71_spill] sm:$0xff] }
 0x280   :  { %v2647_v21 = vpop.f32.mrf.mxu0 }
 0x281   :  { %16996 = vst [vmem:[#allocation67_spill] sm:$0xff] %v13354_v50  ;;  %v13356_v49 = vpop.f32.mrf.mxu1  ;;  %v13359_v29 = vadd.f32 %v2647_v21, %v16997_v1 }
 0x282   :  { %v13361_v25 = vpop.f32.mrf.mxu0 }
 0x283   :  { %16998 = vst [vmem:[#allocation93_spill] sm:$0xff] %v13359_v29  ;;  %v13363_v54 = vpop.f32.mrf.mxu1 }
 0x284   :  { %16999 = vst [vmem:[#allocation68_spill] sm:$0xff] %v13363_v54  ;;  %v2653_v58 = vpop.f32.mrf.mxu0  ;;  %3158 = vmatmul.mubr.bf16.gmra.mxu0 %v17000_v47 }
 0x285   :  { %v13365_v35 = vpop.f32.mrf.mxu1  ;;  %3391 = vmatmul.mubr.bf16.gmra.mxu1 %v17001_v57  ;;  %v13370_v17 = vadd.f32 %v2653_v58, %v12943_v0  ;;  %3167 = vmatprep.mubr.bf16.mxu0 %v17003_v24 }
 0x286   :  { %3400 = vmatprep.mubr.bf16.mxu1 %v16798_v39  ;;  %v2655_v1 = vpop.f32.mrf.mxu0 }
 0x287   :  { %17002 = vst [vmem:[#allocation92_spill] sm:$0xff] %v13370_v17  ;;  %v13374_v21 = vpop.f32.mrf.mxu1  ;;  %v13377_v29 = vadd.f32 %v2655_v1, %v12948_v62  ;;  %v17007_v17 = vld [vmem:[#allocation72_spill] sm:$0xff]  ;;  %v17009_v1 = vld [vmem:[#allocation73_spill] sm:$0xff] }
 0x288   :  { %v2657_v50 = vpop.f32.mrf.mxu0 }
 0x289   :  { %17004 = vst [vmem:[#allocation69_spill] sm:$0xff] %v13377_v29  ;;  %v13379_v54 = vpop.f32.mrf.mxu1  ;;  %v13382_v47 = vadd.f32 %v2657_v50, %v12951_v20 }
 0x28a   :  { %v13384_v57 = vpop.f32.mrf.mxu0 }
 0x28b   :  { %17005 = vst [vmem:[#allocation95_spill] sm:$0xff] %v13382_v47  ;;  %v13386_v0 = vpop.f32.mrf.mxu1 }
 0x28c   :  { %17006 = vst [vmem:[#allocation96_spill] sm:$0xff] %v13386_v0  ;;  %v2663_v58 = vpop.f32.mrf.mxu0  ;;  %3168 = vmatmul.mubr.bf16.gmra.mxu0 %v17007_v17 }
 0x28d   :  { %v13388_v24 = vpop.f32.mrf.mxu1  ;;  %3401 = vmatmul.mubr.bf16.gmra.mxu1 %v12946_v42  ;;  %v13393_v62 = vadd.f32 %v2663_v58, %v12961_v34  ;;  %3177 = vmatprep.mubr.bf16.mxu0 %v17009_v1 }
 0x28e   :  { %3410 = vmatprep.mubr.bf16.mxu1 %v16798_v39  ;;  %v2665_v20 = vpop.f32.mrf.mxu0  ;;  %v17017_v39 = vld [vmem:[#allocation74_spill] sm:$0xff] }
 0x28f   :  { %17008 = vst [vmem:[#allocation70_spill] sm:$0xff] %v13393_v62  ;;  %v13397_v50 = vpop.f32.mrf.mxu1  ;;  %v13400_v47 = vadd.f32 %v2665_v20, %v12966_v51  ;;  %v17018_v62 = vld [vmem:[#allocation99_spill] sm:$0xff] }
 0x290   :  { %17010 = vst [vmem:[#allocation94_spill] sm:$0xff] %v13397_v50  ;;  %v2667_v29 = vpop.f32.mrf.mxu0 }
 0x291   :  { %17011 = vst [vmem:[#allocation71_spill] sm:$0xff] %v13400_v47  ;;  %v13402_v0 = vpop.f32.mrf.mxu1  ;;  %v13405_v17 = vadd.f32 %v2667_v29, %v12969_v13 }
 0x292   :  { %17012 = vst [vmem:[#allocation72_spill] sm:$0xff] %v13402_v0  ;;  %v13407_v42 = vpop.f32.mrf.mxu0  ;;  %v17021_v0 = vld [vmem:[#allocation24_spill] sm:$0xff] }
 0x293   :  { %17013 = vst [vmem:[#allocation73_spill] sm:$0xff] %v13405_v17  ;;  %17014 = vst [vmem:[#allocation118_spill] sm:$0xff] %v13407_v42  ;;  %v13409_v34 = vpop.f32.mrf.mxu1 }
 0x294   :  { %17015 = vst [vmem:[#allocation119_spill] sm:$0xff] %v13409_v34  ;;  %v2673_v58 = vpop.f32.mrf.mxu0  ;;  %3178 = vmatmul.mubr.bf16.gmra.mxu0 %v17017_v39  ;;  %v17023_v34 = vld [vmem:[#allocation101_spill] sm:$0xff] }
 0x295   :  { %v13411_v1 = vpop.f32.mrf.mxu1  ;;  %3411 = vmatmul.mubr.bf16.gmra.mxu1 %v17018_v62  ;;  %v13416_v51 = vadd.f32 %v2673_v58, %v12979_v45  ;;  %v17028_v45 = vld [vmem:[#allocation26_spill] sm:$0xff] }
 0x296   :  { %17016 = vst [vmem:[#allocation120_spill] sm:$0xff] %v13411_v1  ;;  %v2675_v20 = vpop.f32.mrf.mxu0 }
 0x297   :  { %17019 = vst [vmem:[#allocation74_spill] sm:$0xff] %v13416_v51  ;;  %v13418_v47 = vpop.f32.mrf.mxu1  ;;  %v13421_v13 = vadd.f32 %v2675_v20, %v17021_v0 }
 0x298   :  { %17020 = vst [vmem:[#allocation99_spill] sm:$0xff] %v13418_v47  ;;  %v2677_v29 = vpop.f32.mrf.mxu0 }
 0x299   :  { %17022 = vst [vmem:[#allocation24_spill] sm:$0xff] %v13421_v13  ;;  %v13423_v17 = vpop.f32.mrf.mxu1  ;;  %v13426_v42 = vadd.f32 %v2677_v29, %v17023_v34  ;;  %v17033_v34 = vld [vmem:[#allocation102_spill] sm:$0xff] }
 0x29a   :  { %v13428_v1 = vpop.f32.mrf.mxu0 }
 0x29b   :  { %17024 = vst [vmem:[#allocation101_spill] sm:$0xff] %v13426_v42  ;;  %17025 = vst [vmem:[#allocation121_spill] sm:$0xff] %v13428_v1  ;;  %v13430_v39 = vpop.f32.mrf.mxu1 }
 0x29c   :  { %17026 = vst [vmem:[#allocation122_spill] sm:$0xff] %v13430_v39  ;;  %v2683_v62 = vpop.f32.mrf.mxu0 }
 0x29d   :  { %v13432_v50 = vpop.f32.mrf.mxu1  ;;  %v13435_v58 = vadd.f32 %v2683_v62, %v17028_v45  ;;  %v17038_v62 = vld [vmem:[#allocation28_spill] sm:$0xff] }
 0x29e   :  { %17027 = vst [vmem:[#allocation123_spill] sm:$0xff] %v13432_v50  ;;  %v2685_v51 = vpop.f32.mrf.mxu0 }
 0x29f   :  { %17029 = vst [vmem:[#allocation26_spill] sm:$0xff] %v13435_v58  ;;  %v13437_v47 = vpop.f32.mrf.mxu1  ;;  %v13440_v0 = vadd.f32 %v2685_v51, %v12998_v27  ;;  %v17041_v27 = vld [vmem:[#allocation75_spill] sm:$0xff] }
 0x2a0   :  { %17030 = vst [vmem:[#allocation124_spill] sm:$0xff] %v13437_v47  ;;  %v2687_v20 = vpop.f32.mrf.mxu0  ;;  %v16592_v51 = vsub.s32 2, %v17041_v27 }
 0x2a1   :  { %17031 = vst [vmem:[#allocation125_spill] sm:$0xff] %v13440_v0  ;;  %v13442_v13 = vpop.f32.mrf.mxu1  ;;  %v13445_v29 = vadd.f32 %v2687_v20, %v17033_v34  ;;  %v16594_v0 = vsub.s32 3, %v17041_v27  ;;  %v17048_v27 = vld [vmem:[#allocation30_spill] sm:$0xff] }
 0x2a2   :  { %17032 = vst [vmem:[#allocation126_spill] sm:$0xff] %v13442_v13  ;;  %v13447_v42 = vpop.f32.mrf.mxu0  ;;  %v17042_v13 = vld [vmem:[#allocation103_spill] sm:$0xff] }
 0x2a3   :  { %17034 = vst [vmem:[#allocation102_spill] sm:$0xff] %v13445_v29  ;;  %17035 = vst [vmem:[#allocation127_spill] sm:$0xff] %v13447_v42  ;;  %v13449_v39 = vpop.f32.mrf.mxu1 }
 0x2a4   :  { %17036 = vst [vmem:[#allocation128_spill] sm:$0xff] %v13449_v39  ;;  %v2693_v50 = vpop.f32.mrf.mxu0  ;;  %v17044_v39 = vld [vmem:[#allocation104_spill] sm:$0xff] }
 0x2a5   :  { %v13451_v1 = vpop.f32.mrf.mxu1  ;;  %v13454_v45 = vadd.f32 %v2693_v50, %v17038_v62  ;;  %v11593_v62 = vld [vmem:[#allocation4] sm:$0xf] }
 0x2a6   :  { %17037 = vst [vmem:[#allocation129_spill] sm:$0xff] %v13451_v1  ;;  %v2695_v58 = vpop.f32.mrf.mxu0 }
 0x2a7   :  { %17039 = vst [vmem:[#allocation28_spill] sm:$0xff] %v13454_v45  ;;  %v13456_v47 = vpop.f32.mrf.mxu1  ;;  %v13461_v20 = vadd.f32 %v2695_v58, %v17042_v13  ;;  %v13474_v45 = vrot.slane %v11593_v62, %v16592_v51 }
 0x2a8   :  { %17040 = vst [vmem:[#allocation130_spill] sm:$0xff] %v13456_v47  ;;  %v2697_v34 = vpop.f32.mrf.mxu0  ;;  %v13478_v47 = vrot.slane %v11593_v62, %v16594_v0  ;;  %v11107_v0 = vld [vmem:[#allocation6 + $0x4e4] ss:$16 sps:$4 sm:$0xff]  }
 0x2a9   :  { %17043 = vst [vmem:[#allocation103_spill] sm:$0xff] %v13461_v20  ;;  %v13463_v29 = vpop.f32.mrf.mxu1  ;;  %v13466_v42 = vadd.f32 %v2697_v34, %v17044_v39  ;;  %6920 = vmatprep.subr.bf16.mxu0 %v11107_v0 }
 0x2aa   :  { %v13468_v1 = vpop.f32.mrf.mxu0  ;;  %v13493_v51 = vadd.f32 %v13063_v8, %v13478_v47  ;;  %v13512_v8 = vadd.f32 %v13087_v31, %v13478_v47  ;;  %v13533_v31 = vadd.f32 %v13111_v4, %v13478_v47  ;;  %v13553_v4 = vadd.f32 %v13135_v28, %v13478_v47 }
 0x2ab   :  { %17045 = vst [vmem:[#allocation104_spill] sm:$0xff] %v13466_v42  ;;  %v13470_v50 = vpop.f32.mrf.mxu1  ;;  %v13489_v42 = vadd.f32 %v13052_v2, %v13474_v45  ;;  %v13508_v2 = vadd.f32 %v13078_v53, %v13474_v45  ;;  %v13526_v53 = vadd.f32 %v13102_v48, %v13474_v45  ;;  %v13545_v48 = vadd.f32 %v13126_v19, %v13474_v45 }
 0x2ac   :  { %v2703_v13 = vpop.f32.mrf.mxu0  ;;  %v13565_v19 = vadd.f32 %v13150_v5, %v13474_v45  ;;  %v13569_v0 = vadd.f32 %v13159_v52, %v13478_v47  ;;  %v13573_v28 = vadd.f32 %v13164_v23, %v13474_v45  ;;  %v13587_v5 = vadd.f32 %v13183_v18, %v13478_v47 }
 0x2ad   :  { %v13480_v58 = vpop.f32.mrf.mxu1  ;;  %v13483_v20 = vadd.f32 %v2703_v13, %v13027_v41  ;;  %v13504_v41 = vadd.f32 %v13073_v30, %v13478_v47  ;;  %v13522_v30 = vadd.f32 %v13097_v12, %v13478_v47  ;;  %17050 = vst [vmem:[#allocation133_spill] sm:$0xff] %v13526_v53  ;;  %v13541_v12 = vadd.f32 %v13121_v46, %v13478_v47 }
 0x2ae   :  { %17046 = vst [vmem:[#allocation131_spill] sm:$0xff] %v13480_v58  ;;  %v2705_v39 = vpop.f32.mrf.mxu0  ;;  %v13500_v58 = vadd.f32 %v13068_v44, %v13474_v45  ;;  %v13518_v44 = vadd.f32 %v13092_v33, %v13474_v45  ;;  %v13537_v33 = vadd.f32 %v13116_v9, %v13474_v45  ;;  %v13557_v9 = vadd.f32 %v13140_v37, %v13474_v45 }
 0x2af   :  { %17047 = vst [vmem:[#allocation132_spill] sm:$0xff] %v13483_v20  ;;  %v13485_v34 = vpop.f32.mrf.mxu1  ;;  %v13496_v62 = vadd.f32 %v2705_v39, %v17048_v27  ;;  %v11110_v39 = vld [vmem:[#allocation6 + $0x6e4] ss:$16 sps:$4 sm:$0xff]   ;;  %v13561_v46 = vadd.f32 %v13145_v7, %v13478_v47  ;;  %v13577_v37 = vadd.f32 %v13169_v59, %v13478_v47  ;;  %v13581_v7 = vadd.f32 %v13174_v56, %v13474_v45 }
 0x2b0   :  { %v2707_v13 = vpop.f32.mrf.mxu0  ;;  %7073 = vmatprep.subr.bf16.mxu1 %v11110_v39  ;;  %v13591_v52 = vadd.f32 %v13188_v63, %v13474_v45  ;;  %v13595_v23 = vadd.f32 %v13193_v16, %v13478_v47  ;;  %v13602_v56 = vadd.f32 %v13198_v6, %v13474_v45  ;;  %v13610_v18 = vadd.f32 %v13212_v40, %v13474_v45  ;;  %v17061_v6 = vld [vmem:[#allocation50_spill] sm:$0xff]  ;;  %v17063_v40 = vld [vmem:[#allocation32_spill] sm:$0xff] }
 0x2b1   :  { %17049 = vst [vmem:[#allocation30_spill] sm:$0xff] %v13496_v62  ;;  %v13514_v27 = vpop.f32.mrf.mxu1  ;;  %v17051_v62 = vld [vmem:[#allocation105_spill] sm:$0xff]  ;;  %v13614_v63 = vadd.f32 %v13217_v15, %v13478_v47  ;;  %v17065_v15 = vld [vmem:[#allocation44_spill] sm:$0xff] }
 0x2b2   :  { %v13529_v20 = vadd.f32 %v2707_v13, %v17051_v62  ;;  %v13547_v53 = vpop.f32.mrf.mxu0  ;;  %17053 = vst [vmem:[#allocation134_spill] sm:$0xff] %v13595_v23  ;;  %17055 = vst [vmem:[#allocation136_spill] sm:$0xff] %v13602_v56 }
 0x2b3   :  { %v13549_v62 = vpop.f32.mrf.mxu1  ;;  %17057 = vst [vmem:[#allocation138_spill] sm:$0xff] %v13610_v18  ;;  %17058 = vst [vmem:[#allocation139_spill] sm:$0xff] %v13614_v63  ;;  %v13635_v63 = vadd.f32 %v17065_v15, %v13478_v47  ;;  %v17072_v15 = vld [vmem:[#allocation47_spill] sm:$0xff] }
 0x2b4   :  { %17052 = vst [vmem:[#allocation105_spill] sm:$0xff] %v13529_v20  ;;  %v2713_v13 = vpop.f32.mrf.mxu0  ;;  %v13606_v20 = vadd.f32 %v13207_v55, %v13478_v47  ;;  %v13628_v55 = vadd.f32 %v13236_v61, %v13474_v45 }
 0x2b5   :  { %v13583_v39 = vpop.f32.mrf.mxu1  ;;  %v13598_v59 = vadd.f32 %v2713_v13, %v13043_v22  ;;  %v17059_v22 = vld [vmem:[#allocation79_spill] sm:$0xff] }
 0x2b6   :  { %17056 = vst [vmem:[#allocation137_spill] sm:$0xff] %v13606_v20  ;;  %v2715_v16 = vpop.f32.mrf.mxu0  ;;  %v13620_v13 = vadd.f32 %v17059_v22, %v13474_v45  ;;  %17062 = vst [vmem:[#allocation50_spill] sm:$0xff] %v13628_v55  ;;  %v17066_v20 = vld [vmem:[#allocation82_spill] sm:$0xff]  ;;  %v17068_v22 = vld [vmem:[#allocation53_spill] sm:$0xff] }
 0x2b7   :  { %17054 = vst [vmem:[#allocation135_spill] sm:$0xff] %v13598_v59  ;;  %v13616_v23 = vpop.f32.mrf.mxu1  ;;  %v13624_v59 = vadd.f32 %v17061_v6, %v13478_v47  ;;  %v13631_v18 = vadd.f32 %v2715_v16, %v17063_v40  ;;  %v13639_v56 = vadd.f32 %v17066_v20, %v13474_v45  ;;  %v13647_v6 = vadd.f32 %v13260_v60, %v13474_v45  ;;  %v17071_v16 = vld [vmem:[#allocation54_spill] sm:$0xff] }
 0x2b8   :  { %17060 = vst [vmem:[#allocation79_spill] sm:$0xff] %v13620_v13  ;;  %v13643_v13 = vadd.f32 %v17068_v22, %v13478_v47  ;;  %v2717_v61 = vpop.f32.mrf.mxu0  ;;  %v13653_v40 = vadd.f32 %v17071_v16, %v13478_v47  ;;  %v17074_v20 = vld [vmem:[#allocation86_spill] sm:$0xff]  ;;  %v13668_v60 = vadd.f32 %v13284_v11, %v13474_v45  ;;  %v13676_v16 = vadd.f32 %v13294_v43, %v13474_v45 }
 0x2b9   :  { %17064 = vst [vmem:[#allocation32_spill] sm:$0xff] %v13631_v18  ;;  %17067 = vst [vmem:[#allocation44_spill] sm:$0xff] %v13639_v56  ;;  %v13649_v55 = vpop.f32.mrf.mxu1  ;;  %v13657_v18 = vadd.f32 %v17072_v15, %v13474_v45  ;;  %v13661_v56 = vadd.f32 %v17074_v20, %v13478_v47  ;;  %v17075_v22 = vld [vmem:[#allocation106_spill] sm:$0xff]  ;;  %v17077_v15 = vld [vmem:[#allocation60_spill] sm:$0xff]  ;;  %v13688_v11 = vadd.f32 %v13308_v38, %v13474_v45 }
 0x2ba   :  { %17069 = vst [vmem:[#allocation82_spill] sm:$0xff] %v13643_v13  ;;  %17070 = vst [vmem:[#allocation53_spill] sm:$0xff] %v13647_v6  ;;  %v13664_v13 = vadd.f32 %v2717_v61, %v17075_v22  ;;  %v13672_v6 = vadd.f32 %v13289_v32, %v13478_v47  ;;  %v13682_v20 = vpop.f32.mrf.mxu0  ;;  %v13692_v32 = vadd.f32 %v13313_v14, %v13478_v47  ;;  %v17081_v22 = vld [vmem:[#allocation63_spill] sm:$0xff] }
 0x2bb   :  { %17073 = vst [vmem:[#allocation54_spill] sm:$0xff] %v13657_v18  ;;  %v13680_v18 = vadd.f32 %v17077_v15, %v13478_v47  ;;  %v13684_v61 = vpop.f32.mrf.mxu1  ;;  %17078 = vst [vmem:[#allocation86_spill] sm:$0xff] %v13688_v11  ;;  %v13696_v43 = vadd.f32 %v13318_v26, %v13474_v45  ;;  %v13700_v15 = vadd.f32 %v17081_v22, %v13478_v47  ;;  %v17084_v11 = vld [vmem:[#allocation66_spill] sm:$0xff] }
 0x2bc   :  { %17076 = vst [vmem:[#allocation47_spill] sm:$0xff] %v13664_v13  ;;  %17079 = vst [vmem:[#allocation106_spill] sm:$0xff] %v13692_v32  ;;  %v13704_v13 = vadd.f32 %v13332_v3, %v13474_v45  ;;  %v13708_v38 = vadd.f32 %v13337_v36, %v13478_v47  ;;  %v13712_v14 = vadd.f32 %v17084_v11, %v13474_v45  ;;  %v17087_v3 = vld [vmem:[#allocation97_spill] sm:$0xff]  ;;  %v17089_v36 = vld [vmem:[#allocation68_spill] sm:$0xff] }
 0x2bd   :  { %17080 = vst [vmem:[#allocation60_spill] sm:$0xff] %v13696_v43  ;;  %v13716_v26 = vadd.f32 %v13351_v10, %v13478_v47  ;;  %v2989_v43 = vpop.f32.mrf.mxu0  ;;  %v3222_v32 = vpop.f32.mrf.mxu1  ;;  %v13720_v22 = vadd.f32 %v13356_v49, %v13474_v45  ;;  %v13733_v10 = vadd.f32 %v13365_v35, %v13474_v45  ;;  %v13741_v49 = vadd.f32 %v13379_v54, %v13474_v45  ;;  %v17099_v54 = vld [vmem:[#allocation94_spill] sm:$0xff] }
 0x2be   :  { %17082 = vst [vmem:[#allocation63_spill] sm:$0xff] %v13704_v13  ;;  %17083 = vst [vmem:[#allocation140_spill] sm:$0xff] %v13708_v38  ;;  %v13724_v13 = vadd.f32 %v13361_v25, %v17087_v3  ;;  %v13728_v38 = vadd.f32 %v17089_v36, %v13478_v47  ;;  %v2990_v11 = vadd.f32 %v2989_v43, %v13489_v42  ;;  %v17094_v25 = vld [vmem:[#allocation98_spill] sm:$0xff]  ;;  %v17096_v42 = vld [vmem:[#allocation96_spill] sm:$0xff] }
 0x2bf   :  { %17085 = vst [vmem:[#allocation66_spill] sm:$0xff] %v13716_v26  ;;  %17086 = vst [vmem:[#allocation141_spill] sm:$0xff] %v13720_v22  ;;  %v13737_v26 = vadd.f32 %v13374_v21, %v13478_v47  ;;  %v13745_v3 = vadd.f32 %v13384_v57, %v17094_v25  ;;  %v2991_v36 = vpop.f32.mrf.mxu0  ;;  %v13749_v43 = vadd.f32 %v17096_v42, %v13478_v47  ;;  %v17101_v57 = vld [vmem:[#allocation72_spill] sm:$0xff]  ;;  %v17106_v42 = vld [vmem:[#allocation119_spill] sm:$0xff] }
 0x2c0   :  { %17088 = vst [vmem:[#allocation97_spill] sm:$0xff] %v13724_v13  ;;  %17090 = vst [vmem:[#allocation68_spill] sm:$0xff] %v13728_v38  ;;  %v3224_v13 = vpop.f32.mrf.mxu1  ;;  %v13753_v35 = vadd.f32 %v13388_v24, %v13474_v45  ;;  %v3223_v21 = vadd.f32 %v3222_v32, %v2990_v11  ;;  %v13762_v25 = vadd.f32 %v17101_v57, %v13474_v45 }
 0x2c1   :  { %17091 = vst [vmem:[#allocation142_spill] sm:$0xff] %v13733_v10  ;;  %17092 = vst [vmem:[#allocation143_spill] sm:$0xff] %v13737_v26  ;;  %v2992_v26 = vadd.f32 %v2991_v36, %v13493_v51  ;;  %v17104_v10 = vld [vmem:[#allocation118_spill] sm:$0xff]  ;;  %v2993_v24 = vpop.f32.mrf.mxu0  ;;  %v17108_v51 = vld [vmem:[#allocation120_spill] sm:$0xff] }
 0x2c2   :  { %17093 = vst [vmem:[#allocation144_spill] sm:$0xff] %v13741_v49  ;;  %17095 = vst [vmem:[#allocation98_spill] sm:$0xff] %v13745_v3  ;;  %v13758_v49 = vadd.f32 %v17099_v54, %v13478_v47  ;;  %v17103_v3 = vld [vmem:[#allocation100_spill] sm:$0xff]  ;;  %v3226_v32 = vpop.f32.mrf.mxu1  ;;  %v13774_v11 = vadd.f32 %v17108_v51, %v13474_v45  ;;  %v17110_v36 = vld [vmem:[#allocation107_spill] sm:$0xff]  ;;  %v2994_v57 = vadd.f32 %v2993_v24, %v13500_v58 }
 0x2c3   :  { %17097 = vst [vmem:[#allocation96_spill] sm:$0xff] %v13749_v43  ;;  %17098 = vst [vmem:[#allocation145_spill] sm:$0xff] %v13753_v35  ;;  %v13766_v38 = vadd.f32 %v17104_v10, %v17103_v3  ;;  %v13770_v43 = vadd.f32 %v17106_v42, %v13478_v47  ;;  %v3421_v54 = vmax.f32 %v17110_v36, %v3223_v21  ;;  %v17114_v3 = vld [vmem:[#allocation25_spill] sm:$0xff]  ;;  %v17117_v51 = vld [vmem:[#allocation122_spill] sm:$0xff]  ;;  %v2995_v21 = vpop.f32.mrf.mxu0 }
 0x2c4   :  { %17100 = vst [vmem:[#allocation94_spill] sm:$0xff] %v13758_v49  ;;  %17102 = vst [vmem:[#allocation72_spill] sm:$0xff] %v13762_v25  ;;  %v3225_v49 = vadd.f32 %v3224_v13, %v2992_v26  ;;  %v17111_v25 = vld [vmem:[#allocation99_spill] sm:$0xff]  ;;  %v13784_v10 = vadd.f32 %v13423_v17, %v13474_v45  ;;  %v17115_v42 = vld [vmem:[#allocation121_spill] sm:$0xff]  ;;  %v3228_v13 = vpop.f32.mrf.mxu1  ;;  %v3227_v36 = vadd.f32 %v3226_v32, %v2994_v57 }
 0x2c5   :  { %17105 = vst [vmem:[#allocation100_spill] sm:$0xff] %v13766_v38  ;;  %17107 = vst [vmem:[#allocation118_spill] sm:$0xff] %v13770_v43  ;;  %v13780_v35 = vadd.f32 %v17111_v25, %v13478_v47  ;;  %v13788_v38 = vadd.f32 %v17115_v42, %v17114_v3  ;;  %v17119_v58 = vld [vmem:[#allocation123_spill] sm:$0xff]  ;;  %v17121_v25 = vld [vmem:[#allocation34_spill] sm:$0xff]  ;;  %v2996_v17 = vadd.f32 %v2995_v21, %v13504_v41  ;;  %v13812_v43 = vmax.f32 %v3421_v54, 0.0 }
 0x2c6   :  { %17109 = vst [vmem:[#allocation119_spill] sm:$0xff] %v13774_v11  ;;  %17113 = vst [vmem:[#allocation107_spill] sm:$0xff] %v13784_v10  ;;  %v13792_v11 = vadd.f32 %v17117_v51, %v13478_v47  ;;  %v13796_v26 = vadd.f32 %v17119_v58, %v13474_v45  ;;  %v3422_v24 = vmax.f32 %v17121_v25, %v3225_v49  ;;  %v17122_v10 = vld [vmem:[#allocation124_spill] sm:$0xff]  ;;  %v17124_v3 = vld [vmem:[#allocation126_spill] sm:$0xff]  ;;  %v2999_v58 = vpop.f32.mrf.mxu0 }
 0x2c7   :  { %17112 = vst [vmem:[#allocation120_spill] sm:$0xff] %v13780_v35  ;;  %17116 = vst [vmem:[#allocation99_spill] sm:$0xff] %v13788_v38  ;;  %v13802_v35 = vadd.f32 %v17122_v10, %v13478_v47  ;;  %v13806_v42 = vadd.f32 %v17124_v3, %v13474_v45  ;;  %v17126_v51 = vld [vmem:[#allocation27_spill] sm:$0xff]  ;;  %v17129_v49 = vld [vmem:[#allocation128_spill] sm:$0xff]  ;;  %v3229_v25 = vadd.f32 %v3228_v13, %v2996_v17 }
 0x2c8   :  { %17118 = vst [vmem:[#allocation25_spill] sm:$0xff] %v13792_v11  ;;  %17120 = vst [vmem:[#allocation121_spill] sm:$0xff] %v13796_v26  ;;  %v17127_v38 = vld [vmem:[#allocation127_spill] sm:$0xff]  ;;  %v3232_v26 = vpop.f32.mrf.mxu1  ;;  %v13816_v32 = vadd.f32 %v17129_v49, %v13478_v47  ;;  %v17131_v41 = vld [vmem:[#allocation129_spill] sm:$0xff]  ;;  %v13831_v54 = vmax.f32 %v3422_v24, 0.0  ;;  %v3001_v49 = vpop.f32.mrf.mxu0 }
 0x2c9   :  { %17123 = vst [vmem:[#allocation122_spill] sm:$0xff] %v13802_v35  ;;  %17125 = vst [vmem:[#allocation123_spill] sm:$0xff] %v13806_v42  ;;  %v13810_v11 = vadd.f32 %v17127_v38, %v17126_v51  ;;  %v13820_v57 = vadd.f32 %v17131_v41, %v13474_v45  ;;  %v17133_v10 = vld [vmem:[#allocation108_spill] sm:$0xff]  ;;  %v17134_v3 = vld [vmem:[#allocation130_spill] sm:$0xff]  ;;  %v13829_v38 = vadd.f32 %v13463_v29, %v13474_v45 }
 0x2ca   :  { %17130 = vst [vmem:[#allocation124_spill] sm:$0xff] %v13816_v32  ;;  %v3423_v21 = vmax.f32 %v17133_v10, %v3227_v36  ;;  %v13825_v42 = vadd.f32 %v17134_v3, %v13478_v47  ;;  %v3000_v51 = vadd.f32 %v2999_v58, %v13508_v2  ;;  %v17137_v32 = vld [vmem:[#allocation29_spill] sm:$0xff]  ;;  %v3002_v10 = vadd.f32 %v3001_v49, %v13512_v8  ;;  %v17141_v29 = vld [vmem:[#allocation131_spill] sm:$0xff] }
 0x2cb   :  { %17128 = vst [vmem:[#allocation34_spill] sm:$0xff] %v13810_v11  ;;  %17132 = vst [vmem:[#allocation126_spill] sm:$0xff] %v13820_v57  ;;  %v3234_v11 = vpop.f32.mrf.mxu1  ;;  %v13836_v41 = vadd.f32 %v13468_v1, %v17137_v32  ;;  %v17139_v13 = vld [vmem:[#allocation109_spill] sm:$0xff]  ;;  %v13842_v3 = vadd.f32 %v13470_v50, %v13478_v47  ;;  %v13846_v24 = vadd.f32 %v17141_v29, %v13474_v45  ;;  %v3662_v2 = vrot.slane %v13812_v43, 1  ;;  %v17148_v57 = vld [vmem:[#allocation110_spill] sm:$0xff] }
 0x2cc   :  { %17135 = vst [vmem:[#allocation27_spill] sm:$0xff] %v13825_v42  ;;  %17136 = vst [vmem:[#allocation127_spill] sm:$0xff] %v13829_v38  ;;  %v3503_v36 = vmax.f32 %v3423_v21, 0.0  ;;  %v3424_v17 = vmax.f32 %v17139_v13, %v3229_v25  ;;  %v3233_v58 = vadd.f32 %v3232_v26, %v3000_v51  ;;  %v3003_v38 = vpop.f32.mrf.mxu0  ;;  %v3235_v21 = vadd.f32 %v3234_v11, %v3002_v10  ;;  %v17145_v13 = vld [vmem:[#allocation35_spill] sm:$0xff]  ;;  %v17146_v11 = vld [vmem:[#allocation36_spill] sm:$0xff] }
 0x2cd   :  { %17138 = vst [vmem:[#allocation128_spill] sm:$0xff] %v13836_v41  ;;  %17140 = vst [vmem:[#allocation129_spill] sm:$0xff] %v13842_v3  ;;  %v3236_v42 = vpop.f32.mrf.mxu1  ;;  %v3004_v25 = vadd.f32 %v3003_v38, %v13518_v44  ;;  %v13852_v8 = vadd.f32 %v13485_v34, %v13478_v47  ;;  %v13856_v50 = vadd.f32 %v13514_v27, %v13474_v45  ;;  %v3665_v49 = vrot.slane %v13831_v54, 1  ;;  %v17147_v38 = vld [vmem:[#allocation31_spill] sm:$0xff]  ;;  %v17149_v35 = vld [vmem:[#allocation133_spill] sm:$0xff] }
 0x2ce   :  { %17142 = vst [vmem:[#allocation108_spill] sm:$0xff] %v13846_v24  ;;  %v3663_v1 = vrot.slane %v3503_v36, 1  ;;  %v3504_v32 = vmax.f32 %v3424_v17, 0.0  ;;  %v3425_v29 = vmax.f32 %v17145_v13, %v3233_v58  ;;  %v3005_v26 = vpop.f32.mrf.mxu0  ;;  %v3426_v10 = vmax.f32 %v17146_v11, %v3235_v21 }
 0x2cf   :  { %17143 = vst [vmem:[#allocation130_spill] sm:$0xff] %v13852_v8  ;;  %17144 = vst [vmem:[#allocation29_spill] sm:$0xff] %v13856_v50  ;;  %v3238_v51 = vpop.f32.mrf.mxu1  ;;  %v3237_v44 = vadd.f32 %v3236_v42, %v3004_v25  ;;  %v13864_v34 = vadd.f32 %v13547_v53, %v17147_v38  ;;  %v3006_v50 = vadd.f32 %v3005_v26, %v13522_v30 }
 0x2d0   :  { %v3664_v41 = vsel %vm518_vm2, %v3662_v2, %v3663_v1  ;;  %v3666_v17 = vrot.slane %v3504_v32, 1  ;;  %v3505_v27 = vmax.f32 %v3425_v29, 0.0  ;;  %v3009_v24 = vpop.f32.mrf.mxu0  ;;  %v3506_v13 = vmax.f32 %v3426_v10, 0.0 }
 0x2d1   :  { %v3870_v8 = vmax.f32 %v13812_v43, %v3664_v41  ;;  %v3242_v3 = vpop.f32.mrf.mxu1  ;;  %v3427_v2 = vmax.f32 %v17148_v57, %v3237_v44  ;;  %v3010_v22 = vadd.f32 %v3009_v24, %v17149_v35  ;;  %v13873_v42 = vadd.f32 %v13549_v62, %v13478_v47 }
 0x2d2   :  { %v3667_v58 = vsel %vm518_vm2, %v3665_v49, %v3666_v17  ;;  %v3668_v21 = vrot.slane %v3505_v27, 1  ;;  %v3239_v43 = vadd.f32 %v3238_v51, %v3006_v50  ;;  %v3011_v41 = vpop.f32.mrf.mxu0  ;;  %v3670_v30 = vrot.slane %v3506_v13, 1 }
 0x2d3   :  { %v3871_v53 = vmax.f32 %v13831_v54, %v3667_v58  ;;  %v3244_v25 = vpop.f32.mrf.mxu1  ;;  %v3507_v29 = vmax.f32 %v3427_v2, 0.0  ;;  %v3243_v26 = vadd.f32 %v3242_v3, %v3010_v22  ;;  %v3012_v49 = vadd.f32 %v3011_v41, %v13533_v31  ;;  %v17150_v54 = vld [vmem:[#allocation111_spill] sm:$0xff]  ;;  %v17151_v3 = vld [vmem:[#allocation37_spill] sm:$0xff] }
 0x2d4   :  { %v13879_v57 = vadd.f32 %v13583_v39, %v13474_v45  ;;  %v13883_v35 = vadd.f32 %v13616_v23, %v13478_v47  ;;  %v3669_v62 = vsel %vm518_vm2, %v3663_v1, %v3668_v21  ;;  %v3428_v24 = vmax.f32 %v17150_v54, %v3239_v43  ;;  %v3013_v50 = vpop.f32.mrf.mxu0 }
 0x2d5   :  { %v3246_v51 = vpop.f32.mrf.mxu1  ;;  %v3872_v11 = vmax.f32 %v3503_v36, %v3669_v62  ;;  %v3671_v10 = vsel %vm518_vm2, %v3666_v17, %v3670_v30  ;;  %v3672_v22 = vrot.slane %v3507_v29, 1  ;;  %v3429_v31 = vmax.f32 %v17151_v3, %v3243_v26  ;;  %v17152_v26 = vld [vmem:[#allocation38_spill] sm:$0xff] }
 0x2d6   :  { %v3873_v44 = vmax.f32 %v3504_v32, %v3671_v10  ;;  %v13889_v38 = vmax.f32 %v3428_v24, 0.0  ;;  %v3245_v39 = vadd.f32 %v3244_v25, %v3012_v49  ;;  %v3014_v58 = vadd.f32 %v3013_v50, %v13537_v33  ;;  %v3015_v23 = vpop.f32.mrf.mxu0  ;;  %v11105_v33 = vld [vmem:[#allocation6 + $0x4e0] ss:$16 sps:$4 sm:$0xff]  }
 0x2d7   :  { %v3248_v2 = vpop.f32.mrf.mxu1  ;;  %v13892_v41 = vpack.c.bf16 %v3872_v11, %v3870_v8  ;;  %v3673_v1 = vsel %vm518_vm2, %v3668_v21, %v3672_v22  ;;  %v3509_v43 = vmax.f32 %v3429_v31, 0.0  ;;  %v3016_v36 = vadd.f32 %v3015_v23, %v13541_v12  ;;  %v11113_v21 = vld [vmem:[#allocation6 + $0x4c4] ss:$16 sps:$4 sm:$0xff]  }
 0x2d8   :  { %v13896_v62 = vpack.c.bf16 %v3873_v44, %v3871_v53  ;;  %v13898_v17 = vmax.f32 %v3505_v27, %v3673_v1  ;;  %v3674_v32 = vrot.slane %v13889_v38, 1  ;;  %v3430_v54 = vmax.f32 %v17152_v26, %v3245_v39  ;;  %v3019_v25 = vpop.f32.mrf.mxu0  ;;  %v17153_v53 = vld [vmem:[#allocation33_spill] sm:$0xff]  ;;  %v17154_v39 = vld [vmem:[#allocation112_spill] sm:$0xff] }
 0x2d9   :  { %v3252_v49 = vpop.f32.mrf.mxu1  ;;  %v3676_v24 = vrot.slane %v3509_v43, 1  ;;  %v3247_v50 = vadd.f32 %v3246_v51, %v3014_v58  ;;  %v3249_v8 = vadd.f32 %v3248_v2, %v3016_v36  ;;  %v3020_v11 = vadd.f32 %v3019_v25, %v13545_v48  ;;  %v17155_v23 = vld [vmem:[#allocation113_spill] sm:$0xff] }
 0x2da   :  { %v13905_v12 = vadd.f32 %v13649_v55, %v13474_v45  ;;  %v13909_v27 = vadd.f32 %v13682_v20, %v17153_v53  ;;  %v3675_v10 = vsel %vm518_vm2, %v3670_v30, %v3674_v32  ;;  %v3510_v3 = vmax.f32 %v3430_v54, 0.0  ;;  %v3021_v31 = vpop.f32.mrf.mxu0  ;;  %6646 = vmatprep.mubr.bf16.mxu0 %v13896_v62  ;;  %v11111_v36 = vld [vmem:[#allocation6 + $0x4c0] ss:$16 sps:$4 sm:$0xff]   ;;  %v11119_v25 = vld [vmem:[#allocation6 + $0x4a4] ss:$16 sps:$4 sm:$0xff]  }
 0x2db   :  { %v3254_v44 = vpop.f32.mrf.mxu1  ;;  %v13913_v51 = vmax.f32 %v3506_v13, %v3675_v10  ;;  %v3677_v48 = vsel %vm518_vm2, %v3672_v22, %v3676_v24  ;;  %v3431_v58 = vmax.f32 %v17154_v39, %v3247_v50  ;;  %v3432_v45 = vmax.f32 %v17155_v23, %v3249_v8  ;;  %6647 = vmatmul.mubr.bf16.vlgmr.msra.gmra.mxu0 %v13892_v41 }
 0x2dc   :  { %v3876_v55 = vmax.f32 %v3507_v29, %v3677_v48  ;;  %v3678_v20 = vrot.slane %v3510_v3, 1  ;;  %v3253_v2 = vadd.f32 %v3252_v49, %v3020_v11  ;;  %v3022_v30 = vadd.f32 %v3021_v31, %v13553_v4  ;;  %v3023_v1 = vpop.f32.mrf.mxu0  ;;  %6921 = vmatpush1.bf16.msra.mxu0 %v11105_v33  ;;  %v17156_v49 = vld [vmem:[#allocation39_spill] sm:$0xff] }
 0x2dd   :  { %v3256_v43 = vpop.f32.mrf.mxu1  ;;  %v13922_v13 = vadd.f32 %v13684_v61, %v13478_v47  ;;  %v3511_v22 = vmax.f32 %v3431_v58, 0.0  ;;  %v13924_v26 = vmax.f32 %v3432_v45, 0.0  ;;  %v3024_v54 = vadd.f32 %v3023_v1, %v13557_v9  ;;  %6922 = vmatprep.subr.bf16.mxu0 %v11113_v21  ;;  %v17157_v21 = vld [vmem:[#allocation40_spill] sm:$0xff]  ;;  %v17158_v58 = vld [vmem:[#allocation114_spill] sm:$0xff] }
 0x2de   :  { %v13928_v29 = vpack.c.bf16 %v3876_v55, %v13898_v17  ;;  %v3679_v4 = vsel %vm518_vm2, %v3674_v32, %v3678_v20  ;;  %v3433_v24 = vmax.f32 %v17156_v49, %v3253_v2  ;;  %v3255_v33 = vadd.f32 %v3254_v44, %v3022_v30  ;;  %v3025_v50 = vpop.f32.mrf.mxu0  ;;  %v11117_v44 = vld [vmem:[#allocation6 + $0x4a0] ss:$16 sps:$4 sm:$0xff]   ;;  %v11125_v55 = vld [vmem:[#allocation6 + $0x484] ss:$16 sps:$4 sm:$0xff]  }
 0x2df   :  { %v3258_v8 = vpop.f32.mrf.mxu1  ;;  %v3877_v47 = vmax.f32 %v13889_v38, %v3679_v4  ;;  %v3257_v61 = vadd.f32 %v3256_v43, %v3024_v54  ;;  %v4001_v11 = vrot.slane %v13896_v62, 1  ;;  %v3998_v53 = vrot.slane %v13892_v41, 1 }
 0x2e0   :  { %v13935_v9 = vmax.f32 %v3433_v24, 0.0  ;;  %v3434_v10 = vmax.f32 %v17157_v21, %v3255_v33  ;;  %v3026_v3 = vadd.f32 %v3025_v50, %v13561_v46  ;;  %v3029_v31 = vpop.f32.mrf.mxu0  ;;  %v16595_v48 = vrot.slane %v13928_v29, 1  ;;  %6923 = vmatpush1.bf16.msra.mxu0 %v11111_v36  ;;  %v17159_v24 = vld [vmem:[#allocation115_spill] sm:$0xff] }
 0x2e1   :  { %v3262_v32 = vpop.f32.mrf.mxu1  ;;  %v13941_v39 = vpack.c.bf16 %v3877_v47, %v13913_v51  ;;  %v3680_v38 = vrot.slane %v3511_v22, 1  ;;  %v3435_v23 = vmax.f32 %v17158_v58, %v3257_v61  ;;  %v3030_v45 = vadd.f32 %v3029_v31, %v13565_v19  ;;  %6924 = vmatprep.subr.bf16.mxu0 %v11119_v25  ;;  %v11123_v61 = vld [vmem:[#allocation6 + $0x480] ss:$16 sps:$4 sm:$0xff]  }
 0x2e2   :  { %v3683_v20 = vrot.slane %v13924_v26, 1  ;;  %v3681_v46 = vrot.slane %v13935_v9, 1  ;;  %v13947_v2 = vmax.f32 %v3434_v10, 0.0  ;;  %v3259_v30 = vadd.f32 %v3258_v8, %v3026_v3  ;;  %v3031_v1 = vpop.f32.mrf.mxu0 }
 0x2e3   :  { %v3264_v43 = vpop.f32.mrf.mxu1  ;;  %v13949_v36 = vmax.f32 %v3435_v23, 0.0  ;;  %v3263_v54 = vadd.f32 %v3262_v32, %v3030_v45  ;;  %v3032_v4 = vadd.f32 %v3031_v1, %v13569_v0  ;;  %v16596_v49 = vrot.slane %v13941_v39, 1  ;;  %v17161_v0 = vld [vmem:[#allocation41_spill] sm:$0xff] }
 0x2e4   :  { %v3682_v19 = vsel %vm518_vm2, %v3680_v38, %v3681_v46  ;;  %v3684_v25 = vrot.slane %v13947_v2, 1  ;;  %v3436_v33 = vmax.f32 %v17159_v24, %v3259_v30  ;;  %v3033_v50 = vpop.f32.mrf.mxu0  ;;  %v13959_v8 = vsel %vm518_vm2, %v3998_v53, %v16595_v48  ;;  %6925 = vmatpush1.bf16.msra.mxu0 %v11117_v44  ;;  %v11108_v32 = vld [vmem:[#allocation6 + $0x6e0] ss:$16 sps:$4 sm:$0xff]   ;;  %v11131_v38 = vld [vmem:[#allocation6 + $0x464] ss:$16 sps:$4 sm:$0xff]  }
 0x2e5   :  { %v3266_v47 = vpop.f32.mrf.mxu1  ;;  %17160 = vst [vmem:[#allocation109_spill] sm:$0xff] %v13959_v8  ;;  %v3686_v21 = vrot.slane %v13949_v36, 1  ;;  %v3437_v10 = vmax.f32 %v17161_v0, %v3263_v54  ;;  %v3265_v3 = vadd.f32 %v3264_v43, %v3032_v4  ;;  %v3034_v31 = vadd.f32 %v3033_v50, %v13573_v28  ;;  %6926 = vmatprep.subr.bf16.mxu0 %v11125_v55  ;;  %v11116_v1 = vld [vmem:[#allocation6 + $0x6c4] ss:$16 sps:$4 sm:$0xff]   ;;  %v17163_v28 = vld [vmem:[#allocation42_spill] sm:$0xff] }
 0x2e6   :  { %v13964_v58 = vmax.f32 %v3436_v33, 0.0  ;;  %v13969_v23 = vsel %vm518_vm2, %v4001_v11, %v16596_v49  ;;  %v3035_v53 = vpop.f32.mrf.mxu0  ;;  %v3685_v45 = vsel %vm518_vm2, %v3683_v20, %v3684_v25  ;;  %v3878_v30 = vmax.f32 %v3511_v22, %v3682_v19 }
 0x2e7   :  { %17162 = vst [vmem:[#allocation131_spill] sm:$0xff] %v13969_v23  ;;  %v3268_v44 = vpop.f32.mrf.mxu1  ;;  %v3687_v43 = vsel %vm518_vm2, %v3681_v46, %v3686_v21  ;;  %v13973_v54 = vmax.f32 %v3437_v10, 0.0  ;;  %v3438_v55 = vmax.f32 %v17163_v28, %v3265_v3  ;;  %v3267_v4 = vadd.f32 %v3266_v47, %v3034_v31  ;;  %6799 = vmatprep.mubr.bf16.mxu1 %v13969_v23  ;;  %v17164_v47 = vld [vmem:[#allocation116_spill] sm:$0xff]  ;;  %v11137_v28 = vld [vmem:[#allocation6 + $0x444] ss:$16 sps:$4 sm:$0xff]  }
 0x2e8   :  { %v3880_v24 = vmax.f32 %v13935_v9, %v3687_v43  ;;  %v3688_v11 = vrot.slane %v13964_v58, 1  ;;  %v3036_v33 = vadd.f32 %v3035_v53, %v13577_v37  ;;  %6800 = vmatmul.mubr.bf16.vlgmr.msra.gmra.mxu1 %v13959_v8  ;;  %v3039_v20 = vpop.f32.mrf.mxu0  ;;  %v3879_v19 = vmax.f32 %v13924_v26, %v3685_v45  ;;  %6927 = vmatpush1.bf16.msra.mxu0 %v11123_v61  ;;  %v11114_v9 = vld [vmem:[#allocation6 + $0x6c0] ss:$16 sps:$4 sm:$0xff]   ;;  %v11122_v45 = vld [vmem:[#allocation6 + $0x6a4] ss:$16 sps:$4 sm:$0xff]  }
 0x2e9   :  { %v3272_v22 = vpop.f32.mrf.mxu1  ;;  %v3690_v46 = vrot.slane %v13973_v54, 1  ;;  %v13983_v50 = vmax.f32 %v3438_v55, 0.0  ;;  %v3439_v0 = vmax.f32 %v17164_v47, %v3267_v4  ;;  %v3040_v10 = vadd.f32 %v3039_v20, %v13581_v7  ;;  %7074 = vmatpush1.bf16.msra.mxu1 %v11108_v32  ;;  %v11129_v3 = vld [vmem:[#allocation6 + $0x460] ss:$16 sps:$4 sm:$0xff]   ;;  %6928 = vmatprep.subr.bf16.mxu0 %v11131_v38  ;;  %v11161_v23 = vld [vmem:[#allocation6 + $0x5c4] ss:$16 sps:$4 sm:$0xff]  }
 0x2ea   :  { %v3689_v37 = vsel %vm518_vm2, %v3684_v25, %v3688_v11  ;;  %v3269_v31 = vadd.f32 %v3268_v44, %v3036_v33  ;;  %v3041_v53 = vpop.f32.mrf.mxu0  ;;  %v13989_v26 = vpack.c.bf16 %v3879_v19, %v13913_v51  ;;  %v13991_v61 = vpack.c.bf16 %v3880_v24, %v3878_v30  ;;  %7075 = vmatprep.subr.bf16.mxu1 %v11116_v1  ;;  %v17166_v25 = vld [vmem:[#allocation117_spill] sm:$0xff]  ;;  %v17181_v8 = vld [vmem:[#allocation48_spill] sm:$0xff] }
 0x2eb   :  { %v3274_v43 = vpop.f32.mrf.mxu1  ;;  %v3691_v55 = vsel %vm518_vm2, %v3686_v21, %v3690_v46  ;;  %v3692_v7 = vrot.slane %v13983_v50, 1  ;;  %v3519_v32 = vmax.f32 %v3439_v0, 0.0  ;;  %v3273_v4 = vadd.f32 %v3272_v22, %v3040_v10  ;;  %v17167_v21 = vld [vmem:[#allocation45_spill] sm:$0xff] }
 0x2ec   :  { %17165 = vst [vmem:[#allocation35_spill] sm:$0xff] %v13989_v26  ;;  %v3882_v38 = vmax.f32 %v13949_v36, %v3691_v55  ;;  %v3440_v44 = vmax.f32 %v17166_v25, %v3269_v31  ;;  %v3042_v33 = vadd.f32 %v3041_v53, %v13587_v5  ;;  %v3881_v51 = vmax.f32 %v13947_v2, %v3689_v37  ;;  %v3043_v24 = vpop.f32.mrf.mxu0  ;;  %v11120_v36 = vld [vmem:[#allocation6 + $0x6a0] ss:$16 sps:$4 sm:$0xff]   ;;  %v11143_v55 = vld [vmem:[#allocation6 + $0x424] ss:$16 sps:$4 sm:$0xff]  }
 0x2ed   :  { %6656 = vmatprep.mubr.bf16.mxu0 %v13989_v26  ;;  %v3276_v1 = vpop.f32.mrf.mxu1  ;;  %v3693_v20 = vsel %vm518_vm2, %v3688_v11, %v3692_v7  ;;  %v3694_v47 = vrot.slane %v3519_v32, 1  ;;  %v3441_v48 = vmax.f32 %v17167_v21, %v3273_v4  ;;  %v14003_v0 = vpack.c.bf16 %v3878_v30, %v13898_v17  ;;  %7076 = vmatpush1.bf16.msra.mxu1 %v11114_v9  ;;  %v11135_v22 = vld [vmem:[#allocation6 + $0x440] ss:$16 sps:$4 sm:$0xff]   ;;  %v11128_v11 = vld [vmem:[#allocation6 + $0x684] ss:$16 sps:$4 sm:$0xff]  }
 0x2ee   :  { %6929 = vmatpush1.bf16.msra.mxu0 %v11129_v3  ;;  %v3883_v5 = vmax.f32 %v13964_v58, %v3693_v20  ;;  %v3520_v10 = vmax.f32 %v3440_v44, 0.0  ;;  %v3275_v2 = vadd.f32 %v3274_v43, %v3042_v33  ;;  %v14006_v37 = vpack.c.bf16 %v3881_v51, %v3879_v19  ;;  %v3045_v31 = vpop.f32.mrf.mxu0  ;;  %7077 = vmatprep.subr.bf16.mxu1 %v11122_v45  ;;  %v17169_v9 = vld [vmem:[#allocation134_spill] sm:$0xff]  ;;  %v17170_v43 = vld [vmem:[#allocation76_spill] sm:$0xff] }
 0x2ef   :  { %17168 = vst [vmem:[#allocation36_spill] sm:$0xff] %v14003_v0  ;;  %v3278_v53 = vpop.f32.mrf.mxu1  ;;  %6930 = vmatprep.subr.bf16.mxu0 %v11137_v28  ;;  %v3695_v32 = vsel %vm518_vm2, %v3690_v46, %v3694_v47  ;;  %v14009_v17 = vmax.f32 %v3441_v48, 0.0  ;;  %6657 = vmatmul.mubr.bf16.gmra.mxu0 %v14003_v0  ;;  %v3044_v30 = vadd.f32 %v3043_v24, %v13591_v52  ;;  %v17171_v33 = vld [vmem:[#allocation136_spill] sm:$0xff] }
 0x2f0   :  { %v3046_v58 = vadd.f32 %v3045_v31, %v17169_v9  ;;  %v3884_v3 = vmax.f32 %v13973_v54, %v3695_v32  ;;  %v3696_v19 = vrot.slane %v3520_v10, 1  ;;  %v3442_v4 = vmax.f32 %v17170_v43, %v3275_v2  ;;  %v3049_v25 = vpop.f32.mrf.mxu0  ;;  %v11126_v20 = vld [vmem:[#allocation6 + $0x680] ss:$16 sps:$4 sm:$0xff]   ;;  %v11134_v31 = vld [vmem:[#allocation6 + $0x664] ss:$16 sps:$4 sm:$0xff]  }
 0x2f1   :  { %v3282_v45 = vpop.f32.mrf.mxu1  ;;  %v3698_v44 = vrot.slane %v14009_v17, 1  ;;  %v3277_v46 = vadd.f32 %v3276_v1, %v3044_v30  ;;  %v3050_v51 = vadd.f32 %v3049_v25, %v17171_v33  ;;  %7078 = vmatpush1.bf16.msra.mxu1 %v11120_v36  ;;  %v11141_v52 = vld [vmem:[#allocation6 + $0x420] ss:$16 sps:$4 sm:$0xff]   ;;  %v4232_v2 = vunpack.c.h.b16 %v13991_v61  ;;  %v11149_v1 = vld [vmem:[#allocation6 + $0x404] ss:$16 sps:$4 sm:$0xff]  }
 0x2f2   :  { %v3279_v48 = vadd.f32 %v3278_v53, %v3046_v58  ;;  %6931 = vmatpush1.bf16.msra.mxu0 %v11135_v22  ;;  %v14019_v24 = vpack.c.bf16 %v3884_v3, %v3882_v38  ;;  %v3697_v54 = vsel %vm518_vm2, %v3692_v7, %v3696_v19  ;;  %v14022_v47 = vmax.f32 %v3442_v4, 0.0  ;;  %v3051_v21 = vpop.f32.mrf.mxu0  ;;  %7079 = vmatprep.subr.bf16.mxu1 %v11128_v11  ;;  %v17172_v36 = vld [vmem:[#allocation77_spill] sm:$0xff]  ;;  %v17173_v22 = vld [vmem:[#allocation46_spill] sm:$0xff] }
 0x2f3   :  { %v3284_v10 = vpop.f32.mrf.mxu1  ;;  %6932 = vmatprep.subr.bf16.mxu0 %v11143_v55  ;;  %v3885_v53 = vmax.f32 %v13983_v50, %v3697_v54  ;;  %v3443_v32 = vmax.f32 %v17172_v36, %v3277_v46  ;;  %v3283_v38 = vadd.f32 %v3282_v45, %v3050_v51  ;;  %v17174_v7 = vld [vmem:[#allocation137_spill] sm:$0xff]  ;;  %v4007_v11 = vrot.slane %v14006_v37, 1  ;;  %v17175_v25 = vld [vmem:[#allocation78_spill] sm:$0xff] }
 0x2f4   :  { %v3444_v30 = vmax.f32 %v17173_v22, %v3279_v48  ;;  %v3701_v9 = vrot.slane %v14022_v47, 1  ;;  %v3052_v58 = vadd.f32 %v3051_v21, %v17174_v7  ;;  %v3053_v3 = vpop.f32.mrf.mxu0  ;;  %v4242_v43 = vunpack.c.l.b16 %v14019_v24  ;;  %v11132_v45 = vld [vmem:[#allocation6 + $0x660] ss:$16 sps:$4 sm:$0xff]  }
 0x2f5   :  { %v3286_v19 = vpop.f32.mrf.mxu1  ;;  %v14032_v4 = vpack.c.bf16 %v3885_v53, %v3883_v5  ;;  %v14034_v55 = vmax.f32 %v3443_v32, 0.0  ;;  %v3445_v46 = vmax.f32 %v17175_v25, %v3283_v38  ;;  %7080 = vmatpush1.bf16.msra.mxu1 %v11126_v20  ;;  %v11147_v48 = vld [vmem:[#allocation6 + $0x400] ss:$16 sps:$4 sm:$0xff]   ;;  %v11140_v53 = vld [vmem:[#allocation6 + $0x644] ss:$16 sps:$4 sm:$0xff]  }
 0x2f6   :  { %v14036_v50 = vmax.f32 %v3444_v30, 0.0  ;;  %6933 = vmatpush1.bf16.msra.mxu0 %v11141_v52  ;;  %v3285_v33 = vadd.f32 %v3284_v10, %v3052_v58  ;;  %v17176_v51 = vld [vmem:[#allocation138_spill] sm:$0xff]  ;;  %v3055_v21 = vpop.f32.mrf.mxu0  ;;  %v14040_v22 = vpack.c.b16 %v4242_v43, %v4232_v2  ;;  %7081 = vmatprep.subr.bf16.mxu1 %v11134_v31  ;;  %v11155_v32 = vld [vmem:[#allocation6 + $0x5e4] ss:$16 sps:$4 sm:$0xff]   ;;  %v17179_v7 = vld [vmem:[#allocation80_spill] sm:$0xff] }
 0x2f7   :  { %v3054_v54 = vadd.f32 %v3053_v3, %v17176_v51  ;;  %v3288_v36 = vpop.f32.mrf.mxu1  ;;  %6934 = vmatprep.subr.bf16.mxu0 %v11149_v1  ;;  %v3699_v30 = vrot.slane %v14034_v55, 1  ;;  %v14045_v38 = vmax.f32 %v3445_v46, 0.0  ;;  %v17178_v52 = vld [vmem:[#allocation139_spill] sm:$0xff]  ;;  %v4243_v43 = vunpack.c.l.b16 %v14032_v4 }
 0x2f8   :  { %17177 = vst [vmem:[#allocation31_spill] sm:$0xff] %v14040_v22  ;;  %v3702_v20 = vrot.slane %v14036_v50, 1  ;;  %v3056_v10 = vadd.f32 %v3055_v21, %v17178_v52  ;;  %v3446_v58 = vmax.f32 %v17179_v7, %v3285_v33  ;;  %v3059_v25 = vpop.f32.mrf.mxu0  ;;  %v11138_v46 = vld [vmem:[#allocation6 + $0x640] ss:$16 sps:$4 sm:$0xff]  }
 0x2f9   :  { %v3287_v3 = vadd.f32 %v3286_v19, %v3054_v54  ;;  %v3292_v2 = vpop.f32.mrf.mxu1  ;;  %v3700_v1 = vsel %vm518_vm2, %v3698_v44, %v3699_v30  ;;  %v3704_v5 = vrot.slane %v14045_v38, 1  ;;  %7082 = vmatpush1.bf16.msra.mxu1 %v11132_v45  ;;  %v11153_v21 = vld [vmem:[#allocation6 + $0x5e0] ss:$16 sps:$4 sm:$0xff]   ;;  %v11146_v44 = vld [vmem:[#allocation6 + $0x624] ss:$16 sps:$4 sm:$0xff]  }
 0x2fa   :  { %v3703_v51 = vsel %vm518_vm2, %v3701_v9, %v3702_v20  ;;  %v3289_v49 = vadd.f32 %v3288_v36, %v3056_v10  ;;  %6935 = vmatpush1.bf16.msra.mxu0 %v11147_v48  ;;  %v3886_v33 = vmax.f32 %v14009_v17, %v3700_v1  ;;  %v3526_v54 = vmax.f32 %v3446_v58, 0.0  ;;  %v17180_v52 = vld [vmem:[#allocation81_spill] sm:$0xff]  ;;  %v3061_v28 = vpop.f32.mrf.mxu0  ;;  %7083 = vmatprep.subr.bf16.mxu1 %v11140_v53  ;;  %v17182_v45 = vld [vmem:[#allocation79_spill] sm:$0xff] }
 0x2fb   :  { %v3887_v19 = vmax.f32 %v14022_v47, %v3703_v51  ;;  %v3447_v7 = vmax.f32 %v17180_v52, %v3287_v3  ;;  %v3294_v31 = vpop.f32.mrf.mxu1  ;;  %6936 = vmatprep.subr.bf16.mxu0 %v11155_v32  ;;  %v3705_v9 = vsel %vm518_vm2, %v3699_v30, %v3704_v5  ;;  %v3060_v10 = vadd.f32 %v3059_v25, %v17182_v45 }
 0x2fc   :  { %v3448_v36 = vmax.f32 %v17181_v8, %v3289_v49  ;;  %v3062_v48 = vadd.f32 %v3061_v28, %v13624_v59  ;;  %v3888_v17 = vmax.f32 %v14034_v55, %v3705_v9  ;;  %v3706_v47 = vrot.slane %v3526_v54, 1  ;;  %v3063_v53 = vpop.f32.mrf.mxu0  ;;  %v11144_v28 = vld [vmem:[#allocation6 + $0x620] ss:$16 sps:$4 sm:$0xff]  }
 0x2fd   :  { %v14062_v58 = vmax.f32 %v3447_v7, 0.0  ;;  %v17183_v3 = vunpack.c.h.b16 %v14006_v37  ;;  %v3296_v32 = vpop.f32.mrf.mxu1  ;;  %v3293_v30 = vadd.f32 %v3292_v2, %v3060_v10  ;;  %v17185_v8 = vrot.slane %v14032_v4, 1  ;;  %7084 = vmatpush1.bf16.msra.mxu1 %v11138_v46  ;;  %v11159_v55 = vld [vmem:[#allocation6 + $0x5c0] ss:$16 sps:$4 sm:$0xff]   ;;  %v11167_v46 = vld [vmem:[#allocation6 + $0x5a4] ss:$16 sps:$4 sm:$0xff]  }
 0x2fe   :  { %v14068_v51 = vmax.f32 %v3448_v36, 0.0  ;;  %v3295_v49 = vadd.f32 %v3294_v31, %v3062_v48  ;;  %6937 = vmatpush2.bf16.msra.mxu0 %v11153_v21  ;;  %v14073_v25 = vpack.c.bf16 %v3888_v17, %v3886_v33  ;;  %v3707_v52 = vsel %vm518_vm2, %v3702_v20, %v3706_v47  ;;  %v3065_v31 = vpop.f32.mrf.mxu0  ;;  %7085 = vmatprep.subr.bf16.mxu1 %v11146_v44  ;;  %v17189_v36 = vld [vmem:[#allocation49_spill] sm:$0xff]  ;;  %v17190_v20 = vld [vmem:[#allocation83_spill] sm:$0xff]  ;;  %v17191_v17 = vld [vmem:[#allocation50_spill] sm:$0xff] }
 0x2ff   :  { %v14066_v1 = vpack.c.b16 %v4243_v43, %v17183_v3  ;;  %v4009_v59 = vsel %vm518_vm2, %v4007_v11, %v17185_v8  ;;  %v3708_v43 = vrot.slane %v14062_v58, 1  ;;  %v17187_v7 = vrot.slane %v13941_v39, 1  ;;  %v3298_v9 = vpop.f32.mrf.mxu1  ;;  %v11152_v11 = vld [vmem:[#allocation6 + $0x604] ss:$16 sps:$4 sm:$0xff]   ;;  %6938 = vmatprep.subr.bf16.mxu0 %v11161_v23 }
 0x300   :  { %17186 = vst [vmem:[#allocation133_spill] sm:$0xff] %v14073_v25  ;;  %v3889_v21 = vmax.f32 %v14036_v50, %v3707_v52  ;;  %v3710_v33 = vrot.slane %v14068_v51, 1  ;;  %v3449_v45 = vmax.f32 %v17189_v36, %v3293_v30  ;;  %v3450_v10 = vmax.f32 %v17190_v20, %v3295_v49 }
 0x301   :  { %17184 = vst [vmem:[#allocation110_spill] sm:$0xff] %v14066_v1  ;;  %6666 = vmatprep.mubr.bf16.mxu0 %v14066_v1  ;;  %v14080_v2 = vcombine.low %v17187_v7, %v4009_v59  ;;  %v3709_v48 = vsel %vm518_vm2, %v3704_v5, %v3708_v43  ;;  %v3064_v3 = vadd.f32 %v3063_v53, %v17191_v17  ;;  %v16599_v44 = vrot.slane %v14019_v24, 1  ;;  %v3069_v7 = vpop.f32.mrf.mxu0  ;;  %v3302_v50 = vpop.f32.mrf.mxu1  ;;  %v17196_v17 = vld [vmem:[#allocation43_spill] sm:$0xff] }
 0x302   :  { %6667 = vmatmul.mubr.bf16.gmra.mxu0 %v14040_v22  ;;  %v4235_v8 = vunpack.c.h.b16 %v4009_v59  ;;  %v14091_v52 = vpack.c.bf16 %v3889_v21, %v3887_v19  ;;  %v14094_v30 = vmax.f32 %v14045_v38, %v3709_v48  ;;  %v3711_v49 = vsel %vm518_vm2, %v3706_v47, %v3710_v33  ;;  %7086 = vmatpush1.bf16.msra.mxu1 %v11144_v28  ;;  %v11150_v38 = vld [vmem:[#allocation6 + $0x600] ss:$16 sps:$4 sm:$0xff]   ;;  %v11173_v22 = vld [vmem:[#allocation6 + $0x584] ss:$16 sps:$4 sm:$0xff]  }
 0x303   :  { %17188 = vst [vmem:[#allocation111_spill] sm:$0xff] %v14080_v2  ;;  %6809 = vmatprep.mubr.bf16.mxu1 %v14080_v2  ;;  %v3529_v36 = vmax.f32 %v3449_v45, 0.0  ;;  %6939 = vmatpush2.bf16.msra.mxu0 %v11159_v55  ;;  %v14097_v23 = vmax.f32 %v3526_v54, %v3711_v49  ;;  %v3530_v5 = vmax.f32 %v3450_v10, 0.0  ;;  %v3297_v20 = vadd.f32 %v3296_v32, %v3064_v3  ;;  %v3071_v19 = vpop.f32.mrf.mxu0  ;;  %v3304_v21 = vpop.f32.mrf.mxu1  ;;  %v11165_v48 = vld [vmem:[#allocation6 + $0x5a0] ss:$16 sps:$4 sm:$0xff]  }
 0x304   :  { %v17192_v53 = vrot.slane %v13991_v61, 1  ;;  %7087 = vmatprep.subr.bf16.mxu1 %v11152_v11  ;;  %6940 = vmatprep.subr.bf16.mxu0 %v11167_v46  ;;  %v17193_v54 = vrot.slane %v13928_v29, 1  ;;  %v17195_v32 = vrot.slane %v14032_v4, 1  ;;  %v3066_v45 = vadd.f32 %v3065_v31, %v13635_v63  ;;  %v17197_v49 = vld [vmem:[#allocation44_spill] sm:$0xff]  ;;  %v11158_v2 = vld [vmem:[#allocation6 + $0x7e4] ss:$16 sps:$4 sm:$0xff]  }
 0x305   :  { %v3712_v47 = vrot.slane %v3529_v36, 1  ;;  %6676 = vmatprep.mubr.bf16.mxu0 %v14091_v52  ;;  %v3714_v10 = vrot.slane %v3530_v5, 1  ;;  %v3451_v3 = vmax.f32 %v17196_v17, %v3297_v20  ;;  %v3070_v11 = vadd.f32 %v3069_v7, %v17197_v49  ;;  %v3073_v36 = vpop.f32.mrf.mxu0  ;;  %v17200_v31 = vld [vmem:[#allocation53_spill] sm:$0xff] }
 0x306   :  { %v14104_v59 = vsel %vm518_vm2, %v17192_v53, %v16599_v44  ;;  %v4245_v55 = vunpack.c.l.b16 %v17195_v32  ;;  %v17198_v53 = vld [vmem:[#allocation82_spill] sm:$0xff]  ;;  %v3306_v44 = vpop.f32.mrf.mxu1  ;;  %v3299_v63 = vadd.f32 %v3298_v9, %v3066_v45  ;;  %v3074_v1 = vadd.f32 %v3073_v36, %v17200_v31  ;;  %7088 = vmatpush1.bf16.msra.mxu1 %v11150_v38  ;;  %v17201_v9 = vld [vmem:[#allocation51_spill] sm:$0xff] }
 0x307   :  { %v14109_v28 = vcombine.low %v17193_v54, %v14104_v59  ;;  %v3072_v46 = vadd.f32 %v3071_v19, %v17198_v53  ;;  %v3713_v54 = vsel %vm518_vm2, %v3708_v43, %v3712_v47  ;;  %v3715_v20 = vsel %vm518_vm2, %v3710_v33, %v3714_v10  ;;  %v3075_v17 = vpop.f32.mrf.mxu0  ;;  %v11156_v53 = vld [vmem:[#allocation6 + $0x7e0] ss:$16 sps:$4 sm:$0xff]   ;;  %6941 = vmatpush2.bf16.msra.mxu0 %v11165_v48  ;;  %v11164_v33 = vld [vmem:[#allocation6 + $0x7c4] ss:$16 sps:$4 sm:$0xff]  }
 0x308   :  { %v14120_v32 = vpack.c.b16 %v4245_v55, %v4235_v8  ;;  %v3892_v5 = vmax.f32 %v14062_v58, %v3713_v54  ;;  %v14125_v7 = vmax.f32 %v3451_v3, 0.0  ;;  %v3303_v19 = vadd.f32 %v3302_v50, %v3070_v11  ;;  %v3308_v49 = vpop.f32.mrf.mxu1  ;;  %v11171_v43 = vld [vmem:[#allocation6 + $0x580] ss:$16 sps:$4 sm:$0xff]   ;;  %v11179_v45 = vld [vmem:[#allocation6 + $0x564] ss:$16 sps:$4 sm:$0xff]   ;;  %7089 = vmatprep.subr.bf16.mxu1 %v11158_v2  ;;  %6942 = vmatprep.subr.bf16.mxu0 %v11173_v22 }
 0x309   :  { %17194 = vst [vmem:[#allocation37_spill] sm:$0xff] %v14109_v28  ;;  %6810 = vmatmul.mubr.bf16.gmra.mxu1 %v14109_v28  ;;  %v3893_v47 = vmax.f32 %v14068_v51, %v3715_v20  ;;  %v3452_v8 = vmax.f32 %v17201_v9, %v3299_v63  ;;  %v3305_v55 = vadd.f32 %v3304_v21, %v3072_v46  ;;  %v4234_v58 = vunpack.c.h.b16 %v14104_v59  ;;  %v17202_v48 = vld [vmem:[#allocation52_spill] sm:$0xff]  ;;  %v3079_v51 = vpop.f32.mrf.mxu0 }
 0x30a   :  { %17199 = vst [vmem:[#allocation38_spill] sm:$0xff] %v14120_v32  ;;  %6819 = vmatprep.mubr.bf16.mxu1 %v14120_v32  ;;  %6677 = vmatmul.mubr.bf16.gmra.mxu0 %v14073_v25  ;;  %v14133_v50 = vpack.c.bf16 %v3892_v5, %v14094_v30  ;;  %v3716_v38 = vrot.slane %v14125_v7, 1  ;;  %v3453_v10 = vmax.f32 %v17202_v48, %v3303_v19  ;;  %v3312_v11 = vpop.f32.mrf.mxu1  ;;  %v17203_v59 = vld [vmem:[#allocation84_spill] sm:$0xff]  ;;  %v17204_v54 = vrot.slane %v14019_v24, 1  ;;  %v17205_v5 = vld [vmem:[#allocation85_spill] sm:$0xff] }
 0x30b   :  { %v3307_v3 = vadd.f32 %v3306_v44, %v3074_v1  ;;  %v14138_v21 = vpack.c.bf16 %v3893_v47, %v14097_v23  ;;  %v14140_v46 = vmax.f32 %v3452_v8, 0.0  ;;  %v3454_v36 = vmax.f32 %v17203_v59, %v3305_v55  ;;  %v17206_v44 = vld [vmem:[#allocation54_spill] sm:$0xff]  ;;  %v3081_v2 = vpop.f32.mrf.mxu0  ;;  %7090 = vmatpush2.bf16.msra.mxu1 %v11156_v53  ;;  %6943 = vmatpush2.bf16.msra.mxu0 %v11171_v43 }
 0x30c   :  { %v4244_v63 = vunpack.c.l.b16 %v17204_v54  ;;  %v14145_v31 = vmax.f32 %v3453_v10, 0.0  ;;  %v3076_v1 = vadd.f32 %v3075_v17, %v13653_v40  ;;  %v3080_v19 = vadd.f32 %v3079_v51, %v17206_v44  ;;  %v3314_v22 = vpop.f32.mrf.mxu1  ;;  %v11162_v47 = vld [vmem:[#allocation6 + $0x7c0] ss:$16 sps:$4 sm:$0xff]   ;;  %7091 = vmatprep.subr.bf16.mxu1 %v11164_v33  ;;  %6944 = vmatprep.subr.bf16.mxu0 %v11179_v45  ;;  %v11185_v40 = vld [vmem:[#allocation6 + $0x544] ss:$16 sps:$4 sm:$0xff]  }
 0x30d   :  { %v3455_v20 = vmax.f32 %v17205_v5, %v3307_v3  ;;  %v11177_v9 = vld [vmem:[#allocation6 + $0x560] ss:$16 sps:$4 sm:$0xff]   ;;  %v14151_v55 = vmax.f32 %v3454_v36, 0.0  ;;  %v3082_v10 = vadd.f32 %v3081_v2, %v13661_v56  ;;  %v11170_v3 = vld [vmem:[#allocation6 + $0x7a4] ss:$16 sps:$4 sm:$0xff]   ;;  %v3083_v43 = vpop.f32.mrf.mxu0  ;;  %v4013_v56 = vrot.slane %v14091_v52, 1 }
 0x30e   :  { %v14153_v48 = vpack.c.b16 %v4244_v63, %v4234_v58  ;;  %v3717_v17 = vrot.slane %v14145_v31, 1  ;;  %v3309_v53 = vadd.f32 %v3308_v49, %v3076_v1  ;;  %v3313_v59 = vadd.f32 %v3312_v11, %v3080_v19  ;;  %v3316_v54 = vpop.f32.mrf.mxu1  ;;  %v17208_v63 = vld [vmem:[#allocation55_spill] sm:$0xff]  ;;  %v17209_v49 = vld [vmem:[#allocation57_spill] sm:$0xff] }
 0x30f   :  { %v14157_v51 = vmax.f32 %v3455_v20, 0.0  ;;  %v3315_v58 = vadd.f32 %v3314_v22, %v3082_v10  ;;  %v3084_v36 = vadd.f32 %v3083_v43, %v13668_v60  ;;  %v3085_v1 = vpop.f32.mrf.mxu0  ;;  %7092 = vmatpush2.bf16.msra.mxu1 %v11162_v47  ;;  %v11168_v19 = vld [vmem:[#allocation6 + $0x7a0] ss:$16 sps:$4 sm:$0xff]   ;;  %6945 = vmatpush2.bf16.msra.mxu0 %v11177_v9  ;;  %v16603_v60 = vrot.slane %v14138_v21, 1 }
 0x310   :  { %17207 = vst [vmem:[#allocation33_spill] sm:$0xff] %v14153_v48  ;;  %v14164_v33 = vsel %vm518_vm2, %v3716_v38, %v3717_v17  ;;  %v3456_v20 = vmax.f32 %v17208_v63, %v3309_v53  ;;  %v3457_v11 = vmax.f32 %v17209_v49, %v3313_v59  ;;  %v3318_v44 = vpop.f32.mrf.mxu1  ;;  %v17210_v2 = vld [vmem:[#allocation87_spill] sm:$0xff]  ;;  %v3086_v43 = vadd.f32 %v3085_v1, %v13672_v6 }
 0x311   :  { %6820 = vmatmul.mubr.bf16.gmra.mxu1 %v14153_v48  ;;  %v3722_v45 = vrot.slane %v14157_v51, 1  ;;  %v3458_v22 = vmax.f32 %v17210_v2, %v3315_v58  ;;  %v3317_v10 = vadd.f32 %v3316_v54, %v3084_v36  ;;  %7093 = vmatprep.subr.bf16.mxu1 %v11170_v3  ;;  %v11176_v38 = vld [vmem:[#allocation6 + $0x784] ss:$16 sps:$4 sm:$0xff]   ;;  %v11183_v8 = vld [vmem:[#allocation6 + $0x540] ss:$16 sps:$4 sm:$0xff]   ;;  %v4010_v47 = vrot.slane %v14073_v25, 1  ;;  %v3089_v9 = vpop.f32.mrf.mxu0 }
 0x312   :  { %6946 = vmatprep.subr.bf16.mxu0 %v11185_v40  ;;  %v14175_v59 = vmax.f32 %v3456_v20, 0.0  ;;  %v14177_v63 = vmax.f32 %v3457_v11, 0.0  ;;  %v3322_v58 = vpop.f32.mrf.mxu1  ;;  %v11191_v54 = vld [vmem:[#allocation6 + $0x524] ss:$16 sps:$4 sm:$0xff]   ;;  %v17211_v3 = vld [vmem:[#allocation58_spill] sm:$0xff]  ;;  %v14188_v40 = vsel %vm518_vm2, %v4013_v56, %v16603_v60  ;;  %v3319_v11 = vadd.f32 %v3318_v44, %v3086_v43 }
 0x313   :  { %v14173_v53 = vsel %vm518_vm2, %v3717_v17, %v3722_v45  ;;  %v14182_v6 = vmax.f32 %v3458_v22, 0.0  ;;  %v3459_v49 = vmax.f32 %v17211_v3, %v3317_v10  ;;  %17212 = vst [vmem:[#allocation112_spill] sm:$0xff] %v14188_v40  ;;  %6829 = vmatprep.mubr.bf16.mxu1 %v14188_v40  ;;  %v3091_v2 = vpop.f32.mrf.mxu0  ;;  %7094 = vmatpush2.bf16.msra.mxu1 %v11168_v19  ;;  %v11174_v22 = vld [vmem:[#allocation6 + $0x780] ss:$16 sps:$4 sm:$0xff]   ;;  %v11182_v60 = vld [vmem:[#allocation6 + $0x764] ss:$16 sps:$4 sm:$0xff]  }
 0x314   :  { %v3724_v17 = vrot.slane %v14175_v59, 1  ;;  %v3726_v20 = vrot.slane %v14177_v63, 1  ;;  %v3324_v36 = vpop.f32.mrf.mxu1  ;;  %v3090_v5 = vadd.f32 %v3089_v9, %v13676_v16  ;;  %v3092_v56 = vadd.f32 %v3091_v2, %v13680_v18  ;;  %7095 = vmatprep.subr.bf16.mxu1 %v11176_v38  ;;  %6947 = vmatpush2.bf16.msra.mxu0 %v11183_v8  ;;  %v17214_v1 = vld [vmem:[#allocation59_spill] sm:$0xff] }
 0x315   :  { %v3728_v10 = vrot.slane %v14182_v6, 1  ;;  %v3539_v3 = vmax.f32 %v3459_v49, 0.0  ;;  %v17213_v48 = vrot.slane %v14151_v55, 1  ;;  %v3460_v40 = vmax.f32 %v17214_v1, %v3319_v11  ;;  %v3093_v49 = vpop.f32.mrf.mxu0  ;;  %v11189_v9 = vld [vmem:[#allocation6 + $0x520] ss:$16 sps:$4 sm:$0xff]   ;;  %6948 = vmatprep.subr.bf16.mxu0 %v11191_v54 }
 0x316   :  { %v3727_v43 = vsel %vm518_vm2, %v3722_v45, %v3726_v20  ;;  %v17215_v19 = vrot.slane %v14133_v50, 1  ;;  %v3326_v16 = vpop.f32.mrf.mxu1  ;;  %v11194_v45 = vld [vmem:[#allocation6 + $0x504] ss:$16 sps:$4 sm:$0xff]   ;;  %v3325_v2 = vadd.f32 %v3324_v36, %v3092_v56 }
 0x317   :  { %v3725_v44 = vsel %vm518_vm2, %v17213_v48, %v3724_v17  ;;  %v3898_v18 = vmax.f32 %v14157_v51, %v3727_v43  ;;  %v3729_v8 = vsel %vm518_vm2, %v3724_v17, %v3728_v10  ;;  %v3730_v38 = vrot.slane %v3539_v3, 1  ;;  %v3095_v54 = vpop.f32.mrf.mxu0  ;;  %7096 = vmatpush2.bf16.msra.mxu1 %v11174_v22  ;;  %v11180_v51 = vld [vmem:[#allocation6 + $0x760] ss:$16 sps:$4 sm:$0xff]  }
 0x318   :  { %v14205_v32 = vsel %vm518_vm2, %v4010_v47, %v17215_v19  ;;  %v3323_v48 = vadd.f32 %v3322_v58, %v3090_v5  ;;  %v3899_v11 = vmax.f32 %v14175_v59, %v3729_v8  ;;  %v3540_v1 = vmax.f32 %v3460_v40, 0.0  ;;  %v3328_v0 = vpop.f32.mrf.mxu1  ;;  %v17219_v3 = vld [vmem:[#allocation56_spill] sm:$0xff]  ;;  %7097 = vmatprep.subr.bf16.mxu1 %v11182_v60  ;;  %v11188_v58 = vld [vmem:[#allocation6 + $0x744] ss:$16 sps:$4 sm:$0xff]   ;;  %6949 = vmatpush2.bf16.msra.mxu0 %v11189_v9 }
 0x319   :  { %17216 = vst [vmem:[#allocation113_spill] sm:$0xff] %v14205_v32  ;;  %6830 = vmatmul.mubr.bf16.gmra.mxu1 %v14205_v32  ;;  %v17217_v47 = vrot.slane %v14151_v55, 1  ;;  %v17218_v19 = vrot.slane %v14140_v46, 1  ;;  %v3731_v17 = vsel %vm518_vm2, %v3726_v20, %v3730_v38  ;;  %v3897_v59 = vmax.f32 %v14151_v55, %v3725_v44  ;;  %v17220_v56 = vld [vmem:[#allocation61_spill] sm:$0xff]  ;;  %v3099_v22 = vpop.f32.mrf.mxu0  ;;  %6950 = vmatprep.subr.bf16.mxu0 %v11194_v45 }
 0x31a   :  { %v3461_v43 = vmax.f32 %v17219_v3, %v3323_v48  ;;  %v3900_v36 = vmax.f32 %v14177_v63, %v3731_v17  ;;  %v3732_v40 = vrot.slane %v3540_v1, 1  ;;  %v3462_v8 = vmax.f32 %v17220_v56, %v3325_v2  ;;  %v11192_v20 = vld [vmem:[#allocation6 + $0x500] ss:$16 sps:$4 sm:$0xff]   ;;  %v11203_v60 = vld [vmem:[#allocation6 + $0x8e4] ss:$16 sps:$4 sm:$0xff]  }
 0x31b   :  { %v3721_v28 = vsel %vm518_vm2, %v17218_v19, %v17217_v47  ;;  %v3894_v47 = vmax.f32 %v14125_v7, %v14164_v33  ;;  %v3332_v19 = vpop.f32.mrf.mxu1  ;;  %v17224_v33 = vmax.f32 %v14145_v31, %v14173_v53  ;;  %v3101_v1 = vpop.f32.mrf.mxu0  ;;  %7098 = vmatpush2.bf16.msra.mxu1 %v11180_v51  ;;  %v11197_v45 = vld [vmem:[#allocation6 + $0x724] ss:$16 sps:$4 sm:$0xff]   ;;  %v17227_v53 = vld [vmem:[#allocation106_spill] sm:$0xff] }
 0x31c   :  { %v3895_v5 = vmax.f32 %v14140_v46, %v3721_v28  ;;  %v14224_v38 = vmax.f32 %v3461_v43, 0.0  ;;  %v17222_v46 = vld [vmem:[#allocation86_spill] sm:$0xff]  ;;  %v14232_v63 = vpack.c.bf16 %v3900_v36, %v3898_v18  ;;  %v3733_v44 = vsel %vm518_vm2, %v3728_v10, %v3732_v40  ;;  %7099 = vmatprep.subr.bf16.mxu1 %v11188_v58  ;;  %v17228_v43 = vld [vmem:[#allocation60_spill] sm:$0xff]  ;;  %6951 = vmatpush2.bf16.msra.mxu0 %v11192_v20 }
 0x31d   :  { %v3094_v55 = vadd.f32 %v3093_v49, %v17222_v46  ;;  %v14235_v7 = vmax.f32 %v3462_v8, 0.0  ;;  %v14240_v9 = vpack.c.bf16 %v17224_v33, %v3894_v47  ;;  %v3334_v2 = vpop.f32.mrf.mxu1  ;;  %v3901_v17 = vmax.f32 %v14182_v6, %v3733_v44  ;;  %7226 = vmatprep.subr.bf16.mxu0 %v11203_v60  ;;  %v11195_v20 = vld [vmem:[#allocation6 + $0x720] ss:$16 sps:$4 sm:$0xff]  }
 0x31e   :  { %v14226_v48 = vpack.c.bf16 %v3897_v59, %v3895_v5  ;;  %v14229_v28 = vpack.c.bf16 %v3895_v5, %v14097_v23  ;;  %17223 = vst [vmem:[#allocation40_spill] sm:$0xff] %v14232_v63  ;;  %v11186_v23 = vld [vmem:[#allocation6 + $0x740] ss:$16 sps:$4 sm:$0xff]   ;;  %v3734_v49 = vrot.slane %v14224_v38, 1  ;;  %v14246_v18 = vpack.c.bf16 %v3894_v47, %v14094_v30  ;;  %v3103_v59 = vpop.f32.mrf.mxu0 }
 0x31f   :  { %17225 = vst [vmem:[#allocation114_spill] sm:$0xff] %v14240_v9  ;;  %v3327_v10 = vadd.f32 %v3326_v16, %v3094_v55  ;;  %v3737_v31 = vrot.slane %v14235_v7, 1  ;;  %v3096_v3 = vadd.f32 %v3095_v54, %v17227_v53  ;;  %v3100_v5 = vadd.f32 %v3099_v22, %v17228_v43  ;;  %v3336_v6 = vpop.f32.mrf.mxu1  ;;  %v17229_v30 = vld [vmem:[#allocation89_spill] sm:$0xff]  ;;  %v17230_v16 = vld [vmem:[#allocation63_spill] sm:$0xff]  ;;  %7100 = vmatpush2.bf16.msra.mxu1 %v11186_v23  ;;  %v17231_v44 = vld [vmem:[#allocation140_spill] sm:$0xff] }
 0x320   :  { %17221 = vst [vmem:[#allocation39_spill] sm:$0xff] %v14229_v28  ;;  %6686 = vmatprep.mubr.bf16.mxu0 %v14229_v28  ;;  %17226 = vst [vmem:[#allocation115_spill] sm:$0xff] %v14246_v18  ;;  %v3102_v51 = vadd.f32 %v3101_v1, %v13700_v15  ;;  %v14252_v36 = vpack.c.bf16 %v3901_v17, %v3899_v11  ;;  %v3104_v58 = vadd.f32 %v3103_v59, %v17230_v16  ;;  %v3105_v22 = vpop.f32.mrf.mxu0  ;;  %v11200_v17 = vld [vmem:[#allocation6 + $0x704] ss:$16 sps:$4 sm:$0xff]   ;;  %v17233_v60 = vld [vmem:[#allocation62_spill] sm:$0xff] }
 0x321   :  { %6687 = vmatmul.mubr.bf16.gmra.mxu0 %v14246_v18  ;;  %v3463_v40 = vmax.f32 %v17229_v30, %v3327_v10  ;;  %v4293_v56 = vunpack.c.h.b16 %v14226_v48  ;;  %v3329_v8 = vadd.f32 %v3328_v0, %v3096_v3  ;;  %v3333_v54 = vadd.f32 %v3332_v19, %v3100_v5  ;;  %v3338_v46 = vpop.f32.mrf.mxu1  ;;  %7101 = vmatprep.subr.bf16.mxu1 %v11197_v45  ;;  %v17232_v10 = vld [vmem:[#allocation90_spill] sm:$0xff]  ;;  %v17234_v19 = vld [vmem:[#allocation88_spill] sm:$0xff] }
 0x322   :  { %v3335_v47 = vadd.f32 %v3334_v2, %v3102_v51  ;;  %v4292_v15 = vunpack.c.h.b16 %v14240_v9  ;;  %v3337_v55 = vadd.f32 %v3336_v6, %v3104_v58  ;;  %v3106_v33 = vadd.f32 %v3105_v22, %v17231_v44  ;;  %v3109_v3 = vpop.f32.mrf.mxu0  ;;  %v17235_v51 = vld [vmem:[#allocation65_spill] sm:$0xff]  ;;  %v17268_v18 = vld [vmem:[#allocation118_spill] sm:$0xff] }
 0x323   :  { %v3543_v11 = vmax.f32 %v3463_v40, 0.0  ;;  %v4303_v1 = vunpack.c.l.b16 %v14252_v36  ;;  %v3464_v53 = vmax.f32 %v17232_v10, %v3329_v8  ;;  %v3465_v0 = vmax.f32 %v17233_v60, %v3333_v54  ;;  %v3342_v43 = vpop.f32.mrf.mxu1  ;;  %7102 = vmatpush2.bf16.msra.mxu1 %v11195_v20  ;;  %v11198_v54 = vld [vmem:[#allocation6 + $0x700] ss:$16 sps:$4 sm:$0xff]  }
 0x324   :  { %v3466_v2 = vmax.f32 %v17234_v19, %v3335_v47  ;;  %v4302_v5 = vunpack.c.l.b16 %v14232_v63  ;;  %v3467_v59 = vmax.f32 %v17235_v51, %v3337_v55  ;;  %v3339_v6 = vadd.f32 %v3338_v46, %v3106_v33  ;;  %v3111_v58 = vpop.f32.mrf.mxu0  ;;  %v17237_v10 = vld [vmem:[#allocation91_spill] sm:$0xff]  ;;  %7103 = vmatprep.subr.bf16.mxu1 %v11200_v17  ;;  %v11206_v46 = vld [vmem:[#allocation6 + $0xec] ss:$16 sps:$4 sm:$0xff]  }
 0x325   :  { %v3735_v23 = vrot.slane %v3543_v11, 1  ;;  %v3110_v30 = vadd.f32 %v3109_v3, %v13712_v14  ;;  %v3544_v40 = vmax.f32 %v3464_v53, 0.0  ;;  %v3545_v16 = vmax.f32 %v3465_v0, 0.0  ;;  %v3344_v22 = vpop.f32.mrf.mxu1  ;;  %v17239_v3 = vld [vmem:[#allocation66_spill] sm:$0xff] }
 0x326   :  { %v3546_v45 = vmax.f32 %v3466_v2, 0.0  ;;  %v14267_v8 = vpack.c.b16 %v4303_v1, %v4293_v56  ;;  %v14270_v44 = vmax.f32 %v3467_v59, 0.0  ;;  %v3468_v60 = vmax.f32 %v17237_v10, %v3339_v6  ;;  %v3113_v56 = vpop.f32.mrf.mxu0 }
 0x327   :  { %v3736_v47 = vsel %vm518_vm2, %v3734_v49, %v3735_v23  ;;  %v3343_v19 = vadd.f32 %v3342_v43, %v3110_v30  ;;  %v3738_v55 = vrot.slane %v3544_v40, 1  ;;  %v3740_v33 = vrot.slane %v3545_v16, 1  ;;  %v3346_v1 = vpop.f32.mrf.mxu1  ;;  %v17238_v49 = vld [vmem:[#allocation64_spill] sm:$0xff]  ;;  %7104 = vmatpush2.bf16.msra.mxu1 %v11198_v54 }
 0x328   :  { %17236 = vst [vmem:[#allocation41_spill] sm:$0xff] %v14267_v8  ;;  %v3902_v14 = vmax.f32 %v14224_v38, %v3736_v47  ;;  %v3742_v53 = vrot.slane %v3546_v45, 1  ;;  %6696 = vmatprep.mubr.bf16.mxu0 %v14267_v8  ;;  %v3744_v20 = vrot.slane %v14270_v44, 1  ;;  %v14276_v0 = vmax.f32 %v3468_v60, 0.0  ;;  %v3115_v6 = vpop.f32.mrf.mxu0  ;;  %7379 = vmatprep.subr.bf16.mxu1 %v11206_v46  ;;  %v17243_v46 = vld [vmem:[#allocation67_spill] sm:$0xff] }
 0x329   :  { %v3469_v2 = vmax.f32 %v17238_v49, %v3343_v19  ;;  %v3112_v51 = vadd.f32 %v3111_v58, %v17239_v3  ;;  %v3739_v17 = vsel %vm518_vm2, %v3737_v31, %v3738_v55  ;;  %v3741_v38 = vsel %vm518_vm2, %v3735_v23, %v3740_v33  ;;  %v3348_v30 = vpop.f32.mrf.mxu1  ;;  %v17244_v3 = vld [vmem:[#allocation141_spill] sm:$0xff] }
 0x32a   :  { %v3743_v43 = vsel %vm518_vm2, %v3738_v55, %v3742_v53  ;;  %v14285_v59 = vpack.c.b16 %v4302_v5, %v4292_v15  ;;  %v3903_v47 = vmax.f32 %v14235_v7, %v3739_v17  ;;  %v3904_v10 = vmax.f32 %v3543_v11, %v3741_v38  ;;  %v3119_v15 = vpop.f32.mrf.mxu0 }
 0x32b   :  { %v3905_v60 = vmax.f32 %v3544_v40, %v3743_v43  ;;  %v3745_v19 = vsel %vm518_vm2, %v3740_v33, %v3744_v20  ;;  %v3746_v31 = vrot.slane %v14276_v0, 1  ;;  %v3549_v49 = vmax.f32 %v3469_v2, 0.0  ;;  %v3352_v5 = vpop.f32.mrf.mxu1 }
 0x32c   :  { %17240 = vst [vmem:[#allocation42_spill] sm:$0xff] %v14285_v59  ;;  %v14289_v58 = vmax.f32 %v3545_v16, %v3745_v19  ;;  %v3345_v23 = vadd.f32 %v3344_v22, %v3112_v51  ;;  %6697 = vmatmul.mubr.bf16.gmra.mxu0 %v14285_v59  ;;  %v14293_v55 = vpack.c.bf16 %v3904_v10, %v3902_v14  ;;  %v4019_v7 = vrot.slane %v14226_v48, 1  ;;  %v3121_v22 = vpop.f32.mrf.mxu0 }
 0x32d   :  { %v14295_v54 = vpack.c.bf16 %v3905_v60, %v3903_v47  ;;  %v4020_v11 = vrot.slane %v14252_v36, 1  ;;  %v3747_v40 = vsel %vm518_vm2, %v3742_v53, %v3746_v31  ;;  %v3748_v16 = vrot.slane %v3549_v49, 1  ;;  %v3354_v51 = vpop.f32.mrf.mxu1 }
 0x32e   :  { %17241 = vst [vmem:[#allocation116_spill] sm:$0xff] %v14293_v55  ;;  %v3470_v33 = vmax.f32 %v17243_v46, %v3345_v23  ;;  %v3114_v2 = vadd.f32 %v3113_v56, %v17244_v3  ;;  %v14302_v17 = vmax.f32 %v3546_v45, %v3747_v40  ;;  %v4016_v38 = vrot.slane %v14240_v9, 1  ;;  %v3123_v19 = vpop.f32.mrf.mxu0  ;;  %v17247_v3 = vld [vmem:[#allocation93_spill] sm:$0xff] }
 0x32f   :  { %17242 = vst [vmem:[#allocation117_spill] sm:$0xff] %v14295_v54  ;;  %v4021_v14 = vsel %vm518_vm2, %v4019_v7, %v4020_v11  ;;  %v4017_v43 = vrot.slane %v14232_v63, 1  ;;  %6706 = vmatprep.mubr.bf16.mxu0 %v14295_v54  ;;  %v3749_v47 = vsel %vm518_vm2, %v3744_v20, %v3748_v16  ;;  %v17245_v10 = vrot.slane %v14138_v21, 1  ;;  %v3356_v49 = vpop.f32.mrf.mxu1 }
 0x330   :  { %v3550_v53 = vmax.f32 %v3470_v33, 0.0  ;;  %v3347_v56 = vadd.f32 %v3346_v1, %v3114_v2  ;;  %v3908_v45 = vmax.f32 %v14270_v44, %v3749_v47  ;;  %v4295_v7 = vunpack.c.h.b16 %v4021_v14  ;;  %v17250_v33 = vld [vmem:[#allocation68_spill] sm:$0xff]  ;;  %v3125_v1 = vpop.f32.mrf.mxu0 }
 0x331   :  { %v14311_v60 = vcombine.low %v17245_v10, %v4021_v14  ;;  %v4018_v23 = vsel %vm518_vm2, %v4016_v38, %v4017_v43  ;;  %v4305_v40 = vunpack.c.l.b16 %v4020_v11  ;;  %v17248_v20 = vrot.slane %v14133_v50, 1  ;;  %v3358_v2 = vpop.f32.mrf.mxu1  ;;  %v17252_v14 = vld [vmem:[#allocation142_spill] sm:$0xff]  ;;  %v17253_v38 = vld [vmem:[#allocation143_spill] sm:$0xff] }
 0x332   :  { %v3750_v46 = vrot.slane %v3550_v53, 1  ;;  %v3471_v32 = vmax.f32 %v17247_v3, %v3347_v56  ;;  %v3116_v10 = vadd.f32 %v3115_v6, %v17250_v33  ;;  %v14323_v59 = vpack.c.bf16 %v3908_v45, %v14289_v58  ;;  %v17254_v6 = vld [vmem:[#allocation144_spill] sm:$0xff]  ;;  %v3129_v33 = vpop.f32.mrf.mxu0 }
 0x333   :  { %17246 = vst [vmem:[#allocation45_spill] sm:$0xff] %v14311_v60  ;;  %6839 = vmatprep.mubr.bf16.mxu1 %v14311_v60  ;;  %v14319_v16 = vcombine.low %v17248_v20, %v4018_v23  ;;  %v14325_v44 = vpack.c.b16 %v4305_v40, %v4295_v7  ;;  %v3120_v11 = vadd.f32 %v3119_v15, %v17252_v14  ;;  %v3362_v45 = vpop.f32.mrf.mxu1  ;;  %v17257_v60 = vld [vmem:[#allocation69_spill] sm:$0xff] }
 0x334   :  { %v3122_v47 = vadd.f32 %v3121_v22, %v17253_v38  ;;  %v3751_v53 = vsel %vm518_vm2, %v3746_v31, %v3750_v46  ;;  %v14330_v56 = vmax.f32 %v3471_v32, 0.0  ;;  %v3349_v3 = vadd.f32 %v3348_v30, %v3116_v10  ;;  %6707 = vmatmul.mubr.bf16.gmra.mxu0 %v14293_v55  ;;  %v17255_v32 = vld [vmem:[#allocation97_spill] sm:$0xff]  ;;  %v3131_v30 = vpop.f32.mrf.mxu0 }
 0x335   :  { %17249 = vst [vmem:[#allocation134_spill] sm:$0xff] %v14319_v16  ;;  %17251 = vst [vmem:[#allocation76_spill] sm:$0xff] %v14325_v44  ;;  %6840 = vmatmul.mubr.bf16.gmra.mxu1 %v14319_v16  ;;  %v3124_v20 = vadd.f32 %v3123_v19, %v17254_v6  ;;  %v3909_v7 = vmax.f32 %v14276_v0, %v3751_v53  ;;  %v3353_v15 = vadd.f32 %v3352_v5, %v3120_v11  ;;  %v3364_v10 = vpop.f32.mrf.mxu1  ;;  %v17256_v19 = vld [vmem:[#allocation92_spill] sm:$0xff] }
 0x336   :  { %6849 = vmatprep.mubr.bf16.mxu1 %v14325_v44  ;;  %v3355_v40 = vadd.f32 %v3354_v51, %v3122_v47  ;;  %v4294_v22 = vunpack.c.h.b16 %v4018_v23  ;;  %v3752_v31 = vrot.slane %v14330_v56, 1  ;;  %v3472_v46 = vmax.f32 %v17255_v32, %v3349_v3  ;;  %v17258_v53 = vld [vmem:[#allocation96_spill] sm:$0xff]  ;;  %v17259_v51 = vld [vmem:[#allocation95_spill] sm:$0xff]  ;;  %v17261_v47 = vld [vmem:[#allocation145_spill] sm:$0xff] }
 0x337   :  { %v3357_v14 = vadd.f32 %v3356_v49, %v3124_v20  ;;  %v4304_v38 = vunpack.c.l.b16 %v4017_v43  ;;  %v14340_v16 = vpack.c.bf16 %v3909_v7, %v14302_v17  ;;  %v3473_v6 = vmax.f32 %v17256_v19, %v3353_v15  ;;  %v3133_v43 = vpop.f32.mrf.mxu0  ;;  %v3366_v3 = vpop.f32.mrf.mxu1  ;;  %v17262_v15 = vld [vmem:[#allocation94_spill] sm:$0xff] }
 0x338   :  { %v3474_v0 = vmax.f32 %v17257_v60, %v3355_v40  ;;  %v3126_v44 = vadd.f32 %v3125_v1, %v17258_v53  ;;  %v14345_v5 = vmax.f32 %v3472_v46, 0.0  ;;  %v3130_v49 = vadd.f32 %v3129_v33, %v17261_v47  ;;  %v17263_v46 = vld [vmem:[#allocation72_spill] sm:$0xff] }
 0x339   :  { %v3475_v23 = vmax.f32 %v17259_v51, %v3357_v14  ;;  %v14348_v11 = vpack.c.b16 %v4304_v38, %v4294_v22  ;;  %v14351_v20 = vmax.f32 %v3473_v6, 0.0  ;;  %v3132_v19 = vadd.f32 %v3131_v30, %v17262_v15  ;;  %v3135_v22 = vpop.f32.mrf.mxu0  ;;  %v3368_v38 = vpop.f32.mrf.mxu1  ;;  %v17264_v6 = vld [vmem:[#allocation98_spill] sm:$0xff] }
 0x33a   :  { %v14353_v7 = vmax.f32 %v3474_v0, 0.0  ;;  %v3359_v32 = vadd.f32 %v3358_v2, %v3126_v44  ;;  %v3755_v60 = vrot.slane %v14345_v5, 1  ;;  %v3363_v40 = vadd.f32 %v3362_v45, %v3130_v49  ;;  %v17265_v44 = vld [vmem:[#allocation70_spill] sm:$0xff] }
 0x33b   :  { %17260 = vst [vmem:[#allocation136_spill] sm:$0xff] %v14348_v11  ;;  %v14357_v1 = vmax.f32 %v3475_v23, 0.0  ;;  %v3134_v14 = vadd.f32 %v3133_v43, %v17263_v46  ;;  %v3753_v33 = vrot.slane %v14351_v20, 1  ;;  %v3365_v0 = vadd.f32 %v3364_v10, %v3132_v19  ;;  %v3139_v47 = vpop.f32.mrf.mxu0  ;;  %v3372_v49 = vpop.f32.mrf.mxu1  ;;  %v17266_v46 = vld [vmem:[#allocation71_spill] sm:$0xff] }
 0x33c   :  { %v3756_v53 = vrot.slane %v14353_v7, 1  ;;  %v3476_v51 = vmax.f32 %v17264_v6, %v3359_v32  ;;  %v3477_v30 = vmax.f32 %v17265_v44, %v3363_v40  ;;  %v4025_v45 = vrot.slane %v14295_v54, 1  ;;  %v17267_v6 = vld [vmem:[#allocation73_spill] sm:$0xff] }
 0x33d   :  { %v3758_v2 = vrot.slane %v14357_v1, 1  ;;  %6850 = vmatmul.mubr.bf16.gmra.mxu1 %v14348_v11  ;;  %v3367_v23 = vadd.f32 %v3366_v3, %v3134_v14  ;;  %v3754_v43 = vsel %vm518_vm2, %v3752_v31, %v3753_v33  ;;  %v3478_v8 = vmax.f32 %v17266_v46, %v3365_v0  ;;  %v3141_v3 = vpop.f32.mrf.mxu0  ;;  %v3374_v14 = vpop.f32.mrf.mxu1 }
 0x33e   :  { %v14368_v15 = vmax.f32 %v3476_v51, 0.0  ;;  %v16619_v32 = vrot.slane %v14340_v16, 1  ;;  %v3557_v19 = vmax.f32 %v3477_v30, 0.0  ;;  %v3136_v40 = vadd.f32 %v3135_v22, %v17268_v18 }
 0x33f   :  { %v3759_v10 = vsel %vm518_vm2, %v3753_v33, %v3758_v2  ;;  %v3479_v11 = vmax.f32 %v17267_v6, %v3367_v23  ;;  %v3558_v31 = vmax.f32 %v3478_v8, 0.0  ;;  %v4022_v30 = vrot.slane %v14293_v55, 1  ;;  %v3143_v18 = vpop.f32.mrf.mxu0  ;;  %v3376_v22 = vpop.f32.mrf.mxu1  ;;  %v17270_v8 = vld [vmem:[#allocation119_spill] sm:$0xff] }
 0x340   :  { %v3912_v44 = vmax.f32 %v14351_v20, %v3759_v10  ;;  %v3760_v28 = vrot.slane %v14368_v15, 1  ;;  %v14380_v51 = vsel %vm518_vm2, %v4025_v45, %v16619_v32  ;;  %v3762_v0 = vrot.slane %v3557_v19, 1  ;;  %v17271_v32 = vld [vmem:[#allocation100_spill] sm:$0xff] }
 0x341   :  { %17269 = vst [vmem:[#allocation77_spill] sm:$0xff] %v14380_v51  ;;  %v3559_v46 = vmax.f32 %v3479_v11, 0.0  ;;  %6859 = vmatprep.mubr.bf16.mxu1 %v14380_v51  ;;  %v3369_v33 = vadd.f32 %v3368_v38, %v3136_v40  ;;  %v3764_v20 = vrot.slane %v3558_v31, 1  ;;  %v16631_v10 = vrot.slane %v14323_v59, 1  ;;  %v17272_v11 = vld [vmem:[#allocation120_spill] sm:$0xff]  ;;  %v3145_v51 = vpop.f32.mrf.mxu0  ;;  %v3378_v38 = vpop.f32.mrf.mxu1 }
 0x342   :  { %v3761_v23 = vsel %vm518_vm2, %v3756_v53, %v3760_v28  ;;  %v3140_v6 = vadd.f32 %v3139_v47, %v17270_v8  ;;  %v3763_v26 = vsel %vm518_vm2, %v3758_v2, %v3762_v0  ;;  %v3142_v9 = vadd.f32 %v3141_v3, %v17272_v11 }
 0x343   :  { %v3766_v45 = vrot.slane %v3559_v46, 1  ;;  %v3480_v54 = vmax.f32 %v17271_v32, %v3369_v33  ;;  %v3914_v40 = vmax.f32 %v14357_v1, %v3763_v26  ;;  %v3765_v55 = vsel %vm518_vm2, %v3760_v28, %v3764_v20  ;;  %v3149_v3 = vpop.f32.mrf.mxu0  ;;  %v3382_v33 = vpop.f32.mrf.mxu1  ;;  %v17274_v26 = vld [vmem:[#allocation74_spill] sm:$0xff] }
 0x344   :  { %v14395_v63 = vsel %vm518_vm2, %v4022_v30, %v16631_v10  ;;  %v3373_v25 = vadd.f32 %v3372_v49, %v3140_v6  ;;  %v3915_v47 = vmax.f32 %v14368_v15, %v3765_v55  ;;  %v3375_v32 = vadd.f32 %v3374_v14, %v3142_v9  ;;  %v17275_v10 = vld [vmem:[#allocation24_spill] sm:$0xff] }
 0x345   :  { %17273 = vst [vmem:[#allocation46_spill] sm:$0xff] %v14395_v63  ;;  %v3767_v2 = vsel %vm518_vm2, %v3762_v0, %v3766_v45  ;;  %v3560_v46 = vmax.f32 %v3480_v54, 0.0  ;;  %6860 = vmatmul.mubr.bf16.gmra.mxu1 %v14395_v63  ;;  %v3757_v28 = vsel %vm518_vm2, %v3755_v60, %v3756_v53  ;;  %v3913_v11 = vmax.f32 %v14353_v7, %v3761_v23  ;;  %v3151_v54 = vpop.f32.mrf.mxu0  ;;  %v3384_v0 = vpop.f32.mrf.mxu1 }
 0x346   :  { %v3916_v8 = vmax.f32 %v3557_v19, %v3767_v2  ;;  %v3481_v1 = vmax.f32 %v17274_v26, %v3373_v25  ;;  %v3482_v49 = vmax.f32 %v17275_v10, %v3375_v32  ;;  %v3911_v55 = vmax.f32 %v14345_v5, %v3757_v28  ;;  %v17276_v19 = vld [vmem:[#allocation107_spill] sm:$0xff]  ;;  %v17277_v25 = vld [vmem:[#allocation25_spill] sm:$0xff] }
 0x347   :  { %v3768_v30 = vrot.slane %v3560_v46, 1  ;;  %v3910_v15 = vmax.f32 %v14330_v56, %v3754_v43  ;;  %v3144_v14 = vadd.f32 %v3143_v18, %v17276_v19  ;;  %v3146_v45 = vadd.f32 %v3145_v51, %v17277_v25  ;;  %v3153_v56 = vpop.f32.mrf.mxu0  ;;  %v3386_v43 = vpop.f32.mrf.mxu1  ;;  %v17281_v46 = vld [vmem:[#allocation121_spill] sm:$0xff] }
 0x348   :  { %v14406_v6 = vpack.c.bf16 %v3916_v8, %v3914_v40  ;;  %v14408_v9 = vmax.f32 %v3481_v1, 0.0  ;;  %v14413_v7 = vmax.f32 %v3482_v49, 0.0  ;;  %v14415_v53 = vpack.c.bf16 %v3913_v11, %v3911_v55  ;;  %v17283_v1 = vld [vmem:[#allocation123_spill] sm:$0xff] }
 0x349   :  { %v3769_v60 = vsel %vm518_vm2, %v3764_v20, %v3768_v30  ;;  %v14418_v5 = vpack.c.bf16 %v3911_v55, %v14302_v17  ;;  %v14421_v40 = vpack.c.bf16 %v3912_v44, %v3910_v15  ;;  %v14424_v18 = vpack.c.bf16 %v3910_v15, %v14289_v58  ;;  %v3155_v17 = vpop.f32.mrf.mxu0  ;;  %v3388_v8 = vpop.f32.mrf.mxu1  ;;  %v17284_v58 = vld [vmem:[#allocation124_spill] sm:$0xff]  ;;  %v17285_v30 = vld [vmem:[#allocation101_spill] sm:$0xff]  ;;  %v17286_v55 = vld [vmem:[#allocation99_spill] sm:$0xff] }
 0x34a   :  { %v3917_v23 = vmax.f32 %v3558_v31, %v3769_v60  ;;  %v3770_v10 = vrot.slane %v14408_v9, 1  ;;  %v3773_v51 = vrot.slane %v14413_v7, 1  ;;  %v3377_v20 = vadd.f32 %v3376_v22, %v3144_v14  ;;  %v17282_v31 = vld [vmem:[#allocation122_spill] sm:$0xff] }
 0x34b   :  { %17278 = vst [vmem:[#allocation137_spill] sm:$0xff] %v14418_v5  ;;  %17279 = vst [vmem:[#allocation78_spill] sm:$0xff] %v14421_v40  ;;  %6716 = vmatprep.mubr.bf16.mxu0 %v14418_v5  ;;  %v3379_v2 = vadd.f32 %v3378_v38, %v3146_v45  ;;  %v3150_v32 = vadd.f32 %v3149_v3, %v17281_v46  ;;  %v3152_v44 = vadd.f32 %v3151_v54, %v17282_v31  ;;  %v3159_v38 = vpop.f32.mrf.mxu0  ;;  %v3392_v19 = vpop.f32.mrf.mxu1  ;;  %v17287_v45 = vld [vmem:[#allocation126_spill] sm:$0xff] }
 0x34c   :  { %17280 = vst [vmem:[#allocation138_spill] sm:$0xff] %v14424_v18  ;;  %v14429_v26 = vpack.c.bf16 %v3917_v23, %v3915_v47  ;;  %6717 = vmatmul.mubr.bf16.gmra.mxu0 %v14424_v18  ;;  %v3154_v28 = vadd.f32 %v3153_v56, %v17283_v1  ;;  %v3156_v11 = vadd.f32 %v3155_v17, %v17284_v58  ;;  %v4353_v3 = vunpack.c.h.b16 %v14415_v53  ;;  %v17288_v46 = vld [vmem:[#allocation26_spill] sm:$0xff]  ;;  %v17289_v1 = vld [vmem:[#allocation125_spill] sm:$0xff] }
 0x34d   :  { %v3483_v49 = vmax.f32 %v17285_v30, %v3377_v20  ;;  %v3484_v15 = vmax.f32 %v17286_v55, %v3379_v2  ;;  %v3383_v22 = vadd.f32 %v3382_v33, %v3150_v32  ;;  %v3385_v14 = vadd.f32 %v3384_v0, %v3152_v44  ;;  %v3161_v31 = vpop.f32.mrf.mxu0  ;;  %v3394_v17 = vpop.f32.mrf.mxu1  ;;  %v17290_v33 = vld [vmem:[#allocation102_spill] sm:$0xff]  ;;  %v17292_v44 = vld [vmem:[#allocation27_spill] sm:$0xff] }
 0x34e   :  { %v3387_v47 = vadd.f32 %v3386_v43, %v3154_v28  ;;  %v3389_v25 = vadd.f32 %v3388_v8, %v3156_v11  ;;  %v3160_v60 = vadd.f32 %v3159_v38, %v17287_v45  ;;  %v4363_v20 = vunpack.c.l.b16 %v14429_v26  ;;  %v17291_v58 = vld [vmem:[#allocation34_spill] sm:$0xff]  ;;  %v17293_v45 = vld [vmem:[#allocation28_spill] sm:$0xff] }
 0x34f   :  { %v3563_v23 = vmax.f32 %v3483_v49, 0.0  ;;  %v3564_v54 = vmax.f32 %v3484_v15, 0.0  ;;  %v3485_v56 = vmax.f32 %v17288_v46, %v3383_v22  ;;  %v3486_v2 = vmax.f32 %v17289_v1, %v3385_v14  ;;  %v3163_v11 = vpop.f32.mrf.mxu0  ;;  %v3396_v49 = vpop.f32.mrf.mxu1 }
 0x350   :  { %v3487_v32 = vmax.f32 %v17290_v33, %v3387_v47  ;;  %v3488_v30 = vmax.f32 %v17291_v58, %v3389_v25  ;;  %v3393_v55 = vadd.f32 %v3392_v19, %v3160_v60  ;;  %v3162_v28 = vadd.f32 %v3161_v31, %v17292_v44 }
 0x351   :  { %v3771_v0 = vrot.slane %v3563_v23, 1  ;;  %v3774_v43 = vrot.slane %v3564_v54, 1  ;;  %v3565_v8 = vmax.f32 %v3485_v56, 0.0  ;;  %v3566_v15 = vmax.f32 %v3486_v2, 0.0  ;;  %v3165_v19 = vpop.f32.mrf.mxu0  ;;  %v3398_v60 = vpop.f32.mrf.mxu1 }
 0x352   :  { %v3567_v22 = vmax.f32 %v3487_v32, 0.0  ;;  %v14445_v38 = vmax.f32 %v3488_v30, 0.0  ;;  %v3489_v46 = vmax.f32 %v17293_v45, %v3393_v55  ;;  %v3395_v25 = vadd.f32 %v3394_v17, %v3162_v28  ;;  %v17294_v55 = vld [vmem:[#allocation103_spill] sm:$0xff] }
 0x353   :  { %v3772_v14 = vsel %vm518_vm2, %v3770_v10, %v3771_v0  ;;  %v3775_v47 = vsel %vm518_vm2, %v3773_v51, %v3774_v43  ;;  %v3776_v1 = vrot.slane %v3565_v8, 1  ;;  %v3778_v33 = vrot.slane %v3566_v15, 1  ;;  %v3169_v10 = vpop.f32.mrf.mxu0  ;;  %v3402_v45 = vpop.f32.mrf.mxu1 }
 0x354   :  { %v3918_v56 = vmax.f32 %v14408_v9, %v3772_v14  ;;  %v3919_v31 = vmax.f32 %v14413_v7, %v3775_v47  ;;  %v3780_v58 = vrot.slane %v3567_v22, 1  ;;  %v3782_v32 = vrot.slane %v14445_v38, 1 }
 0x355   :  { %v3777_v2 = vsel %vm518_vm2, %v3771_v0, %v3776_v1  ;;  %v3569_v30 = vmax.f32 %v3489_v46, 0.0  ;;  %v3490_v44 = vmax.f32 %v17294_v55, %v3395_v25  ;;  %v3779_v17 = vsel %vm518_vm2, %v3774_v43, %v3778_v33  ;;  %v3171_v47 = vpop.f32.mrf.mxu0  ;;  %v3404_v18 = vpop.f32.mrf.mxu1 }
 0x356   :  { %v3920_v51 = vmax.f32 %v3563_v23, %v3777_v2  ;;  %v3781_v28 = vsel %vm518_vm2, %v3776_v1, %v3780_v58  ;;  %v14457_v63 = vpack.c.b16 %v4363_v20, %v4353_v3  ;;  %v3921_v9 = vmax.f32 %v3564_v54, %v3779_v17  ;;  %v17296_v2 = vld [vmem:[#allocation127_spill] sm:$0xff]  ;;  %v17298_v17 = vld [vmem:[#allocation129_spill] sm:$0xff] }
 0x357   :  { %v14459_v7 = vmax.f32 %v3565_v8, %v3781_v28  ;;  %v3783_v14 = vsel %vm518_vm2, %v3778_v33, %v3782_v32  ;;  %v3784_v0 = vrot.slane %v3569_v30, 1  ;;  %v3570_v55 = vmax.f32 %v3490_v44, 0.0  ;;  %v3173_v8 = vpop.f32.mrf.mxu0  ;;  %v3406_v1 = vpop.f32.mrf.mxu1 }
 0x358   :  { %17295 = vst [vmem:[#allocation139_spill] sm:$0xff] %v14457_v63  ;;  %v14462_v46 = vpack.c.bf16 %v3920_v51, %v3918_v56  ;;  %v14464_v25 = vmax.f32 %v3566_v15, %v3783_v14  ;;  %6726 = vmatprep.mubr.bf16.mxu0 %v14457_v63  ;;  %v4352_v23 = vunpack.c.h.b16 %v14421_v40  ;;  %v14468_v43 = vpack.c.bf16 %v3921_v9, %v3919_v31 }
 0x359   :  { %v3785_v3 = vsel %vm518_vm2, %v3780_v58, %v3784_v0  ;;  %v4362_v54 = vunpack.c.l.b16 %v14406_v6  ;;  %v4031_v20 = vrot.slane %v14415_v53, 1  ;;  %v3786_v56 = vrot.slane %v3570_v55, 1  ;;  %v3175_v28 = vpop.f32.mrf.mxu0  ;;  %v3408_v9 = vpop.f32.mrf.mxu1 }
 0x35a   :  { %v3924_v33 = vmax.f32 %v3567_v22, %v3785_v3  ;;  %v4032_v15 = vrot.slane %v14429_v26, 1  ;;  %v3164_v30 = vadd.f32 %v3163_v11, %v17296_v2  ;;  %v4028_v51 = vrot.slane %v14421_v40, 1 }
 0x35b   :  { %v14475_v44 = vpack.c.b16 %v4362_v54, %v4352_v23  ;;  %v4029_v31 = vrot.slane %v14406_v6, 1  ;;  %v3166_v58 = vadd.f32 %v3165_v19, %v17298_v17  ;;  %v3787_v22 = vsel %vm518_vm2, %v3782_v32, %v3786_v56  ;;  %v3179_v2 = vpop.f32.mrf.mxu0  ;;  %v17301_v17 = vld [vmem:[#allocation104_spill] sm:$0xff] }
 0x35c   :  { %v14481_v14 = vpack.c.bf16 %v3924_v33, %v14459_v7  ;;  %v4033_v0 = vsel %vm518_vm2, %v4031_v20, %v4032_v15  ;;  %v3397_v55 = vadd.f32 %v3396_v49, %v3164_v30  ;;  %v3925_v11 = vmax.f32 %v14445_v38, %v3787_v22  ;;  %v3412_v38 = vpop.f32.mrf.mxu1  ;;  %v17304_v30 = vld [vmem:[#allocation108_spill] sm:$0xff]  ;;  %v17305_v22 = vld [vmem:[#allocation130_spill] sm:$0xff] }
 0x35d   :  { %17297 = vst [vmem:[#allocation80_spill] sm:$0xff] %v14475_v44  ;;  %6727 = vmatmul.mubr.bf16.gmra.mxu0 %v14475_v44  ;;  %v17299_v23 = vrot.slane %v14340_v16, 1  ;;  %v4030_v19 = vsel %vm518_vm2, %v4028_v51, %v4029_v31  ;;  %v4355_v54 = vunpack.c.h.b16 %v4033_v0  ;;  %v17302_v63 = vrot.slane %v14323_v59, 1 }
 0x35e   :  { %v3491_v33 = vmax.f32 %v17301_v17, %v3397_v55  ;;  %v4365_v20 = vunpack.c.l.b16 %v4032_v15  ;;  %v3399_v49 = vadd.f32 %v3398_v60, %v3166_v58  ;;  %6736 = vmatprep.mubr.bf16.mxu0 %v14468_v43  ;;  %v14499_v56 = vpack.c.bf16 %v3925_v11, %v14464_v25  ;;  %v3181_v17 = vpop.f32.mrf.mxu0  ;;  %v17308_v60 = vld [vmem:[#allocation128_spill] sm:$0xff] }
 0x35f   :  { %v14489_v3 = vcombine.low %v17299_v23, %v4033_v0  ;;  %v14495_v32 = vcombine.low %v17302_v63, %v4030_v19  ;;  %v3170_v51 = vadd.f32 %v3169_v10, %v17304_v30  ;;  %v3172_v0 = vadd.f32 %v3171_v47, %v17305_v22  ;;  %v17306_v23 = vld [vmem:[#allocation29_spill] sm:$0xff]  ;;  %v3414_v30 = vpop.f32.mrf.mxu1 }
 0x360   :  { %v3174_v55 = vadd.f32 %v3173_v8, %v17306_v23  ;;  %v14505_v44 = vmax.f32 %v3491_v33, 0.0  ;;  %v14508_v63 = vpack.c.b16 %v4365_v20, %v4355_v54  ;;  %v3492_v15 = vmax.f32 %v17308_v60, %v3399_v49  ;;  %v3183_v22 = vpop.f32.mrf.mxu0  ;;  %v17309_v54 = vld [vmem:[#allocation132_spill] sm:$0xff]  ;;  %v17310_v23 = vld [vmem:[#allocation30_spill] sm:$0xff] }
 0x361   :  { %17300 = vst [vmem:[#allocation81_spill] sm:$0xff] %v14489_v3  ;;  %17303 = vst [vmem:[#allocation48_spill] sm:$0xff] %v14495_v32  ;;  %6869 = vmatprep.mubr.bf16.mxu1 %v14489_v3  ;;  %v4354_v58 = vunpack.c.h.b16 %v4030_v19  ;;  %v3403_v11 = vadd.f32 %v3402_v45, %v3170_v51  ;;  %v3405_v5 = vadd.f32 %v3404_v18, %v3172_v0  ;;  %v4364_v3 = vunpack.c.l.b16 %v4029_v31  ;;  %v17311_v19 = vld [vmem:[#allocation105_spill] sm:$0xff] }
 0x362   :  { %6870 = vmatmul.mubr.bf16.gmra.mxu1 %v14495_v32  ;;  %17307 = vst [vmem:[#allocation79_spill] sm:$0xff] %v14508_v63  ;;  %v3407_v40 = vadd.f32 %v3406_v1, %v3174_v55  ;;  %v3788_v10 = vrot.slane %v14505_v44, 1  ;;  %v3572_v47 = vmax.f32 %v3492_v15, 0.0  ;;  %v3176_v8 = vadd.f32 %v3175_v28, %v13873_v42  ;;  %v17347_v32 = vld [vmem:[#allocation114_spill] sm:$0xff] }
 0x363   :  { %6879 = vmatprep.mubr.bf16.mxu1 %v14508_v63  ;;  %v3180_v33 = vadd.f32 %v3179_v2, %v13879_v57  ;;  %v3493_v20 = vmax.f32 %v17309_v54, %v3403_v11  ;;  %v3494_v49 = vmax.f32 %v17310_v23, %v3405_v5  ;;  %v14518_v18 = vpack.c.b16 %v4364_v3, %v4354_v58  ;;  %v17313_v2 = vld [vmem:[#allocation135_spill] sm:$0xff]  ;;  %v3185_v58 = vpop.f32.mrf.mxu0 }
 0x364   :  { %v3495_v45 = vmax.f32 %v17311_v19, %v3407_v40  ;;  %v3791_v1 = vrot.slane %v3572_v47, 1  ;;  %v3409_v31 = vadd.f32 %v3408_v9, %v3176_v8  ;;  %v3182_v0 = vadd.f32 %v3181_v17, %v13883_v35  ;;  %v3416_v40 = vpop.f32.mrf.mxu1 }
 0x365   :  { %17312 = vst [vmem:[#allocation49_spill] sm:$0xff] %v14518_v18  ;;  %v3413_v51 = vadd.f32 %v3412_v38, %v3180_v33  ;;  %v3573_v55 = vmax.f32 %v3493_v20, 0.0  ;;  %v3574_v60 = vmax.f32 %v3494_v49, 0.0  ;;  %6737 = vmatmul.mubr.bf16.gmra.mxu0 %v14462_v46  ;;  %v3184_v57 = vadd.f32 %v3183_v22, %v13905_v12  ;;  %v17314_v33 = vld [vmem:[#allocation32_spill] sm:$0xff]  ;;  %v17315_v22 = vld [vmem:[#allocation47_spill] sm:$0xff] }
 0x366   :  { %v3575_v42 = vmax.f32 %v3495_v45, 0.0  ;;  %v3496_v28 = vmax.f32 %v13864_v34, %v3409_v31  ;;  %v3415_v15 = vadd.f32 %v3414_v30, %v3182_v0  ;;  %v4037_v3 = vrot.slane %v14468_v43, 1 }
 0x367   :  { %v3497_v5 = vmax.f32 %v17313_v2, %v3413_v51  ;;  %v3789_v9 = vrot.slane %v3573_v55, 1  ;;  %v3792_v38 = vrot.slane %v3574_v60, 1  ;;  %v3417_v35 = vadd.f32 %v3416_v40, %v3184_v57  ;;  %v3418_v51 = vpop.f32.mrf.mxu1 }
 0x368   :  { %v3794_v11 = vrot.slane %v3575_v42, 1  ;;  %v3576_v17 = vmax.f32 %v3496_v28, 0.0  ;;  %v3498_v54 = vmax.f32 %v17314_v33, %v3415_v15  ;;  %v4038_v12 = vrot.slane %v14499_v56, 1 }
 0x369   :  { %v3577_v8 = vmax.f32 %v3497_v5, 0.0  ;;  %v3790_v34 = vsel %vm518_vm2, %v3788_v10, %v3789_v9  ;;  %v3499_v20 = vmax.f32 %v17315_v22, %v3417_v35  ;;  %v3186_v23 = vadd.f32 %v3185_v58, %v13922_v13 }
 0x36a   :  { %6880 = vmatmul.mubr.bf16.gmra.mxu1 %v14518_v18  ;;  %v3795_v30 = vsel %vm518_vm2, %v3789_v9, %v3794_v11  ;;  %v3796_v19 = vrot.slane %v3576_v17, 1  ;;  %v3578_v31 = vmax.f32 %v3498_v54, 0.0  ;;  %v14534_v57 = vsel %vm518_vm2, %v4037_v3, %v4038_v12 }
 0x36b   :  { %v3928_v49 = vmax.f32 %v3573_v55, %v3795_v30  ;;  %v3798_v45 = vrot.slane %v3577_v8, 1  ;;  %v3579_v0 = vmax.f32 %v3499_v20, 0.0  ;;  %17316 = vst [vmem:[#allocation83_spill] sm:$0xff] %v14534_v57  ;;  %v3419_v28 = vadd.f32 %v3418_v51, %v3186_v23  ;;  %6889 = vmatprep.mubr.bf16.mxu1 %v14534_v57  ;;  %v11228_v57 = vld [vmem:[#allocation6 + $0x68] ss:$16 sps:$4 sm:$0xff]  }
 0x36c   :  { %v4034_v2 = vrot.slane %v14462_v46, 1  ;;  %v3797_v10 = vsel %vm518_vm2, %v3792_v38, %v3796_v19  ;;  %v3800_v15 = vrot.slane %v3578_v31, 1  ;;  %v4035_v13 = vrot.slane %v14481_v14, 1 }
 0x36d   :  { %v3799_v5 = vsel %vm518_vm2, %v3794_v11, %v3798_v45  ;;  %v3802_v40 = vrot.slane %v3579_v0, 1  ;;  %v3500_v58 = vmax.f32 %v13909_v27, %v3419_v28  ;;  %v3793_v9 = vsel %vm518_vm2, %v3791_v1, %v3792_v38 }
 0x36e   :  { %v3930_v55 = vmax.f32 %v3575_v42, %v3799_v5  ;;  %v3801_v3 = vsel %vm518_vm2, %v3796_v19, %v3800_v15  ;;  %v14545_v35 = vsel %vm518_vm2, %v4034_v2, %v4035_v13  ;;  %v3927_v33 = vmax.f32 %v3572_v47, %v3793_v9 }
 0x36f   :  { %17317 = vst [vmem:[#allocation50_spill] sm:$0xff] %v14545_v35  ;;  %v3929_v54 = vmax.f32 %v3574_v60, %v3797_v10  ;;  %v3931_v30 = vmax.f32 %v3576_v17, %v3801_v3  ;;  %v3803_v11 = vsel %vm518_vm2, %v3798_v45, %v3802_v40  ;;  %v3580_v22 = vmax.f32 %v3500_v58, 0.0 }
 0x370   :  { %v3926_v20 = vmax.f32 %v14505_v44, %v3790_v34  ;;  %v3932_v23 = vmax.f32 %v3577_v8, %v3803_v11  ;;  %v14553_v27 = vpack.c.bf16 %v3927_v33, %v14464_v25  ;;  %v4050_v5 = vrot.slane %v13941_v39, 2 }
 0x371   :  { %v14550_v42 = vpack.c.bf16 %v3929_v54, %v3927_v33  ;;  %v3804_v1 = vrot.slane %v3580_v22, 1  ;;  %v4049_v3 = vrot.slane %v13896_v62, 2  ;;  %v4056_v22 = vrot.slane %v14032_v4, 2 }
 0x372   :  { %6890 = vmatmul.mubr.bf16.gmra.mxu1 %v14545_v35  ;;  %17318 = vst [vmem:[#allocation43_spill] sm:$0xff] %v14553_v27  ;;  %v14555_v38 = vpack.c.bf16 %v3928_v49, %v3926_v20  ;;  %v14558_v47 = vpack.c.bf16 %v3926_v20, %v14459_v7  ;;  %v14560_v60 = vpack.c.bf16 %v3932_v23, %v3930_v55  ;;  %v4046_v23 = vrot.slane %v13892_v41, 2 }
 0x373   :  { %6746 = vmatprep.mubr.bf16.mxu0 %v14553_v27  ;;  %v3805_v44 = vsel %vm518_vm2, %v3800_v15, %v3804_v1  ;;  %v4413_v28 = vunpack.c.h.b16 %v14550_v42  ;;  %v4099_v1 = vrot.slane %v13941_v39, 3  ;;  %v4110_v35 = vrot.slane %v14091_v52, 3 }
 0x374   :  { %17319 = vst [vmem:[#allocation44_spill] sm:$0xff] %v14558_v47  ;;  %6747 = vmatmul.mubr.bf16.gmra.mxu0 %v14558_v47  ;;  %v4412_v17 = vunpack.c.h.b16 %v14555_v38  ;;  %v3933_v8 = vmax.f32 %v3578_v31, %v3805_v44  ;;  %v4422_v25 = vunpack.c.l.b16 %v14560_v60  ;;  %v4040_v34 = vrot.slane %v14555_v38, 1  ;;  %v11201_v44 = vld [vmem:[#allocation6 + $0x8e0] ss:$16 sps:$4 sm:$0xff]  }
 0x375   :  { %v4041_v49 = vrot.slane %v14560_v60, 1  ;;  %v4043_v31 = vrot.slane %v14550_v42, 1 }
 0x376   :  { %v14569_v19 = vpack.c.bf16 %v3933_v8, %v3931_v30  ;;  %v14571_v7 = vpack.c.b16 %v4422_v25, %v4412_v17  ;;  %v14593_v30 = vsel %vm648_vm3, %v4049_v3, %v4050_v5  ;;  %v4098_v25 = vrot.slane %v13896_v62, 3 }
 0x377   :  { %v4042_v45 = vsel %vm518_vm2, %v4040_v34, %v4041_v49  ;;  %v4424_v51 = vunpack.c.l.b16 %v4041_v49  ;;  %17325 = vst [vmem:[#allocation85_spill] sm:$0xff] %v14593_v30  ;;  %v4053_v34 = vrot.slane %v14019_v24, 2  ;;  %v11209_v49 = vld [vmem:[#allocation6 + $0x8c4] ss:$16 sps:$4 sm:$0xff]  }
 0x378   :  { %17320 = vst [vmem:[#allocation82_spill] sm:$0xff] %v14571_v7  ;;  %v4414_v0 = vunpack.c.h.b16 %v4042_v45  ;;  %v4423_v2 = vunpack.c.l.b16 %v14569_v19  ;;  %v4044_v10 = vrot.slane %v14569_v19, 1  ;;  %v14588_v54 = vcombine.low %v4035_v13, %v4042_v45 }
 0x379   :  { %v4047_v13 = vrot.slane %v13928_v29, 2  ;;  %v14617_v45 = vsel %vm4094_vm4, %v4098_v25, %v4099_v1  ;;  %v11212_v25 = vld [vmem:[#allocation6 + $0xcc] ss:$16 sps:$4 sm:$0xff]  }
 0x37a   :  { %v14579_v15 = vpack.c.b16 %v4424_v51, %v4414_v0  ;;  %v14581_v55 = vpack.c.b16 %v4423_v2, %v4413_v28  ;;  %v4045_v40 = vsel %vm518_vm2, %v4043_v31, %v4044_v10  ;;  %v4425_v58 = vunpack.c.l.b16 %v4044_v10  ;;  %17324 = vst [vmem:[#allocation84_spill] sm:$0xff] %v14588_v54  ;;  %17329 = vst [vmem:[#allocation87_spill] sm:$0xff] %v14617_v45  ;;  %v11207_v28 = vld [vmem:[#allocation6 + $0x8c0] ss:$16 sps:$4 sm:$0xff]  }
 0x37b   :  { %v14584_v9 = vcombine.low %v4038_v12, %v4045_v40  ;;  %v4415_v33 = vunpack.c.h.b16 %v4045_v40  ;;  %v4055_v12 = vrot.slane %v14006_v37, 2  ;;  %v14607_v17 = vsel %vm648_vm3, %v4046_v23, %v4047_v13  ;;  %v11215_v40 = vld [vmem:[#allocation6 + $0x8a4] ss:$16 sps:$4 sm:$0xff]   ;;  %v11204_v23 = vld [vmem:[#allocation6 + $0xe8] ss:$16 sps:$4 sm:$0xff]  }
 0x37c   :  { %17321 = vst [vmem:[#allocation53_spill] sm:$0xff] %v14579_v15  ;;  %17322 = vst [vmem:[#allocation51_spill] sm:$0xff] %v14581_v55  ;;  %6756 = vmatprep.mubr.bf16.mxu0 %v14581_v55  ;;  %v4052_v51 = vrot.slane %v13991_v61, 2  ;;  %v4105_v0 = vrot.slane %v14032_v4, 3  ;;  %v4247_v10 = vunpack.c.l.b16 %v4056_v22 }
 0x37d   :  { %17323 = vst [vmem:[#allocation52_spill] sm:$0xff] %v14584_v9  ;;  %6757 = vmatmul.mubr.bf16.gmra.mxu0 %v14571_v7  ;;  %6899 = vmatprep.mubr.bf16.mxu1 %v14584_v9  ;;  %v14595_v11 = vpack.c.b16 %v4425_v58, %v4415_v33  ;;  %v4057_v20 = vsel %vm648_vm3, %v4055_v12, %v4056_v22  ;;  %17327 = vst [vmem:[#allocation55_spill] sm:$0xff] %v14607_v17  ;;  %v4096_v58 = vrot.slane %v13928_v29, 3  ;;  %v11255_v7 = vld [vmem:[#allocation6 + $0x9c0] ss:$16 sps:$4 sm:$0xff]  }
 0x37e   :  { %6900 = vmatmul.mubr.bf16.gmra.mxu1 %v14588_v54  ;;  %6952 = vmatprep.mubr.bf16.mxu0 %v14593_v30  ;;  %v14609_v8 = vcombine.low %v4050_v5, %v4057_v20  ;;  %v4054_v2 = vsel %vm648_vm3, %v4052_v51, %v4053_v34  ;;  %v4237_v31 = vunpack.c.h.b16 %v4057_v20  ;;  %v4104_v5 = vrot.slane %v14006_v37, 3  ;;  %v11213_v51 = vld [vmem:[#allocation6 + $0x8a0] ss:$16 sps:$4 sm:$0xff]  }
 0x37f   :  { %17326 = vst [vmem:[#allocation54_spill] sm:$0xff] %v14595_v11  ;;  %6909 = vmatprep.mubr.bf16.mxu1 %v14595_v11  ;;  %v14626_v33 = vcombine.low %v4047_v13, %v4054_v2  ;;  %v4095_v12 = vrot.slane %v13892_v41, 3  ;;  %v11221_v13 = vld [vmem:[#allocation6 + $0x884] ss:$16 sps:$4 sm:$0xff]   ;;  %v4249_v11 = vunpack.c.l.b16 %v4105_v0 }
 0x380   :  { %17328 = vst [vmem:[#allocation57_spill] sm:$0xff] %v14609_v8  ;;  %v4106_v3 = vsel %vm4094_vm4, %v4104_v5, %v4105_v0  ;;  %v4101_v5 = vrot.slane %v13991_v61, 3 }
 0x381   :  { %17330 = vst [vmem:[#allocation58_spill] sm:$0xff] %v14626_v33  ;;  %v14633_v22 = vsel %vm4094_vm4, %v4095_v12, %v4096_v58  ;;  %v14635_v20 = vcombine.low %v4099_v1, %v4106_v3  ;;  %v11219_v1 = vld [vmem:[#allocation6 + $0x880] ss:$16 sps:$4 sm:$0xff]   ;;  %v4062_v12 = vrot.slane %v14138_v21, 2 }
 0x382   :  { %17332 = vst [vmem:[#allocation56_spill] sm:$0xff] %v14633_v22 }
 0x383   :  { %17333 = vst [vmem:[#allocation61_spill] sm:$0xff] %v14635_v20 }
 0x385   :  { %6953 = vmatmul.mubr.bf16.vlgmr.msra.gmra.mxu0 %v14607_v17 }
 0x386   :  { %6910 = vmatmul.mubr.bf16.gmra.mxu1 %v14579_v15  ;;  %6962 = vmatprep.mubr.bf16.mxu0 %v14609_v8  ;;  %v4239_v15 = vunpack.c.h.b16 %v4106_v3 }
 0x387   :  { %7105 = vmatprep.mubr.bf16.mxu1 %v14617_v45  ;;  %7227 = vmatpush1.bf16.msra.mxu0 %v11201_v44  ;;  %v14629_v44 = vpack.c.b16 %v4247_v10, %v4237_v31  ;;  %v4236_v31 = vunpack.c.h.b16 %v4054_v2  ;;  %v4246_v10 = vunpack.c.l.b16 %v4053_v34  ;;  %v4061_v2 = vrot.slane %v14091_v52, 2  ;;  %v11216_v34 = vld [vmem:[#allocation6 + $0xa8] ss:$16 sps:$4 sm:$0xff]  }
 0x388   :  { %7228 = vmatprep.subr.bf16.mxu0 %v11209_v49  ;;  %v4102_v49 = vrot.slane %v14019_v24, 3  ;;  %v14654_v3 = vpack.c.b16 %v4249_v11, %v4239_v15  ;;  %v17338_v15 = vld [vmem:[#allocation133_spill] sm:$0xff] }
 0x389   :  { %17331 = vst [vmem:[#allocation59_spill] sm:$0xff] %v14629_v44  ;;  %v14644_v54 = vpack.c.b16 %v4246_v10, %v4236_v31  ;;  %v14652_v0 = vsel %vm648_vm3, %v4061_v2, %v4062_v12  ;;  %v11233_v31 = vld [vmem:[#allocation6 + $0x844] ss:$16 sps:$4 sm:$0xff]   ;;  %v4058_v11 = vrot.slane %v17338_v15, 2  ;;  %v11230_v2 = vld [vmem:[#allocation6 + $0x6c] ss:$16 sps:$4 sm:$0xff]  }
 0x38a   :  { %v4103_v45 = vsel %vm4094_vm4, %v4101_v5, %v4102_v49  ;;  %17336 = vst [vmem:[#allocation60_spill] sm:$0xff] %v14652_v0  ;;  %17337 = vst [vmem:[#allocation89_spill] sm:$0xff] %v14654_v3  ;;  %v4248_v10 = vunpack.c.l.b16 %v4102_v49  ;;  %v4091_v5 = vrot.slane %v14550_v42, 2 }
 0x38b   :  { %7229 = vmatpush1.bf16.msra.mxu0 %v11207_v28  ;;  %v11210_v28 = vld [vmem:[#allocation6 + $0xc8] ss:$16 sps:$4 sm:$0xff]   ;;  %17334 = vst [vmem:[#allocation86_spill] sm:$0xff] %v14644_v54 }
 0x38c   :  { %7230 = vmatprep.subr.bf16.mxu0 %v11215_v40  ;;  %v11218_v40 = vld [vmem:[#allocation6 + $0xac] ss:$16 sps:$4 sm:$0xff]  }
 0x38d   :  { %6963 = vmatmul.mubr.bf16.gmra.mxu0 %v14626_v33 }
 0x38e   :  { %6972 = vmatprep.mubr.bf16.mxu0 %v14629_v44  ;;  %7106 = vmatmul.mubr.bf16.vlgmr.msra.gmra.mxu1 %v14633_v22  ;;  %v11227_v22 = vld [vmem:[#allocation6 + $0x864] ss:$16 sps:$4 sm:$0xff]  }
 0x38f   :  { %7115 = vmatprep.mubr.bf16.mxu1 %v14635_v20  ;;  %7380 = vmatpush1.bf16.msra.mxu1 %v11204_v23  ;;  %v16649_v23 = vrot.slane %v14252_v36, 2  ;;  %v11225_v20 = vld [vmem:[#allocation6 + $0x860] ss:$16 sps:$4 sm:$0xff]  }
 0x390   :  { %7381 = vmatprep.subr.bf16.mxu1 %v11212_v25  ;;  %7231 = vmatpush1.bf16.msra.mxu0 %v11213_v51  ;;  %v14648_v25 = vcombine.low %v4096_v58, %v4103_v45  ;;  %v11224_v51 = vld [vmem:[#allocation6 + $0x8c] ss:$16 sps:$4 sm:$0xff]   ;;  %v4238_v58 = vunpack.c.h.b16 %v4103_v45  ;;  %v11231_v45 = vld [vmem:[#allocation6 + $0x840] ss:$16 sps:$4 sm:$0xff]  }
 0x391   :  { %7232 = vmatprep.subr.bf16.mxu0 %v11221_v13  ;;  %v4088_v13 = vrot.slane %v14555_v38, 2 }
 0x392   :  { %17335 = vst [vmem:[#allocation106_spill] sm:$0xff] %v14648_v25 }
 0x393   :  { %7382 = vmatpush1.bf16.msra.mxu1 %v11210_v28  ;;  %v4067_v28 = vrot.slane %v14226_v48, 2 }
 0x394   :  { %7383 = vmatprep.subr.bf16.mxu1 %v11218_v40  ;;  %7233 = vmatpush1.bf16.msra.mxu0 %v11219_v1  ;;  %v4092_v40 = vrot.slane %v14569_v19, 2  ;;  %v11222_v1 = vld [vmem:[#allocation6 + $0x88] ss:$16 sps:$4 sm:$0xff]  }
 0x395   :  { %6973 = vmatmul.mubr.bf16.gmra.mxu0 %v14644_v54  ;;  %7234 = vmatprep.subr.bf16.mxu0 %v11227_v22  ;;  %v14667_v22 = vsel %vm648_vm3, %v4067_v28, %v16649_v23  ;;  %v4141_v28 = vrot.slane %v14569_v19, 3  ;;  %v11245_v54 = vld [vmem:[#allocation6 + $0x804] ss:$16 sps:$4 sm:$0xff]  }
 0x396   :  { %6982 = vmatprep.mubr.bf16.mxu0 %v14652_v0  ;;  %7116 = vmatmul.mubr.bf16.gmra.mxu1 %v14648_v25  ;;  %v14670_v49 = vsel %vm648_vm3, %v4091_v5, %v4092_v40  ;;  %v17339_v25 = vrot.slane %v14133_v50, 2  ;;  %v14682_v23 = vcombine.low %v4062_v12, %v14667_v22  ;;  %v14684_v5 = vpack.c.b16 %v4248_v10, %v4238_v58  ;;  %v17344_v12 = vld [vmem:[#allocation40_spill] sm:$0xff] }
 0x397   :  { %7125 = vmatprep.mubr.bf16.mxu1 %v14654_v3  ;;  %7384 = vmatpush1.bf16.msra.mxu1 %v11216_v34  ;;  %v4089_v3 = vrot.slane %v14560_v60, 2  ;;  %v4427_v34 = vunpack.c.l.b16 %v4092_v40  ;;  %v4065_v63 = vrot.slane %v17344_v12, 2  ;;  %v11237_v58 = vld [vmem:[#allocation6 + $0x820] ss:$16 sps:$4 sm:$0xff]   ;;  %v4064_v0 = vrot.slane %v17347_v32, 2 }
 0x398   :  { %7385 = vmatprep.subr.bf16.mxu1 %v11224_v51  ;;  %7235 = vmatpush1.bf16.msra.mxu0 %v11225_v20  ;;  %v14677_v9 = vsel %vm648_vm3, %v4058_v11, %v17339_v25  ;;  %v11239_v51 = vld [vmem:[#allocation6 + $0x824] ss:$16 sps:$4 sm:$0xff]   ;;  %v4417_v20 = vunpack.c.h.b16 %v14670_v49  ;;  %17341 = vst [vmem:[#allocation140_spill] sm:$0xff] %v14682_v23  ;;  %17342 = vst [vmem:[#allocation90_spill] sm:$0xff] %v14684_v5  ;;  %v11236_v25 = vld [vmem:[#allocation6 + $0x4c] ss:$16 sps:$4 sm:$0xff]   ;;  %v4429_v44 = vunpack.c.l.b16 %v4141_v28 }
 0x399   :  { %17340 = vst [vmem:[#allocation63_spill] sm:$0xff] %v14677_v9  ;;  %7236 = vmatprep.subr.bf16.mxu0 %v11233_v31  ;;  %v14688_v40 = vsel %vm648_vm3, %v4088_v13, %v4089_v3  ;;  %v4140_v31 = vrot.slane %v14550_v42, 3  ;;  %v4426_v10 = vunpack.c.l.b16 %v4089_v3  ;;  %v4137_v13 = vrot.slane %v14555_v38, 3 }
 0x39a   :  { %v14690_v11 = vpack.c.b16 %v4427_v34, %v4417_v20  ;;  %v4416_v18 = vunpack.c.h.b16 %v14688_v40  ;;  %v17345_v34 = vrot.slane %v14138_v21, 3  ;;  %v4117_v3 = vrot.slane %v14252_v36, 3 }
 0x39b   :  { %7386 = vmatpush1.bf16.msra.mxu1 %v11222_v1  ;;  %v4138_v1 = vrot.slane %v14560_v60, 3 }
 0x39c   :  { %17343 = vst [vmem:[#allocation62_spill] sm:$0xff] %v14690_v11  ;;  %7387 = vmatprep.subr.bf16.mxu1 %v11230_v2  ;;  %7237 = vmatpush1.bf16.msra.mxu0 %v11231_v45  ;;  %v14702_v20 = vsel %vm4094_vm4, %v4110_v35, %v17345_v34  ;;  %v14706_v2 = vsel %vm4094_vm4, %v4140_v31, %v4141_v28  ;;  %v17349_v31 = vrot.slane %v14252_v36, 2 }
 0x39d   :  { %6983 = vmatmul.mubr.bf16.gmra.mxu0 %v14677_v9  ;;  %17346 = vst [vmem:[#allocation88_spill] sm:$0xff] %v14702_v20  ;;  %7238 = vmatprep.subr.bf16.mxu0 %v11239_v51  ;;  %v14711_v45 = vpack.c.b16 %v4426_v10, %v4416_v18  ;;  %v14714_v9 = vsel %vm4094_vm4, %v4137_v13, %v4138_v1  ;;  %v4419_v35 = vunpack.c.h.b16 %v14706_v2  ;;  %v4297_v51 = vunpack.c.h.b16 %v14667_v22  ;;  %v11242_v10 = vld [vmem:[#allocation6 + $0x2c] ss:$16 sps:$4 sm:$0xff]   ;;  %v11243_v13 = vld [vmem:[#allocation6 + $0x800] ss:$16 sps:$4 sm:$0xff]  }
 0x39e   :  { %6992 = vmatprep.mubr.bf16.mxu0 %v14682_v23  ;;  %7126 = vmatmul.mubr.bf16.gmra.mxu1 %v14684_v5  ;;  %v4307_v34 = vunpack.c.l.b16 %v17349_v31  ;;  %v11234_v23 = vld [vmem:[#allocation6 + $0x48] ss:$16 sps:$4 sm:$0xff]   ;;  %v4066_v5 = vsel %vm648_vm3, %v4064_v0, %v4065_v63  ;;  %v4116_v18 = vrot.slane %v14226_v48, 3  ;;  %v4418_v33 = vunpack.c.h.b16 %v14714_v9  ;;  %v11251_v22 = vld [vmem:[#allocation6 + $0x9e4] ss:$16 sps:$4 sm:$0xff]  }
 0x39f   :  { %17348 = vst [vmem:[#allocation65_spill] sm:$0xff] %v14711_v45  ;;  %7135 = vmatprep.mubr.bf16.mxu1 %v14702_v20  ;;  %7388 = vmatpush1.bf16.msra.mxu1 %v11228_v57  ;;  %v4428_v8 = vunpack.c.l.b16 %v4138_v1  ;;  %v4108_v20 = vrot.slane %v14133_v50, 3  ;;  %v14725_v17 = vpack.c.b16 %v4429_v44, %v4419_v35  ;;  %v17352_v0 = vrot.slane %v14133_v50, 2  ;;  %v11249_v1 = vld [vmem:[#allocation6 + $0x9e0] ss:$16 sps:$4 sm:$0xff]   ;;  %v6648_v35 = vpop.f32.mrf.mxu0 }
 0x3a0   :  { %7389 = vmatprep.subr.bf16.mxu1 %v11236_v25  ;;  %7239 = vmatpush1.bf16.msra.mxu0 %v11237_v58  ;;  %v4118_v57 = vsel %vm4094_vm4, %v4116_v18, %v4117_v3  ;;  %v4107_v25 = vrot.slane %v17338_v15, 3  ;;  %v11240_v58 = vld [vmem:[#allocation6 + $0x28] ss:$16 sps:$4 sm:$0xff]   ;;  %v14735_v30 = vpack.c.b16 %v4307_v34, %v4297_v51  ;;  %v4752_v44 = vld [vmem:[#allocation7] sm:$0xf]  ;;  %v4296_v34 = vunpack.c.h.b16 %v4066_v5 }
 0x3a1   :  { %7240 = vmatprep.subr.bf16.mxu0 %v11245_v54  ;;  %17350 = vst [vmem:[#allocation91_spill] sm:$0xff] %v14725_v17  ;;  %v14728_v28 = vpack.c.b16 %v4428_v8, %v4418_v33  ;;  %v14732_v31 = vcombine.low %v17352_v0, %v4066_v5  ;;  %v11248_v54 = vld [vmem:[#allocation6 + $0xc] ss:$16 sps:$4 sm:$0xff]   ;;  %v17356_v33 = vrot.slane %v14138_v21, 3  ;;  %v11257_v51 = vld [vmem:[#allocation6 + $0x9c4] ss:$16 sps:$4 sm:$0xff]   ;;  %v6650_v55 = vpop.f32.mrf.mxu0  ;;  %v4309_v5 = vunpack.c.l.b16 %v4117_v3 }
 0x3a2   :  { %17354 = vst [vmem:[#allocation67_spill] sm:$0xff] %v14735_v30  ;;  %v14739_v8 = vsel %vm4094_vm4, %v4107_v25, %v4108_v20  ;;  %v11246_v0 = vld [vmem:[#allocation6 + $0x8] ss:$16 sps:$4 sm:$0xff]   ;;  %v11261_v3 = vld [vmem:[#allocation6 + $0x9a0] ss:$16 sps:$4 sm:$0xff]  }
 0x3a3   :  { %17351 = vst [vmem:[#allocation64_spill] sm:$0xff] %v14728_v28  ;;  %17353 = vst [vmem:[#allocation66_spill] sm:$0xff] %v14732_v31  ;;  %7390 = vmatpush1.bf16.msra.mxu1 %v11234_v23  ;;  %v14743_v18 = vcombine.low %v17356_v33, %v4118_v57  ;;  %v4114_v23 = vrot.slane %v17344_v12, 3  ;;  %v17358_v25 = vld [vmem:[#allocation75_spill] sm:$0xff] }
 0x3a4   :  { %7391 = vmatprep.subr.bf16.mxu1 %v11242_v10  ;;  %7241 = vmatpush1.bf16.msra.mxu0 %v11243_v13  ;;  %17355 = vst [vmem:[#allocation141_spill] sm:$0xff] %v14739_v8  ;;  %v4306_v10 = vunpack.c.l.b16 %v4065_v63  ;;  %v4113_v13 = vrot.slane %v17347_v32, 3  ;;  %v11263_v63 = vld [vmem:[#allocation6 + $0x9a4] ss:$16 sps:$4 sm:$0xff]  }
 0x3a5   :  { %6993 = vmatmul.mubr.bf16.gmra.mxu0 %v14732_v31  ;;  %17357 = vst [vmem:[#allocation93_spill] sm:$0xff] %v14743_v18  ;;  %7242 = vmatprep.subr.bf16.mxu0 %v11251_v22  ;;  %v17359_v31 = vsub.s32 0, %v17358_v25  ;;  %v11254_v22 = vld [vmem:[#allocation6 + $0x1ec] ss:$16 sps:$4 sm:$0xff]  }
 0x3a6   :  { %7002 = vmatprep.mubr.bf16.mxu0 %v14735_v30  ;;  %7136 = vmatmul.mubr.bf16.gmra.mxu1 %v14739_v8  ;;  %v4074_v30 = vrot.slane %v14340_v16, 2  ;;  %v4115_v8 = vsel %vm4094_vm4, %v4113_v13, %v4114_v23  ;;  %v14760_v27 = vpack.c.b16 %v4306_v10, %v4296_v34  ;;  %v4080_v13 = vrot.slane %v14429_v26, 2 }
 0x3a7   :  { %7145 = vmatprep.mubr.bf16.mxu1 %v14743_v18  ;;  %7392 = vmatpush1.bf16.msra.mxu1 %v11240_v58  ;;  %v14752_v33 = vrot.slane %v4752_v44, %v17359_v31  ;;  %v4299_v18 = vunpack.c.h.b16 %v4118_v57  ;;  %v17360_v58 = vsub.s32 1, %v17358_v25  ;;  %v17362_v31 = vld [vmem:[#allocation117_spill] sm:$0xff]  ;;  %v14764_v12 = vcombine.low %v4108_v20, %v4115_v8  ;;  %v11260_v57 = vld [vmem:[#allocation6 + $0x1cc] ss:$16 sps:$4 sm:$0xff]  }
 0x3a8   :  { %7393 = vmatprep.subr.bf16.mxu1 %v11248_v54  ;;  %7243 = vmatpush2.bf16.msra.mxu0 %v11249_v1  ;;  %17361 = vst [vmem:[#allocation68_spill] sm:$0xff] %v14760_v27  ;;  %v4073_v54 = vrot.slane %v17362_v31, 2  ;;  %v11252_v1 = vld [vmem:[#allocation6 + $0x1e8] ss:$16 sps:$4 sm:$0xff]   ;;  %v6801_v10 = vpop.f32.mrf.mxu1  ;;  %v11266_v25 = vld [vmem:[#allocation6 + $0x1ac] ss:$16 sps:$4 sm:$0xff]  }
 0x3a9   :  { %7244 = vmatprep.subr.bf16.mxu0 %v11257_v51  ;;  %v14758_v47 = vrot.slane %v4752_v44, %v17360_v58  ;;  %v6649_v32 = vadd.f32 %v6648_v35, %v14752_v33  ;;  %17363 = vst [vmem:[#allocation142_spill] sm:$0xff] %v14764_v12  ;;  %v6652_v51 = vpop.f32.mrf.mxu0  ;;  %v14770_v34 = vpack.c.b16 %v4309_v5, %v4299_v18  ;;  %v4079_v18 = vrot.slane %v14415_v53, 2  ;;  %v11258_v5 = vld [vmem:[#allocation6 + $0x1c8] ss:$16 sps:$4 sm:$0xff]  }
 0x3aa   :  { %v14768_v44 = vsel %vm648_vm3, %v4073_v54, %v4074_v30  ;;  %v6803_v35 = vpop.f32.mrf.mxu1  ;;  %v4308_v54 = vunpack.c.l.b16 %v4114_v23  ;;  %v4122_v23 = vrot.slane %v17362_v31, 3 }
 0x3ab   :  { %7394 = vmatpush1.bf16.msra.mxu1 %v11246_v0  ;;  %17364 = vst [vmem:[#allocation143_spill] sm:$0xff] %v14768_v44  ;;  %17365 = vst [vmem:[#allocation144_spill] sm:$0xff] %v14770_v34  ;;  %v11269_v0 = vld [vmem:[#allocation6 + $0x984] ss:$16 sps:$4 sm:$0xff]   ;;  %v6651_v20 = vadd.f32 %v6650_v55, %v14758_v47  ;;  %v4298_v55 = vunpack.c.h.b16 %v4115_v8 }
 0x3ac   :  { %7395 = vmatprep.subr.bf16.mxu1 %v11254_v22  ;;  %7245 = vmatpush2.bf16.msra.mxu0 %v11255_v7  ;;  %v14776_v7 = vadd.f32 %v6801_v10, %v6649_v32  ;;  %v11267_v32 = vld [vmem:[#allocation6 + $0x980] ss:$16 sps:$4 sm:$0xff]   ;;  %v6805_v10 = vpop.f32.mrf.mxu1  ;;  %v11275_v22 = vld [vmem:[#allocation6 + $0x964] ss:$16 sps:$4 sm:$0xff]  }
 0x3ad   :  { %7003 = vmatmul.mubr.bf16.gmra.mxu0 %v14760_v27  ;;  %7246 = vmatprep.subr.bf16.mxu0 %v11263_v63  ;;  %v6653_v63 = vadd.f32 %v6652_v51, %v14752_v33  ;;  %v14782_v58 = vadd.f32 %v6803_v35, %v6651_v20  ;;  %v17370_v51 = vrot.slane %v14323_v59, 2  ;;  %v4187_v20 = vrot.slane %v14560_v60, 4  ;;  %v14797_v35 = vpop.f32.mrf.mxu0 }
 0x3ae   :  { %7012 = vmatprep.mubr.bf16.mxu0 %v14768_v44  ;;  %7146 = vmatmul.mubr.bf16.gmra.mxu1 %v14764_v12  ;;  %17366 = vst [vmem:[#allocation97_spill] sm:$0xff] %v14776_v7  ;;  %v17368_v12 = vld [vmem:[#allocation116_spill] sm:$0xff]  ;;  %v4081_v44 = vsel %vm648_vm3, %v4079_v18, %v4080_v13  ;;  %17372 = vst [vmem:[#allocation95_spill] sm:$0xff] %v14797_v35  ;;  %v14801_v18 = vpack.c.b16 %v4308_v54, %v4298_v55  ;;  %v4190_v60 = vrot.slane %v14569_v19, 4 }
 0x3af   :  { %7155 = vmatprep.mubr.bf16.mxu1 %v14770_v34  ;;  %7396 = vmatpush2.bf16.msra.mxu1 %v11252_v1  ;;  %17367 = vst [vmem:[#allocation92_spill] sm:$0xff] %v14782_v58  ;;  %v4070_v34 = vrot.slane %v17368_v12, 2  ;;  %v14786_v27 = vadd.f32 %v6805_v10, %v6653_v63  ;;  %v16684_v1 = vrot.slane %v14340_v16, 3  ;;  %v4077_v63 = vrot.slane %v14406_v6, 2  ;;  %v11273_v10 = vld [vmem:[#allocation6 + $0x960] ss:$16 sps:$4 sm:$0xff]   ;;  %v14810_v54 = vpop.f32.mrf.mxu0 }
 0x3b0   :  { %7397 = vmatprep.subr.bf16.mxu1 %v11260_v57  ;;  %7247 = vmatpush2.bf16.msra.mxu0 %v11261_v3  ;;  %v11264_v57 = vld [vmem:[#allocation6 + $0x1a8] ss:$16 sps:$4 sm:$0xff]   ;;  %v4186_v3 = vrot.slane %v14555_v38, 4  ;;  %17374 = vst [vmem:[#allocation94_spill] sm:$0xff] %v14801_v18  ;;  %v4189_v38 = vrot.slane %v14550_v42, 4  ;;  %v4430_v55 = vunpack.c.l.b16 %v4187_v20  ;;  %v4129_v42 = vrot.slane %v14429_v26, 3 }
 0x3b1   :  { %7248 = vmatprep.subr.bf16.mxu0 %v11269_v0  ;;  %17369 = vst [vmem:[#allocation69_spill] sm:$0xff] %v14786_v27  ;;  %v14792_v8 = vsel %vm648_vm3, %v4070_v34, %v17370_v51  ;;  %v14799_v0 = vcombine.low %v4074_v30, %v4081_v44  ;;  %v11272_v34 = vld [vmem:[#allocation6 + $0x18c] ss:$16 sps:$4 sm:$0xff]   ;;  %v4357_v51 = vunpack.c.h.b16 %v4081_v44  ;;  %v11279_v35 = vld [vmem:[#allocation6 + $0x940] ss:$16 sps:$4 sm:$0xff]   ;;  %v4120_v44 = vrot.slane %v14323_v59, 3 }
 0x3b2   :  { %17371 = vst [vmem:[#allocation96_spill] sm:$0xff] %v14792_v8  ;;  %v14808_v30 = vsel %vm4143_vm5, %v4186_v3, %v4187_v20  ;;  %v4367_v3 = vunpack.c.l.b16 %v4080_v13  ;;  %v11270_v20 = vld [vmem:[#allocation6 + $0x188] ss:$16 sps:$4 sm:$0xff]   ;;  %v11287_v13 = vld [vmem:[#allocation6 + $0x924] ss:$16 sps:$4 sm:$0xff]  }
 0x3b3   :  { %7398 = vmatpush2.bf16.msra.mxu1 %v11258_v5  ;;  %17373 = vst [vmem:[#allocation145_spill] sm:$0xff] %v14799_v0  ;;  %v11281_v5 = vld [vmem:[#allocation6 + $0x944] ss:$16 sps:$4 sm:$0xff]   ;;  %v4420_v19 = vunpack.c.h.b16 %v14808_v30 }
 0x3b4   :  { %7399 = vmatprep.subr.bf16.mxu1 %v11266_v25  ;;  %7249 = vmatpush2.bf16.msra.mxu0 %v11267_v32  ;;  %v14817_v25 = vsel %vm4094_vm4, %v4122_v23, %v16684_v1  ;;  %v4128_v23 = vrot.slane %v14415_v53, 3  ;;  %v11278_v1 = vld [vmem:[#allocation6 + $0x16c] ss:$16 sps:$4 sm:$0xff]  }
 0x3b5   :  { %7013 = vmatmul.mubr.bf16.gmra.mxu0 %v14792_v8  ;;  %7250 = vmatprep.subr.bf16.mxu0 %v11275_v22  ;;  %17375 = vst [vmem:[#allocation72_spill] sm:$0xff] %v14817_v25  ;;  %v17376_v22 = vld [vmem:[#allocation78_spill] sm:$0xff]  ;;  %v14829_v58 = vpack.c.b16 %v4430_v55, %v4420_v19  ;;  %v14842_v55 = vpack.c.b16 %v4367_v3, %v4357_v51 }
 0x3b6   :  { %7022 = vmatprep.mubr.bf16.mxu0 %v14799_v0  ;;  %7156 = vmatmul.mubr.bf16.gmra.mxu1 %v14801_v18  ;;  %v4076_v32 = vrot.slane %v17376_v22, 2  ;;  %v14824_v0 = vsel %vm4143_vm5, %v4189_v38, %v4190_v60  ;;  %v4431_v18 = vunpack.c.l.b16 %v4190_v60  ;;  %v4130_v38 = vsel %vm4094_vm4, %v4128_v23, %v4129_v42  ;;  %v11285_v19 = vld [vmem:[#allocation6 + $0x920] ss:$16 sps:$4 sm:$0xff]   ;;  %v11282_v3 = vld [vmem:[#allocation6 + $0x148] ss:$16 sps:$4 sm:$0xff]  }
 0x3b7   :  { %7165 = vmatprep.mubr.bf16.mxu1 %v14817_v25  ;;  %7400 = vmatpush2.bf16.msra.mxu1 %v11264_v57  ;;  %v4421_v27 = vunpack.c.h.b16 %v14824_v0  ;;  %17377 = vst [vmem:[#allocation98_spill] sm:$0xff] %v14829_v58  ;;  %v14832_v57 = vpop.f32.mrf.mxu0  ;;  %v11276_v25 = vld [vmem:[#allocation6 + $0x168] ss:$16 sps:$4 sm:$0xff]   ;;  %17381 = vst [vmem:[#allocation73_spill] sm:$0xff] %v14842_v55  ;;  %v4125_v51 = vrot.slane %v17376_v22, 3  ;;  %v4359_v58 = vunpack.c.h.b16 %v4130_v38 }
 0x3b8   :  { %v4078_v8 = vsel %vm648_vm3, %v4076_v32, %v4077_v63  ;;  %7401 = vmatprep.subr.bf16.mxu1 %v11272_v34  ;;  %7251 = vmatpush2.bf16.msra.mxu0 %v11273_v10  ;;  %v17379_v32 = vrot.slane %v14323_v59, 2  ;;  %v4119_v10 = vrot.slane %v17368_v12, 3 }
 0x3b9   :  { %7252 = vmatprep.subr.bf16.mxu0 %v11281_v5  ;;  %v14835_v60 = vpack.c.b16 %v4431_v18, %v4421_v27  ;;  %v11284_v5 = vld [vmem:[#allocation6 + $0x14c] ss:$16 sps:$4 sm:$0xff]   ;;  %v17383_v27 = vrot.slane %v14340_v16, 3  ;;  %v6662_v7 = vpop.f32.mrf.mxu0 }
 0x3ba   :  { %v14839_v34 = vcombine.low %v17379_v32, %v4078_v8  ;;  %v14846_v23 = vsel %vm4094_vm4, %v4119_v10, %v4120_v44  ;;  %v4126_v32 = vrot.slane %v14406_v6, 3  ;;  %v11288_v10 = vld [vmem:[#allocation6 + $0x900] ss:$16 sps:$4 sm:$0xff]  }
 0x3bb   :  { %17378 = vst [vmem:[#allocation70_spill] sm:$0xff] %v14835_v60  ;;  %7402 = vmatpush2.bf16.msra.mxu1 %v11270_v20  ;;  %17382 = vst [vmem:[#allocation118_spill] sm:$0xff] %v14846_v23  ;;  %v14850_v18 = vcombine.low %v17383_v27, %v4130_v38  ;;  %v11290_v20 = vld [vmem:[#allocation6 + $0x904] ss:$16 sps:$4 sm:$0xff]   ;;  %v11293_v27 = vld [vmem:[#allocation6 + $0x12c] ss:$16 sps:$4 sm:$0xff]   ;;  %v14859_v60 = vpop.f32.mrf.mxu0 }
 0x3bc   :  { %17380 = vst [vmem:[#allocation71_spill] sm:$0xff] %v14839_v34  ;;  %7403 = vmatprep.subr.bf16.mxu1 %v11278_v1  ;;  %7253 = vmatpush2.bf16.msra.mxu0 %v11279_v35  ;;  %v4356_v1 = vunpack.c.h.b16 %v4078_v8  ;;  %v4366_v35 = vunpack.c.l.b16 %v4077_v63  ;;  %v4085_v63 = vrot.slane %v14468_v43, 2 }
 0x3bd   :  { %7023 = vmatmul.mubr.bf16.gmra.mxu0 %v14839_v34  ;;  %17384 = vst [vmem:[#allocation119_spill] sm:$0xff] %v14850_v18  ;;  %7254 = vmatprep.subr.bf16.mxu0 %v11287_v13  ;;  %v4086_v13 = vrot.slane %v14499_v56, 2  ;;  %v4127_v34 = vsel %vm4094_vm4, %v4125_v51, %v4126_v32 }
 0x3be   :  { %7032 = vmatprep.mubr.bf16.mxu0 %v14842_v55  ;;  %7166 = vmatmul.mubr.bf16.gmra.mxu1 %v14846_v23  ;;  %v4369_v55 = vunpack.c.l.b16 %v4129_v42  ;;  %v11299_v23 = vld [vmem:[#allocation6 + $0x2ec] ss:$16 sps:$4 sm:$0xff]   ;;  %v14861_v8 = vpack.c.b16 %v4366_v35, %v4356_v1  ;;  %v14875_v1 = vpop.f32.mrf.mxu1  ;;  %v4083_v35 = vrot.slane %v14481_v14, 2  ;;  %v4358_v51 = vunpack.c.h.b16 %v4127_v34 }
 0x3bf   :  { %7175 = vmatprep.mubr.bf16.mxu1 %v14850_v18  ;;  %7404 = vmatpush2.bf16.msra.mxu1 %v11276_v25  ;;  %v11291_v25 = vld [vmem:[#allocation6 + $0x128] ss:$16 sps:$4 sm:$0xff]   ;;  %v11296_v18 = vld [vmem:[#allocation6 + $0x10c] ss:$16 sps:$4 sm:$0xff]   ;;  %v14868_v42 = vsel %vm648_vm3, %v4085_v63, %v4086_v13  ;;  %v4135_v63 = vrot.slane %v14499_v56, 3 }
 0x3c0   :  { %7405 = vmatprep.subr.bf16.mxu1 %v11284_v5  ;;  %7255 = vmatpush2.bf16.msra.mxu0 %v11285_v19  ;;  %17385 = vst [vmem:[#allocation100_spill] sm:$0xff] %v14861_v8  ;;  %v14864_v19 = vcombine.low %v4120_v44, %v4127_v34  ;;  %17387 = vst [vmem:[#allocation74_spill] sm:$0xff] %v14868_v42  ;;  %v14870_v38 = vpack.c.b16 %v4369_v55, %v4359_v58  ;;  %v11294_v44 = vld [vmem:[#allocation6 + $0x108] ss:$16 sps:$4 sm:$0xff]  }
 0x3c1   :  { %7256 = vmatprep.subr.bf16.mxu0 %v11290_v20  ;;  %v6659_v58 = vadd.f32 %v14810_v54, %v14752_v33 }
 0x3c2   :  { %v6668_v5 = vpop.f32.mrf.mxu0  ;;  %17386 = vst [vmem:[#allocation120_spill] sm:$0xff] %v14864_v19  ;;  %17388 = vst [vmem:[#allocation24_spill] sm:$0xff] %v14870_v38 }
 0x3c3   :  { %7406 = vmatpush2.bf16.msra.mxu1 %v11282_v3  ;;  %v4368_v3 = vunpack.c.l.b16 %v4126_v32  ;;  %v4134_v32 = vrot.slane %v14468_v43, 3 }
 0x3c4   :  { %7257 = vmatpush2.bf16.msra.mxu0 %v11288_v10  ;;  %7407 = vmatprep.subr.bf16.mxu1 %v11293_v27  ;;  %v6670_v20 = vpop.f32.mrf.mxu0  ;;  %v11302_v10 = vld [vmem:[#allocation6 + $0x4ec] ss:$16 sps:$4 sm:$0xff]   ;;  %v4082_v27 = vrot.slane %v14462_v46, 2 }
 0x3c5   :  { %7033 = vmatmul.mubr.bf16.gmra.mxu0 %v14861_v8  ;;  %7532 = vmatprep.subr.bf16.mxu0 %v11299_v23  ;;  %v14892_v54 = vpack.c.b16 %v4368_v3, %v4358_v51 }
 0x3c6   :  { %7042 = vmatprep.mubr.bf16.mxu0 %v14868_v42  ;;  %7176 = vmatmul.mubr.bf16.gmra.mxu1 %v14864_v19  ;;  %v6672_v23 = vpop.f32.mrf.mxu0  ;;  %v14887_v34 = vsel %vm648_vm3, %v4082_v27, %v4083_v35  ;;  %v6663_v42 = vadd.f32 %v6662_v7, %v14752_v33  ;;  %v6669_v7 = vadd.f32 %v6668_v5, %v14752_v33 }
 0x3c7   :  { %7185 = vmatprep.mubr.bf16.mxu1 %v14870_v38  ;;  %7408 = vmatpush2.bf16.msra.mxu1 %v11291_v25  ;;  %v6661_v25 = vadd.f32 %v14832_v57, %v14758_v47  ;;  %17389 = vst [vmem:[#allocation107_spill] sm:$0xff] %v14887_v34  ;;  %17391 = vst [vmem:[#allocation121_spill] sm:$0xff] %v14892_v54  ;;  %v14917_v27 = vcombine.low %v4083_v35, %v14688_v40 }
 0x3c8   :  { %7409 = vmatprep.subr.bf16.mxu1 %v11296_v18  ;;  %v14890_v18 = vcombine.low %v4086_v13, %v14670_v49  ;;  %v14904_v49 = vsel %vm4094_vm4, %v4134_v32, %v4135_v63  ;;  %v6673_v32 = vadd.f32 %v6672_v23, %v14752_v33 }
 0x3c9   :  { %v6811_v55 = vpop.f32.mrf.mxu1  ;;  %17392 = vst [vmem:[#allocation122_spill] sm:$0xff] %v14904_v49  ;;  %17393 = vst [vmem:[#allocation123_spill] sm:$0xff] %v14917_v27 }
 0x3ca   :  { %v14884_v38 = vadd.f32 %v6811_v55, %v6659_v58  ;;  %17390 = vst [vmem:[#allocation25_spill] sm:$0xff] %v14890_v18  ;;  %v6671_v58 = vadd.f32 %v6670_v20, %v14758_v47 }
 0x3cb   :  { %7410 = vmatpush2.bf16.msra.mxu1 %v11294_v44  ;;  %v6813_v19 = vpop.f32.mrf.mxu1  ;;  %v14899_v44 = vpop.f32.mrf.mxu0 }
 0x3cc   :  { %7685 = vmatprep.subr.bf16.mxu1 %v11302_v10  ;;  %v14896_v8 = vadd.f32 %v6813_v19, %v6661_v25  ;;  %v4132_v19 = vrot.slane %v14481_v14, 3 }
 0x3cd   :  { %7043 = vmatmul.mubr.bf16.gmra.mxu0 %v14887_v34  ;;  %v6815_v57 = vpop.f32.mrf.mxu1  ;;  %v6678_v3 = vpop.f32.mrf.mxu0 }
 0x3ce   :  { %7052 = vmatprep.mubr.bf16.mxu0 %v14890_v18  ;;  %7186 = vmatmul.mubr.bf16.gmra.mxu1 %v14892_v54  ;;  %v14906_v13 = vadd.f32 %v6815_v57, %v6663_v42  ;;  %v4131_v42 = vrot.slane %v14462_v46, 3  ;;  %v6679_v23 = vadd.f32 %v6678_v3, %v14752_v33  ;;  %v4154_v3 = vrot.slane %v14032_v4, 4 }
 0x3cf   :  { %7195 = vmatprep.mubr.bf16.mxu1 %v14904_v49  ;;  %v14909_v51 = vpop.f32.mrf.mxu1  ;;  %v14928_v49 = vcombine.low %v4135_v63, %v14706_v2  ;;  %v6680_v20 = vpop.f32.mrf.mxu0  ;;  %v4144_v4 = vrot.slane %v13892_v41, 4 }
 0x3d0   :  { %v14925_v5 = vsel %vm4094_vm4, %v4131_v42, %v4132_v19  ;;  %v6681_v2 = vadd.f32 %v6680_v20, %v14758_v47 }
 0x3d1   :  { %v6821_v10 = vpop.f32.mrf.mxu1  ;;  %17394 = vst [vmem:[#allocation124_spill] sm:$0xff] %v14925_v5  ;;  %17395 = vst [vmem:[#allocation101_spill] sm:$0xff] %v14928_v49 }
 0x3d2   :  { %v14914_v55 = vadd.f32 %v6821_v10, %v6669_v7  ;;  %v4148_v10 = vrot.slane %v13941_v39, 4 }
 0x3d3   :  { %v6823_v25 = vpop.f32.mrf.mxu1 }
 0x3d4   :  { %v14921_v57 = vadd.f32 %v6823_v25, %v6671_v58  ;;  %v6682_v58 = vpop.f32.mrf.mxu0  ;;  %v4147_v25 = vrot.slane %v13896_v62, 4 }
 0x3d5   :  { %7053 = vmatmul.mubr.bf16.gmra.mxu0 %v14917_v27  ;;  %v6825_v7 = vpop.f32.mrf.mxu1 }
 0x3d6   :  { %7062 = vmatprep.mubr.bf16.mxu0 %v14690_v11  ;;  %7196 = vmatmul.mubr.bf16.gmra.mxu1 %v14925_v5  ;;  %v14932_v40 = vadd.f32 %v6825_v7, %v6673_v32  ;;  %v14944_v32 = vcombine.low %v4132_v19, %v14714_v9  ;;  %v6683_v7 = vadd.f32 %v6682_v58, %v14752_v33  ;;  %v4153_v9 = vrot.slane %v14006_v37, 4  ;;  %v17406_v11 = vld [vmem:[#allocation110_spill] sm:$0xff] }
 0x3d7   :  { %7205 = vmatprep.mubr.bf16.mxu1 %v14928_v49  ;;  %v14935_v35 = vpop.f32.mrf.mxu1  ;;  %v14951_v39 = vsel %vm4143_vm5, %v4147_v25, %v4148_v10  ;;  %v4145_v19 = vrot.slane %v13928_v29, 4  ;;  %v4150_v29 = vrot.slane %v13991_v61, 4  ;;  %v4251_v5 = vunpack.c.l.b16 %v4154_v3  ;;  %v11308_v61 = vld [vmem:[#allocation6 + $0x4cc] ss:$16 sps:$4 sm:$0xff]  }
 0x3d8   :  { %17396 = vst [vmem:[#allocation99_spill] sm:$0xff] %v14944_v32  ;;  %17397 = vst [vmem:[#allocation126_spill] sm:$0xff] %v14951_v39  ;;  %v4155_v58 = vsel %vm4143_vm5, %v4153_v9, %v4154_v3  ;;  %v11303_v9 = vld [vmem:[#allocation6 + $0x2c8] ss:$16 sps:$4 sm:$0xff]  }
 0x3d9   :  { %v6831_v42 = vpop.f32.mrf.mxu1  ;;  %v17402_v3 = vld [vmem:[#allocation35_spill] sm:$0xff] }
 0x3da   :  { %v14940_v63 = vadd.f32 %v6831_v42, %v6679_v23 }
 0x3db   :  { %v6833_v54 = vpop.f32.mrf.mxu1 }
 0x3dc   :  { %v14947_v49 = vadd.f32 %v6833_v54, %v6681_v2  ;;  %v14960_v54 = vpop.f32.mrf.mxu0  ;;  %v11297_v2 = vld [vmem:[#allocation6 + $0x2e8] ss:$16 sps:$4 sm:$0xff]  }
 0x3dd   :  { %7063 = vmatmul.mubr.bf16.gmra.mxu0 %v14711_v45  ;;  %v6835_v20 = vpop.f32.mrf.mxu1  ;;  %v11309_v45 = vld [vmem:[#allocation6 + $0x2a8] ss:$16 sps:$4 sm:$0xff]  }
 0x3de   :  { %7206 = vmatmul.mubr.bf16.gmra.mxu1 %v14944_v32  ;;  %7258 = vmatprep.mubr.bf16.mxu0 %v14951_v39  ;;  %v14956_v23 = vadd.f32 %v6835_v20, %v6683_v7  ;;  %v14966_v32 = vsel %vm4143_vm5, %v4144_v4, %v4145_v19  ;;  %v14968_v7 = vcombine.low %v4148_v10, %v4155_v58  ;;  %v4151_v20 = vrot.slane %v14019_v24, 4  ;;  %v11311_v24 = vld [vmem:[#allocation6 + $0x2ac] ss:$16 sps:$4 sm:$0xff]  }
 0x3df   :  { %7215 = vmatprep.mubr.bf16.mxu1 %v14725_v17  ;;  %17398 = vst [vmem:[#allocation26_spill] sm:$0xff] %v14966_v32  ;;  %v11305_v17 = vld [vmem:[#allocation6 + $0x2cc] ss:$16 sps:$4 sm:$0xff]   ;;  %v4241_v4 = vunpack.c.h.b16 %v4155_v58 }
 0x3e0   :  { %17399 = vst [vmem:[#allocation125_spill] sm:$0xff] %v14968_v7  ;;  %v4152_v10 = vsel %vm4143_vm5, %v4150_v29, %v4151_v20  ;;  %v4250_v58 = vunpack.c.l.b16 %v4151_v20  ;;  %v11314_v29 = vld [vmem:[#allocation6 + $0x4ac] ss:$16 sps:$4 sm:$0xff]  }
 0x3e1   :  { %v6688_v42 = vpop.f32.mrf.mxu0 }
 0x3e2   :  { %v6689_v20 = vadd.f32 %v6688_v42, %v14752_v33  ;;  %v17405_v42 = vld [vmem:[#allocation36_spill] sm:$0xff] }
 0x3e3   :  { %v6690_v25 = vpop.f32.mrf.mxu0 }
 0x3e5   :  { %7259 = vmatmul.mubr.bf16.vlgmr.msra.gmra.mxu0 %v14966_v32  ;;  %v14975_v37 = vpop.f32.mrf.mxu0  ;;  %v14981_v32 = vcombine.low %v4145_v19, %v4152_v10  ;;  %v11306_v19 = vld [vmem:[#allocation6 + $0x4c8] ss:$16 sps:$4 sm:$0xff]  }
 0x3e6   :  { %7216 = vmatmul.mubr.bf16.gmra.mxu1 %v14728_v28  ;;  %7268 = vmatprep.mubr.bf16.mxu0 %v14968_v7  ;;  %v11300_v28 = vld [vmem:[#allocation6 + $0x4e8] ss:$16 sps:$4 sm:$0xff]   ;;  %v14983_v7 = vpack.c.b16 %v4251_v5, %v4241_v4  ;;  %v4240_v5 = vunpack.c.h.b16 %v4152_v10  ;;  %v4160_v4 = vrot.slane %v14138_v21, 4 }
 0x3e7   :  { %7411 = vmatprep.mubr.bf16.mxu1 %v13896_v62  ;;  %7533 = vmatpush1.bf16.msra.mxu0 %v11297_v2  ;;  %v14979_v39 = vpop.f32.mrf.mxu0  ;;  %17400 = vst [vmem:[#allocation102_spill] sm:$0xff] %v14981_v32  ;;  %v11317_v2 = vld [vmem:[#allocation6 + $0x28c] ss:$16 sps:$4 sm:$0xff]   ;;  %v11321_v10 = vld [vmem:[#allocation6 + $0x268] ss:$16 sps:$4 sm:$0xff]  }
 0x3e8   :  { %7534 = vmatprep.subr.bf16.mxu0 %v11305_v17  ;;  %17401 = vst [vmem:[#allocation34_spill] sm:$0xff] %v14983_v7 }
 0x3eb   :  { %7535 = vmatpush1.bf16.msra.mxu0 %v11303_v9  ;;  %v11315_v9 = vld [vmem:[#allocation6 + $0x288] ss:$16 sps:$4 sm:$0xff]  }
 0x3ec   :  { %7536 = vmatprep.subr.bf16.mxu0 %v11311_v24  ;;  %v14985_v62 = vpop.f32.mrf.mxu0  ;;  %v11323_v24 = vld [vmem:[#allocation6 + $0x26c] ss:$16 sps:$4 sm:$0xff]  }
 0x3ed   :  { %7269 = vmatmul.mubr.bf16.gmra.mxu0 %v14981_v32  ;;  %v14994_v32 = vpop.f32.mrf.mxu1 }
 0x3ee   :  { %7278 = vmatprep.mubr.bf16.mxu0 %v14983_v7  ;;  %7412 = vmatmul.mubr.bf16.vlgmr.msra.gmra.mxu1 %v13892_v41  ;;  %v14990_v17 = vpop.f32.mrf.mxu0  ;;  %v14998_v41 = vpack.c.b16 %v4250_v58, %v4240_v5  ;;  %v11329_v5 = vld [vmem:[#allocation6 + $0x24c] ss:$16 sps:$4 sm:$0xff]  }
 0x3ef   :  { %7421 = vmatprep.mubr.bf16.mxu1 %v17402_v3  ;;  %7686 = vmatpush1.bf16.msra.mxu1 %v11300_v28  ;;  %v4159_v28 = vrot.slane %v14091_v52, 4  ;;  %v11312_v3 = vld [vmem:[#allocation6 + $0x4a8] ss:$16 sps:$4 sm:$0xff]  }
 0x3f0   :  { %7687 = vmatprep.subr.bf16.mxu1 %v11308_v61  ;;  %7537 = vmatpush1.bf16.msra.mxu0 %v11309_v45  ;;  %v14996_v7 = vpop.f32.mrf.mxu0  ;;  %17403 = vst [vmem:[#allocation27_spill] sm:$0xff] %v14998_v41  ;;  %v11320_v45 = vld [vmem:[#allocation6 + $0x48c] ss:$16 sps:$4 sm:$0xff]  }
 0x3f1   :  { %7538 = vmatprep.subr.bf16.mxu0 %v11317_v2  ;;  %v15004_v21 = vsel %vm4143_vm5, %v4159_v28, %v4160_v4  ;;  %v4166_v2 = vrot.slane %v14252_v36, 4  ;;  %v4157_v28 = vrot.slane %v14133_v50, 4  ;;  %v11318_v36 = vld [vmem:[#allocation6 + $0x488] ss:$16 sps:$4 sm:$0xff]   ;;  %v6695_v50 = vadd.f32 %v14979_v39, %v14758_v47  ;;  %v11332_v39 = vld [vmem:[#allocation6 + $0x44c] ss:$16 sps:$4 sm:$0xff]  }
 0x3f2   :  { %17404 = vst [vmem:[#allocation28_spill] sm:$0xff] %v15004_v21 }
 0x3f3   :  { %7688 = vmatpush1.bf16.msra.mxu1 %v11306_v19  ;;  %v6691_v19 = vadd.f32 %v6690_v25, %v14758_v47 }
 0x3f4   :  { %7689 = vmatprep.subr.bf16.mxu1 %v11314_v29  ;;  %7539 = vmatpush1.bf16.msra.mxu0 %v11315_v9  ;;  %v6704_v9 = vpop.f32.mrf.mxu0 }
 0x3f5   :  { %v6841_v61 = vpop.f32.mrf.mxu1  ;;  %7279 = vmatmul.mubr.bf16.gmra.mxu0 %v14998_v41  ;;  %7540 = vmatprep.subr.bf16.mxu0 %v11323_v24  ;;  %v4165_v41 = vrot.slane %v14226_v48, 4  ;;  %v6693_v24 = vadd.f32 %v14975_v37, %v14752_v33 }
 0x3f6   :  { %v15008_v58 = vadd.f32 %v6841_v61, %v6689_v20  ;;  %7288 = vmatprep.mubr.bf16.mxu0 %v15004_v21  ;;  %7422 = vmatmul.mubr.bf16.gmra.mxu1 %v17405_v42  ;;  %v11326_v20 = vld [vmem:[#allocation6 + $0x46c] ss:$16 sps:$4 sm:$0xff]   ;;  %v11327_v61 = vld [vmem:[#allocation6 + $0x248] ss:$16 sps:$4 sm:$0xff]   ;;  %v4156_v21 = vrot.slane %v17338_v15, 4  ;;  %v6708_v37 = vpop.f32.mrf.mxu0 }
 0x3f7   :  { %v6843_v29 = vpop.f32.mrf.mxu1  ;;  %7431 = vmatprep.mubr.bf16.mxu1 %v17406_v11  ;;  %7690 = vmatpush1.bf16.msra.mxu1 %v11312_v3  ;;  %v4167_v11 = vsel %vm4143_vm5, %v4165_v41, %v4166_v2  ;;  %v11335_v3 = vld [vmem:[#allocation6 + $0x22c] ss:$16 sps:$4 sm:$0xff]  }
 0x3f8   :  { %v15017_v25 = vadd.f32 %v6843_v29, %v6691_v19  ;;  %7691 = vmatprep.subr.bf16.mxu1 %v11320_v45  ;;  %7541 = vmatpush1.bf16.msra.mxu0 %v11321_v10  ;;  %v15026_v19 = vsel %vm4143_vm5, %v4156_v21, %v4157_v28  ;;  %v11324_v45 = vld [vmem:[#allocation6 + $0x468] ss:$16 sps:$4 sm:$0xff]   ;;  %v6699_v10 = vadd.f32 %v14985_v62, %v14752_v33  ;;  %v11341_v21 = vld [vmem:[#allocation6 + $0x20c] ss:$16 sps:$4 sm:$0xff]  }
 0x3f9   :  { %v6845_v42 = vpop.f32.mrf.mxu1  ;;  %7542 = vmatprep.subr.bf16.mxu0 %v11329_v5  ;;  %17407 = vst [vmem:[#allocation103_spill] sm:$0xff] %v15026_v19  ;;  %v15032_v41 = vcombine.low %v4160_v4, %v4167_v11  ;;  %v17410_v5 = vld [vmem:[#allocation40_spill] sm:$0xff]  ;;  %v17413_v62 = vld [vmem:[#allocation114_spill] sm:$0xff] }
 0x3fa   :  { %v15023_v48 = vadd.f32 %v6845_v42, %v6693_v24  ;;  %v4163_v18 = vrot.slane %v17410_v5, 4  ;;  %v11333_v24 = vld [vmem:[#allocation6 + $0x228] ss:$16 sps:$4 sm:$0xff]   ;;  %v4162_v4 = vrot.slane %v17413_v62, 4 }
 0x3fb   :  { %v6847_v27 = vpop.f32.mrf.mxu1  ;;  %7692 = vmatpush1.bf16.msra.mxu1 %v11318_v36  ;;  %17409 = vst [vmem:[#allocation129_spill] sm:$0xff] %v15032_v41  ;;  %v6701_v36 = vadd.f32 %v14990_v17, %v14758_v47  ;;  %v11330_v5 = vld [vmem:[#allocation6 + $0x448] ss:$16 sps:$4 sm:$0xff]  }
 0x3fc   :  { %v15030_v29 = vadd.f32 %v6847_v27, %v6695_v50  ;;  %7693 = vmatprep.subr.bf16.mxu1 %v11326_v20  ;;  %7543 = vmatpush1.bf16.msra.mxu0 %v11327_v61  ;;  %v17412_v27 = vld [vmem:[#allocation31_spill] sm:$0xff]  ;;  %v6710_v20 = vpop.f32.mrf.mxu0  ;;  %v4311_v50 = vunpack.c.l.b16 %v4166_v2  ;;  %v4164_v17 = vsel %vm4143_vm5, %v4162_v4, %v4163_v18 }
 0x3fd   :  { %v6851_v42 = vpop.f32.mrf.mxu1  ;;  %7289 = vmatmul.mubr.bf16.gmra.mxu0 %v15026_v19  ;;  %7544 = vmatprep.subr.bf16.mxu0 %v11335_v3  ;;  %v6703_v3 = vadd.f32 %v14996_v7, %v14752_v33  ;;  %v11336_v7 = vld [vmem:[#allocation6 + $0x428] ss:$16 sps:$4 sm:$0xff]  }
 0x3fe   :  { %17408 = vst [vmem:[#allocation127_spill] sm:$0xff] %v15030_v29  ;;  %v15038_v34 = vadd.f32 %v6851_v42, %v6699_v10  ;;  %7298 = vmatprep.mubr.bf16.mxu0 %v15032_v41  ;;  %7432 = vmatmul.mubr.bf16.gmra.mxu1 %v17412_v27  ;;  %v4301_v10 = vunpack.c.h.b16 %v4167_v11  ;;  %v11338_v42 = vld [vmem:[#allocation6 + $0x42c] ss:$16 sps:$4 sm:$0xff]   ;;  %v11339_v27 = vld [vmem:[#allocation6 + $0x208] ss:$16 sps:$4 sm:$0xff]   ;;  %v15052_v29 = vcombine.low %v4157_v28, %v4164_v17 }
 0x3ff   :  { %v6853_v61 = vpop.f32.mrf.mxu1  ;;  %7441 = vmatprep.mubr.bf16.mxu1 %v14091_v52  ;;  %7694 = vmatpush1.bf16.msra.mxu1 %v11324_v45  ;;  %v11347_v41 = vld [vmem:[#allocation6 + $0x3ec] ss:$16 sps:$4 sm:$0xff]   ;;  %v6705_v52 = vadd.f32 %v6704_v9, %v14758_v47  ;;  %v6712_v45 = vpop.f32.mrf.mxu0  ;;  %v6711_v28 = vadd.f32 %v6710_v20, %v14758_v47 }
 0x400   :  { %17411 = vst [vmem:[#allocation104_spill] sm:$0xff] %v15038_v34  ;;  %v15046_v19 = vadd.f32 %v6853_v61, %v6701_v36  ;;  %7695 = vmatprep.subr.bf16.mxu1 %v11332_v39  ;;  %7545 = vmatpush1.bf16.msra.mxu0 %v11333_v24  ;;  %17414 = vst [vmem:[#allocation108_spill] sm:$0xff] %v15052_v29  ;;  %v6709_v36 = vadd.f32 %v6708_v37, %v14752_v33  ;;  %v11344_v24 = vld [vmem:[#allocation6 + $0x40c] ss:$16 sps:$4 sm:$0xff]  }
 0x401   :  { %v6855_v62 = vpop.f32.mrf.mxu1  ;;  %7546 = vmatprep.subr.bf16.mxu0 %v11341_v21  ;;  %v15057_v39 = vpack.c.b16 %v4311_v50, %v4301_v10  ;;  %v11345_v21 = vld [vmem:[#allocation6 + $0x3e8] ss:$16 sps:$4 sm:$0xff]   ;;  %v11353_v9 = vld [vmem:[#allocation6 + $0x3cc] ss:$16 sps:$4 sm:$0xff]  }
 0x402   :  { %v15050_v2 = vadd.f32 %v6855_v62, %v6703_v3  ;;  %v17416_v50 = vld [vmem:[#allocation39_spill] sm:$0xff]  ;;  %v4310_v3 = vunpack.c.l.b16 %v4163_v18  ;;  %v11350_v20 = vld [vmem:[#allocation6 + $0x5ec] ss:$16 sps:$4 sm:$0xff]  }
 0x403   :  { %v6857_v34 = vpop.f32.mrf.mxu1  ;;  %7696 = vmatpush1.bf16.msra.mxu1 %v11330_v5  ;;  %17415 = vst [vmem:[#allocation130_spill] sm:$0xff] %v15057_v39  ;;  %v4300_v5 = vunpack.c.h.b16 %v4164_v17  ;;  %v11342_v10 = vld [vmem:[#allocation6 + $0x408] ss:$16 sps:$4 sm:$0xff]  }
 0x404   :  { %v15055_v11 = vadd.f32 %v6857_v34, %v6705_v52  ;;  %7697 = vmatprep.subr.bf16.mxu1 %v11338_v42  ;;  %7547 = vmatpush1.bf16.msra.mxu0 %v11339_v27  ;;  %v6714_v34 = vpop.f32.mrf.mxu0  ;;  %v6713_v42 = vadd.f32 %v6712_v45, %v14752_v33  ;;  %v11351_v27 = vld [vmem:[#allocation6 + $0x3c8] ss:$16 sps:$4 sm:$0xff]   ;;  %v4172_v52 = vrot.slane %v14340_v16, 4  ;;  %v4171_v45 = vrot.slane %v17362_v31, 4 }
 0x405   :  { %v6861_v4 = vpop.f32.mrf.mxu1  ;;  %7299 = vmatmul.mubr.bf16.gmra.mxu0 %v15052_v29  ;;  %7548 = vmatprep.subr.bf16.mxu0 %v11347_v41  ;;  %v15073_v17 = vpack.c.b16 %v4310_v3, %v4300_v5  ;;  %v17420_v5 = vld [vmem:[#allocation41_spill] sm:$0xff]  ;;  %v4177_v3 = vrot.slane %v14415_v53, 4 }
 0x406   :  { %v15061_v61 = vadd.f32 %v6861_v4, %v6709_v36  ;;  %7308 = vmatprep.mubr.bf16.mxu0 %v15057_v39  ;;  %7442 = vmatmul.mubr.bf16.gmra.mxu1 %v17338_v15  ;;  %v11359_v15 = vld [vmem:[#allocation6 + $0x3ac] ss:$16 sps:$4 sm:$0xff]   ;;  %v6715_v36 = vadd.f32 %v6714_v34, %v14758_v47  ;;  %v15080_v16 = vsel %vm4143_vm5, %v4171_v45, %v4172_v52  ;;  %v17446_v39 = vld [vmem:[#allocation111_spill] sm:$0xff]  ;;  %v17448_v29 = vld [vmem:[#allocation85_spill] sm:$0xff] }
 0x407   :  { %v6863_v37 = vpop.f32.mrf.mxu1  ;;  %7451 = vmatprep.mubr.bf16.mxu1 %v17416_v50  ;;  %7698 = vmatpush1.bf16.msra.mxu1 %v11336_v7  ;;  %17417 = vst [vmem:[#allocation29_spill] sm:$0xff] %v15073_v17  ;;  %v11348_v7 = vld [vmem:[#allocation6 + $0x5e8] ss:$16 sps:$4 sm:$0xff]   ;;  %17418 = vst [vmem:[#allocation128_spill] sm:$0xff] %v15080_v16  ;;  %v11365_v34 = vld [vmem:[#allocation6 + $0x38c] ss:$16 sps:$4 sm:$0xff]  }
 0x408   :  { %v15067_v41 = vadd.f32 %v6863_v37, %v6711_v28  ;;  %7699 = vmatprep.subr.bf16.mxu1 %v11344_v24  ;;  %7549 = vmatpush2.bf16.msra.mxu0 %v11345_v21  ;;  %v11356_v21 = vld [vmem:[#allocation6 + $0x5cc] ss:$16 sps:$4 sm:$0xff]   ;;  %v11357_v28 = vld [vmem:[#allocation6 + $0x3a8] ss:$16 sps:$4 sm:$0xff]  }
 0x409   :  { %v6865_v62 = vpop.f32.mrf.mxu1  ;;  %7550 = vmatprep.subr.bf16.mxu0 %v11353_v9  ;;  %v4178_v9 = vrot.slane %v14429_v26, 4  ;;  %v17419_v37 = vld [vmem:[#allocation115_spill] sm:$0xff] }
 0x40a   :  { %v15071_v4 = vadd.f32 %v6865_v62, %v6713_v42  ;;  %v4169_v42 = vrot.slane %v14323_v59, 4  ;;  %v11371_v62 = vld [vmem:[#allocation6 + $0x36c] ss:$16 sps:$4 sm:$0xff]   ;;  %v4175_v59 = vrot.slane %v14406_v6, 4 }
 0x40b   :  { %v6867_v18 = vpop.f32.mrf.mxu1  ;;  %7700 = vmatpush1.bf16.msra.mxu1 %v11342_v10  ;;  %v11354_v10 = vld [vmem:[#allocation6 + $0x5c8] ss:$16 sps:$4 sm:$0xff]   ;;  %v4179_v26 = vsel %vm4143_vm5, %v4177_v3, %v4178_v9 }
 0x40c   :  { %v15076_v24 = vadd.f32 %v6867_v18, %v6715_v36  ;;  %7701 = vmatprep.subr.bf16.mxu1 %v11350_v20  ;;  %7551 = vmatpush2.bf16.msra.mxu0 %v11351_v27  ;;  %v6718_v50 = vpop.f32.mrf.mxu0  ;;  %v11362_v20 = vld [vmem:[#allocation6 + $0x5ac] ss:$16 sps:$4 sm:$0xff]   ;;  %v11363_v27 = vld [vmem:[#allocation6 + $0x388] ss:$16 sps:$4 sm:$0xff]   ;;  %v15093_v53 = vcombine.low %v4172_v52, %v4179_v26  ;;  %v4361_v3 = vunpack.c.h.b16 %v4179_v26 }
 0x40d   :  { %7309 = vmatmul.mubr.bf16.gmra.mxu0 %v15073_v17  ;;  %7552 = vmatprep.subr.bf16.mxu0 %v11359_v15  ;;  %v4168_v15 = vrot.slane %v17368_v12, 4  ;;  %v11360_v18 = vld [vmem:[#allocation6 + $0x5a8] ss:$16 sps:$4 sm:$0xff]  }
 0x40e   :  { %7318 = vmatprep.mubr.bf16.mxu0 %v15080_v16  ;;  %7452 = vmatmul.mubr.bf16.gmra.mxu1 %v17419_v37  ;;  %v6720_v36 = vpop.f32.mrf.mxu0  ;;  %17422 = vst [vmem:[#allocation30_spill] sm:$0xff] %v15093_v53  ;;  %v4174_v37 = vrot.slane %v17376_v22, 4  ;;  %v11366_v52 = vld [vmem:[#allocation6 + $0x588] ss:$16 sps:$4 sm:$0xff]  }
 0x40f   :  { %7461 = vmatprep.mubr.bf16.mxu1 %v17420_v5  ;;  %7702 = vmatpush2.bf16.msra.mxu1 %v11348_v7  ;;  %v15091_v45 = vsel %vm4143_vm5, %v4168_v15, %v4169_v42  ;;  %v11368_v7 = vld [vmem:[#allocation6 + $0x58c] ss:$16 sps:$4 sm:$0xff]   ;;  %v11372_v22 = vld [vmem:[#allocation6 + $0x568] ss:$16 sps:$4 sm:$0xff]  }
 0x410   :  { %7703 = vmatprep.subr.bf16.mxu1 %v11356_v21  ;;  %7553 = vmatpush2.bf16.msra.mxu0 %v11357_v28  ;;  %17421 = vst [vmem:[#allocation132_spill] sm:$0xff] %v15091_v45  ;;  %v11369_v21 = vld [vmem:[#allocation6 + $0x368] ss:$16 sps:$4 sm:$0xff]   ;;  %v11377_v28 = vld [vmem:[#allocation6 + $0x34c] ss:$16 sps:$4 sm:$0xff]   ;;  %v6722_v5 = vpop.f32.mrf.mxu0  ;;  %v4176_v6 = vsel %vm4143_vm5, %v4174_v37, %v4175_v59 }
 0x411   :  { %7554 = vmatprep.subr.bf16.mxu0 %v11365_v34  ;;  %v17423_v34 = vld [vmem:[#allocation42_spill] sm:$0xff]  ;;  %v17443_v16 = vld [vmem:[#allocation109_spill] sm:$0xff] }
 0x412   :  { %v6724_v15 = vpop.f32.mrf.mxu0  ;;  %v17445_v17 = vld [vmem:[#allocation82_spill] sm:$0xff] }
 0x413   :  { %7704 = vmatpush2.bf16.msra.mxu1 %v11354_v10  ;;  %v4371_v10 = vunpack.c.l.b16 %v4178_v9  ;;  %v11386_v9 = vld [vmem:[#allocation6 + $0x30c] ss:$16 sps:$4 sm:$0xff]  }
 0x414   :  { %7705 = vmatprep.subr.bf16.mxu1 %v11362_v20  ;;  %7555 = vmatpush2.bf16.msra.mxu0 %v11363_v27  ;;  %v11374_v20 = vld [vmem:[#allocation6 + $0x56c] ss:$16 sps:$4 sm:$0xff]   ;;  %v11375_v27 = vld [vmem:[#allocation6 + $0x348] ss:$16 sps:$4 sm:$0xff]  }
 0x415   :  { %7319 = vmatmul.mubr.bf16.gmra.mxu0 %v15091_v45  ;;  %7556 = vmatprep.subr.bf16.mxu0 %v11371_v62  ;;  %v11383_v62 = vld [vmem:[#allocation6 + $0x32c] ss:$16 sps:$4 sm:$0xff]  }
 0x416   :  { %7328 = vmatprep.mubr.bf16.mxu0 %v15093_v53  ;;  %7462 = vmatmul.mubr.bf16.gmra.mxu1 %v17423_v34  ;;  %v15102_v53 = vcombine.low %v4169_v42, %v4176_v6  ;;  %v15104_v34 = vpack.c.b16 %v4371_v10, %v4361_v3  ;;  %v6719_v42 = vadd.f32 %v6718_v50, %v14752_v33  ;;  %v11384_v10 = vld [vmem:[#allocation6 + $0x308] ss:$16 sps:$4 sm:$0xff]   ;;  %v11395_v50 = vld [vmem:[#allocation6 + $0x6ec] ss:$16 sps:$4 sm:$0xff]  }
 0x417   :  { %7471 = vmatprep.mubr.bf16.mxu1 %v17362_v31  ;;  %7706 = vmatpush2.bf16.msra.mxu1 %v11360_v18  ;;  %v11380_v31 = vld [vmem:[#allocation6 + $0x54c] ss:$16 sps:$4 sm:$0xff]   ;;  %v11381_v18 = vld [vmem:[#allocation6 + $0x328] ss:$16 sps:$4 sm:$0xff]  }
 0x418   :  { %7707 = vmatprep.subr.bf16.mxu1 %v11368_v7  ;;  %7557 = vmatpush2.bf16.msra.mxu0 %v11369_v21  ;;  %17424 = vst [vmem:[#allocation105_spill] sm:$0xff] %v15102_v53  ;;  %17425 = vst [vmem:[#allocation135_spill] sm:$0xff] %v15104_v34  ;;  %v17426_v7 = vld [vmem:[#allocation137_spill] sm:$0xff]  ;;  %v4360_v21 = vunpack.c.h.b16 %v4176_v6  ;;  %v6723_v6 = vadd.f32 %v6722_v5, %v14752_v33 }
 0x419   :  { %7558 = vmatprep.subr.bf16.mxu0 %v11377_v28  ;;  %v4370_v28 = vunpack.c.l.b16 %v4175_v59 }
 0x41b   :  { %7708 = vmatpush2.bf16.msra.mxu1 %v11366_v52  ;;  %v11378_v52 = vld [vmem:[#allocation6 + $0x548] ss:$16 sps:$4 sm:$0xff]  }
 0x41c   :  { %7709 = vmatprep.subr.bf16.mxu1 %v11374_v20  ;;  %7559 = vmatpush2.bf16.msra.mxu0 %v11375_v27  ;;  %v11389_v20 = vld [vmem:[#allocation6 + $0x52c] ss:$16 sps:$4 sm:$0xff]   ;;  %v6721_v27 = vadd.f32 %v6720_v36, %v14758_v47 }
 0x41d   :  { %v6728_v37 = vpop.f32.mrf.mxu0  ;;  %7329 = vmatmul.mubr.bf16.gmra.mxu0 %v15102_v53  ;;  %7560 = vmatprep.subr.bf16.mxu0 %v11383_v62 }
 0x41e   :  { %7338 = vmatprep.mubr.bf16.mxu0 %v15104_v34  ;;  %7472 = vmatmul.mubr.bf16.gmra.mxu1 %v17368_v12  ;;  %v4184_v12 = vrot.slane %v14499_v56, 4  ;;  %v6725_v56 = vadd.f32 %v6724_v15, %v14758_v47  ;;  %v11390_v15 = vld [vmem:[#allocation6 + $0x508] ss:$16 sps:$4 sm:$0xff]  }
 0x41f   :  { %v6730_v26 = vpop.f32.mrf.mxu0  ;;  %7481 = vmatprep.mubr.bf16.mxu1 %v17426_v7  ;;  %7710 = vmatpush2.bf16.msra.mxu1 %v11372_v22  ;;  %v15118_v7 = vpack.c.b16 %v4370_v28, %v4360_v21  ;;  %v17429_v21 = vld [vmem:[#allocation138_spill] sm:$0xff]  ;;  %v6729_v28 = vadd.f32 %v6728_v37, %v14752_v33 }
 0x420   :  { %7711 = vmatprep.subr.bf16.mxu1 %v11380_v31  ;;  %7561 = vmatpush2.bf16.msra.mxu0 %v11381_v18  ;;  %v4183_v31 = vrot.slane %v14468_v43, 4  ;;  %v11387_v18 = vld [vmem:[#allocation6 + $0x528] ss:$16 sps:$4 sm:$0xff]  }
 0x421   :  { %v6732_v34 = vpop.f32.mrf.mxu0  ;;  %7562 = vmatprep.subr.bf16.mxu0 %v11386_v9  ;;  %17427 = vst [vmem:[#allocation32_spill] sm:$0xff] %v15118_v7 }
 0x422   :  { %v6871_v3 = vpop.f32.mrf.mxu1  ;;  %v6733_v37 = vadd.f32 %v6732_v34, %v14752_v33  ;;  %v17433_v34 = vld [vmem:[#allocation80_spill] sm:$0xff] }
 0x423   :  { %v15112_v62 = vadd.f32 %v6871_v3, %v6719_v42  ;;  %v6734_v22 = vpop.f32.mrf.mxu0  ;;  %7712 = vmatpush2.bf16.msra.mxu1 %v11378_v52  ;;  %v11392_v42 = vld [vmem:[#allocation6 + $0x50c] ss:$16 sps:$4 sm:$0xff]  }
 0x424   :  { %v6873_v53 = vpop.f32.mrf.mxu1  ;;  %7563 = vmatpush2.bf16.msra.mxu0 %v11384_v10  ;;  %7713 = vmatprep.subr.bf16.mxu1 %v11389_v20  ;;  %v17430_v10 = vld [vmem:[#allocation139_spill] sm:$0xff] }
 0x425   :  { %v15116_v59 = vadd.f32 %v6873_v53, %v6721_v27  ;;  %v6738_v3 = vpop.f32.mrf.mxu0  ;;  %7339 = vmatmul.mubr.bf16.gmra.mxu0 %v15118_v7  ;;  %v15126_v53 = vsel %vm4143_vm5, %v4183_v31, %v4184_v12  ;;  %7838 = vmatprep.subr.bf16.mxu0 %v11395_v50  ;;  %v4181_v27 = vrot.slane %v14481_v14, 4  ;;  %v6731_v50 = vadd.f32 %v6730_v26, %v14758_v47 }
 0x426   :  { %v6875_v36 = vpop.f32.mrf.mxu1  ;;  %17428 = vst [vmem:[#allocation47_spill] sm:$0xff] %v15126_v53  ;;  %7348 = vmatprep.mubr.bf16.mxu0 %v15126_v53  ;;  %7482 = vmatmul.mubr.bf16.gmra.mxu1 %v17429_v21  ;;  %v4180_v21 = vrot.slane %v14462_v46, 4  ;;  %v15146_v14 = vcombine.low %v4184_v12, %v14824_v0  ;;  %v6735_v26 = vadd.f32 %v6734_v22, %v14758_v47 }
 0x427   :  { %v15122_v9 = vadd.f32 %v6875_v36, %v6723_v6  ;;  %7491 = vmatprep.mubr.bf16.mxu1 %v17430_v10  ;;  %7714 = vmatpush2.bf16.msra.mxu1 %v11387_v18  ;;  %v11398_v6 = vld [vmem:[#allocation6 + $0x8ec] ss:$16 sps:$4 sm:$0xff]   ;;  %v6740_v36 = vpop.f32.mrf.mxu0 }
 0x428   :  { %v6877_v5 = vpop.f32.mrf.mxu1  ;;  %7715 = vmatprep.subr.bf16.mxu1 %v11392_v42  ;;  %17432 = vst [vmem:[#allocation117_spill] sm:$0xff] %v15146_v14  ;;  %v6741_v12 = vadd.f32 %v6740_v36, %v14758_v47 }
 0x429   :  { %v15131_v52 = vadd.f32 %v6877_v5, %v6725_v56  ;;  %v15143_v5 = vsel %vm4143_vm5, %v4180_v21, %v4181_v27  ;;  %v6742_v42 = vpop.f32.mrf.mxu0 }
 0x42a   :  { %v6881_v20 = vpop.f32.mrf.mxu1  ;;  %17431 = vst [vmem:[#allocation133_spill] sm:$0xff] %v15143_v5 }
 0x42b   :  { %v15136_v31 = vadd.f32 %v6881_v20, %v6729_v28  ;;  %7716 = vmatpush2.bf16.msra.mxu1 %v11390_v15  ;;  %v6744_v22 = vpop.f32.mrf.mxu0 }
 0x42c   :  { %v6883_v53 = vpop.f32.mrf.mxu1  ;;  %7991 = vmatprep.subr.bf16.mxu1 %v11398_v6 }
 0x42d   :  { %v15140_v56 = vadd.f32 %v6883_v53, %v6731_v50  ;;  %7349 = vmatmul.mubr.bf16.gmra.mxu0 %v15143_v5  ;;  %v6739_v53 = vadd.f32 %v6738_v3, %v14752_v33  ;;  %v6743_v50 = vadd.f32 %v6742_v42, %v14752_v33 }
 0x42e   :  { %v6885_v18 = vpop.f32.mrf.mxu1  ;;  %7358 = vmatprep.mubr.bf16.mxu0 %v15146_v14  ;;  %7492 = vmatmul.mubr.bf16.gmra.mxu1 %v17433_v34  ;;  %v17435_v34 = vld [vmem:[#allocation70_spill] sm:$0xff] }
 0x42f   :  { %v15149_v28 = vadd.f32 %v6885_v18, %v6733_v37  ;;  %7501 = vmatprep.mubr.bf16.mxu1 %v14468_v43  ;;  %v15165_v18 = vcombine.low %v4181_v27, %v14808_v30 }
 0x430   :  { %v6887_v10 = vpop.f32.mrf.mxu1 }
 0x431   :  { %v15155_v15 = vadd.f32 %v6887_v10, %v6735_v26  ;;  %17434 = vst [vmem:[#allocation116_spill] sm:$0xff] %v15165_v18  ;;  %v6745_v26 = vadd.f32 %v6744_v22, %v14758_v47  ;;  %v17437_v22 = vld [vmem:[#allocation98_spill] sm:$0xff] }
 0x432   :  { %v6891_v0 = vpop.f32.mrf.mxu1 }
 0x433   :  { %v15159_v20 = vadd.f32 %v6891_v0, %v6739_v53  ;;  %v17436_v0 = vld [vmem:[#allocation43_spill] sm:$0xff] }
 0x434   :  { %v6893_v6 = vpop.f32.mrf.mxu1  ;;  %v6748_v37 = vpop.f32.mrf.mxu0 }
 0x435   :  { %v15162_v21 = vadd.f32 %v6893_v6, %v6741_v12  ;;  %7359 = vmatmul.mubr.bf16.gmra.mxu0 %v15165_v18  ;;  %v6749_v27 = vadd.f32 %v6748_v37, %v14752_v33 }
 0x436   :  { %v6895_v3 = vpop.f32.mrf.mxu1  ;;  %v6750_v43 = vpop.f32.mrf.mxu0  ;;  %7368 = vmatprep.mubr.bf16.mxu0 %v17435_v34  ;;  %7502 = vmatmul.mubr.bf16.gmra.mxu1 %v14462_v46 }
 0x437   :  { %v15168_v10 = vadd.f32 %v6895_v3, %v6743_v50  ;;  %7511 = vmatprep.mubr.bf16.mxu1 %v17436_v0  ;;  %v17438_v50 = vld [vmem:[#allocation44_spill] sm:$0xff]  ;;  %v17439_v3 = vld [vmem:[#allocation131_spill] sm:$0xff]  ;;  %v6751_v34 = vadd.f32 %v6750_v43, %v14758_v47 }
 0x438   :  { %v6897_v36 = vpop.f32.mrf.mxu1  ;;  %v6752_v53 = vpop.f32.mrf.mxu0  ;;  %v11401_v43 = vld [vmem:[#allocation6 + $0x6cc] ss:$16 sps:$4 sm:$0xff]  }
 0x439   :  { %v15173_v42 = vadd.f32 %v6897_v36, %v6745_v26  ;;  %v17440_v26 = vld [vmem:[#allocation51_spill] sm:$0xff]  ;;  %v6753_v0 = vadd.f32 %v6752_v53, %v14752_v33  ;;  %v17444_v53 = vld [vmem:[#allocation97_spill] sm:$0xff] }
 0x43a   :  { %v6754_v30 = vpop.f32.mrf.mxu0 }
 0x43d   :  { %v6758_v12 = vpop.f32.mrf.mxu0  ;;  %7369 = vmatmul.mubr.bf16.gmra.mxu0 %v17437_v22  ;;  %v6755_v22 = vadd.f32 %v6754_v30, %v14758_v47 }
 0x43e   :  { %v6901_v6 = vpop.f32.mrf.mxu1  ;;  %7512 = vmatmul.mubr.bf16.gmra.mxu1 %v17438_v50  ;;  %7564 = vmatprep.mubr.bf16.mxu0 %v17439_v3  ;;  %v11393_v3 = vld [vmem:[#allocation6 + $0x6e8] ss:$16 sps:$4 sm:$0xff]  }
 0x43f   :  { %v15181_v18 = vadd.f32 %v6901_v6, %v6749_v27  ;;  %v6760_v46 = vpop.f32.mrf.mxu0  ;;  %7521 = vmatprep.mubr.bf16.mxu1 %v17440_v26  ;;  %v6759_v27 = vadd.f32 %v6758_v12, %v14752_v33  ;;  %v17449_v12 = vld [vmem:[#allocation92_spill] sm:$0xff] }
 0x440   :  { %v6903_v36 = vpop.f32.mrf.mxu1 }
 0x441   :  { %v15185_v14 = vadd.f32 %v6903_v36, %v6751_v34  ;;  %v6762_v37 = vpop.f32.mrf.mxu0 }
 0x442   :  { %v6905_v5 = vpop.f32.mrf.mxu1 }
 0x443   :  { %v15188_v7 = vadd.f32 %v6905_v5, %v6753_v0  ;;  %v6764_v50 = vpop.f32.mrf.mxu0  ;;  %v6761_v5 = vadd.f32 %v6760_v46, %v14758_v47 }
 0x444   :  { %v6907_v45 = vpop.f32.mrf.mxu1 }
 0x445   :  { %17441 = vst [vmem:[#allocation78_spill] sm:$0xff] %v15188_v7  ;;  %v15191_v6 = vadd.f32 %v6907_v45, %v6755_v22  ;;  %v6954_v26 = vpop.f32.mrf.mxu0  ;;  %7565 = vmatmul.mubr.bf16.vlgmr.msra.gmra.mxu0 %v17443_v16  ;;  %v11399_v45 = vld [vmem:[#allocation6 + $0x6c8] ss:$16 sps:$4 sm:$0xff]   ;;  %v11407_v16 = vld [vmem:[#allocation6 + $0x6ac] ss:$16 sps:$4 sm:$0xff]  }
 0x446   :  { %v6955_v34 = vadd.f32 %v6954_v26, %v17444_v53  ;;  %v6911_v36 = vpop.f32.mrf.mxu1  ;;  %7522 = vmatmul.mubr.bf16.gmra.mxu1 %v17445_v17  ;;  %7574 = vmatprep.mubr.bf16.mxu0 %v17446_v39  ;;  %v6763_v26 = vadd.f32 %v6762_v37, %v14752_v33  ;;  %v17450_v39 = vld [vmem:[#allocation69_spill] sm:$0xff] }
 0x447   :  { %17442 = vst [vmem:[#allocation35_spill] sm:$0xff] %v15191_v6  ;;  %v15198_v30 = vadd.f32 %v6911_v36, %v6759_v27  ;;  %v6956_v0 = vpop.f32.mrf.mxu0  ;;  %7717 = vmatprep.mubr.bf16.mxu1 %v17448_v29  ;;  %7839 = vmatpush1.bf16.msra.mxu0 %v11393_v3  ;;  %v6765_v27 = vadd.f32 %v6764_v50, %v14758_v47  ;;  %v11396_v3 = vld [vmem:[#allocation6 + $0x8e8] ss:$16 sps:$4 sm:$0xff]  }
 0x448   :  { %v6957_v22 = vadd.f32 %v6956_v0, %v17449_v12  ;;  %v6913_v6 = vpop.f32.mrf.mxu1  ;;  %7840 = vmatprep.subr.bf16.mxu0 %v11401_v43  ;;  %v11404_v0 = vld [vmem:[#allocation6 + $0x8cc] ss:$16 sps:$4 sm:$0xff]   ;;  %v11405_v12 = vld [vmem:[#allocation6 + $0x6a8] ss:$16 sps:$4 sm:$0xff]  }
 0x449   :  { %17447 = vst [vmem:[#allocation36_spill] sm:$0xff] %v15198_v30  ;;  %v15203_v53 = vadd.f32 %v6913_v6, %v6761_v5  ;;  %v6958_v17 = vpop.f32.mrf.mxu0  ;;  %v17453_v37 = vld [vmem:[#allocation37_spill] sm:$0xff]  ;;  %v11413_v6 = vld [vmem:[#allocation6 + $0x68c] ss:$16 sps:$4 sm:$0xff]   ;;  %v17455_v50 = vld [vmem:[#allocation55_spill] sm:$0xff] }
 0x44a   :  { %v6959_v7 = vadd.f32 %v6958_v17, %v17450_v39  ;;  %v6915_v46 = vpop.f32.mrf.mxu1  ;;  %v17454_v39 = vld [vmem:[#allocation38_spill] sm:$0xff] }
 0x44b   :  { %v15207_v36 = vadd.f32 %v6915_v46, %v6763_v26  ;;  %v6960_v29 = vpop.f32.mrf.mxu0  ;;  %7841 = vmatpush1.bf16.msra.mxu0 %v11399_v45  ;;  %v17456_v26 = vld [vmem:[#allocation95_spill] sm:$0xff] }
 0x44c   :  { %v6917_v30 = vpop.f32.mrf.mxu1  ;;  %7842 = vmatprep.subr.bf16.mxu0 %v11407_v16  ;;  %v6655_v45 = vadd.f32 %v17456_v26, %v14758_v47  ;;  %v17458_v16 = vld [vmem:[#allocation57_spill] sm:$0xff] }
 0x44d   :  { %17451 = vst [vmem:[#allocation110_spill] sm:$0xff] %v15207_v36  ;;  %v15209_v43 = vadd.f32 %v6917_v30, %v6765_v27  ;;  %v6964_v33 = vpop.f32.mrf.mxu0  ;;  %7575 = vmatmul.mubr.bf16.gmra.mxu0 %v17453_v37  ;;  %v11402_v30 = vld [vmem:[#allocation6 + $0x8c8] ss:$16 sps:$4 sm:$0xff]  }
 0x44e   :  { %v6965_v5 = vadd.f32 %v6964_v33, %v14884_v38  ;;  %v7107_v17 = vpop.f32.mrf.mxu1  ;;  %7584 = vmatprep.mubr.bf16.mxu0 %v17454_v39  ;;  %7718 = vmatmul.mubr.bf16.vlgmr.msra.gmra.mxu1 %v17455_v50  ;;  %v11410_v38 = vld [vmem:[#allocation6 + $0x8ac] ss:$16 sps:$4 sm:$0xff]   ;;  %v11411_v33 = vld [vmem:[#allocation6 + $0x688] ss:$16 sps:$4 sm:$0xff]   ;;  %v6808_v39 = vadd.f32 %v14875_v1, %v6655_v45 }
 0x44f   :  { %17452 = vst [vmem:[#allocation40_spill] sm:$0xff] %v15209_v43  ;;  %v15217_v46 = vadd.f32 %v7107_v17, %v6955_v34  ;;  %v6966_v36 = vpop.f32.mrf.mxu0  ;;  %7727 = vmatprep.mubr.bf16.mxu1 %v17458_v16  ;;  %7992 = vmatpush1.bf16.msra.mxu1 %v11396_v3  ;;  %v11419_v34 = vld [vmem:[#allocation6 + $0x66c] ss:$16 sps:$4 sm:$0xff]   ;;  %v17459_v45 = vld [vmem:[#allocation33_spill] sm:$0xff] }
 0x450   :  { %v6967_v27 = vadd.f32 %v6966_v36, %v14896_v8  ;;  %v7109_v37 = vpop.f32.mrf.mxu1  ;;  %7993 = vmatprep.subr.bf16.mxu1 %v11404_v0  ;;  %7843 = vmatpush1.bf16.msra.mxu0 %v11405_v12  ;;  %v6961_v16 = vadd.f32 %v6960_v29, %v6808_v39  ;;  %v11408_v8 = vld [vmem:[#allocation6 + $0x8a8] ss:$16 sps:$4 sm:$0xff]   ;;  %v11416_v0 = vld [vmem:[#allocation6 + $0x88c] ss:$16 sps:$4 sm:$0xff]  }
 0x451   :  { %17457 = vst [vmem:[#allocation31_spill] sm:$0xff] %v15217_v46  ;;  %v15222_v50 = vadd.f32 %v7109_v37, %v6957_v22  ;;  %v6968_v43 = vpop.f32.mrf.mxu0  ;;  %7844 = vmatprep.subr.bf16.mxu0 %v11413_v6  ;;  %v11417_v12 = vld [vmem:[#allocation6 + $0x668] ss:$16 sps:$4 sm:$0xff]   ;;  %v11425_v6 = vld [vmem:[#allocation6 + $0x64c] ss:$16 sps:$4 sm:$0xff]  }
 0x452   :  { %v6969_v17 = vadd.f32 %v6968_v43, %v14906_v13  ;;  %v7111_v26 = vpop.f32.mrf.mxu1  ;;  %v17461_v43 = vld [vmem:[#allocation58_spill] sm:$0xff] }
 0x453   :  { %v15225_v3 = vadd.f32 %v7111_v26, %v6959_v7  ;;  %v6970_v46 = vpop.f32.mrf.mxu0  ;;  %7994 = vmatpush1.bf16.msra.mxu1 %v11402_v30  ;;  %v17460_v7 = vld [vmem:[#allocation112_spill] sm:$0xff]  ;;  %v6665_v30 = vadd.f32 %v14859_v60, %v14758_v47 }
 0x454   :  { %v7113_v36 = vpop.f32.mrf.mxu1  ;;  %7995 = vmatprep.subr.bf16.mxu1 %v11410_v38  ;;  %7845 = vmatpush1.bf16.msra.mxu0 %v11411_v33  ;;  %v17462_v33 = vld [vmem:[#allocation59_spill] sm:$0xff]  ;;  %v11431_v60 = vld [vmem:[#allocation6 + $0x62c] ss:$16 sps:$4 sm:$0xff]  }
 0x455   :  { %v15227_v1 = vadd.f32 %v7113_v36, %v6961_v16  ;;  %v6974_v22 = vpop.f32.mrf.mxu0  ;;  %7585 = vmatmul.mubr.bf16.gmra.mxu0 %v17459_v45  ;;  %7846 = vmatprep.subr.bf16.mxu0 %v11419_v34  ;;  %v11414_v39 = vld [vmem:[#allocation6 + $0x888] ss:$16 sps:$4 sm:$0xff]   ;;  %v6818_v36 = vadd.f32 %v14909_v51, %v6665_v30 }
 0x456   :  { %v6975_v13 = vadd.f32 %v6974_v22, %v14914_v55  ;;  %v7117_v29 = vpop.f32.mrf.mxu1  ;;  %7594 = vmatprep.mubr.bf16.mxu0 %v17460_v7  ;;  %7728 = vmatmul.mubr.bf16.gmra.mxu1 %v17461_v43  ;;  %v11422_v55 = vld [vmem:[#allocation6 + $0x86c] ss:$16 sps:$4 sm:$0xff]   ;;  %v11423_v16 = vld [vmem:[#allocation6 + $0x648] ss:$16 sps:$4 sm:$0xff]  }
 0x457   :  { %v15235_v37 = vadd.f32 %v7117_v29, %v6965_v5  ;;  %v6976_v38 = vpop.f32.mrf.mxu0  ;;  %7737 = vmatprep.mubr.bf16.mxu1 %v17462_v33  ;;  %7996 = vmatpush1.bf16.msra.mxu1 %v11408_v8  ;;  %v6971_v7 = vadd.f32 %v6970_v46, %v6818_v36  ;;  %v17463_v30 = vld [vmem:[#allocation113_spill] sm:$0xff]  ;;  %v17465_v33 = vld [vmem:[#allocation86_spill] sm:$0xff] }
 0x458   :  { %v6977_v34 = vadd.f32 %v6976_v38, %v14921_v57  ;;  %v7119_v26 = vpop.f32.mrf.mxu1  ;;  %7997 = vmatprep.subr.bf16.mxu1 %v11416_v0  ;;  %7847 = vmatpush1.bf16.msra.mxu0 %v11417_v12  ;;  %v11420_v57 = vld [vmem:[#allocation6 + $0x868] ss:$16 sps:$4 sm:$0xff]   ;;  %v11428_v12 = vld [vmem:[#allocation6 + $0x84c] ss:$16 sps:$4 sm:$0xff]  }
 0x459   :  { %v15240_v22 = vadd.f32 %v7119_v26, %v6967_v27  ;;  %v6978_v45 = vpop.f32.mrf.mxu0  ;;  %7848 = vmatprep.subr.bf16.mxu0 %v11425_v6  ;;  %v11429_v38 = vld [vmem:[#allocation6 + $0x628] ss:$16 sps:$4 sm:$0xff]   ;;  %v11437_v6 = vld [vmem:[#allocation6 + $0x60c] ss:$16 sps:$4 sm:$0xff]  }
 0x45a   :  { %v6979_v5 = vadd.f32 %v6978_v45, %v14932_v40  ;;  %v7121_v29 = vpop.f32.mrf.mxu1  ;;  %v11426_v36 = vld [vmem:[#allocation6 + $0x848] ss:$16 sps:$4 sm:$0xff]  }
 0x45b   :  { %v15243_v8 = vadd.f32 %v7121_v29, %v6969_v17  ;;  %v6980_v43 = vpop.f32.mrf.mxu0  ;;  %7998 = vmatpush1.bf16.msra.mxu1 %v11414_v39  ;;  %v17464_v17 = vld [vmem:[#allocation45_spill] sm:$0xff]  ;;  %v6675_v39 = vadd.f32 %v14899_v44, %v14758_v47  ;;  %v11443_v44 = vld [vmem:[#allocation6 + $0x7ec] ss:$16 sps:$4 sm:$0xff]  }
 0x45c   :  { %v7123_v0 = vpop.f32.mrf.mxu1  ;;  %7999 = vmatprep.subr.bf16.mxu1 %v11422_v55  ;;  %7849 = vmatpush1.bf16.msra.mxu0 %v11423_v16  ;;  %v17466_v16 = vld [vmem:[#allocation60_spill] sm:$0xff] }
 0x45d   :  { %v15245_v51 = vadd.f32 %v7123_v0, %v6971_v7  ;;  %v6984_v27 = vpop.f32.mrf.mxu0  ;;  %7595 = vmatmul.mubr.bf16.gmra.mxu0 %v17463_v30  ;;  %7850 = vmatprep.subr.bf16.mxu0 %v11431_v60  ;;  %v11435_v29 = vld [vmem:[#allocation6 + $0x608] ss:$16 sps:$4 sm:$0xff]   ;;  %v6828_v7 = vadd.f32 %v14935_v35, %v6675_v39 }
 0x45e   :  { %v6985_v40 = vadd.f32 %v6984_v27, %v14940_v63  ;;  %v7127_v46 = vpop.f32.mrf.mxu1  ;;  %7604 = vmatprep.mubr.bf16.mxu0 %v17464_v17  ;;  %7738 = vmatmul.mubr.bf16.gmra.mxu1 %v17465_v33  ;;  %v11434_v63 = vld [vmem:[#allocation6 + $0x82c] ss:$16 sps:$4 sm:$0xff]   ;;  %v11441_v33 = vld [vmem:[#allocation6 + $0x7e8] ss:$16 sps:$4 sm:$0xff]  }
 0x45f   :  { %v15253_v26 = vadd.f32 %v7127_v46, %v6975_v13  ;;  %v6986_v55 = vpop.f32.mrf.mxu0  ;;  %7747 = vmatprep.mubr.bf16.mxu1 %v17466_v16  ;;  %8000 = vmatpush1.bf16.msra.mxu1 %v11420_v57  ;;  %v6981_v46 = vadd.f32 %v6980_v43, %v6828_v7  ;;  %v17467_v39 = vld [vmem:[#allocation134_spill] sm:$0xff]  ;;  %v6685_v16 = vadd.f32 %v14960_v54, %v14758_v47 }
 0x460   :  { %v6987_v45 = vadd.f32 %v6986_v55, %v14947_v49  ;;  %v7129_v60 = vpop.f32.mrf.mxu1  ;;  %8001 = vmatprep.subr.bf16.mxu1 %v11428_v12  ;;  %7851 = vmatpush1.bf16.msra.mxu0 %v11429_v38  ;;  %v11432_v49 = vld [vmem:[#allocation6 + $0x828] ss:$16 sps:$4 sm:$0xff]   ;;  %v11440_v38 = vld [vmem:[#allocation6 + $0x80c] ss:$16 sps:$4 sm:$0xff]  }
 0x461   :  { %v15258_v0 = vadd.f32 %v7129_v60, %v6977_v34  ;;  %v6988_v27 = vpop.f32.mrf.mxu0  ;;  %7852 = vmatprep.subr.bf16.mxu0 %v11437_v6  ;;  %v11449_v6 = vld [vmem:[#allocation6 + $0x7cc] ss:$16 sps:$4 sm:$0xff]   ;;  %v17469_v55 = vld [vmem:[#allocation63_spill] sm:$0xff] }
 0x462   :  { %v6989_v13 = vadd.f32 %v6988_v27, %v14956_v23  ;;  %v7131_v30 = vpop.f32.mrf.mxu1  ;;  %v11455_v47 = vld [vmem:[#allocation6 + $0x7ac] ss:$16 sps:$4 sm:$0xff]  }
 0x463   :  { %v15261_v57 = vadd.f32 %v7131_v30, %v6979_v5  ;;  %v6990_v17 = vpop.f32.mrf.mxu0  ;;  %8002 = vmatpush1.bf16.msra.mxu1 %v11426_v36  ;;  %v17468_v5 = vld [vmem:[#allocation76_spill] sm:$0xff]  ;;  %v6838_v30 = vadd.f32 %v14994_v32, %v6685_v16 }
 0x464   :  { %v7133_v12 = vpop.f32.mrf.mxu1  ;;  %8003 = vmatprep.subr.bf16.mxu1 %v11434_v63  ;;  %7853 = vmatpush1.bf16.msra.mxu0 %v11435_v29  ;;  %v17470_v63 = vld [vmem:[#allocation140_spill] sm:$0xff] }
 0x465   :  { %v15263_v35 = vadd.f32 %v7133_v12, %v6981_v46  ;;  %v6994_v34 = vpop.f32.mrf.mxu0  ;;  %7605 = vmatmul.mubr.bf16.gmra.mxu0 %v17467_v39  ;;  %7854 = vmatprep.subr.bf16.mxu0 %v11443_v44  ;;  %v11438_v29 = vld [vmem:[#allocation6 + $0x808] ss:$16 sps:$4 sm:$0xff]   ;;  %v11452_v32 = vld [vmem:[#allocation6 + $0x9cc] ss:$16 sps:$4 sm:$0xff]  }
 0x466   :  { %v6995_v23 = vadd.f32 %v6994_v34, %v15008_v58  ;;  %v7137_v43 = vpop.f32.mrf.mxu1  ;;  %7614 = vmatprep.mubr.bf16.mxu0 %v17468_v5  ;;  %7748 = vmatmul.mubr.bf16.gmra.mxu1 %v17469_v55  ;;  %v11446_v58 = vld [vmem:[#allocation6 + $0x9ec] ss:$16 sps:$4 sm:$0xff]   ;;  %v11447_v44 = vld [vmem:[#allocation6 + $0x7c8] ss:$16 sps:$4 sm:$0xff]   ;;  %v6991_v34 = vadd.f32 %v6990_v17, %v6838_v30 }
 0x467   :  { %v15271_v36 = vadd.f32 %v7137_v43, %v6985_v40  ;;  %v6996_v60 = vpop.f32.mrf.mxu0  ;;  %7757 = vmatprep.mubr.bf16.mxu1 %v17470_v63  ;;  %8004 = vmatpush1.bf16.msra.mxu1 %v11432_v49  ;;  %v17472_v55 = vld [vmem:[#allocation136_spill] sm:$0xff]  ;;  %v17475_v63 = vld [vmem:[#allocation66_spill] sm:$0xff] }
 0x468   :  { %v6997_v7 = vadd.f32 %v6996_v60, %v15017_v25  ;;  %v7139_v27 = vpop.f32.mrf.mxu1  ;;  %8005 = vmatprep.subr.bf16.mxu1 %v11440_v38  ;;  %7855 = vmatpush2.bf16.msra.mxu0 %v11441_v33  ;;  %v11444_v25 = vld [vmem:[#allocation6 + $0x9e8] ss:$16 sps:$4 sm:$0xff]  }
 0x469   :  { %v15276_v46 = vadd.f32 %v7139_v27, %v6987_v45  ;;  %v6998_v12 = vpop.f32.mrf.mxu0  ;;  %7856 = vmatprep.subr.bf16.mxu0 %v11449_v6  ;;  %v17471_v38 = vld [vmem:[#allocation127_spill] sm:$0xff]  ;;  %v17473_v17 = vld [vmem:[#allocation104_spill] sm:$0xff]  ;;  %v17474_v60 = vld [vmem:[#allocation77_spill] sm:$0xff] }
 0x46a   :  { %v6999_v54 = vadd.f32 %v6998_v12, %v15023_v48  ;;  %v7141_v40 = vpop.f32.mrf.mxu1  ;;  %v11453_v45 = vld [vmem:[#allocation6 + $0x7a8] ss:$16 sps:$4 sm:$0xff]   ;;  %v11461_v48 = vld [vmem:[#allocation6 + $0x78c] ss:$16 sps:$4 sm:$0xff]  }
 0x46b   :  { %v15279_v49 = vadd.f32 %v7141_v40, %v6989_v13  ;;  %v7000_v39 = vpop.f32.mrf.mxu0  ;;  %8006 = vmatpush1.bf16.msra.mxu1 %v11438_v29  ;;  %v11459_v40 = vld [vmem:[#allocation6 + $0x788] ss:$16 sps:$4 sm:$0xff]  }
 0x46c   :  { %v7001_v33 = vadd.f32 %v7000_v39, %v17471_v38  ;;  %v7143_v43 = vpop.f32.mrf.mxu1  ;;  %8007 = vmatprep.subr.bf16.mxu1 %v11446_v58  ;;  %7857 = vmatpush2.bf16.msra.mxu0 %v11447_v44  ;;  %v17476_v58 = vld [vmem:[#allocation67_spill] sm:$0xff]  ;;  %v11467_v38 = vld [vmem:[#allocation6 + $0x76c] ss:$16 sps:$4 sm:$0xff]  }
 0x46d   :  { %v15282_v5 = vadd.f32 %v7143_v43, %v6991_v34  ;;  %v7004_v6 = vpop.f32.mrf.mxu0  ;;  %7615 = vmatmul.mubr.bf16.gmra.mxu0 %v17472_v55  ;;  %7858 = vmatprep.subr.bf16.mxu0 %v11455_v47  ;;  %v11450_v44 = vld [vmem:[#allocation6 + $0x9c8] ss:$16 sps:$4 sm:$0xff]   ;;  %v11458_v47 = vld [vmem:[#allocation6 + $0x9ac] ss:$16 sps:$4 sm:$0xff]  }
 0x46e   :  { %v7005_v13 = vadd.f32 %v7004_v6, %v17473_v17  ;;  %v7147_v16 = vpop.f32.mrf.mxu1  ;;  %7624 = vmatprep.mubr.bf16.mxu0 %v17474_v60  ;;  %7758 = vmatmul.mubr.bf16.gmra.mxu1 %v17475_v63  ;;  %v17478_v63 = vld [vmem:[#allocation81_spill] sm:$0xff] }
 0x46f   :  { %v15288_v29 = vadd.f32 %v7147_v16, %v6995_v23  ;;  %v7006_v27 = vpop.f32.mrf.mxu0  ;;  %7767 = vmatprep.mubr.bf16.mxu1 %v17476_v58  ;;  %8008 = vmatpush2.bf16.msra.mxu1 %v11444_v25  ;;  %v11456_v25 = vld [vmem:[#allocation6 + $0x9a8] ss:$16 sps:$4 sm:$0xff]  }
 0x470   :  { %v7007_v30 = vadd.f32 %v7006_v27, %v15046_v19  ;;  %v7149_v12 = vpop.f32.mrf.mxu1  ;;  %8009 = vmatprep.subr.bf16.mxu1 %v11452_v32  ;;  %7859 = vmatpush2.bf16.msra.mxu0 %v11453_v45  ;;  %v11464_v32 = vld [vmem:[#allocation6 + $0x98c] ss:$16 sps:$4 sm:$0xff]   ;;  %v11465_v45 = vld [vmem:[#allocation6 + $0x768] ss:$16 sps:$4 sm:$0xff]  }
 0x471   :  { %v15292_v34 = vadd.f32 %v7149_v12, %v6997_v7  ;;  %v7008_v39 = vpop.f32.mrf.mxu0  ;;  %7860 = vmatprep.subr.bf16.mxu0 %v11461_v48  ;;  %v17477_v48 = vld [vmem:[#allocation46_spill] sm:$0xff]  ;;  %v17479_v27 = vld [vmem:[#allocation68_spill] sm:$0xff] }
 0x472   :  { %v7009_v23 = vadd.f32 %v7008_v39, %v15050_v2  ;;  %v7151_v43 = vpop.f32.mrf.mxu1  ;;  %v11473_v2 = vld [vmem:[#allocation6 + $0x74c] ss:$16 sps:$4 sm:$0xff]   ;;  %v11471_v39 = vld [vmem:[#allocation6 + $0x748] ss:$16 sps:$4 sm:$0xff]  }
 0x473   :  { %v15295_v6 = vadd.f32 %v7151_v43, %v6999_v54  ;;  %v7010_v55 = vpop.f32.mrf.mxu0  ;;  %8010 = vmatpush2.bf16.msra.mxu1 %v11450_v44  ;;  %v17480_v44 = vld [vmem:[#allocation143_spill] sm:$0xff]  ;;  %v11479_v43 = vld [vmem:[#allocation6 + $0x72c] ss:$16 sps:$4 sm:$0xff]  }
 0x474   :  { %v7011_v19 = vadd.f32 %v7010_v55, %v15055_v11  ;;  %v7153_v17 = vpop.f32.mrf.mxu1  ;;  %8011 = vmatprep.subr.bf16.mxu1 %v11458_v47  ;;  %7861 = vmatpush2.bf16.msra.mxu0 %v11459_v40  ;;  %v11470_v40 = vld [vmem:[#allocation6 + $0x96c] ss:$16 sps:$4 sm:$0xff]  }
 0x475   :  { %v15298_v7 = vadd.f32 %v7153_v17, %v7001_v33  ;;  %v7014_v16 = vpop.f32.mrf.mxu0  ;;  %7625 = vmatmul.mubr.bf16.gmra.mxu0 %v17477_v48  ;;  %7862 = vmatprep.subr.bf16.mxu0 %v11467_v38  ;;  %v11462_v33 = vld [vmem:[#allocation6 + $0x988] ss:$16 sps:$4 sm:$0xff]  }
 0x476   :  { %v7015_v54 = vadd.f32 %v7014_v16, %v15061_v61  ;;  %v7157_v60 = vpop.f32.mrf.mxu1  ;;  %7634 = vmatprep.mubr.bf16.mxu0 %v17478_v63  ;;  %7768 = vmatmul.mubr.bf16.gmra.mxu1 %v17479_v27  ;;  %v17482_v27 = vld [vmem:[#allocation79_spill] sm:$0xff] }
 0x477   :  { %v15304_v11 = vadd.f32 %v7157_v60, %v7005_v13  ;;  %v7016_v58 = vpop.f32.mrf.mxu0  ;;  %7777 = vmatprep.mubr.bf16.mxu1 %v17480_v44  ;;  %8012 = vmatpush2.bf16.msra.mxu1 %v11456_v25  ;;  %v11468_v25 = vld [vmem:[#allocation6 + $0x968] ss:$16 sps:$4 sm:$0xff]  }
 0x478   :  { %v7017_v12 = vadd.f32 %v7016_v58, %v15067_v41  ;;  %v7159_v47 = vpop.f32.mrf.mxu1  ;;  %8013 = vmatprep.subr.bf16.mxu1 %v11464_v32  ;;  %7863 = vmatpush2.bf16.msra.mxu0 %v11465_v45  ;;  %v11476_v32 = vld [vmem:[#allocation6 + $0x94c] ss:$16 sps:$4 sm:$0xff]   ;;  %v11477_v45 = vld [vmem:[#allocation6 + $0x728] ss:$16 sps:$4 sm:$0xff]  }
 0x479   :  { %v15308_v61 = vadd.f32 %v7159_v47, %v7007_v30  ;;  %v7018_v38 = vpop.f32.mrf.mxu0  ;;  %7864 = vmatprep.subr.bf16.mxu0 %v11473_v2  ;;  %v17481_v2 = vld [vmem:[#allocation48_spill] sm:$0xff] }
 0x47a   :  { %v7019_v13 = vadd.f32 %v7018_v38, %v15071_v4  ;;  %v7161_v55 = vpop.f32.mrf.mxu1  ;;  %v11482_v4 = vld [vmem:[#allocation6 + $0x70c] ss:$16 sps:$4 sm:$0xff]  }
 0x47b   :  { %v15311_v17 = vadd.f32 %v7161_v55, %v7009_v23  ;;  %v7020_v16 = vpop.f32.mrf.mxu0  ;;  %8014 = vmatpush2.bf16.msra.mxu1 %v11462_v33  ;;  %v17483_v58 = vld [vmem:[#allocation96_spill] sm:$0xff]  ;;  %v17484_v33 = vld [vmem:[#allocation145_spill] sm:$0xff] }
 0x47c   :  { %v7021_v41 = vadd.f32 %v7020_v16, %v15076_v24  ;;  %v7163_v48 = vpop.f32.mrf.mxu1  ;;  %8015 = vmatprep.subr.bf16.mxu1 %v11470_v40  ;;  %7865 = vmatpush2.bf16.msra.mxu0 %v11471_v39  ;;  %v11480_v39 = vld [vmem:[#allocation6 + $0x708] ss:$16 sps:$4 sm:$0xff]   ;;  %v11485_v38 = vld [vmem:[#allocation6 + $0x92c] ss:$16 sps:$4 sm:$0xff]  }
 0x47d   :  { %v15314_v30 = vadd.f32 %v7163_v48, %v7011_v19  ;;  %v7024_v60 = vpop.f32.mrf.mxu0  ;;  %7635 = vmatmul.mubr.bf16.gmra.mxu0 %v17481_v2  ;;  %7866 = vmatprep.subr.bf16.mxu0 %v11479_v43  ;;  %v11474_v19 = vld [vmem:[#allocation6 + $0x948] ss:$16 sps:$4 sm:$0xff]  }
 0x47e   :  { %v7025_v23 = vadd.f32 %v7024_v60, %v15112_v62  ;;  %v7167_v63 = vpop.f32.mrf.mxu1  ;;  %7644 = vmatprep.mubr.bf16.mxu0 %v17482_v27  ;;  %7778 = vmatmul.mubr.bf16.gmra.mxu1 %v17483_v58  ;;  %v17485_v2 = vld [vmem:[#allocation49_spill] sm:$0xff] }
 0x47f   :  { %v15320_v24 = vadd.f32 %v7167_v63, %v7015_v54  ;;  %v7026_v44 = vpop.f32.mrf.mxu0  ;;  %7787 = vmatprep.mubr.bf16.mxu1 %v17484_v33  ;;  %8016 = vmatpush2.bf16.msra.mxu1 %v11468_v25  ;;  %v11483_v25 = vld [vmem:[#allocation6 + $0x928] ss:$16 sps:$4 sm:$0xff]  }
 0x480   :  { %v7027_v47 = vadd.f32 %v7026_v44, %v15116_v59  ;;  %v7169_v40 = vpop.f32.mrf.mxu1  ;;  %8017 = vmatprep.subr.bf16.mxu1 %v11476_v32  ;;  %7867 = vmatpush2.bf16.msra.mxu0 %v11477_v45  ;;  %v11488_v32 = vld [vmem:[#allocation6 + $0x90c] ss:$16 sps:$4 sm:$0xff]   ;;  %v17486_v63 = vld [vmem:[#allocation83_spill] sm:$0xff] }
 0x481   :  { %v15324_v62 = vadd.f32 %v7169_v40, %v7017_v12  ;;  %v7028_v43 = vpop.f32.mrf.mxu0  ;;  %7868 = vmatprep.subr.bf16.mxu0 %v11482_v4  ;;  %v11486_v44 = vld [vmem:[#allocation6 + $0x908] ss:$16 sps:$4 sm:$0xff]  }
 0x482   :  { %v7029_v55 = vadd.f32 %v7028_v43, %v15122_v9  ;;  %v7171_v54 = vpop.f32.mrf.mxu1 }
 0x483   :  { %v15327_v16 = vadd.f32 %v7171_v54, %v7019_v13  ;;  %v7030_v48 = vpop.f32.mrf.mxu0  ;;  %8018 = vmatpush2.bf16.msra.mxu1 %v11474_v19  ;;  %v17487_v13 = vld [vmem:[#allocation71_spill] sm:$0xff] }
 0x484   :  { %v7031_v60 = vadd.f32 %v7030_v48, %v15131_v52  ;;  %v7173_v59 = vpop.f32.mrf.mxu1  ;;  %7869 = vmatpush2.bf16.msra.mxu0 %v11480_v39  ;;  %8019 = vmatprep.subr.bf16.mxu1 %v11485_v38  ;;  %v17488_v52 = vld [vmem:[#allocation73_spill] sm:$0xff] }
 0x485   :  { %v15330_v45 = vadd.f32 %v7173_v59, %v7021_v41  ;;  %v7034_v12 = vpop.f32.mrf.mxu0  ;;  %7645 = vmatmul.mubr.bf16.gmra.mxu0 %v17485_v2  ;;  %v17489_v59 = vld [vmem:[#allocation50_spill] sm:$0xff] }
 0x486   :  { %v7035_v4 = vadd.f32 %v7034_v12, %v15136_v31  ;;  %v7177_v9 = vpop.f32.mrf.mxu1  ;;  %7654 = vmatprep.mubr.bf16.mxu0 %v17486_v63  ;;  %7788 = vmatmul.mubr.bf16.gmra.mxu1 %v17487_v13  ;;  %v17491_v12 = vld [vmem:[#allocation100_spill] sm:$0xff]  ;;  %v17492_v2 = vld [vmem:[#allocation74_spill] sm:$0xff] }
 0x487   :  { %v15336_v27 = vadd.f32 %v7177_v9, %v7025_v23  ;;  %v7036_v58 = vpop.f32.mrf.mxu0  ;;  %7797 = vmatprep.mubr.bf16.mxu1 %v17488_v52  ;;  %8020 = vmatpush2.bf16.msra.mxu1 %v11483_v25 }
 0x488   :  { %v7037_v41 = vadd.f32 %v7036_v58, %v15140_v56  ;;  %v7179_v33 = vpop.f32.mrf.mxu1  ;;  %8021 = vmatprep.subr.bf16.mxu1 %v11488_v32  ;;  %v17490_v32 = vld [vmem:[#allocation52_spill] sm:$0xff] }
 0x489   :  { %v15340_v19 = vadd.f32 %v7179_v33, %v7027_v47  ;;  %v7038_v40 = vpop.f32.mrf.mxu0 }
 0x48a   :  { %v7039_v31 = vadd.f32 %v7038_v40, %v15149_v28  ;;  %v7181_v39 = vpop.f32.mrf.mxu1 }
 0x48b   :  { %v15343_v38 = vadd.f32 %v7181_v39, %v7029_v55  ;;  %v7040_v43 = vpop.f32.mrf.mxu0  ;;  %8022 = vmatpush2.bf16.msra.mxu1 %v11486_v44  ;;  %v17494_v39 = vld [vmem:[#allocation84_spill] sm:$0xff] }
 0x48c   :  { %v7041_v23 = vadd.f32 %v7040_v43, %v15155_v15  ;;  %v7183_v54 = vpop.f32.mrf.mxu1 }
 0x48d   :  { %v15346_v48 = vadd.f32 %v7183_v54, %v7031_v60  ;;  %v7044_v25 = vpop.f32.mrf.mxu0  ;;  %7655 = vmatmul.mubr.bf16.gmra.mxu0 %v17489_v59  ;;  %v17496_v54 = vld [vmem:[#allocation107_spill] sm:$0xff] }
 0x48e   :  { %v7045_v56 = vadd.f32 %v7044_v25, %v15159_v20  ;;  %v7187_v47 = vpop.f32.mrf.mxu1  ;;  %7664 = vmatprep.mubr.bf16.mxu0 %v17490_v32  ;;  %7798 = vmatmul.mubr.bf16.gmra.mxu1 %v17491_v12  ;;  %v17497_v25 = vld [vmem:[#allocation25_spill] sm:$0xff]  ;;  %v17498_v32 = vld [vmem:[#allocation78_spill] sm:$0xff] }
 0x48f   :  { %v15352_v28 = vadd.f32 %v7187_v47, %v7035_v4  ;;  %v7046_v55 = vpop.f32.mrf.mxu0  ;;  %7807 = vmatprep.mubr.bf16.mxu1 %v17492_v2 }
 0x490   :  { %v7047_v15 = vadd.f32 %v7046_v55, %v15162_v21  ;;  %v7189_v9 = vpop.f32.mrf.mxu1 }
 0x491   :  { %v15356_v60 = vadd.f32 %v7189_v9, %v7037_v41  ;;  %v7048_v63 = vpop.f32.mrf.mxu0  ;;  %v17495_v41 = vld [vmem:[#allocation54_spill] sm:$0xff]  ;;  %v17499_v9 = vld [vmem:[#allocation35_spill] sm:$0xff] }
 0x492   :  { %v7049_v13 = vadd.f32 %v7048_v63, %v15168_v10  ;;  %v7191_v58 = vpop.f32.mrf.mxu1 }
 0x493   :  { %v15359_v20 = vadd.f32 %v7191_v58, %v7039_v31  ;;  %v7050_v52 = vpop.f32.mrf.mxu0 }
 0x494   :  { %v7051_v44 = vadd.f32 %v7050_v52, %v15173_v42  ;;  %v7193_v33 = vpop.f32.mrf.mxu1 }
 0x495   :  { %v15362_v4 = vadd.f32 %v7193_v33, %v7041_v23  ;;  %v7054_v40 = vpop.f32.mrf.mxu0  ;;  %7665 = vmatmul.mubr.bf16.gmra.mxu0 %v17494_v39  ;;  %v17501_v33 = vld [vmem:[#allocation53_spill] sm:$0xff] }
 0x496   :  { %v7055_v21 = vadd.f32 %v7054_v40, %v15181_v18  ;;  %v7197_v43 = vpop.f32.mrf.mxu1  ;;  %7674 = vmatprep.mubr.bf16.mxu0 %v17495_v41  ;;  %7808 = vmatmul.mubr.bf16.gmra.mxu1 %v17496_v54  ;;  %v17502_v40 = vld [vmem:[#allocation36_spill] sm:$0xff]  ;;  %v17505_v54 = vld [vmem:[#allocation62_spill] sm:$0xff] }
 0x497   :  { %17493 = vst [vmem:[#allocation114_spill] sm:$0xff] %v15362_v4  ;;  %v15368_v10 = vadd.f32 %v7197_v43, %v7045_v56  ;;  %v7056_v31 = vpop.f32.mrf.mxu0  ;;  %7817 = vmatprep.mubr.bf16.mxu1 %v17497_v25  ;;  %v17504_v43 = vld [vmem:[#allocation87_spill] sm:$0xff] }
 0x498   :  { %v7057_v42 = vadd.f32 %v7056_v31, %v15185_v14  ;;  %v7199_v59 = vpop.f32.mrf.mxu1 }
 0x499   :  { %v15372_v23 = vadd.f32 %v7199_v59, %v7047_v15  ;;  %v7058_v47 = vpop.f32.mrf.mxu0  ;;  %v17503_v15 = vld [vmem:[#allocation123_spill] sm:$0xff] }
 0x49a   :  { %v7059_v12 = vadd.f32 %v7058_v47, %v17498_v32  ;;  %v7201_v55 = vpop.f32.mrf.mxu1  ;;  %v17506_v47 = vld [vmem:[#allocation110_spill] sm:$0xff] }
 0x49b   :  { %v15375_v18 = vadd.f32 %v7201_v55, %v7049_v13  ;;  %v7060_v2 = vpop.f32.mrf.mxu0 }
 0x49c   :  { %v7061_v63 = vadd.f32 %v7060_v2, %v17499_v9  ;;  %v7203_v58 = vpop.f32.mrf.mxu1 }
 0x49d   :  { %v15378_v56 = vadd.f32 %v7203_v58, %v7051_v44  ;;  %v7064_v52 = vpop.f32.mrf.mxu0  ;;  %7675 = vmatmul.mubr.bf16.gmra.mxu0 %v17501_v33  ;;  %v17507_v58 = vld [vmem:[#allocation40_spill] sm:$0xff] }
 0x49e   :  { %v7065_v14 = vadd.f32 %v7064_v52, %v17502_v40  ;;  %v7207_v39 = vpop.f32.mrf.mxu1  ;;  %7818 = vmatmul.mubr.bf16.gmra.mxu1 %v17503_v15  ;;  %7870 = vmatprep.mubr.bf16.mxu0 %v17504_v43  ;;  %v17510_v15 = vld [vmem:[#allocation31_spill] sm:$0xff]  ;;  %v17512_v43 = vld [vmem:[#allocation65_spill] sm:$0xff] }
 0x49f   :  { %17500 = vst [vmem:[#allocation39_spill] sm:$0xff] %v15378_v56  ;;  %v15384_v41 = vadd.f32 %v7207_v39, %v7055_v21  ;;  %v7066_v13 = vpop.f32.mrf.mxu0  ;;  %7827 = vmatprep.mubr.bf16.mxu1 %v17505_v54  ;;  %v17509_v39 = vld [vmem:[#allocation56_spill] sm:$0xff] }
 0x4a0   :  { %v7067_v31 = vadd.f32 %v7066_v13, %v15203_v53  ;;  %v7209_v25 = vpop.f32.mrf.mxu1  ;;  %v17513_v13 = vld [vmem:[#allocation61_spill] sm:$0xff] }
 0x4a1   :  { %v15388_v44 = vadd.f32 %v7209_v25, %v7057_v42  ;;  %v7068_v59 = vpop.f32.mrf.mxu0  ;;  %v17514_v25 = vld [vmem:[#allocation126_spill] sm:$0xff] }
 0x4a2   :  { %v7069_v32 = vadd.f32 %v7068_v59, %v17506_v47  ;;  %v7211_v55 = vpop.f32.mrf.mxu1 }
 0x4a3   :  { %v15391_v2 = vadd.f32 %v7211_v55, %v7059_v12  ;;  %v7070_v9 = vpop.f32.mrf.mxu0 }
 0x4a4   :  { %v7071_v52 = vadd.f32 %v7070_v9, %v17507_v58  ;;  %v7213_v33 = vpop.f32.mrf.mxu1 }
 0x4a5   :  { %v15394_v21 = vadd.f32 %v7213_v33, %v7061_v63  ;;  %v7260_v40 = vpop.f32.mrf.mxu0  ;;  %7871 = vmatmul.mubr.bf16.vlgmr.msra.gmra.mxu0 %v17509_v39 }
 0x4a6   :  { %v15398_v53 = vadd.f32 %v7260_v40, %v17510_v15  ;;  %v7217_v42 = vpop.f32.mrf.mxu1  ;;  %7828 = vmatmul.mubr.bf16.gmra.mxu1 %v17512_v43  ;;  %7880 = vmatprep.mubr.bf16.mxu0 %v17513_v13  ;;  %v17522_v13 = vld [vmem:[#allocation26_spill] sm:$0xff] }
 0x4a7   :  { %17508 = vst [vmem:[#allocation115_spill] sm:$0xff] %v15394_v21  ;;  %v15402_v54 = vadd.f32 %v7217_v42, %v7065_v14  ;;  %v7262_v12 = vpop.f32.mrf.mxu0  ;;  %8023 = vmatprep.mubr.bf16.mxu1 %v17514_v25 }
 0x4a8   :  { %17511 = vst [vmem:[#allocation41_spill] sm:$0xff] %v15398_v53  ;;  %v15406_v59 = vadd.f32 %v7262_v12, %v15222_v50  ;;  %v7219_v63 = vpop.f32.mrf.mxu1  ;;  %v17519_v50 = vld [vmem:[#allocation106_spill] sm:$0xff]  ;;  %v17523_v12 = vld [vmem:[#allocation125_spill] sm:$0xff] }
 0x4a9   :  { %v15408_v47 = vadd.f32 %v7219_v63, %v7067_v31  ;;  %v7264_v55 = vpop.f32.mrf.mxu0 }
 0x4aa   :  { %17515 = vst [vmem:[#allocation42_spill] sm:$0xff] %v15406_v59  ;;  %v15411_v9 = vadd.f32 %v7264_v55, %v15225_v3  ;;  %v7221_v58 = vpop.f32.mrf.mxu1  ;;  %v17521_v3 = vld [vmem:[#allocation89_spill] sm:$0xff] }
 0x4ab   :  { %v15413_v33 = vadd.f32 %v7221_v58, %v7069_v32  ;;  %v7266_v40 = vpop.f32.mrf.mxu0 }
 0x4ac   :  { %17516 = vst [vmem:[#allocation137_spill] sm:$0xff] %v15411_v9  ;;  %v15416_v14 = vadd.f32 %v7266_v40, %v15227_v1  ;;  %v7223_v39 = vpop.f32.mrf.mxu1 }
 0x4ad   :  { %v15418_v15 = vadd.f32 %v7223_v39, %v7071_v52  ;;  %v7270_v42 = vpop.f32.mrf.mxu0  ;;  %7881 = vmatmul.mubr.bf16.gmra.mxu0 %v17519_v50 }
 0x4ae   :  { %17517 = vst [vmem:[#allocation138_spill] sm:$0xff] %v15416_v14  ;;  %v15422_v31 = vadd.f32 %v7270_v42, %v15235_v37  ;;  %v15424_v43 = vpop.f32.mrf.mxu1  ;;  %7890 = vmatprep.mubr.bf16.mxu0 %v17521_v3  ;;  %8024 = vmatmul.mubr.bf16.vlgmr.msra.gmra.mxu1 %v17522_v13  ;;  %v17527_v42 = vld [vmem:[#allocation90_spill] sm:$0xff]  ;;  %v17529_v3 = vld [vmem:[#allocation88_spill] sm:$0xff] }
 0x4af   :  { %17518 = vst [vmem:[#allocation139_spill] sm:$0xff] %v15418_v15  ;;  %v7272_v32 = vpop.f32.mrf.mxu0  ;;  %8033 = vmatprep.mubr.bf16.mxu1 %v17523_v12 }
 0x4b0   :  { %17520 = vst [vmem:[#allocation80_spill] sm:$0xff] %v15422_v31  ;;  %v15430_v1 = vadd.f32 %v7272_v32, %v15240_v22  ;;  %v15432_v52 = vpop.f32.mrf.mxu1  ;;  %v17531_v32 = vld [vmem:[#allocation34_spill] sm:$0xff] }
 0x4b1   :  { %v7274_v25 = vpop.f32.mrf.mxu0 }
 0x4b2   :  { %17524 = vst [vmem:[#allocation43_spill] sm:$0xff] %v15430_v1  ;;  %v15435_v63 = vadd.f32 %v7274_v25, %v15243_v8  ;;  %v15437_v37 = vpop.f32.mrf.mxu1  ;;  %v17530_v8 = vld [vmem:[#allocation102_spill] sm:$0xff] }
 0x4b3   :  { %v7276_v55 = vpop.f32.mrf.mxu0 }
 0x4b4   :  { %17525 = vst [vmem:[#allocation44_spill] sm:$0xff] %v15435_v63  ;;  %v15440_v58 = vadd.f32 %v7276_v55, %v15245_v51  ;;  %v15442_v40 = vpop.f32.mrf.mxu1  ;;  %v17602_v63 = vld [vmem:[#allocation70_spill] sm:$0xff] }
 0x4b5   :  { %v7280_v39 = vpop.f32.mrf.mxu0  ;;  %7891 = vmatmul.mubr.bf16.gmra.mxu0 %v17527_v42 }
 0x4b6   :  { %17526 = vst [vmem:[#allocation131_spill] sm:$0xff] %v15440_v58  ;;  %v15446_v22 = vadd.f32 %v7280_v39, %v15253_v26  ;;  %v15448_v50 = vpop.f32.mrf.mxu1  ;;  %7900 = vmatprep.mubr.bf16.mxu0 %v17529_v3  ;;  %8034 = vmatmul.mubr.bf16.gmra.mxu1 %v17530_v8 }
 0x4b7   :  { %v7282_v13 = vpop.f32.mrf.mxu0  ;;  %8043 = vmatprep.mubr.bf16.mxu1 %v17531_v32  ;;  %v17537_v32 = vld [vmem:[#allocation93_spill] sm:$0xff] }
 0x4b8   :  { %17528 = vst [vmem:[#allocation51_spill] sm:$0xff] %v15446_v22  ;;  %v15454_v51 = vadd.f32 %v7282_v13, %v15258_v0  ;;  %v15456_v12 = vpop.f32.mrf.mxu1  ;;  %v17535_v22 = vld [vmem:[#allocation141_spill] sm:$0xff] }
 0x4b9   :  { %v7284_v25 = vpop.f32.mrf.mxu0 }
 0x4ba   :  { %17532 = vst [vmem:[#allocation109_spill] sm:$0xff] %v15454_v51  ;;  %v15459_v55 = vadd.f32 %v7284_v25, %v15261_v57  ;;  %v15461_v26 = vpop.f32.mrf.mxu1  ;;  %v17538_v57 = vld [vmem:[#allocation27_spill] sm:$0xff]  ;;  %v17543_v51 = vld [vmem:[#allocation142_spill] sm:$0xff] }
 0x4bb   :  { %v7286_v39 = vpop.f32.mrf.mxu0 }
 0x4bc   :  { %17533 = vst [vmem:[#allocation97_spill] sm:$0xff] %v15459_v55  ;;  %v15464_v42 = vadd.f32 %v7286_v39, %v15263_v35  ;;  %v15466_v3 = vpop.f32.mrf.mxu1  ;;  %v17539_v55 = vld [vmem:[#allocation28_spill] sm:$0xff] }
 0x4bd   :  { %v7290_v8 = vpop.f32.mrf.mxu0  ;;  %7901 = vmatmul.mubr.bf16.gmra.mxu0 %v17535_v22 }
 0x4be   :  { %17534 = vst [vmem:[#allocation82_spill] sm:$0xff] %v15464_v42  ;;  %v15470_v0 = vadd.f32 %v7290_v8, %v15271_v36  ;;  %v15472_v13 = vpop.f32.mrf.mxu1  ;;  %7910 = vmatprep.mubr.bf16.mxu0 %v17537_v32  ;;  %8044 = vmatmul.mubr.bf16.gmra.mxu1 %v17538_v57 }
 0x4bf   :  { %v7292_v25 = vpop.f32.mrf.mxu0  ;;  %8053 = vmatprep.mubr.bf16.mxu1 %v17539_v55 }
 0x4c0   :  { %17536 = vst [vmem:[#allocation111_spill] sm:$0xff] %v15470_v0  ;;  %v15478_v35 = vadd.f32 %v7292_v25, %v15276_v46  ;;  %v15480_v39 = vpop.f32.mrf.mxu1  ;;  %v17545_v25 = vld [vmem:[#allocation144_spill] sm:$0xff] }
 0x4c1   :  { %v7294_v42 = vpop.f32.mrf.mxu0 }
 0x4c2   :  { %17540 = vst [vmem:[#allocation85_spill] sm:$0xff] %v15478_v35  ;;  %v15483_v22 = vadd.f32 %v7294_v42, %v15279_v49  ;;  %v15485_v36 = vpop.f32.mrf.mxu1  ;;  %v17546_v49 = vld [vmem:[#allocation103_spill] sm:$0xff]  ;;  %v17551_v35 = vld [vmem:[#allocation94_spill] sm:$0xff] }
 0x4c3   :  { %v7296_v8 = vpop.f32.mrf.mxu0 }
 0x4c4   :  { %17541 = vst [vmem:[#allocation92_spill] sm:$0xff] %v15483_v22  ;;  %v15488_v0 = vadd.f32 %v7296_v8, %v15282_v5  ;;  %v15490_v32 = vpop.f32.mrf.mxu1  ;;  %v17547_v22 = vld [vmem:[#allocation129_spill] sm:$0xff] }
 0x4c5   :  { %v7300_v57 = vpop.f32.mrf.mxu0  ;;  %7911 = vmatmul.mubr.bf16.gmra.mxu0 %v17543_v51 }
 0x4c6   :  { %17542 = vst [vmem:[#allocation69_spill] sm:$0xff] %v15488_v0  ;;  %v15494_v46 = vadd.f32 %v7300_v57, %v15288_v29  ;;  %v15496_v55 = vpop.f32.mrf.mxu1  ;;  %7920 = vmatprep.mubr.bf16.mxu0 %v17545_v25  ;;  %8054 = vmatmul.mubr.bf16.gmra.mxu1 %v17546_v49 }
 0x4c7   :  { %v7302_v42 = vpop.f32.mrf.mxu0  ;;  %8063 = vmatprep.mubr.bf16.mxu1 %v17547_v22 }
 0x4c8   :  { %17544 = vst [vmem:[#allocation37_spill] sm:$0xff] %v15494_v46  ;;  %v15502_v5 = vadd.f32 %v7302_v42, %v15292_v34  ;;  %v15504_v8 = vpop.f32.mrf.mxu1  ;;  %v17553_v42 = vld [vmem:[#allocation72_spill] sm:$0xff] }
 0x4c9   :  { %v7304_v0 = vpop.f32.mrf.mxu0 }
 0x4ca   :  { %17548 = vst [vmem:[#allocation38_spill] sm:$0xff] %v15502_v5  ;;  %v15507_v51 = vadd.f32 %v7304_v0, %v15295_v6  ;;  %v15509_v29 = vpop.f32.mrf.mxu1  ;;  %v17554_v6 = vld [vmem:[#allocation108_spill] sm:$0xff]  ;;  %v17559_v5 = vld [vmem:[#allocation118_spill] sm:$0xff] }
 0x4cb   :  { %v7306_v57 = vpop.f32.mrf.mxu0 }
 0x4cc   :  { %17549 = vst [vmem:[#allocation55_spill] sm:$0xff] %v15507_v51  ;;  %v15512_v46 = vadd.f32 %v7306_v57, %v15298_v7  ;;  %v15514_v25 = vpop.f32.mrf.mxu1  ;;  %v17555_v51 = vld [vmem:[#allocation130_spill] sm:$0xff] }
 0x4cd   :  { %v7310_v49 = vpop.f32.mrf.mxu0  ;;  %7921 = vmatmul.mubr.bf16.gmra.mxu0 %v17551_v35 }
 0x4ce   :  { %17550 = vst [vmem:[#allocation95_spill] sm:$0xff] %v15512_v46  ;;  %v15518_v34 = vadd.f32 %v7310_v49, %v15304_v11  ;;  %v15520_v22 = vpop.f32.mrf.mxu1  ;;  %7930 = vmatprep.mubr.bf16.mxu0 %v17553_v42  ;;  %8064 = vmatmul.mubr.bf16.gmra.mxu1 %v17554_v6 }
 0x4cf   :  { %v7312_v0 = vpop.f32.mrf.mxu0  ;;  %8073 = vmatprep.mubr.bf16.mxu1 %v17555_v51 }
 0x4d0   :  { %17552 = vst [vmem:[#allocation57_spill] sm:$0xff] %v15518_v34  ;;  %v15526_v7 = vadd.f32 %v7312_v0, %v15308_v61  ;;  %v15528_v57 = vpop.f32.mrf.mxu1  ;;  %v17561_v0 = vld [vmem:[#allocation119_spill] sm:$0xff] }
 0x4d1   :  { %v7314_v46 = vpop.f32.mrf.mxu0 }
 0x4d2   :  { %17556 = vst [vmem:[#allocation33_spill] sm:$0xff] %v15526_v7  ;;  %v15531_v35 = vadd.f32 %v7314_v46, %v15311_v17  ;;  %v15533_v11 = vpop.f32.mrf.mxu1  ;;  %v17562_v17 = vld [vmem:[#allocation29_spill] sm:$0xff]  ;;  %v17567_v7 = vld [vmem:[#allocation120_spill] sm:$0xff] }
 0x4d3   :  { %v7316_v49 = vpop.f32.mrf.mxu0 }
 0x4d4   :  { %17557 = vst [vmem:[#allocation112_spill] sm:$0xff] %v15531_v35  ;;  %v15536_v34 = vadd.f32 %v7316_v49, %v15314_v30  ;;  %v15538_v42 = vpop.f32.mrf.mxu1  ;;  %v17563_v35 = vld [vmem:[#allocation128_spill] sm:$0xff] }
 0x4d5   :  { %v7320_v6 = vpop.f32.mrf.mxu0  ;;  %7931 = vmatmul.mubr.bf16.gmra.mxu0 %v17559_v5 }
 0x4d6   :  { %17558 = vst [vmem:[#allocation58_spill] sm:$0xff] %v15536_v34  ;;  %v15542_v61 = vadd.f32 %v7320_v6, %v15320_v24  ;;  %v15544_v51 = vpop.f32.mrf.mxu1  ;;  %7940 = vmatprep.mubr.bf16.mxu0 %v17561_v0  ;;  %8074 = vmatmul.mubr.bf16.gmra.mxu1 %v17562_v17 }
 0x4d7   :  { %v7322_v46 = vpop.f32.mrf.mxu0  ;;  %8083 = vmatprep.mubr.bf16.mxu1 %v17563_v35 }
 0x4d8   :  { %17560 = vst [vmem:[#allocation59_spill] sm:$0xff] %v15542_v61  ;;  %v15550_v30 = vadd.f32 %v7322_v46, %v15324_v62  ;;  %v15552_v49 = vpop.f32.mrf.mxu1  ;;  %v17569_v46 = vld [vmem:[#allocation24_spill] sm:$0xff] }
 0x4d9   :  { %v7324_v34 = vpop.f32.mrf.mxu0 }
 0x4da   :  { %17564 = vst [vmem:[#allocation113_spill] sm:$0xff] %v15550_v30  ;;  %v15555_v5 = vadd.f32 %v7324_v34, %v15327_v16  ;;  %v15557_v24 = vpop.f32.mrf.mxu1  ;;  %v17570_v16 = vld [vmem:[#allocation132_spill] sm:$0xff]  ;;  %v17575_v30 = vld [vmem:[#allocation121_spill] sm:$0xff] }
 0x4db   :  { %v7326_v6 = vpop.f32.mrf.mxu0 }
 0x4dc   :  { %17565 = vst [vmem:[#allocation45_spill] sm:$0xff] %v15555_v5  ;;  %v15560_v61 = vadd.f32 %v7326_v6, %v15330_v45  ;;  %v15562_v0 = vpop.f32.mrf.mxu1  ;;  %v17571_v5 = vld [vmem:[#allocation30_spill] sm:$0xff] }
 0x4dd   :  { %v7330_v17 = vpop.f32.mrf.mxu0  ;;  %7941 = vmatmul.mubr.bf16.gmra.mxu0 %v17567_v7 }
 0x4de   :  { %17566 = vst [vmem:[#allocation86_spill] sm:$0xff] %v15560_v61  ;;  %v15566_v62 = vadd.f32 %v7330_v17, %v15336_v27  ;;  %v15568_v35 = vpop.f32.mrf.mxu1  ;;  %7950 = vmatprep.mubr.bf16.mxu0 %v17569_v46  ;;  %8084 = vmatmul.mubr.bf16.gmra.mxu1 %v17570_v16 }
 0x4df   :  { %v7332_v34 = vpop.f32.mrf.mxu0  ;;  %8093 = vmatprep.mubr.bf16.mxu1 %v17571_v5 }
 0x4e0   :  { %17568 = vst [vmem:[#allocation60_spill] sm:$0xff] %v15566_v62  ;;  %v15574_v45 = vadd.f32 %v7332_v34, %v15340_v19  ;;  %v15576_v6 = vpop.f32.mrf.mxu1  ;;  %v17577_v34 = vld [vmem:[#allocation122_spill] sm:$0xff] }
 0x4e1   :  { %v7334_v61 = vpop.f32.mrf.mxu0 }
 0x4e2   :  { %17572 = vst [vmem:[#allocation134_spill] sm:$0xff] %v15574_v45  ;;  %v15579_v7 = vadd.f32 %v7334_v61, %v15343_v38  ;;  %v15581_v27 = vpop.f32.mrf.mxu1  ;;  %v17578_v38 = vld [vmem:[#allocation105_spill] sm:$0xff] }
 0x4e3   :  { %v7336_v17 = vpop.f32.mrf.mxu0 }
 0x4e4   :  { %17573 = vst [vmem:[#allocation76_spill] sm:$0xff] %v15579_v7  ;;  %v15584_v62 = vadd.f32 %v7336_v17, %v15346_v48  ;;  %v15586_v46 = vpop.f32.mrf.mxu1  ;;  %v17579_v7 = vld [vmem:[#allocation135_spill] sm:$0xff] }
 0x4e5   :  { %v7340_v16 = vpop.f32.mrf.mxu0  ;;  %7951 = vmatmul.mubr.bf16.gmra.mxu0 %v17575_v30 }
 0x4e6   :  { %17574 = vst [vmem:[#allocation63_spill] sm:$0xff] %v15584_v62  ;;  %v15590_v19 = vadd.f32 %v7340_v16, %v15352_v28  ;;  %v15592_v5 = vpop.f32.mrf.mxu1  ;;  %7960 = vmatprep.mubr.bf16.mxu0 %v17577_v34  ;;  %8094 = vmatmul.mubr.bf16.gmra.mxu1 %v17578_v38  ;;  %v17583_v38 = vld [vmem:[#allocation124_spill] sm:$0xff] }
 0x4e7   :  { %v7342_v61 = vpop.f32.mrf.mxu0  ;;  %8103 = vmatprep.mubr.bf16.mxu1 %v17579_v7 }
 0x4e8   :  { %17576 = vst [vmem:[#allocation140_spill] sm:$0xff] %v15590_v19  ;;  %v15598_v48 = vadd.f32 %v7342_v61, %v15356_v60  ;;  %v15600_v17 = vpop.f32.mrf.mxu1  ;;  %v17585_v61 = vld [vmem:[#allocation101_spill] sm:$0xff] }
 0x4e9   :  { %v7344_v62 = vpop.f32.mrf.mxu0 }
 0x4ea   :  { %17580 = vst [vmem:[#allocation127_spill] sm:$0xff] %v15598_v48  ;;  %v15603_v30 = vadd.f32 %v7344_v62, %v15359_v20  ;;  %v15605_v28 = vpop.f32.mrf.mxu1  ;;  %v17586_v48 = vld [vmem:[#allocation32_spill] sm:$0xff]  ;;  %v17587_v62 = vld [vmem:[#allocation47_spill] sm:$0xff] }
 0x4eb   :  { %v15607_v16 = vpop.f32.mrf.mxu0 }
 0x4ec   :  { %17581 = vst [vmem:[#allocation136_spill] sm:$0xff] %v15603_v30  ;;  %17582 = vst [vmem:[#allocation104_spill] sm:$0xff] %v15607_v16  ;;  %v15609_v19 = vpop.f32.mrf.mxu1 }
 0x4ed   :  { %v7350_v34 = vpop.f32.mrf.mxu0  ;;  %7961 = vmatmul.mubr.bf16.gmra.mxu0 %v17583_v38 }
 0x4ee   :  { %v15613_v7 = vadd.f32 %v7350_v34, %v15368_v10  ;;  %v15615_v60 = vpop.f32.mrf.mxu1  ;;  %7970 = vmatprep.mubr.bf16.mxu0 %v17585_v61  ;;  %8104 = vmatmul.mubr.bf16.gmra.mxu1 %v17586_v48  ;;  %v17591_v48 = vld [vmem:[#allocation99_spill] sm:$0xff] }
 0x4ef   :  { %v7352_v20 = vpop.f32.mrf.mxu0  ;;  %8113 = vmatprep.mubr.bf16.mxu1 %v17587_v62 }
 0x4f0   :  { %17584 = vst [vmem:[#allocation77_spill] sm:$0xff] %v15613_v7  ;;  %v15621_v30 = vadd.f32 %v7352_v20, %v15372_v23  ;;  %v15623_v45 = vpop.f32.mrf.mxu1  ;;  %v17593_v20 = vld [vmem:[#allocation91_spill] sm:$0xff] }
 0x4f1   :  { %v7354_v15 = vpop.f32.mrf.mxu0 }
 0x4f2   :  { %17588 = vst [vmem:[#allocation66_spill] sm:$0xff] %v15621_v30  ;;  %v15626_v38 = vadd.f32 %v7354_v15, %v15375_v18  ;;  %v15628_v10 = vpop.f32.mrf.mxu1  ;;  %v17594_v30 = vld [vmem:[#allocation133_spill] sm:$0xff] }
 0x4f3   :  { %v15630_v34 = vpop.f32.mrf.mxu0  ;;  %v17595_v15 = vld [vmem:[#allocation117_spill] sm:$0xff] }
 0x4f4   :  { %17589 = vst [vmem:[#allocation67_spill] sm:$0xff] %v15626_v38  ;;  %17590 = vst [vmem:[#allocation46_spill] sm:$0xff] %v15630_v34  ;;  %v15632_v7 = vpop.f32.mrf.mxu1 }
 0x4f5   :  { %v7360_v61 = vpop.f32.mrf.mxu0  ;;  %7971 = vmatmul.mubr.bf16.gmra.mxu0 %v17591_v48 }
 0x4f6   :  { %v15636_v62 = vadd.f32 %v7360_v61, %v15384_v41  ;;  %v15638_v23 = vpop.f32.mrf.mxu1  ;;  %7980 = vmatprep.mubr.bf16.mxu0 %v17593_v20  ;;  %8114 = vmatmul.mubr.bf16.gmra.mxu1 %v17594_v30  ;;  %v17599_v30 = vld [vmem:[#allocation64_spill] sm:$0xff] }
 0x4f7   :  { %v7362_v18 = vpop.f32.mrf.mxu0  ;;  %8123 = vmatprep.mubr.bf16.mxu1 %v17595_v15 }
 0x4f8   :  { %17592 = vst [vmem:[#allocation81_spill] sm:$0xff] %v15636_v62  ;;  %v15644_v38 = vadd.f32 %v7362_v18, %v15388_v44  ;;  %v15646_v21 = vpop.f32.mrf.mxu1  ;;  %v17601_v18 = vld [vmem:[#allocation116_spill] sm:$0xff] }
 0x4f9   :  { %v7364_v58 = vpop.f32.mrf.mxu0 }
 0x4fa   :  { %17596 = vst [vmem:[#allocation68_spill] sm:$0xff] %v15644_v38  ;;  %v15649_v48 = vadd.f32 %v7364_v58, %v15391_v2  ;;  %v15651_v41 = vpop.f32.mrf.mxu1  ;;  %v11594_v2 = vld [vmem:[#allocation7] sm:$0xf] }
 0x4fb   :  { %v15653_v61 = vpop.f32.mrf.mxu0  ;;  %v17603_v58 = vld [vmem:[#allocation75_spill] sm:$0xff] }
 0x4fc   :  { %17597 = vst [vmem:[#allocation143_spill] sm:$0xff] %v15649_v48  ;;  %17598 = vst [vmem:[#allocation48_spill] sm:$0xff] %v15653_v61  ;;  %v15655_v62 = vpop.f32.mrf.mxu1  ;;  %v17604_v48 = vsub.s32 2, %v17603_v58 }
 0x4fd   :  { %v7370_v20 = vpop.f32.mrf.mxu0  ;;  %7981 = vmatmul.mubr.bf16.gmra.mxu0 %v17599_v30 }
 0x4fe   :  { %v15659_v15 = vadd.f32 %v7370_v20, %v15402_v54  ;;  %v15661_v44 = vpop.f32.mrf.mxu1  ;;  %8124 = vmatmul.mubr.bf16.gmra.mxu1 %v17601_v18  ;;  %v15667_v34 = vrot.slane %v11594_v2, %v17604_v48  ;;  %v17606_v54 = vsub.s32 3, %v17603_v58 }
 0x4ff   :  { %v7372_v38 = vpop.f32.mrf.mxu0  ;;  %8133 = vmatprep.mubr.bf16.mxu1 %v17602_v63 }
 0x500   :  { %17600 = vst [vmem:[#allocation79_spill] sm:$0xff] %v15659_v15  ;;  %v15670_v61 = vadd.f32 %v7372_v38, %v15408_v47  ;;  %v15672_v56 = vpop.f32.mrf.mxu1  ;;  %v15676_v20 = vrot.slane %v11594_v2, %v17606_v54  ;;  %v7414_v48 = vadd.f32 %v15424_v43, %v15667_v34  ;;  %v17609_v2 = vld [vmem:[#allocation98_spill] sm:$0xff] }
 0x501   :  { %v7374_v30 = vpop.f32.mrf.mxu0 }
 0x502   :  { %17605 = vst [vmem:[#allocation96_spill] sm:$0xff] %v15670_v61  ;;  %v15679_v18 = vadd.f32 %v7374_v30, %v15413_v33  ;;  %v15681_v15 = vpop.f32.mrf.mxu1  ;;  %v7416_v38 = vadd.f32 %v15432_v52, %v15676_v20  ;;  %v7418_v30 = vadd.f32 %v15437_v37, %v15667_v34  ;;  %v7420_v43 = vadd.f32 %v15442_v40, %v15676_v20 }
 0x503   :  { %v15683_v63 = vpop.f32.mrf.mxu0  ;;  %v7426_v37 = vadd.f32 %v15456_v12, %v15676_v20  ;;  %v7428_v40 = vadd.f32 %v15461_v26, %v15667_v34  ;;  %v7434_v12 = vadd.f32 %v15472_v13, %v15667_v34  ;;  %v11489_v26 = vld [vmem:[#allocation9 + $0x78] sm:$0xff]  }
 0x504   :  { %17607 = vst [vmem:[#allocation145_spill] sm:$0xff] %v15679_v18  ;;  %17608 = vst [vmem:[#allocation49_spill] sm:$0xff] %v15683_v63  ;;  %v15687_v1 = vpop.f32.mrf.mxu1  ;;  %10548 = vmatprep.subr.bf16.mxu0 %v11489_v26 }
 0x505   :  { %v7566_v47 = vpop.f32.mrf.mxu0 }
 0x506   :  { %v7567_v61 = vadd.f32 %v7566_v47, %v7414_v48  ;;  %v15691_v58 = vpop.f32.mrf.mxu1  ;;  %8134 = vmatmul.mubr.bf16.gmra.mxu1 %v17609_v2  ;;  %v7424_v48 = vadd.f32 %v15448_v50, %v15667_v34 }
 0x507   :  { %v7568_v33 = vpop.f32.mrf.mxu0 }
 0x508   :  { %v7569_v54 = vadd.f32 %v7568_v33, %v7416_v38  ;;  %v15696_v18 = vpop.f32.mrf.mxu1 }
 0x509   :  { %v7570_v63 = vpop.f32.mrf.mxu0 }
 0x50a   :  { %v7571_v16 = vadd.f32 %v7570_v63, %v7418_v30  ;;  %v15700_v4 = vpop.f32.mrf.mxu1 }
 0x50b   :  { %v7572_v52 = vpop.f32.mrf.mxu0 }
 0x50c   :  { %v7573_v47 = vadd.f32 %v7572_v52, %v7420_v43  ;;  %v15704_v2 = vpop.f32.mrf.mxu1  ;;  %v7430_v43 = vadd.f32 %v15466_v3, %v15676_v20 }
 0x50d   :  { %17610 = vst [vmem:[#allocation83_spill] sm:$0xff] %v15704_v2  ;;  %v7576_v31 = vpop.f32.mrf.mxu0 }
 0x50e   :  { %v7577_v38 = vadd.f32 %v7576_v31, %v7424_v48  ;;  %v7719_v33 = vpop.f32.mrf.mxu1 }
 0x50f   :  { %v15708_v14 = vadd.f32 %v7719_v33, %v7567_v61  ;;  %v7578_v9 = vpop.f32.mrf.mxu0 }
 0x510   :  { %v7579_v63 = vadd.f32 %v7578_v9, %v7426_v37  ;;  %v7721_v30 = vpop.f32.mrf.mxu1  ;;  %v7436_v37 = vadd.f32 %v15480_v39, %v15676_v20 }
 0x511   :  { %v15712_v59 = vadd.f32 %v7721_v30, %v7569_v54  ;;  %v7580_v50 = vpop.f32.mrf.mxu0  ;;  %v11490_v54 = vld [vmem:[#allocation9 + $0x38] sm:$0xff]  }
 0x512   :  { %v7581_v52 = vadd.f32 %v7580_v50, %v7428_v40  ;;  %v7723_v53 = vpop.f32.mrf.mxu1  ;;  %10549 = vmatpush3.bf16.msra.mxu0 %v11490_v54 }
 0x513   :  { %v15716_v2 = vadd.f32 %v7723_v53, %v7571_v16  ;;  %v7582_v31 = vpop.f32.mrf.mxu0  ;;  %v7438_v16 = vadd.f32 %v15485_v36, %v15667_v34 }
 0x514   :  { %v7583_v61 = vadd.f32 %v7582_v31, %v7430_v43  ;;  %v7725_v48 = vpop.f32.mrf.mxu1  ;;  %v7440_v31 = vadd.f32 %v15490_v32, %v15676_v20 }
 0x515   :  { %v15720_v33 = vadd.f32 %v7725_v48, %v7573_v47  ;;  %v7586_v9 = vpop.f32.mrf.mxu0 }
 0x516   :  { %v7587_v30 = vadd.f32 %v7586_v9, %v7434_v12  ;;  %v7729_v3 = vpop.f32.mrf.mxu1  ;;  %v7444_v9 = vadd.f32 %v15496_v55, %v15667_v34 }
 0x517   :  { %v15724_v40 = vadd.f32 %v7729_v3, %v7577_v38  ;;  %v7588_v53 = vpop.f32.mrf.mxu0 }
 0x518   :  { %v7589_v13 = vadd.f32 %v7588_v53, %v7436_v37  ;;  %v7731_v50 = vpop.f32.mrf.mxu1 }
 0x519   :  { %v15728_v47 = vadd.f32 %v7731_v50, %v7579_v63  ;;  %v7590_v43 = vpop.f32.mrf.mxu0  ;;  %v7446_v63 = vadd.f32 %v15504_v8, %v15676_v20 }
 0x51a   :  { %v7591_v48 = vadd.f32 %v7590_v43, %v7438_v16  ;;  %v7733_v39 = vpop.f32.mrf.mxu1 }
 0x51b   :  { %v15732_v12 = vadd.f32 %v7733_v39, %v7581_v52  ;;  %v7592_v38 = vpop.f32.mrf.mxu0  ;;  %v7448_v52 = vadd.f32 %v15509_v29, %v15667_v34  ;;  %v11492_v29 = vld [vmem:[#allocation9 + $0x30] sm:$0xff]  }
 0x51c   :  { %v7593_v26 = vadd.f32 %v7592_v38, %v7440_v31  ;;  %v7735_v3 = vpop.f32.mrf.mxu1 }
 0x51d   :  { %v15736_v36 = vadd.f32 %v7735_v3, %v7583_v61  ;;  %v7596_v37 = vpop.f32.mrf.mxu0  ;;  %v7450_v61 = vadd.f32 %v15514_v25, %v15676_v20 }
 0x51e   :  { %v7597_v54 = vadd.f32 %v7596_v37, %v7444_v9  ;;  %v7739_v53 = vpop.f32.mrf.mxu1 }
 0x51f   :  { %v15740_v50 = vadd.f32 %v7739_v53, %v7587_v30  ;;  %v7598_v32 = vpop.f32.mrf.mxu0  ;;  %v7454_v30 = vadd.f32 %v15520_v22, %v15667_v34  ;;  %v11491_v53 = vld [vmem:[#allocation9 + $0x70] sm:$0xff]   ;;  %v7458_v22 = vadd.f32 %v15533_v11, %v15667_v34 }
 0x520   :  { %v7599_v16 = vadd.f32 %v7598_v32, %v7446_v63  ;;  %v7741_v43 = vpop.f32.mrf.mxu1  ;;  %v7456_v32 = vadd.f32 %v15528_v57, %v15676_v20  ;;  %10550 = vmatprep.subr.bf16.mxu0 %v11491_v53 }
 0x521   :  { %v15744_v39 = vadd.f32 %v7741_v43, %v7589_v13  ;;  %v7600_v55 = vpop.f32.mrf.mxu0  ;;  %10551 = vmatpush3.bf16.msra.mxu0 %v11492_v29 }
 0x522   :  { %v7601_v31 = vadd.f32 %v7600_v55, %v7448_v52  ;;  %v7743_v38 = vpop.f32.mrf.mxu1 }
 0x523   :  { %v15748_v3 = vadd.f32 %v7743_v38, %v7591_v48  ;;  %v7602_v8 = vpop.f32.mrf.mxu0 }
 0x524   :  { %v7603_v9 = vadd.f32 %v7602_v8, %v7450_v61  ;;  %v7745_v37 = vpop.f32.mrf.mxu1  ;;  %v7460_v8 = vadd.f32 %v15538_v42, %v15676_v20 }
 0x525   :  { %v15752_v63 = vadd.f32 %v7745_v37, %v7593_v26  ;;  %v7606_v13 = vpop.f32.mrf.mxu0 }
 0x526   :  { %v7607_v43 = vadd.f32 %v7606_v13, %v7454_v30  ;;  %v7749_v25 = vpop.f32.mrf.mxu1 }
 0x527   :  { %v15756_v52 = vadd.f32 %v7749_v25, %v7597_v54  ;;  %v7608_v48 = vpop.f32.mrf.mxu0  ;;  %v7464_v54 = vadd.f32 %v15544_v51, %v15667_v34 }
 0x528   :  { %v7609_v55 = vadd.f32 %v7608_v48, %v7456_v32  ;;  %v7751_v61 = vpop.f32.mrf.mxu1 }
 0x529   :  { %v15760_v38 = vadd.f32 %v7751_v61, %v7599_v16  ;;  %v7610_v26 = vpop.f32.mrf.mxu0  ;;  %v7466_v16 = vadd.f32 %v15552_v49, %v15676_v20 }
 0x52a   :  { %v7611_v37 = vadd.f32 %v7610_v26, %v7458_v22  ;;  %v7753_v57 = vpop.f32.mrf.mxu1 }
 0x52b   :  { %v15764_v30 = vadd.f32 %v7753_v57, %v7601_v31  ;;  %v7612_v53 = vpop.f32.mrf.mxu0  ;;  %v7468_v31 = vadd.f32 %v15557_v24, %v15667_v34 }
 0x52c   :  { %v7613_v29 = vadd.f32 %v7612_v53, %v7460_v8  ;;  %v7755_v13 = vpop.f32.mrf.mxu1 }
 0x52d   :  { %v15768_v25 = vadd.f32 %v7755_v13, %v7603_v9  ;;  %v7616_v11 = vpop.f32.mrf.mxu0  ;;  %v7470_v9 = vadd.f32 %v15562_v0, %v15676_v20 }
 0x52e   :  { %v7617_v32 = vadd.f32 %v7616_v11, %v7464_v54  ;;  %v7759_v48 = vpop.f32.mrf.mxu1  ;;  %v11493_v54 = vld [vmem:[#allocation9 + $0x68] sm:$0xff]   ;;  %v7474_v11 = vadd.f32 %v15568_v35, %v15667_v34 }
 0x52f   :  { %v15772_v61 = vadd.f32 %v7759_v48, %v7607_v43  ;;  %v7618_v42 = vpop.f32.mrf.mxu0  ;;  %v11494_v43 = vld [vmem:[#allocation9 + $0x28] sm:$0xff]   ;;  %10552 = vmatprep.subr.bf16.mxu0 %v11493_v54 }
 0x530   :  { %v7619_v22 = vadd.f32 %v7618_v42, %v7466_v16  ;;  %v7761_v26 = vpop.f32.mrf.mxu1  ;;  %v7476_v42 = vadd.f32 %v15576_v6, %v15676_v20  ;;  %10553 = vmatpush3.bf16.msra.mxu0 %v11494_v43 }
 0x531   :  { %v15776_v57 = vadd.f32 %v7761_v26, %v7609_v55  ;;  %v7620_v51 = vpop.f32.mrf.mxu0 }
 0x532   :  { %v7621_v8 = vadd.f32 %v7620_v51, %v7468_v31  ;;  %v7763_v53 = vpop.f32.mrf.mxu1  ;;  %v7478_v51 = vadd.f32 %v15581_v27, %v15667_v34  ;;  %v11496_v27 = vld [vmem:[#allocation9 + $0xb8] sm:$0xff]  }
 0x533   :  { %v15780_v13 = vadd.f32 %v7763_v53, %v7611_v37  ;;  %v7622_v49 = vpop.f32.mrf.mxu0 }
 0x534   :  { %v7623_v48 = vadd.f32 %v7622_v49, %v7470_v9  ;;  %v7765_v24 = vpop.f32.mrf.mxu1  ;;  %v7480_v49 = vadd.f32 %v15586_v46, %v15676_v20 }
 0x535   :  { %v15784_v16 = vadd.f32 %v7765_v24, %v7613_v29  ;;  %v7626_v55 = vpop.f32.mrf.mxu0 }
 0x536   :  { %v7627_v0 = vadd.f32 %v7626_v55, %v7474_v11  ;;  %v7769_v31 = vpop.f32.mrf.mxu1 }
 0x537   :  { %v15788_v37 = vadd.f32 %v7769_v31, %v7617_v32  ;;  %v7628_v26 = vpop.f32.mrf.mxu0  ;;  %v7484_v32 = vadd.f32 %v15592_v5, %v15667_v34  ;;  %v11495_v31 = vld [vmem:[#allocation9 + $0xf8] sm:$0xff]   ;;  %v7488_v5 = vadd.f32 %v15605_v28, %v15667_v34  ;;  %v11498_v28 = vld [vmem:[#allocation9 + $0x20] sm:$0xff]  }
 0x538   :  { %v7629_v53 = vadd.f32 %v7628_v26, %v7476_v42  ;;  %v7771_v35 = vpop.f32.mrf.mxu1  ;;  %v7486_v26 = vadd.f32 %v15600_v17, %v15676_v20  ;;  %10570 = vmatprep.subr.bf16.mxu1 %v11495_v31 }
 0x539   :  { %v15792_v9 = vadd.f32 %v7771_v35, %v7619_v22  ;;  %v7630_v29 = vpop.f32.mrf.mxu0  ;;  %10571 = vmatpush3.bf16.msra.mxu1 %v11496_v27 }
 0x53a   :  { %v7631_v54 = vadd.f32 %v7630_v29, %v7478_v51  ;;  %v7773_v24 = vpop.f32.mrf.mxu1 }
 0x53b   :  { %v15796_v6 = vadd.f32 %v7773_v24, %v7621_v8  ;;  %v7632_v11 = vpop.f32.mrf.mxu0 }
 0x53c   :  { %v7633_v43 = vadd.f32 %v7632_v11, %v7480_v49  ;;  %v7775_v55 = vpop.f32.mrf.mxu1  ;;  %v7490_v11 = vadd.f32 %v15609_v19, %v15676_v20 }
 0x53d   :  { %v15800_v42 = vadd.f32 %v7775_v55, %v7623_v48  ;;  %v7636_v22 = vpop.f32.mrf.mxu0 }
 0x53e   :  { %v7637_v35 = vadd.f32 %v7636_v22, %v7484_v32  ;;  %v7779_v46 = vpop.f32.mrf.mxu1 }
 0x53f   :  { %v15804_v51 = vadd.f32 %v7779_v46, %v7627_v0  ;;  %v7638_v8 = vpop.f32.mrf.mxu0  ;;  %v7494_v0 = vadd.f32 %v15615_v60, %v15667_v34  ;;  %v11497_v46 = vld [vmem:[#allocation9 + $0x60] sm:$0xff]   ;;  %v7498_v60 = vadd.f32 %v15628_v10, %v15667_v34  ;;  %v7506_v10 = vadd.f32 %v15646_v21, %v15676_v20 }
 0x540   :  { %v7639_v29 = vadd.f32 %v7638_v8, %v7486_v26  ;;  %v7781_v49 = vpop.f32.mrf.mxu1  ;;  %v7496_v8 = vadd.f32 %v15623_v45, %v15676_v20  ;;  %10554 = vmatprep.subr.bf16.mxu0 %v11497_v46 }
 0x541   :  { %v15808_v24 = vadd.f32 %v7781_v49, %v7629_v53  ;;  %v7640_v48 = vpop.f32.mrf.mxu0  ;;  %10555 = vmatpush3.bf16.msra.mxu0 %v11498_v28 }
 0x542   :  { %v7641_v55 = vadd.f32 %v7640_v48, %v7488_v5  ;;  %v7783_v17 = vpop.f32.mrf.mxu1 }
 0x543   :  { %v15812_v32 = vadd.f32 %v7783_v17, %v7631_v54  ;;  %v7642_v31 = vpop.f32.mrf.mxu0 }
 0x544   :  { %v7643_v27 = vadd.f32 %v7642_v31, %v7490_v11  ;;  %v7785_v22 = vpop.f32.mrf.mxu1 }
 0x545   :  { %v15816_v26 = vadd.f32 %v7785_v22, %v7633_v43  ;;  %v7646_v53 = vpop.f32.mrf.mxu0 }
 0x546   :  { %v7647_v49 = vadd.f32 %v7646_v53, %v7494_v0  ;;  %v7789_v19 = vpop.f32.mrf.mxu1  ;;  %v11499_v0 = vld [vmem:[#allocation9 + $0xf0] sm:$0xff]  }
 0x547   :  { %17611 = vst [vmem:[#allocation71_spill] sm:$0xff] %v15816_v26  ;;  %v15820_v5 = vadd.f32 %v7789_v19, %v7637_v35  ;;  %v7648_v54 = vpop.f32.mrf.mxu0  ;;  %v11500_v53 = vld [vmem:[#allocation9 + $0xb0] sm:$0xff]   ;;  %v7504_v35 = vadd.f32 %v15638_v23, %v15667_v34  ;;  %10572 = vmatprep.subr.bf16.mxu1 %v11499_v0  ;;  %v7500_v23 = vadd.f32 %v15632_v7, %v15676_v20 }
 0x548   :  { %v7649_v48 = vadd.f32 %v7648_v54, %v7496_v8  ;;  %v7791_v11 = vpop.f32.mrf.mxu1  ;;  %10573 = vmatpush3.bf16.msra.mxu1 %v11500_v53  ;;  %v7516_v7 = vadd.f32 %v15672_v56, %v15676_v20  ;;  %v11503_v56 = vld [vmem:[#allocation9 + $0xe8] sm:$0xff]  }
 0x549   :  { %v15824_v17 = vadd.f32 %v7791_v11, %v7639_v29  ;;  %v7650_v43 = vpop.f32.mrf.mxu0  ;;  %10574 = vmatprep.subr.bf16.mxu1 %v11503_v56 }
 0x54a   :  { %v7651_v31 = vadd.f32 %v7650_v43, %v7498_v60  ;;  %v7793_v22 = vpop.f32.mrf.mxu1  ;;  %v7508_v60 = vadd.f32 %v15651_v41, %v15667_v34 }
 0x54b   :  { %v15826_v26 = vadd.f32 %v7793_v22, %v7641_v55  ;;  %v7652_v45 = vpop.f32.mrf.mxu0 }
 0x54c   :  { %v7795_v46 = vpop.f32.mrf.mxu1  ;;  %v7653_v21 = vadd.f32 %v7652_v45, %v7500_v23 }
 0x54d   :  { %v15830_v28 = vadd.f32 %v7795_v46, %v7643_v27  ;;  %v7656_v19 = vpop.f32.mrf.mxu0 }
 0x54e   :  { %v7657_v29 = vadd.f32 %v7656_v19, %v7504_v35  ;;  %v7799_v8 = vpop.f32.mrf.mxu1  ;;  %v11502_v19 = vld [vmem:[#allocation9 + $0x18] sm:$0xff]  }
 0x54f   :  { %v15834_v54 = vadd.f32 %v7799_v8, %v7647_v49  ;;  %v7658_v55 = vpop.f32.mrf.mxu0  ;;  %v11501_v49 = vld [vmem:[#allocation9 + $0x58] sm:$0xff]   ;;  %v7514_v8 = vadd.f32 %v15661_v44, %v15667_v34  ;;  %v7510_v44 = vadd.f32 %v15655_v62, %v15676_v20  ;;  %v7526_v62 = vadd.f32 %v15696_v18, %v15676_v20 }
 0x550   :  { %v7659_v11 = vadd.f32 %v7658_v55, %v7506_v10  ;;  %v7801_v43 = vpop.f32.mrf.mxu1  ;;  %10556 = vmatprep.subr.bf16.mxu0 %v11501_v49 }
 0x551   :  { %v15840_v27 = vadd.f32 %v7801_v43, %v7649_v48  ;;  %v7660_v22 = vpop.f32.mrf.mxu0  ;;  %10557 = vmatpush3.bf16.msra.mxu0 %v11502_v19  ;;  %v7518_v43 = vadd.f32 %v15681_v15, %v15667_v34 }
 0x552   :  { %v7661_v0 = vadd.f32 %v7660_v22, %v7508_v60  ;;  %v7803_v46 = vpop.f32.mrf.mxu1 }
 0x553   :  { %v15842_v35 = vadd.f32 %v7803_v46, %v7651_v31  ;;  %v7662_v53 = vpop.f32.mrf.mxu0 }
 0x554   :  { %v7805_v41 = vpop.f32.mrf.mxu1 }
 0x555   :  { %v15846_v10 = vadd.f32 %v7805_v41, %v7653_v21  ;;  %v7666_v55 = vpop.f32.mrf.mxu0 }
 0x556   :  { %v7667_v48 = vadd.f32 %v7666_v55, %v7514_v8  ;;  %v7809_v60 = vpop.f32.mrf.mxu1  ;;  %v11504_v8 = vld [vmem:[#allocation9 + $0xa8] sm:$0xff]   ;;  %v7663_v55 = vadd.f32 %v7662_v53, %v7510_v44 }
 0x557   :  { %v15850_v45 = vadd.f32 %v7809_v60, %v7657_v29  ;;  %v7668_v31 = vpop.f32.mrf.mxu0  ;;  %v7524_v60 = vadd.f32 %v15691_v58, %v15667_v34  ;;  %10575 = vmatpush3.bf16.msra.mxu1 %v11504_v8  ;;  %v7520_v58 = vadd.f32 %v15687_v1, %v15676_v20  ;;  %v17614_v8 = vld [vmem:[#allocation83_spill] sm:$0xff] }
 0x558   :  { %v7669_v23 = vadd.f32 %v7668_v31, %v7516_v7  ;;  %v7811_v22 = vpop.f32.mrf.mxu1 }
 0x559   :  { %v15856_v46 = vadd.f32 %v7811_v22, %v7659_v11  ;;  %v7670_v21 = vpop.f32.mrf.mxu0 }
 0x55a   :  { %v7671_v49 = vadd.f32 %v7670_v21, %v7518_v43  ;;  %v7813_v41 = vpop.f32.mrf.mxu1 }
 0x55b   :  { %v15858_v19 = vadd.f32 %v7813_v41, %v7661_v0  ;;  %v7672_v29 = vpop.f32.mrf.mxu0  ;;  %v7528_v0 = vadd.f32 %v15700_v4, %v15667_v34  ;;  %v11505_v4 = vld [vmem:[#allocation9 + $0x50] sm:$0xff]  }
 0x55c   :  { %v7815_v15 = vpop.f32.mrf.mxu1  ;;  %v11506_v34 = vld [vmem:[#allocation9 + $0x10] sm:$0xff]   ;;  %10558 = vmatprep.subr.bf16.mxu0 %v11505_v4 }
 0x55d   :  { %v15862_v7 = vadd.f32 %v7815_v15, %v7663_v55  ;;  %v7676_v31 = vpop.f32.mrf.mxu0  ;;  %v7530_v55 = vadd.f32 %v17614_v8, %v15676_v20  ;;  %v7673_v15 = vadd.f32 %v7672_v29, %v7520_v58  ;;  %10559 = vmatpush3.bf16.msra.mxu0 %v11506_v34  ;;  %v11508_v8 = vld [vmem:[#allocation9 + $0xa0] sm:$0xff]  }
 0x55e   :  { %v7677_v11 = vadd.f32 %v7676_v31, %v7524_v60  ;;  %v7819_v43 = vpop.f32.mrf.mxu1 }
 0x55f   :  { %v15866_v22 = vadd.f32 %v7819_v43, %v7667_v48  ;;  %v7678_v53 = vpop.f32.mrf.mxu0 }
 0x560   :  { %v7679_v44 = vadd.f32 %v7678_v53, %v7526_v62  ;;  %v7821_v21 = vpop.f32.mrf.mxu1 }
 0x561   :  { %17612 = vst [vmem:[#allocation73_spill] sm:$0xff] %v15866_v22  ;;  %v15872_v41 = vadd.f32 %v7821_v21, %v7669_v23  ;;  %v7680_v56 = vpop.f32.mrf.mxu0 }
 0x562   :  { %v7681_v18 = vadd.f32 %v7680_v56, %v7528_v0  ;;  %v7823_v60 = vpop.f32.mrf.mxu1  ;;  %v11507_v56 = vld [vmem:[#allocation9 + $0xe0] sm:$0xff]  }
 0x563   :  { %17613 = vst [vmem:[#allocation50_spill] sm:$0xff] %v15872_v41  ;;  %v15876_v48 = vadd.f32 %v7823_v60, %v7671_v49  ;;  %v7682_v31 = vpop.f32.mrf.mxu0  ;;  %10576 = vmatprep.subr.bf16.mxu1 %v11507_v56  ;;  %v17632_v41 = vld [vmem:[#allocation44_spill] sm:$0xff] }
 0x564   :  { %v7683_v43 = vadd.f32 %v7682_v31, %v7530_v55  ;;  %v7825_v22 = vpop.f32.mrf.mxu1  ;;  %10577 = vmatpush3.bf16.msra.mxu1 %v11508_v8 }
 0x565   :  { %17615 = vst [vmem:[#allocation52_spill] sm:$0xff] %v15876_v48  ;;  %v15878_v62 = vadd.f32 %v7825_v22, %v7673_v15  ;;  %v7872_v53 = vpop.f32.mrf.mxu0 }
 0x566   :  { %v7873_v1 = vadd.f32 %v7872_v53, %v15708_v14  ;;  %v7829_v23 = vpop.f32.mrf.mxu1 }
 0x567   :  { %17616 = vst [vmem:[#allocation100_spill] sm:$0xff] %v15878_v62  ;;  %v15881_v21 = vadd.f32 %v7829_v23, %v7677_v11  ;;  %v7874_v20 = vpop.f32.mrf.mxu0 }
 0x568   :  { %v7875_v29 = vadd.f32 %v7874_v20, %v15712_v59  ;;  %v7831_v49 = vpop.f32.mrf.mxu1  ;;  %v11509_v20 = vld [vmem:[#allocation9 + $0x48] sm:$0xff]  }
 0x569   :  { %17617 = vst [vmem:[#allocation74_spill] sm:$0xff] %v15881_v21  ;;  %v15884_v0 = vadd.f32 %v7831_v49, %v7679_v44  ;;  %v7876_v58 = vpop.f32.mrf.mxu0  ;;  %v17621_v49 = vld [vmem:[#allocation41_spill] sm:$0xff]  ;;  %10560 = vmatprep.subr.bf16.mxu0 %v11509_v20  ;;  %v17624_v20 = vld [vmem:[#allocation138_spill] sm:$0xff] }
 0x56a   :  { %v7877_v22 = vadd.f32 %v7876_v58, %v15716_v2  ;;  %v7833_v55 = vpop.f32.mrf.mxu1 }
 0x56b   :  { %17618 = vst [vmem:[#allocation84_spill] sm:$0xff] %v15884_v0  ;;  %v15887_v60 = vadd.f32 %v7833_v55, %v7681_v18  ;;  %v7878_v14 = vpop.f32.mrf.mxu0  ;;  %v11510_v18 = vld [vmem:[#allocation9 + $0x8] sm:$0xff]  }
 0x56c   :  { %v7879_v11 = vadd.f32 %v7878_v14, %v15720_v33  ;;  %v7835_v15 = vpop.f32.mrf.mxu1  ;;  %10561 = vmatpush3.bf16.msra.mxu0 %v11510_v18  ;;  %v11512_v18 = vld [vmem:[#allocation9 + $0x98] sm:$0xff]  }
 0x56d   :  { %17619 = vst [vmem:[#allocation54_spill] sm:$0xff] %v15887_v60  ;;  %v15890_v31 = vadd.f32 %v7835_v15, %v7683_v43  ;;  %v7882_v59 = vpop.f32.mrf.mxu0  ;;  %v17622_v43 = vld [vmem:[#allocation42_spill] sm:$0xff] }
 0x56e   :  { %v7883_v44 = vadd.f32 %v7882_v59, %v15724_v40  ;;  %v8025_v4 = vpop.f32.mrf.mxu1 }
 0x56f   :  { %17620 = vst [vmem:[#allocation107_spill] sm:$0xff] %v15890_v31  ;;  %v8026_v34 = vadd.f32 %v8025_v4, %v7873_v1  ;;  %v7884_v53 = vpop.f32.mrf.mxu0  ;;  %v17623_v4 = vld [vmem:[#allocation137_spill] sm:$0xff] }
 0x570   :  { %v7885_v23 = vadd.f32 %v7884_v53, %v15728_v47  ;;  %v8027_v2 = vpop.f32.mrf.mxu1 }
 0x571   :  { %v8144_v58 = vmax.f32 %v17621_v49, %v8026_v34  ;;  %v8028_v56 = vadd.f32 %v8027_v2, %v7875_v29  ;;  %v7886_v55 = vpop.f32.mrf.mxu0 }
 0x572   :  { %v7887_v33 = vadd.f32 %v7886_v55, %v15732_v12  ;;  %v8029_v8 = vpop.f32.mrf.mxu1  ;;  %v11511_v55 = vld [vmem:[#allocation9 + $0xd8] sm:$0xff]  }
 0x573   :  { %v8145_v14 = vmax.f32 %v17622_v43, %v8028_v56  ;;  %v8030_v15 = vadd.f32 %v8029_v8, %v7877_v22  ;;  %v7888_v40 = vpop.f32.mrf.mxu0  ;;  %v8192_v1 = vmax.f32 %v8144_v58, 0.0  ;;  %v11513_v58 = vld [vmem:[#allocation9 + $0xd0] sm:$0xff]   ;;  %10578 = vmatprep.subr.bf16.mxu1 %v11511_v55  ;;  %v11517_v55 = vld [vmem:[#allocation9 + $0xc8] sm:$0xff]  }
 0x574   :  { %v7889_v59 = vadd.f32 %v7888_v40, %v15736_v36  ;;  %v8031_v47 = vpop.f32.mrf.mxu1  ;;  %10579 = vmatpush3.bf16.msra.mxu1 %v11512_v18 }
 0x575   :  { %v8146_v53 = vmax.f32 %v17623_v4, %v8030_v15  ;;  %v8032_v31 = vadd.f32 %v8031_v47, %v7879_v11  ;;  %v7892_v60 = vpop.f32.mrf.mxu0  ;;  %v8193_v34 = vmax.f32 %v8145_v14, 0.0  ;;  %v8289_v8 = vrot.slane %v8192_v1, 2  ;;  %v11514_v11 = vld [vmem:[#allocation9 + $0x40] sm:$0xff]   ;;  %10580 = vmatprep.subr.bf16.mxu1 %v11513_v58 }
 0x576   :  { %v15900_v29 = vadd.f32 %v7892_v60, %v15740_v50  ;;  %v8035_v12 = vpop.f32.mrf.mxu1  ;;  %v11516_v15 = vld [vmem:[#allocation9] sm:$0xff]   ;;  %10562 = vmatprep.subr.bf16.mxu0 %v11514_v11 }
 0x577   :  { %v8194_v2 = vmax.f32 %v8146_v53, 0.0  ;;  %v8147_v49 = vmax.f32 %v17624_v20, %v8032_v31  ;;  %v8036_v56 = vadd.f32 %v8035_v12, %v7883_v44  ;;  %v7894_v22 = vpop.f32.mrf.mxu0  ;;  %v17625_v50 = vld [vmem:[#allocation80_spill] sm:$0xff]  ;;  %v17626_v31 = vld [vmem:[#allocation114_spill] sm:$0xff]  ;;  %v8292_v12 = vrot.slane %v8193_v34, 2  ;;  %10563 = vmatpush3.bf16.msra.mxu0 %v11516_v15 }
 0x578   :  { %v15904_v36 = vadd.f32 %v7894_v22, %v15744_v39  ;;  %v8037_v43 = vpop.f32.mrf.mxu1  ;;  %v17627_v44 = vld [vmem:[#allocation104_spill] sm:$0xff]  ;;  %v11515_v22 = vld [vmem:[#allocation9 + $0x90] sm:$0xff]  }
 0x579   :  { %v8290_v14 = vrot.slane %v8194_v2, 2  ;;  %v8195_v40 = vmax.f32 %v8147_v49, 0.0  ;;  %v8148_v60 = vmax.f32 %v17625_v50, %v8036_v56  ;;  %v8038_v47 = vadd.f32 %v8037_v43, %v7885_v23  ;;  %v7896_v4 = vpop.f32.mrf.mxu0  ;;  %v17629_v56 = vld [vmem:[#allocation43_spill] sm:$0xff]  ;;  %10581 = vmatpush3.bf16.msra.mxu1 %v11515_v22 }
 0x57a   :  { %v15909_v53 = vadd.f32 %v17627_v44, %v17626_v31  ;;  %v15912_v20 = vadd.f32 %v7896_v4, %v15748_v3  ;;  %v8039_v39 = vpop.f32.mrf.mxu1  ;;  %v11521_v50 = vld [vmem:[#allocation9 + $0x178] sm:$0xff]   ;;  %10582 = vmatprep.subr.bf16.mxu1 %v11517_v55 }
 0x57b   :  { %v8291_v0 = vsel %vm648_vm3, %v8289_v8, %v8290_v14  ;;  %v8293_v49 = vrot.slane %v8195_v40, 2  ;;  %v8196_v21 = vmax.f32 %v8148_v60, 0.0  ;;  %v8149_v23 = vmax.f32 %v17629_v56, %v8038_v47  ;;  %v7898_v43 = vpop.f32.mrf.mxu0  ;;  %v17630_v31 = vld [vmem:[#allocation39_spill] sm:$0xff]  ;;  %v17631_v44 = vld [vmem:[#allocation46_spill] sm:$0xff]  ;;  %10592 = vmatprep.subr.bf16.mxu0 %v11521_v50 }
 0x57c   :  { %17628 = vst [vmem:[#allocation25_spill] sm:$0xff] %v15909_v53  ;;  %v15918_v62 = vadd.f32 %v17631_v44, %v17630_v31  ;;  %v8417_v3 = vmax.f32 %v8192_v1, %v8291_v0  ;;  %v8040_v4 = vadd.f32 %v8039_v39, %v7887_v33  ;;  %v15921_v18 = vadd.f32 %v7898_v43, %v15752_v63  ;;  %v8041_v11 = vpop.f32.mrf.mxu1  ;;  %v11518_v0 = vld [vmem:[#allocation9 + $0x88] sm:$0xff]   ;;  %v17633_v39 = vld [vmem:[#allocation131_spill] sm:$0xff] }
 0x57d   :  { %v8294_v8 = vsel %vm648_vm3, %v8292_v12, %v8293_v49  ;;  %v8295_v60 = vrot.slane %v8196_v21, 2  ;;  %v8197_v48 = vmax.f32 %v8149_v23, 0.0  ;;  %v8042_v47 = vadd.f32 %v8041_v11, %v7889_v59  ;;  %v7902_v56 = vpop.f32.mrf.mxu0  ;;  %v11519_v59 = vld [vmem:[#allocation9 + $0xc0] sm:$0xff]   ;;  %10583 = vmatpush3.bf16.msra.mxu1 %v11518_v0 }
 0x57e   :  { %v8466_v58 = vpack.c.bf16 %v8417_v3, %v8417_v3  ;;  %v8418_v15 = vmax.f32 %v8193_v34, %v8294_v8  ;;  %v8150_v53 = vmax.f32 %v17632_v41, %v8040_v4  ;;  %v7903_v31 = vadd.f32 %v7902_v56, %v15756_v52  ;;  %v8045_v44 = vpop.f32.mrf.mxu1  ;;  %v17635_v8 = vld [vmem:[#allocation48_spill] sm:$0xff]  ;;  %10584 = vmatprep.subr.bf16.mxu1 %v11519_v59  ;;  %v17641_v59 = vld [vmem:[#allocation51_spill] sm:$0xff] }
 0x57f   :  { %v8296_v63 = vsel %vm648_vm3, %v8290_v14, %v8295_v60  ;;  %v8421_v33 = vmax.f32 %v8196_v21, %v8295_v60  ;;  %v8297_v1 = vrot.slane %v8197_v48, 2  ;;  %v8151_v12 = vmax.f32 %v17633_v39, %v8042_v47  ;;  %v7904_v43 = vpop.f32.mrf.mxu0  ;;  %v17634_v14 = vld [vmem:[#allocation115_spill] sm:$0xff] }
 0x580   :  { %v15928_v23 = vunpack.c.l.b16 %v8466_v58  ;;  %v8467_v50 = vpack.c.bf16 %v8418_v15, %v8418_v15  ;;  %v8419_v34 = vmax.f32 %v8194_v2, %v8296_v63  ;;  %v15930_v3 = vmax.f32 %v8150_v53, 0.0  ;;  %v8047_v41 = vpop.f32.mrf.mxu1  ;;  %v11520_v2 = vld [vmem:[#allocation9 + $0x80] sm:$0xff]   ;;  %v17638_v15 = vld [vmem:[#allocation49_spill] sm:$0xff]  ;;  %v11522_v39 = vld [vmem:[#allocation9 + $0x1f8] sm:$0xff]  }
 0x581   :  { %v9382_v52 = vpack.c.bf16 %v8421_v33, %v8421_v33  ;;  %v8298_v22 = vsel %vm648_vm3, %v8293_v49, %v8297_v1  ;;  %v8422_v4 = vmax.f32 %v8197_v48, %v8297_v1  ;;  %v15933_v11 = vmax.f32 %v8151_v12, 0.0  ;;  %v7906_v21 = vpop.f32.mrf.mxu0  ;;  %v17637_v53 = vld [vmem:[#allocation139_spill] sm:$0xff]  ;;  %10585 = vmatpush3.bf16.msra.mxu1 %v11520_v2 }
 0x582   :  { %v15937_v60 = vadd.f32 %v17635_v8, %v17634_v14  ;;  %v15939_v55 = vunpack.c.l.b16 %v8467_v50  ;;  %v8930_v47 = vpack.c.bf16 %v8419_v34, %v8419_v34  ;;  %v8420_v56 = vmax.f32 %v8195_v40, %v8298_v22  ;;  %v8049_v58 = vpop.f32.mrf.mxu1  ;;  %10614 = vmatprep.subr.bf16.mxu1 %v11522_v39  ;;  %v17645_v39 = vld [vmem:[#allocation111_spill] sm:$0xff] }
 0x583   :  { %v15943_v63 = vadd.f32 %v17638_v15, %v17637_v53  ;;  %v15946_v49 = vunpack.c.l.b16 %v9382_v52  ;;  %v9383_v33 = vpack.c.bf16 %v8422_v4, %v8422_v4  ;;  %v7908_v1 = vpop.f32.mrf.mxu0  ;;  %v8299_v40 = vrot.slane %v15930_v3, 2 }
 0x584   :  { %17636 = vst [vmem:[#allocation78_spill] sm:$0xff] %v15939_v55  ;;  %v15948_v12 = vunpack.c.l.b16 %v8930_v47  ;;  %v8931_v50 = vpack.c.bf16 %v8420_v56, %v8420_v56  ;;  %v8046_v0 = vadd.f32 %v8045_v44, %v15900_v29  ;;  %v8051_v34 = vpop.f32.mrf.mxu1  ;;  %v8302_v8 = vrot.slane %v15933_v11, 2  ;;  %v17642_v29 = vld [vmem:[#allocation109_spill] sm:$0xff] }
 0x585   :  { %17639 = vst [vmem:[#allocation35_spill] sm:$0xff] %v15943_v63  ;;  %v15953_v14 = vunpack.c.l.b16 %v9383_v33  ;;  %v8048_v52 = vadd.f32 %v8047_v41, %v15904_v36  ;;  %v7912_v4 = vpop.f32.mrf.mxu0  ;;  %v7905_v56 = vadd.f32 %v7904_v43, %v15760_v38  ;;  %v8050_v15 = vadd.f32 %v8049_v58, %v15912_v20 }
 0x586   :  { %v15957_v53 = vunpack.c.l.b16 %v8931_v50  ;;  %v8152_v47 = vmax.f32 %v17641_v59, %v8046_v0  ;;  %v8055_v48 = vpop.f32.mrf.mxu1  ;;  %v7907_v33 = vadd.f32 %v7906_v21, %v15764_v30  ;;  %v8052_v22 = vadd.f32 %v8051_v34, %v15921_v18  ;;  %v17643_v0 = vld [vmem:[#allocation97_spill] sm:$0xff] }
 0x587   :  { %v8153_v44 = vmax.f32 %v17642_v29, %v8048_v52  ;;  %v15966_v55 = vadd.f32 %v7912_v4, %v15772_v61  ;;  %v7914_v36 = vpop.f32.mrf.mxu0  ;;  %v8154_v38 = vmax.f32 %v17643_v0, %v8050_v15  ;;  %v8056_v43 = vadd.f32 %v8055_v48, %v7903_v31  ;;  %v17644_v52 = vld [vmem:[#allocation82_spill] sm:$0xff]  ;;  %v17646_v48 = vld [vmem:[#allocation85_spill] sm:$0xff] }
 0x588   :  { %17640 = vst [vmem:[#allocation53_spill] sm:$0xff] %v15957_v53  ;;  %v8200_v50 = vmax.f32 %v8152_v47, 0.0  ;;  %v8057_v20 = vpop.f32.mrf.mxu1  ;;  %v7909_v2 = vadd.f32 %v7908_v1, %v15768_v25  ;;  %v8155_v59 = vmax.f32 %v17644_v52, %v8052_v22  ;;  %v15975_v31 = vadd.f32 %v7914_v36, %v15776_v57 }
 0x589   :  { %v8201_v58 = vmax.f32 %v8153_v44, 0.0  ;;  %v8058_v30 = vadd.f32 %v8057_v20, %v7905_v56  ;;  %v7916_v21 = vpop.f32.mrf.mxu0  ;;  %v8202_v34 = vmax.f32 %v8154_v38, 0.0  ;;  %v8156_v4 = vmax.f32 %v17645_v39, %v8056_v43 }
 0x58a   :  { %v8300_v61 = vrot.slane %v8200_v50, 2  ;;  %v8059_v29 = vpop.f32.mrf.mxu1  ;;  %v8203_v41 = vmax.f32 %v8155_v59, 0.0  ;;  %v15980_v56 = vadd.f32 %v7916_v21, %v15780_v13 }
 0x58b   :  { %v8303_v47 = vrot.slane %v8201_v58, 2  ;;  %v8157_v15 = vmax.f32 %v17646_v48, %v8058_v30  ;;  %v7918_v25 = vpop.f32.mrf.mxu0  ;;  %v8305_v22 = vrot.slane %v8202_v34, 2  ;;  %v8060_v44 = vadd.f32 %v8059_v29, %v7907_v33 }
 0x58c   :  { %v8301_v1 = vsel %vm648_vm3, %v8299_v40, %v8300_v61  ;;  %v8061_v0 = vpop.f32.mrf.mxu1  ;;  %v8307_v20 = vrot.slane %v8203_v41, 2  ;;  %v15984_v52 = vmax.f32 %v8156_v4, 0.0  ;;  %v7919_v40 = vadd.f32 %v7918_v25, %v15784_v16 }
 0x58d   :  { %v8423_v38 = vmax.f32 %v15930_v3, %v8301_v1  ;;  %v8304_v43 = vsel %vm648_vm3, %v8302_v8, %v8303_v47  ;;  %v7922_v57 = vpop.f32.mrf.mxu0  ;;  %v8306_v59 = vsel %vm648_vm3, %v8300_v61, %v8305_v22  ;;  %v8427_v30 = vmax.f32 %v8202_v34, %v8305_v22  ;;  %v17647_v61 = vld [vmem:[#allocation92_spill] sm:$0xff] }
 0x58e   :  { %v8424_v36 = vmax.f32 %v15933_v11, %v8304_v43  ;;  %v8065_v39 = vpop.f32.mrf.mxu1  ;;  %v8425_v21 = vmax.f32 %v8200_v50, %v8306_v59  ;;  %v8308_v33 = vsel %vm648_vm3, %v8303_v47, %v8307_v20  ;;  %v8428_v29 = vmax.f32 %v8203_v41, %v8307_v20 }
 0x58f   :  { %v8468_v13 = vpack.c.bf16 %v8423_v38, %v8423_v38  ;;  %v7924_v3 = vpop.f32.mrf.mxu0  ;;  %v9384_v8 = vpack.c.bf16 %v8427_v30, %v8427_v30  ;;  %v8426_v1 = vmax.f32 %v8201_v58, %v8308_v33  ;;  %v15990_v4 = vmax.f32 %v8157_v15, 0.0 }
 0x590   :  { %v8469_v48 = vpack.c.bf16 %v8424_v36, %v8424_v36  ;;  %v8067_v18 = vpop.f32.mrf.mxu1  ;;  %v8932_v11 = vpack.c.bf16 %v8425_v21, %v8425_v21  ;;  %v9385_v43 = vpack.c.bf16 %v8428_v29, %v8428_v29  ;;  %v8158_v34 = vmax.f32 %v17647_v61, %v8060_v44 }
 0x591   :  { %v8532_v53 = vunpack.c.l.b16 %v8468_v13  ;;  %v7926_v22 = vpop.f32.mrf.mxu0  ;;  %v9449_v25 = vunpack.c.l.b16 %v9384_v8  ;;  %v8933_v50 = vpack.c.bf16 %v8426_v1, %v8426_v1  ;;  %v8062_v38 = vadd.f32 %v8061_v0, %v7909_v2 }
 0x592   :  { %v15993_v16 = vunpack.c.l.b16 %v8469_v48  ;;  %v8069_v47 = vpop.f32.mrf.mxu1  ;;  %v8997_v36 = vunpack.c.l.b16 %v8932_v11  ;;  %v9450_v59 = vunpack.c.l.b16 %v9385_v43  ;;  %v8309_v13 = vrot.slane %v15984_v52, 2 }
 0x593   :  { %v8546_v41 = vrot.slane %v8532_v53, 7  ;;  %v8762_v20 = vrot.slane %v8532_v53, 3  ;;  %v7928_v58 = vpop.f32.mrf.mxu0  ;;  %v9463_v15 = vrot.slane %v9449_v25, 7  ;;  %v15995_v30 = vunpack.c.l.b16 %v8933_v50 }
 0x594   :  { %17648 = vst [vmem:[#allocation36_spill] sm:$0xff] %v15993_v16  ;;  %v8312_v21 = vrot.slane %v15990_v4, 2  ;;  %v8071_v44 = vpop.f32.mrf.mxu1  ;;  %v17650_v2 = vrot.slane %v15928_v23, 4  ;;  %v9011_v53 = vrot.slane %v8997_v36, 7  ;;  %v9214_v29 = vrot.slane %v8997_v36, 3  ;;  %v17655_v16 = vld [vmem:[#allocation55_spill] sm:$0xff] }
 0x595   :  { %17649 = vst [vmem:[#allocation123_spill] sm:$0xff] %v15995_v30  ;;  %v16001_v33 = vsel %vm8547_vm6, %v8546_v41, %v15928_v23  ;;  %v7932_v48 = vpop.f32.mrf.mxu0  ;;  %v16012_v11 = vsel %vm8547_vm6, %v9463_v15, %v15946_v49  ;;  %v9477_v43 = vrot.slane %v9450_v59, 7  ;;  %v17651_v23 = vrot.slane %v15948_v12, 4  ;;  %v17654_v30 = vld [vmem:[#allocation38_spill] sm:$0xff] }
 0x596   :  { %v16006_v0 = vsel %vm8547_vm6, %v8762_v20, %v17650_v2  ;;  %v8075_v61 = vpop.f32.mrf.mxu1  ;;  %v16016_v25 = vsel %vm8547_vm6, %v9011_v53, %v15948_v12  ;;  %v8206_v41 = vmax.f32 %v8158_v34, 0.0  ;;  %v17652_v20 = vld [vmem:[#allocation69_spill] sm:$0xff]  ;;  %v8066_v15 = vadd.f32 %v8065_v39, %v15966_v55 }
 0x597   :  { %v16021_v50 = vsel %vm8547_vm6, %v9214_v29, %v17651_v23  ;;  %v8159_v36 = vmax.f32 %v17652_v20, %v8062_v38  ;;  %v7934_v2 = vpop.f32.mrf.mxu0  ;;  %v16028_v59 = vsel %vm8547_vm6, %v9477_v43, %v15953_v14  ;;  %v8068_v29 = vadd.f32 %v8067_v18, %v15975_v31  ;;  %v17653_v20 = vld [vmem:[#allocation37_spill] sm:$0xff] }
 0x598   :  { %v8077_v53 = vpop.f32.mrf.mxu1  ;;  %v8310_v8 = vrot.slane %v8206_v41, 2  ;;  %v16033_v34 = vadd.f32 %v7926_v22, %v15796_v6  ;;  %v7923_v23 = vadd.f32 %v7922_v57, %v15788_v37  ;;  %v8160_v49 = vmax.f32 %v17653_v20, %v8066_v15  ;;  %v17656_v57 = vld [vmem:[#allocation95_spill] sm:$0xff] }
 0x599   :  { %v8207_v12 = vmax.f32 %v8159_v36, 0.0  ;;  %v16035_v38 = vpop.f32.mrf.mxu0  ;;  %v8070_v14 = vadd.f32 %v8069_v47, %v15980_v56  ;;  %v8072_v43 = vadd.f32 %v8071_v44, %v7919_v40  ;;  %v7925_v36 = vadd.f32 %v7924_v3, %v15792_v9 }
 0x59a   :  { %v8079_v1 = vpop.f32.mrf.mxu1  ;;  %v8311_v55 = vsel %vm648_vm3, %v8309_v13, %v8310_v8  ;;  %v8161_v18 = vmax.f32 %v17654_v30, %v8068_v29  ;;  %v8208_v22 = vmax.f32 %v8160_v49, 0.0  ;;  %v16052_v47 = vadd.f32 %v7928_v58, %v15800_v42 }
 0x59b   :  { %v8313_v39 = vrot.slane %v8207_v12, 2  ;;  %v16043_v31 = vpop.f32.mrf.mxu0  ;;  %v8429_v6 = vmax.f32 %v15984_v52, %v8311_v55  ;;  %v8162_v37 = vmax.f32 %v17655_v16, %v8070_v14  ;;  %v8163_v15 = vmax.f32 %v17656_v57, %v8072_v43 }
 0x59c   :  { %v16048_v20 = vpop.f32.mrf.mxu1  ;;  %v8209_v40 = vmax.f32 %v8161_v18, 0.0  ;;  %v8076_v9 = vadd.f32 %v8075_v61, %v7923_v23  ;;  %v8315_v52 = vrot.slane %v8208_v22, 2  ;;  %v16058_v44 = vadd.f32 %v7932_v48, %v15804_v51 }
 0x59d   :  { %v8314_v56 = vsel %vm648_vm3, %v8312_v21, %v8313_v39  ;;  %v16054_v3 = vpop.f32.mrf.mxu0  ;;  %v8470_v30 = vpack.c.bf16 %v8429_v6, %v8429_v6  ;;  %v8210_v29 = vmax.f32 %v8162_v37, 0.0  ;;  %v16062_v14 = vmax.f32 %v8163_v15, 0.0  ;;  %v17657_v21 = vld [vmem:[#allocation57_spill] sm:$0xff] }
 0x59e   :  { %v8430_v13 = vmax.f32 %v15990_v4, %v8314_v56  ;;  %v16060_v16 = vpop.f32.mrf.mxu1  ;;  %v8317_v49 = vrot.slane %v8209_v40, 2  ;;  %v8164_v43 = vmax.f32 %v17657_v21, %v8076_v9  ;;  %v8316_v23 = vsel %vm648_vm3, %v8310_v8, %v8315_v52 }
 0x59f   :  { %v16065_v42 = vpop.f32.mrf.mxu0  ;;  %v8534_v58 = vunpack.c.l.b16 %v8470_v30  ;;  %v8433_v55 = vmax.f32 %v8208_v22, %v8315_v52  ;;  %v8431_v18 = vmax.f32 %v8206_v41, %v8316_v23  ;;  %v8078_v6 = vadd.f32 %v8077_v53, %v7925_v36 }
 0x5a0   :  { %v8471_v61 = vpack.c.bf16 %v8430_v13, %v8430_v13  ;;  %v16068_v4 = vpop.f32.mrf.mxu1  ;;  %v8318_v51 = vsel %vm648_vm3, %v8313_v39, %v8317_v49  ;;  %v8434_v48 = vmax.f32 %v8209_v40, %v8317_v49  ;;  %v7935_v8 = vadd.f32 %v7934_v2, %v15808_v24 }
 0x5a1   :  { %v16071_v57 = vpop.f32.mrf.mxu0  ;;  %v8549_v37 = vrot.slane %v8534_v58, 6  ;;  %v8764_v15 = vrot.slane %v8534_v58, 2  ;;  %v9386_v9 = vpack.c.bf16 %v8433_v55, %v8433_v55  ;;  %v8934_v30 = vpack.c.bf16 %v8431_v18, %v8431_v18 }
 0x5a2   :  { %v16073_v56 = vunpack.c.l.b16 %v8471_v61  ;;  %v8089_v21 = vpop.f32.mrf.mxu1  ;;  %v8432_v13 = vmax.f32 %v8207_v12, %v8318_v51  ;;  %v9387_v63 = vpack.c.bf16 %v8434_v48, %v8434_v48  ;;  %v8319_v39 = vrot.slane %v8210_v29, 2 }
 0x5a3   :  { %v16076_v22 = vpop.f32.mrf.mxu0  ;;  %v16080_v41 = vsel %vm8550_vm7, %v8549_v37, %v16001_v33  ;;  %v16084_v53 = vsel %vm8550_vm7, %v8764_v15, %v16006_v0  ;;  %v8322_v36 = vrot.slane %v16062_v14, 2  ;;  %v8999_v52 = vunpack.c.l.b16 %v8934_v30  ;;  %v17658_v33 = vld [vmem:[#allocation33_spill] sm:$0xff] }
 0x5a4   :  { %v16087_v40 = vpop.f32.mrf.mxu1  ;;  %v9451_v12 = vunpack.c.l.b16 %v9386_v9  ;;  %v8935_v49 = vpack.c.bf16 %v8432_v13, %v8432_v13  ;;  %v9452_v58 = vunpack.c.l.b16 %v9387_v63  ;;  %v8212_v61 = vmax.f32 %v8164_v43, 0.0  ;;  %v17660_v13 = vld [vmem:[#allocation112_spill] sm:$0xff] }
 0x5a5   :  { %v16089_v24 = vpop.f32.mrf.mxu0  ;;  %v8165_v23 = vmax.f32 %v17658_v33, %v8078_v6  ;;  %v8080_v55 = vadd.f32 %v8079_v1, %v16033_v34  ;;  %v9013_v18 = vrot.slane %v8999_v52, 6  ;;  %v9216_v51 = vrot.slane %v8999_v52, 2 }
 0x5a6   :  { %v16094_v0 = vpop.f32.mrf.mxu1  ;;  %v9465_v48 = vrot.slane %v9451_v12, 6  ;;  %v16096_v37 = vunpack.c.l.b16 %v8935_v49  ;;  %v9479_v9 = vrot.slane %v9452_v58, 6  ;;  %v8320_v63 = vrot.slane %v8212_v61, 2 }
 0x5a7   :  { %v16098_v15 = vpop.f32.mrf.mxu0  ;;  %v8213_v30 = vmax.f32 %v8165_v23, 0.0  ;;  %v8166_v2 = vmax.f32 %v17660_v13, %v8080_v55  ;;  %v16106_v1 = vsel %vm8550_vm7, %v9013_v18, %v16016_v25  ;;  %v16110_v34 = vsel %vm8550_vm7, %v9216_v51, %v16021_v50 }
 0x5a8   :  { %17659 = vst [vmem:[#allocation87_spill] sm:$0xff] %v16096_v37  ;;  %v16101_v43 = vpop.f32.mrf.mxu1  ;;  %v16114_v52 = vsel %vm8550_vm7, %v9465_v48, %v16012_v11  ;;  %v16118_v12 = vsel %vm8550_vm7, %v9479_v9, %v16028_v59  ;;  %v8321_v49 = vsel %vm648_vm3, %v8319_v39, %v8320_v63  ;;  %v7937_v33 = vadd.f32 %v16035_v38, %v15812_v32  ;;  %v17661_v9 = vld [vmem:[#allocation58_spill] sm:$0xff] }
 0x5a9   :  { %v8323_v58 = vrot.slane %v8213_v30, 2  ;;  %v16123_v25 = vpop.f32.mrf.mxu0  ;;  %v8435_v55 = vmax.f32 %v8210_v29, %v8321_v49  ;;  %v8214_v18 = vmax.f32 %v8166_v2, 0.0  ;;  %v8082_v11 = vadd.f32 %v16048_v20, %v16052_v47  ;;  %v17662_v20 = vld [vmem:[#allocation71_spill] sm:$0xff] }
 0x5aa   :  { %v16125_v23 = vpop.f32.mrf.mxu1  ;;  %v16134_v39 = vadd.f32 %v16054_v3, %v15820_v5  ;;  %v8086_v32 = vadd.f32 %v16060_v16, %v16058_v44  ;;  %v7939_v47 = vadd.f32 %v16043_v31, %v17662_v20  ;;  %v17663_v49 = vld [vmem:[#allocation59_spill] sm:$0xff]  ;;  %v8088_v59 = vadd.f32 %v16068_v4, %v7935_v8 }
 0x5ab   :  { %v8324_v51 = vsel %vm648_vm3, %v8322_v36, %v8323_v58  ;;  %v8472_v48 = vpack.c.bf16 %v8435_v55, %v8435_v55  ;;  %v8325_v2 = vrot.slane %v8214_v18, 2  ;;  %v8167_v13 = vmax.f32 %v17661_v9, %v8082_v11  ;;  %v16146_v3 = vpop.f32.mrf.mxu0  ;;  %v17664_v9 = vld [vmem:[#allocation113_spill] sm:$0xff] }
 0x5ac   :  { %v16138_v38 = vpop.f32.mrf.mxu1  ;;  %v8436_v29 = vmax.f32 %v16062_v14, %v8324_v51  ;;  %v8168_v36 = vmax.f32 %v17663_v49, %v8086_v32  ;;  %v8090_v5 = vadd.f32 %v8089_v21, %v7937_v33  ;;  %v8169_v37 = vmax.f32 %v17664_v9, %v8088_v59 }
 0x5ad   :  { %v8536_v44 = vunpack.c.l.b16 %v8472_v48  ;;  %v8326_v55 = vsel %vm648_vm3, %v8320_v63, %v8325_v2  ;;  %v8439_v14 = vmax.f32 %v8214_v18, %v8325_v2  ;;  %v8215_v6 = vmax.f32 %v8167_v13, 0.0 }
 0x5ae   :  { %v16148_v50 = vpop.f32.mrf.mxu1  ;;  %v8473_v16 = vpack.c.bf16 %v8436_v29, %v8436_v29  ;;  %v8437_v51 = vmax.f32 %v8212_v61, %v8326_v55  ;;  %v8216_v11 = vmax.f32 %v8168_v36, 0.0  ;;  %v7945_v48 = vadd.f32 %v16065_v42, %v15824_v17  ;;  %v16160_v61 = vpop.f32.mrf.mxu0 }
 0x5af   :  { %v8552_v32 = vrot.slane %v8536_v44, 5  ;;  %v8766_v20 = vrot.slane %v8536_v44, 1  ;;  %v9388_v21 = vpack.c.bf16 %v8439_v14, %v8439_v14  ;;  %v8327_v33 = vrot.slane %v8215_v6, 2 }
 0x5b0   :  { %v16152_v31 = vpop.f32.mrf.mxu1  ;;  %v16154_v4 = vunpack.c.l.b16 %v8473_v16  ;;  %v8936_v8 = vpack.c.bf16 %v8437_v51, %v8437_v51  ;;  %v7947_v63 = vadd.f32 %v16071_v57, %v15826_v26  ;;  %v8329_v2 = vrot.slane %v8216_v11, 2 }
 0x5b1   :  { %v16166_v59 = vsel %vm8553_vm8, %v8552_v32, %v16080_v41  ;;  %v16170_v29 = vsel %vm8553_vm8, %v8766_v20, %v16084_v53  ;;  %v8217_v13 = vmax.f32 %v8169_v37, 0.0  ;;  %v9453_v36 = vunpack.c.l.b16 %v9388_v21  ;;  %v17665_v41 = vld [vmem:[#allocation45_spill] sm:$0xff]  ;;  %v16178_v32 = vpop.f32.mrf.mxu0 }
 0x5b2   :  { %v16162_v18 = vpop.f32.mrf.mxu1  ;;  %v9001_v49 = vunpack.c.l.b16 %v8936_v8  ;;  %v8328_v17 = vsel %vm648_vm3, %v8323_v58, %v8327_v33  ;;  %v8440_v42 = vmax.f32 %v8215_v6, %v8327_v33  ;;  %v8571_v57 = vrot.slane %v16154_v4, 5 }
 0x5b3   :  { %v8780_v44 = vrot.slane %v16154_v4, 1  ;;  %v8438_v16 = vmax.f32 %v8213_v30, %v8328_v17  ;;  %v8170_v55 = vmax.f32 %v17665_v41, %v8090_v5  ;;  %v9467_v53 = vrot.slane %v9453_v36, 5  ;;  %v17666_v17 = vld [vmem:[#allocation86_spill] sm:$0xff] }
 0x5b4   :  { %v16173_v26 = vpop.f32.mrf.mxu1  ;;  %v9015_v14 = vrot.slane %v9001_v49, 5  ;;  %v9218_v51 = vrot.slane %v9001_v49, 1  ;;  %v9389_v9 = vpack.c.bf16 %v8440_v42, %v8440_v42  ;;  %v8332_v58 = vrot.slane %v8217_v13, 2 }
 0x5b5   :  { %v8937_v20 = vpack.c.bf16 %v8438_v16, %v8438_v16  ;;  %v8218_v6 = vmax.f32 %v8170_v55, 0.0  ;;  %v8092_v21 = vadd.f32 %v16087_v40, %v7939_v47  ;;  %v16193_v5 = vsel %vm8553_vm8, %v9467_v53, %v16114_v52  ;;  %v16205_v52 = vpop.f32.mrf.mxu0 }
 0x5b6   :  { %v16180_v37 = vpop.f32.mrf.mxu1  ;;  %v16185_v8 = vsel %vm8553_vm8, %v9015_v14, %v16106_v1  ;;  %v16189_v30 = vsel %vm8553_vm8, %v9218_v51, %v16110_v34  ;;  %v9454_v33 = vunpack.c.l.b16 %v9389_v9  ;;  %v8096_v40 = vadd.f32 %v16094_v0, %v16134_v39 }
 0x5b7   :  { %v16195_v49 = vunpack.c.l.b16 %v8937_v20  ;;  %v8330_v36 = vrot.slane %v8218_v6, 2  ;;  %v8171_v42 = vmax.f32 %v17666_v17, %v8092_v21  ;;  %v7949_v1 = vadd.f32 %v16076_v22, %v15830_v28  ;;  %v17667_v22 = vld [vmem:[#allocation60_spill] sm:$0xff]  ;;  %v16224_v20 = vpop.f32.mrf.mxu0  ;;  %v17670_v17 = vld [vmem:[#allocation63_spill] sm:$0xff] }
 0x5b8   :  { %v9481_v47 = vrot.slane %v9454_v33, 5  ;;  %v7953_v34 = vadd.f32 %v16089_v24, %v15834_v54  ;;  %v8098_v16 = vadd.f32 %v16101_v43, %v7945_v48  ;;  %v16207_v41 = vpop.f32.mrf.mxu1  ;;  %v7955_v51 = vadd.f32 %v16098_v15, %v15840_v27  ;;  %v17668_v43 = vld [vmem:[#allocation134_spill] sm:$0xff]  ;;  %v17669_v21 = vld [vmem:[#allocation76_spill] sm:$0xff] }
 0x5b9   :  { %v8331_v55 = vsel %vm648_vm3, %v8329_v2, %v8330_v36  ;;  %v8219_v14 = vmax.f32 %v8171_v42, 0.0  ;;  %v7957_v0 = vadd.f32 %v16123_v25, %v15842_v35  ;;  %v8172_v24 = vmax.f32 %v17667_v22, %v8096_v40 }
 0x5ba   :  { %v16216_v28 = vsel %vm8553_vm8, %v9481_v47, %v16118_v12  ;;  %v8441_v54 = vmax.f32 %v8216_v11, %v8331_v55  ;;  %v8173_v39 = vmax.f32 %v17668_v43, %v8098_v16  ;;  %v9029_v48 = vrot.slane %v16195_v49, 5  ;;  %v16226_v12 = vpop.f32.mrf.mxu1 }
 0x5bb   :  { %v8333_v53 = vrot.slane %v8219_v14, 2  ;;  %v8100_v2 = vadd.f32 %v16125_v23, %v7947_v63  ;;  %v8102_v9 = vadd.f32 %v16138_v38, %v7949_v1  ;;  %v9232_v27 = vrot.slane %v16195_v49, 1 }
 0x5bc   :  { %v8474_v15 = vpack.c.bf16 %v8441_v54, %v8441_v54  ;;  %v8220_v35 = vmax.f32 %v8172_v24, 0.0  ;;  %v8221_v25 = vmax.f32 %v8173_v39, 0.0  ;;  %v8106_v40 = vadd.f32 %v16148_v50, %v7953_v34  ;;  %v17671_v54 = vld [vmem:[#allocation140_spill] sm:$0xff]  ;;  %v7972_v34 = vpop.f32.mrf.mxu0 }
 0x5bd   :  { %v8334_v11 = vsel %vm648_vm3, %v8332_v58, %v8333_v53  ;;  %v8174_v33 = vmax.f32 %v17669_v21, %v8100_v2  ;;  %v8175_v42 = vmax.f32 %v17670_v17, %v8102_v9  ;;  %v7959_v16 = vadd.f32 %v16146_v3, %v15846_v10 }
 0x5be   :  { %v8538_v23 = vunpack.c.l.b16 %v8474_v15  ;;  %v8442_v63 = vmax.f32 %v8217_v13, %v8334_v11  ;;  %v8335_v38 = vrot.slane %v8220_v35, 2  ;;  %v8337_v47 = vrot.slane %v8221_v25, 2  ;;  %v16242_v13 = vpop.f32.mrf.mxu1 }
 0x5bf   :  { %v8222_v1 = vmax.f32 %v8174_v33, 0.0  ;;  %v16234_v55 = vmax.f32 %v8175_v42, 0.0  ;;  %v8176_v22 = vmax.f32 %v17671_v54, %v8106_v40  ;;  %v7965_v11 = vadd.f32 %v16178_v32, %v15856_v46  ;;  %v7974_v42 = vpop.f32.mrf.mxu0  ;;  %v17672_v32 = vld [vmem:[#allocation127_spill] sm:$0xff] }
 0x5c0   :  { %v8555_v24 = vrot.slane %v8538_v23, 4  ;;  %v16239_v58 = vsel %vm8556_vm9, %v8538_v23, %v16170_v29  ;;  %v8475_v43 = vpack.c.bf16 %v8442_v63, %v8442_v63  ;;  %v8336_v50 = vsel %vm648_vm3, %v8330_v36, %v8335_v38 }
 0x5c1   :  { %v8443_v39 = vmax.f32 %v8218_v6, %v8336_v50  ;;  %v8445_v2 = vmax.f32 %v8220_v35, %v8335_v38  ;;  %v8338_v9 = vsel %vm648_vm3, %v8333_v53, %v8337_v47  ;;  %v8446_v10 = vmax.f32 %v8221_v25, %v8337_v47  ;;  %v17673_v50 = vld [vmem:[#allocation136_spill] sm:$0xff] }
 0x5c2   :  { %v16247_v3 = vsel %vm8556_vm9, %v8555_v24, %v16166_v59  ;;  %v8444_v15 = vmax.f32 %v8219_v14, %v8338_v9  ;;  %v7963_v29 = vadd.f32 %v16160_v61, %v15850_v45  ;;  %v16253_v36 = vunpack.c.l.b16 %v8475_v43  ;;  %v16256_v59 = vpop.f32.mrf.mxu1 }
 0x5c3   :  { %v8938_v21 = vpack.c.bf16 %v8443_v39, %v8443_v39  ;;  %v9390_v33 = vpack.c.bf16 %v8445_v2, %v8445_v2  ;;  %v9391_v6 = vpack.c.bf16 %v8446_v10, %v8446_v10  ;;  %v8339_v17 = vrot.slane %v8222_v1, 2  ;;  %v7976_v2 = vpop.f32.mrf.mxu0 }
 0x5c4   :  { %v8939_v35 = vpack.c.bf16 %v8444_v15, %v8444_v15  ;;  %v8224_v53 = vmax.f32 %v8176_v22, 0.0  ;;  %v8108_v25 = vadd.f32 %v16152_v31, %v7955_v51  ;;  %v8342_v45 = vrot.slane %v16234_v55, 2  ;;  %v16274_v9 = vpop.f32.mrf.mxu1 }
 0x5c5   :  { %v9003_v14 = vunpack.c.l.b16 %v8938_v21  ;;  %v9455_v40 = vunpack.c.l.b16 %v9390_v33  ;;  %v16258_v23 = vunpack.c.l.b16 %v9391_v6  ;;  %v8110_v38 = vadd.f32 %v16162_v18, %v7957_v0 }
 0x5c6   :  { %v16261_v46 = vunpack.c.l.b16 %v8939_v35  ;;  %v8340_v61 = vrot.slane %v8224_v53, 2  ;;  %v8177_v63 = vmax.f32 %v17672_v32, %v8108_v25  ;;  %v8573_v47 = vrot.slane %v16253_v36, 4  ;;  %v17674_v25 = vld [vmem:[#allocation25_spill] sm:$0xff]  ;;  %v7978_v32 = vpop.f32.mrf.mxu0 }
 0x5c7   :  { %v9017_v31 = vrot.slane %v9003_v14, 4  ;;  %v16268_v51 = vsel %vm8556_vm9, %v9003_v14, %v16189_v30  ;;  %v9469_v54 = vrot.slane %v9455_v40, 4  ;;  %v7967_v43 = vadd.f32 %v16205_v52, %v15858_v19 }
 0x5c8   :  { %v8341_v22 = vsel %vm648_vm3, %v8339_v17, %v8340_v61  ;;  %v8225_v24 = vmax.f32 %v8177_v63, 0.0  ;;  %v8178_v39 = vmax.f32 %v17673_v50, %v8110_v38  ;;  %v9483_v0 = vrot.slane %v16258_v23, 4  ;;  %v8129_v63 = vpop.f32.mrf.mxu1  ;;  %v11535_v23 = vld [vmem:[#allocation9 + $0x120] sm:$0xff]  }
 0x5c9   :  { %v16278_v18 = vsel %vm8556_vm9, %v9017_v31, %v16185_v8  ;;  %v9470_v30 = vsel %vm8556_vm9, %v9469_v54, %v16193_v5  ;;  %v8447_v10 = vmax.f32 %v8222_v1, %v8341_v22  ;;  %v9031_v15 = vrot.slane %v16261_v46, 4  ;;  %v17675_v1 = vld [vmem:[#allocation73_spill] sm:$0xff]  ;;  %v17677_v54 = vld [vmem:[#allocation66_spill] sm:$0xff] }
 0x5ca   :  { %v8343_v21 = vrot.slane %v8225_v24, 2  ;;  %v8226_v33 = vmax.f32 %v8178_v39, 0.0  ;;  %v8112_v19 = vadd.f32 %v16173_v26, %v7959_v16  ;;  %v7969_v6 = vadd.f32 %v16224_v20, %v15862_v7  ;;  %v17676_v16 = vld [vmem:[#allocation77_spill] sm:$0xff] }
 0x5cb   :  { %v8476_v52 = vpack.c.bf16 %v8447_v10, %v8447_v10  ;;  %v8116_v35 = vadd.f32 %v16180_v37, %v7963_v29  ;;  %v8118_v8 = vadd.f32 %v16207_v41, %v7965_v11  ;;  %v7973_v40 = vadd.f32 %v7972_v34, %v17675_v1 }
 0x5cc   :  { %v8344_v17 = vsel %vm648_vm3, %v8342_v45, %v8343_v21  ;;  %v8345_v5 = vrot.slane %v8226_v33, 2  ;;  %v8179_v14 = vmax.f32 %v17674_v25, %v8112_v19  ;;  %v8120_v29 = vadd.f32 %v16226_v12, %v7967_v43  ;;  %v17678_v19 = vld [vmem:[#allocation50_spill] sm:$0xff] }
 0x5cd   :  { %v8540_v38 = vunpack.c.l.b16 %v8476_v52  ;;  %v8448_v26 = vmax.f32 %v16234_v55, %v8344_v17  ;;  %v8180_v31 = vmax.f32 %v17676_v16, %v8116_v35  ;;  %v8181_v7 = vmax.f32 %v17677_v54, %v8118_v8  ;;  %v7982_v55 = vpop.f32.mrf.mxu0  ;;  %v8131_v17 = vpop.f32.mrf.mxu1 }
 0x5ce   :  { %v8346_v37 = vsel %vm648_vm3, %v8340_v61, %v8345_v5  ;;  %v8451_v20 = vmax.f32 %v8226_v33, %v8345_v5  ;;  %v8227_v41 = vmax.f32 %v8179_v14, 0.0  ;;  %v7975_v52 = vadd.f32 %v7974_v42, %v17678_v19  ;;  %v17679_v5 = vld [vmem:[#allocation52_spill] sm:$0xff] }
 0x5cf   :  { %v8558_v11 = vrot.slane %v8540_v38, 3  ;;  %v8769_v45 = vrot.slane %v8540_v38, 7  ;;  %v8477_v22 = vpack.c.bf16 %v8448_v26, %v8448_v26  ;;  %v8449_v50 = vmax.f32 %v8224_v53, %v8346_v37  ;;  %v17680_v38 = vld [vmem:[#allocation67_spill] sm:$0xff]  ;;  %v7984_v54 = vpop.f32.mrf.mxu0  ;;  %v17683_v19 = vld [vmem:[#allocation84_spill] sm:$0xff] }
 0x5d0   :  { %v9392_v34 = vpack.c.bf16 %v8451_v20, %v8451_v20  ;;  %v8347_v39 = vrot.slane %v8227_v41, 2  ;;  %v8228_v10 = vmax.f32 %v8180_v31, 0.0  ;;  %v8229_v43 = vmax.f32 %v8181_v7, 0.0  ;;  %v8135_v7 = vpop.f32.mrf.mxu1 }
 0x5d1   :  { %v16300_v35 = vsel %vm8559_vm10, %v8558_v11, %v16247_v3  ;;  %v16304_v61 = vsel %vm8559_vm10, %v8769_v45, %v16239_v58  ;;  %v8940_v12 = vpack.c.bf16 %v8449_v50, %v8449_v50  ;;  %v7977_v25 = vadd.f32 %v7976_v2, %v17679_v5  ;;  %v17684_v5 = vld [vmem:[#allocation81_spill] sm:$0xff] }
 0x5d2   :  { %v9457_v33 = vunpack.c.l.b16 %v9392_v34  ;;  %v8348_v53 = vsel %vm648_vm3, %v8343_v21, %v8347_v39  ;;  %v8452_v8 = vmax.f32 %v8227_v41, %v8347_v39  ;;  %v16308_v14 = vunpack.c.l.b16 %v8477_v22  ;;  %v17681_v41 = vld [vmem:[#allocation100_spill] sm:$0xff] }
 0x5d3   :  { %v16310_v42 = vunpack.c.l.b16 %v8940_v12  ;;  %v8450_v1 = vmax.f32 %v8225_v24, %v8348_v53  ;;  %v8182_v3 = vmax.f32 %v17680_v38, %v8120_v29  ;;  %v8349_v31 = vrot.slane %v8228_v10, 2  ;;  %v8137_v53 = vpop.f32.mrf.mxu1 }
 0x5d4   :  { %v9471_v26 = vrot.slane %v9457_v33, 3  ;;  %v9393_v16 = vpack.c.bf16 %v8452_v8, %v8452_v8  ;;  %v8122_v58 = vadd.f32 %v16242_v13, %v7969_v6  ;;  %v8352_v20 = vrot.slane %v8229_v43, 2  ;;  %v17682_v13 = vld [vmem:[#allocation74_spill] sm:$0xff]  ;;  %v7986_v33 = vpop.f32.mrf.mxu0 }
 0x5d5   :  { %v8941_v37 = vpack.c.bf16 %v8450_v1, %v8450_v1  ;;  %v8230_v21 = vmax.f32 %v8182_v3, 0.0  ;;  %v7979_v11 = vadd.f32 %v7978_v32, %v17681_v41  ;;  %v9019_v2 = vrot.slane %v16310_v42, 3 }
 0x5d6   :  { %v16317_v45 = vsel %vm8559_vm10, %v9471_v26, %v9470_v30  ;;  %v16319_v24 = vunpack.c.l.b16 %v9393_v16  ;;  %v8183_v29 = vmax.f32 %v15918_v62, %v8122_v58  ;;  %v9221_v22 = vrot.slane %v16310_v42, 7  ;;  %v17685_v26 = vld [vmem:[#allocation68_spill] sm:$0xff]  ;;  %v17686_v58 = vld [vmem:[#allocation143_spill] sm:$0xff] }
 0x5d7   :  { %v8350_v50 = vrot.slane %v8230_v21, 2  ;;  %v7983_v6 = vadd.f32 %v7982_v55, %v17682_v13  ;;  %v8126_v34 = vadd.f32 %v16256_v59, %v7973_v40  ;;  %v16325_v39 = vunpack.c.l.b16 %v8941_v37  ;;  %v7988_v13 = vpop.f32.mrf.mxu0 }
 0x5d8   :  { %v8231_v32 = vmax.f32 %v8183_v29, 0.0  ;;  %v7985_v12 = vadd.f32 %v7984_v54, %v17683_v19  ;;  %v8128_v30 = vadd.f32 %v16274_v9, %v7975_v52  ;;  %v9485_v8 = vrot.slane %v16319_v24, 3  ;;  %v11536_v24 = vld [vmem:[#allocation9 + $0x1a0] sm:$0xff]  }
 0x5d9   :  { %v8351_v62 = vsel %vm648_vm3, %v8349_v31, %v8350_v50  ;;  %v8184_v1 = vmax.f32 %v17684_v5, %v8126_v34  ;;  %v8130_v38 = vadd.f32 %v8129_v63, %v7977_v25  ;;  %v8132_v40 = vadd.f32 %v8131_v17, %v7979_v11  ;;  %v17687_v63 = vld [vmem:[#allocation54_spill] sm:$0xff]  ;;  %v17688_v25 = vld [vmem:[#allocation79_spill] sm:$0xff] }
 0x5da   :  { %v8453_v3 = vmax.f32 %v8228_v10, %v8351_v62  ;;  %v8353_v55 = vrot.slane %v8231_v32, 2  ;;  %v8185_v59 = vmax.f32 %v17685_v26, %v8128_v30  ;;  %v8136_v54 = vadd.f32 %v8135_v7, %v7983_v6  ;;  %v8139_v30 = vpop.f32.mrf.mxu1 }
 0x5db   :  { %v8232_v16 = vmax.f32 %v8184_v1, 0.0  ;;  %v8186_v37 = vmax.f32 %v17686_v58, %v8130_v38  ;;  %v8138_v41 = vadd.f32 %v8137_v53, %v7985_v12  ;;  %v8187_v31 = vmax.f32 %v15937_v60, %v8132_v40  ;;  %v17689_v1 = vld [vmem:[#allocation96_spill] sm:$0xff] }
 0x5dc   :  { %v8478_v9 = vpack.c.bf16 %v8453_v3, %v8453_v3  ;;  %v8354_v52 = vsel %vm648_vm3, %v8352_v20, %v8353_v55  ;;  %v8233_v29 = vmax.f32 %v8185_v59, 0.0  ;;  %v7987_v10 = vadd.f32 %v7986_v33, %v17687_v63  ;;  %v17690_v20 = vld [vmem:[#allocation107_spill] sm:$0xff] }
 0x5dd   :  { %v8454_v19 = vmax.f32 %v8229_v43, %v8354_v52  ;;  %v8355_v34 = vrot.slane %v8232_v16, 2  ;;  %v8188_v62 = vmax.f32 %v17688_v25, %v8136_v54  ;;  %v8234_v5 = vmax.f32 %v8186_v37, 0.0  ;;  %v8141_v54 = vpop.f32.mrf.mxu1 }
 0x5de   :  { %v8542_v17 = vunpack.c.l.b16 %v8478_v9  ;;  %v8357_v11 = vrot.slane %v8233_v29, 2  ;;  %v8189_v7 = vmax.f32 %v17689_v1, %v8138_v41  ;;  %v7989_v53 = vadd.f32 %v7988_v13, %v17690_v20 }
 0x5df   :  { %v8356_v6 = vsel %vm648_vm3, %v8350_v50, %v8355_v34  ;;  %v8457_v12 = vmax.f32 %v8232_v16, %v8355_v34  ;;  %v8235_v38 = vmax.f32 %v8187_v31, 0.0  ;;  %v8479_v33 = vpack.c.bf16 %v8454_v19, %v8454_v19 }
 0x5e0   :  { %v8561_v3 = vrot.slane %v8542_v17, 2  ;;  %v8771_v60 = vrot.slane %v8542_v17, 6  ;;  %v8455_v43 = vmax.f32 %v8230_v21, %v8356_v6  ;;  %v8358_v26 = vsel %vm648_vm3, %v8353_v55, %v8357_v11 }
 0x5e1   :  { %v9394_v59 = vpack.c.bf16 %v8457_v12, %v8457_v12  ;;  %v8456_v40 = vmax.f32 %v8231_v32, %v8358_v26  ;;  %v8458_v58 = vmax.f32 %v8233_v29, %v8357_v11  ;;  %v8359_v41 = vrot.slane %v8234_v5, 2  ;;  %v17691_v11 = vld [vmem:[#allocation145_spill] sm:$0xff] }
 0x5e2   :  { %v16344_v37 = vsel %vm8562_vm11, %v8561_v3, %v16300_v35  ;;  %v16348_v50 = vsel %vm8562_vm11, %v8771_v60, %v16304_v61  ;;  %v8942_v16 = vpack.c.bf16 %v8455_v43, %v8455_v43  ;;  %v8236_v13 = vmax.f32 %v8188_v62, 0.0  ;;  %v17693_v3 = vld [vmem:[#allocation78_spill] sm:$0xff]  ;;  %v17694_v60 = vld [vmem:[#allocation36_spill] sm:$0xff] }
 0x5e3   :  { %v9459_v9 = vunpack.c.l.b16 %v9394_v59  ;;  %v8943_v52 = vpack.c.bf16 %v8456_v40, %v8456_v40  ;;  %v9395_v21 = vpack.c.bf16 %v8458_v58, %v8458_v58  ;;  %v8237_v31 = vmax.f32 %v8189_v7, 0.0 }
 0x5e4   :  { %v16350_v55 = vunpack.c.l.b16 %v8942_v16  ;;  %v8140_v32 = vadd.f32 %v8139_v30, %v7987_v10  ;;  %v8142_v29 = vadd.f32 %v8141_v54, %v7989_v53  ;;  %v16352_v19 = vunpack.c.l.b16 %v8479_v33  ;;  %v17692_v30 = vld [vmem:[#allocation35_spill] sm:$0xff] }
 0x5e5   :  { %v9473_v34 = vrot.slane %v9459_v9, 2  ;;  %v8362_v35 = vrot.slane %v8235_v38, 2  ;;  %v8360_v63 = vrot.slane %v8236_v13, 2  ;;  %v16354_v25 = vunpack.c.l.b16 %v8943_v52 }
 0x5e6   :  { %v16356_v61 = vunpack.c.l.b16 %v9395_v21  ;;  %v8363_v17 = vrot.slane %v8237_v31, 2  ;;  %v8190_v1 = vmax.f32 %v17691_v11, %v8140_v32  ;;  %v9021_v6 = vrot.slane %v16350_v55, 2 }
 0x5e7   :  { %v9474_v62 = vsel %vm8562_vm11, %v9473_v34, %v16317_v45  ;;  %v8361_v10 = vsel %vm648_vm3, %v8359_v41, %v8360_v63  ;;  %v8191_v7 = vmax.f32 %v17692_v30, %v8142_v29  ;;  %v17695_v43 = vrot.slane %v17694_v60, 7 }
 0x5e8   :  { %v8459_v12 = vmax.f32 %v8234_v5, %v8361_v10  ;;  %v8364_v20 = vsel %vm648_vm3, %v8362_v35, %v8363_v17  ;;  %v8238_v53 = vmax.f32 %v8190_v1, 0.0  ;;  %v17696_v40 = vrot.slane %v16073_v56, 6 }
 0x5e9   :  { %v8568_v26 = vsel %vm8547_vm6, %v17695_v43, %v17693_v3  ;;  %v8460_v33 = vmax.f32 %v8235_v38, %v8364_v20  ;;  %v8239_v59 = vmax.f32 %v8191_v7, 0.0  ;;  %v8575_v58 = vrot.slane %v16308_v14, 3 }
 0x5ea   :  { %v8570_v45 = vsel %vm8550_vm7, %v17696_v40, %v8568_v26  ;;  %v8480_v54 = vpack.c.bf16 %v8459_v12, %v8459_v12  ;;  %v8365_v16 = vrot.slane %v8238_v53, 2  ;;  %v8577_v41 = vrot.slane %v16352_v19, 2 }
 0x5eb   :  { %v8572_v5 = vsel %vm8553_vm8, %v8571_v57, %v8570_v45  ;;  %v8481_v9 = vpack.c.bf16 %v8460_v33, %v8460_v33  ;;  %v8367_v52 = vrot.slane %v8239_v59, 2  ;;  %v17697_v21 = vrot.slane %v17693_v3, 4 }
 0x5ec   :  { %v8574_v38 = vsel %vm8556_vm9, %v8573_v47, %v8572_v5  ;;  %v17698_v32 = vrot.slane %v17694_v60, 3  ;;  %v8544_v34 = vunpack.c.l.b16 %v8480_v54  ;;  %v8366_v35 = vsel %vm648_vm3, %v8360_v63, %v8365_v16 }
 0x5ed   :  { %v8463_v11 = vmax.f32 %v8238_v53, %v8365_v16  ;;  %v8576_v57 = vsel %vm8559_vm10, %v8575_v58, %v8574_v38  ;;  %v8461_v1 = vmax.f32 %v8236_v13, %v8366_v35  ;;  %v8368_v10 = vsel %vm648_vm3, %v8363_v17, %v8367_v52 }
 0x5ee   :  { %v8777_v29 = vsel %vm8547_vm6, %v17698_v32, %v17697_v21  ;;  %v8464_v30 = vmax.f32 %v8239_v59, %v8367_v52  ;;  %v8545_v7 = vunpack.c.l.b16 %v8481_v9  ;;  %v9223_v12 = vrot.slane %v16350_v55, 6  ;;  %v11523_v21 = vld [vmem:[#allocation9 + $0x138] sm:$0xff]  }
 0x5ef   :  { %v8564_v47 = vrot.slane %v8544_v34, 1  ;;  %v9396_v20 = vpack.c.bf16 %v8463_v11, %v8463_v11  ;;  %v8462_v3 = vmax.f32 %v8237_v31, %v8368_v10  ;;  %v8944_v43 = vpack.c.bf16 %v8461_v1, %v8461_v1  ;;  %v17701_v1 = vld [vmem:[#allocation123_spill] sm:$0xff] }
 0x5f0   :  { %v9397_v60 = vpack.c.bf16 %v8464_v30, %v8464_v30  ;;  %v8578_v26 = vsel %vm8562_vm11, %v8577_v41, %v8576_v57  ;;  %v8579_v33 = vrot.slane %v8545_v7, 1  ;;  %v8773_v40 = vrot.slane %v8544_v34, 5  ;;  %v11525_v34 = vld [vmem:[#allocation9 + $0x170] sm:$0xff]  }
 0x5f1   :  { %v9461_v63 = vunpack.c.l.b16 %v9396_v20  ;;  %v17699_v53 = vrot.slane %v16073_v56, 2  ;;  %v8783_v17 = vrot.slane %v16308_v14, 7  ;;  %v16394_v59 = vunpack.c.l.b16 %v8944_v43  ;;  %v17700_v57 = vld [vmem:[#allocation53_spill] sm:$0xff]  ;;  %v17703_v20 = vld [vmem:[#allocation87_spill] sm:$0xff] }
 0x5f2   :  { %v8945_v45 = vpack.c.bf16 %v8462_v3, %v8462_v3  ;;  %v8580_v58 = vsel %vm8565_vm12, %v8579_v33, %v8578_v26  ;;  %v8785_v56 = vrot.slane %v16352_v19, 6  ;;  %v9487_v41 = vrot.slane %v16356_v61, 2  ;;  %v11526_v33 = vld [vmem:[#allocation9 + $0x1f0] sm:$0xff]   ;;  %v11540_v61 = vld [vmem:[#allocation9 + $0x198] sm:$0xff]  }
 0x5f3   :  { %v8779_v13 = vsel %vm8550_vm7, %v17699_v53, %v8777_v29  ;;  %v9475_v54 = vrot.slane %v9461_v63, 1  ;;  %v8582_v16 = vpack.c.b16 %v8580_v58, %v8580_v58  ;;  %v9023_v14 = vrot.slane %v16394_v59, 1 }
 0x5f4   :  { %v8781_v31 = vsel %vm8553_vm8, %v8780_v44, %v8779_v13  ;;  %v16405_v9 = vunpack.c.l.b16 %v9397_v60  ;;  %v8787_v44 = vrot.slane %v8545_v7, 5  ;;  %v9225_v19 = vrot.slane %v16394_v59, 5  ;;  %v11527_v59 = vld [vmem:[#allocation9 + $0x130] sm:$0xff]  }
 0x5f5   :  { %v8782_v5 = vsel %vm8556_vm9, %v16253_v36, %v8781_v31  ;;  %v16409_v38 = vsel %vm8565_vm12, %v9475_v54, %v9474_v62  ;;  %8713 = vmatprep.mubr.bf16.mxu0 %v8582_v16  ;;  %v8566_v36 = vsel %vm8565_vm12, %v8564_v47, %v16344_v37  ;;  %v8774_v29 = vsel %vm8565_vm12, %v8773_v40, %v16348_v50  ;;  %v11524_v47 = vld [vmem:[#allocation9 + $0x1b8] sm:$0xff]   ;;  %v11529_v54 = vld [vmem:[#allocation9 + $0x168] sm:$0xff]  }
 0x5f6   :  { %v8784_v52 = vsel %vm8559_vm10, %v8783_v17, %v8782_v5  ;;  %v8581_v32 = vpack.c.b16 %v8566_v36, %v8566_v36  ;;  %v9010_v35 = vunpack.c.l.b16 %v8945_v45  ;;  %v8789_v62 = vpack.c.b16 %v8774_v29, %v8774_v29  ;;  %v11539_v29 = vld [vmem:[#allocation9 + $0x118] sm:$0xff]  }
 0x5f7   :  { %v8786_v4 = vsel %vm8562_vm11, %v8785_v56, %v8784_v52  ;;  %v17702_v10 = vrot.slane %v17701_v1, 7  ;;  %v9033_v7 = vrot.slane %v16325_v39, 3  ;;  %v17704_v3 = vrot.slane %v17703_v20, 6  ;;  %v11531_v52 = vld [vmem:[#allocation9 + $0x128] sm:$0xff]  }
 0x5f8   :  { %v8788_v11 = vsel %vm8565_vm12, %v8787_v44, %v8786_v4  ;;  %8714 = vmatmul.mubr.bf16.vlgmr.msra.gmra.mxu0 %v8581_v32  ;;  %v9035_v50 = vrot.slane %v16354_v25, 2  ;;  %v9037_v60 = vrot.slane %v9010_v35, 1  ;;  %v17705_v40 = vrot.slane %v17700_v57, 4  ;;  %v11534_v32 = vld [vmem:[#allocation9 + $0x1e0] sm:$0xff]  }
 0x5f9   :  { %v9026_v30 = vsel %vm8547_vm6, %v17702_v10, %v17700_v57  ;;  %v8790_v37 = vpack.c.b16 %v8788_v11, %v8788_v11  ;;  %10593 = vmatpush3.bf16.msra.mxu0 %v11523_v21  ;;  %v17706_v63 = vrot.slane %v17701_v1, 3  ;;  %v9235_v13 = vrot.slane %v16325_v39, 7  ;;  %v11532_v21 = vld [vmem:[#allocation9 + $0x1a8] sm:$0xff]   ;;  %v11549_v10 = vld [vmem:[#allocation9 + $0x140] sm:$0xff]  }
 0x5fa   :  { %v9028_v43 = vsel %vm8550_vm7, %v17704_v3, %v9026_v30  ;;  %v9237_v17 = vrot.slane %v16354_v25, 6  ;;  %10594 = vmatprep.subr.bf16.mxu0 %v11525_v34  ;;  %v9239_v31 = vrot.slane %v9010_v35, 5  ;;  %v9020_v39 = vsel %vm8559_vm10, %v9019_v2, %v16278_v18  ;;  %v11528_v2 = vld [vmem:[#allocation9 + $0x1b0] sm:$0xff]   ;;  %v11545_v11 = vld [vmem:[#allocation9 + $0x148] sm:$0xff]   ;;  %v11554_v3 = vld [vmem:[#allocation9 + $0x238] sm:$0xff]  }
 0x5fb   :  { %v9030_v26 = vsel %vm8553_vm8, %v9029_v48, %v9028_v43  ;;  %v9229_v53 = vsel %vm8547_vm6, %v17706_v63, %v17705_v40  ;;  %8921 = vmatprep.mubr.bf16.mxu1 %v8790_v37  ;;  %v17707_v48 = vrot.slane %v17703_v20, 2  ;;  %v9222_v5 = vsel %vm8559_vm10, %v9221_v22, %v16268_v51  ;;  %v11530_v22 = vld [vmem:[#allocation9 + $0x1e8] sm:$0xff]   ;;  %v11541_v34 = vld [vmem:[#allocation9 + $0x150] sm:$0xff]   ;;  %v11551_v37 = vld [vmem:[#allocation9 + $0x100] sm:$0xff]  }
 0x5fc   :  { %v9032_v45 = vsel %vm8556_vm9, %v9031_v15, %v9030_v26  ;;  %8922 = vmatmul.mubr.bf16.vlgmr.msra.gmra.mxu1 %v8789_v62  ;;  %v9022_v15 = vsel %vm8562_vm11, %v9021_v6, %v9020_v39  ;;  %v9489_v6 = vrot.slane %v16405_v9, 1  ;;  %v9484_v55 = vsel %vm8556_vm9, %v9483_v0, %v16216_v28  ;;  %v11537_v0 = vld [vmem:[#allocation9 + $0x158] sm:$0xff]   ;;  %v11543_v35 = vld [vmem:[#allocation9 + $0x110] sm:$0xff]   ;;  %v11546_v57 = vld [vmem:[#allocation9 + $0x1c8] sm:$0xff]  }
 0x5fd   :  { %v9231_v58 = vsel %vm8550_vm7, %v17707_v48, %v9229_v53  ;;  %v9034_v25 = vsel %vm8559_vm10, %v9033_v7, %v9032_v45  ;;  %10615 = vmatpush3.bf16.msra.mxu1 %v11524_v47  ;;  %v16462_v49 = vsel %vm8565_vm12, %v9023_v14, %v9022_v15  ;;  %10595 = vmatpush3.bf16.msra.mxu0 %v11527_v59  ;;  %v11533_v14 = vld [vmem:[#allocation9 + $0x160] sm:$0xff]   ;;  %v11544_v62 = vld [vmem:[#allocation9 + $0x190] sm:$0xff]   ;;  %v11547_v1 = vld [vmem:[#allocation9 + $0x108] sm:$0xff]   ;;  %v11822_v15 = vmov 0.0  }
 0x5fe   :  { %v9233_v16 = vsel %vm8553_vm8, %v9232_v27, %v9231_v58  ;;  %v9036_v56 = vsel %vm8562_vm11, %v9035_v50, %v9034_v25  ;;  %v9224_v27 = vsel %vm8562_vm11, %v9223_v12, %v9222_v5  ;;  %10616 = vmatprep.subr.bf16.mxu1 %v11526_v33  ;;  %10596 = vmatprep.subr.bf16.mxu0 %v11529_v54  ;;  %v11548_v30 = vld [vmem:[#allocation9 + $0x188] sm:$0xff]   ;;  %v11550_v7 = vld [vmem:[#allocation9 + $0x1c0] sm:$0xff]   ;;  %v11553_v47 = vld [vmem:[#allocation9 + $0x278] sm:$0xff]  }
 0x5ff   :  { %v9234_v18 = vsel %vm8556_vm9, %v16261_v46, %v9233_v16  ;;  %v9038_v42 = vsel %vm8565_vm12, %v9037_v60, %v9036_v56  ;;  %v16472_v44 = vsel %vm8565_vm12, %v9225_v19, %v9224_v27  ;;  %v9486_v9 = vsel %vm8559_vm10, %v9485_v8, %v9484_v55  ;;  %v11538_v8 = vld [vmem:[#allocation9 + $0x1d8] sm:$0xff]   ;;  %v11552_v20 = vld [vmem:[#allocation9 + $0x180] sm:$0xff]   ;;  %v11555_v50 = vld [vmem:[#allocation9 + $0x270] sm:$0xff]  }
 0x600   :  { %v9236_v51 = vsel %vm8559_vm10, %v9235_v13, %v9234_v18  ;;  %v9040_v4 = vpack.c.b16 %v9038_v42, %v9038_v42  ;;  %v9488_v19 = vsel %vm8562_vm11, %v9487_v41, %v9486_v9  ;;  %v11542_v41 = vld [vmem:[#allocation9 + $0x1d0] sm:$0xff]   ;;  %v9039_v43 = vpack.c.b16 %v16462_v49, %v16462_v49  ;;  %v11557_v40 = vld [vmem:[#allocation9 + $0x268] sm:$0xff]   ;;  %v11559_v53 = vld [vmem:[#allocation9 + $0x260] sm:$0xff]  }
 0x601   :  { %v9238_v46 = vsel %vm8562_vm11, %v9237_v17, %v9236_v51  ;;  %10617 = vmatpush3.bf16.msra.mxu1 %v11528_v2  ;;  %10597 = vmatpush3.bf16.msra.mxu0 %v11531_v52  ;;  %v9490_v28 = vsel %vm8565_vm12, %v9489_v6, %v9488_v19  ;;  %v9241_v26 = vpack.c.b16 %v16472_v44, %v16472_v44  ;;  %v11556_v33 = vld [vmem:[#allocation9 + $0x230] sm:$0xff]   ;;  %v11558_v63 = vld [vmem:[#allocation9 + $0x228] sm:$0xff]   ;;  %v11560_v13 = vld [vmem:[#allocation9 + $0x220] sm:$0xff]  }
 0x602   :  { %v9240_v12 = vsel %vm8565_vm12, %v9239_v31, %v9238_v46  ;;  %9171 = vmatprep.mubr.bf16.mxu0 %v9040_v4  ;;  %10618 = vmatprep.subr.bf16.mxu1 %v11530_v22  ;;  %v9492_v60 = vpack.c.b16 %v9490_v28, %v9490_v28  ;;  %v11561_v17 = vld [vmem:[#allocation9 + $0x258] sm:$0xff]   ;;  %v11563_v45 = vld [vmem:[#allocation9 + $0x250] sm:$0xff]   ;;  %v11565_v58 = vld [vmem:[#allocation9 + $0x248] sm:$0xff]   ;;  %v9491_v25 = vpack.c.b16 %v16409_v38, %v16409_v38 }
 0x603   :  { %v9242_v36 = vpack.c.b16 %v9240_v12, %v9240_v12  ;;  %10598 = vmatprep.subr.bf16.mxu0 %v11533_v14  ;;  %v11562_v59 = vld [vmem:[#allocation9 + $0x218] sm:$0xff]   ;;  %v11564_v48 = vld [vmem:[#allocation9 + $0x210] sm:$0xff]   ;;  %v11566_v31 = vld [vmem:[#allocation9 + $0x208] sm:$0xff]  }
 0x604   :  { %v11567_v54 = vld [vmem:[#allocation9 + $0x240] sm:$0xff]   ;;  %v11570_v5 = vld [vmem:[#allocation12 + $0x30] sm:$0xff]   ;;  %v11571_v56 = vld [vmem:[#allocation12 + $0x28] sm:$0xff]  }
 0x605   :  { %9373 = vmatprep.mubr.bf16.mxu1 %v9242_v36  ;;  %10619 = vmatpush3.bf16.msra.mxu1 %v11532_v21  ;;  %v11568_v39 = vld [vmem:[#allocation9 + $0x200] sm:$0xff]   ;;  %v11574_v2 = vld [vmem:[#allocation12 + $0x10] sm:$0xff]   ;;  %v11575_v49 = vld [vmem:[#allocation12 + $0x8] sm:$0xff]  }
 0x606   :  { %10620 = vmatprep.subr.bf16.mxu1 %v11534_v32  ;;  %10599 = vmatpush3.bf16.msra.mxu0 %v11535_v23  ;;  %v11569_v16 = vld [vmem:[#allocation12 + $0x38] sm:$0xff]   ;;  %v11572_v18 = vld [vmem:[#allocation12 + $0x20] sm:$0xff]   ;;  %v11579_v51 = vld [vmem:[#allocation15 + $0x28] sm:$0xff]  }
 0x607   :  { %10600 = vmatprep.subr.bf16.mxu0 %v11537_v0  ;;  %v11573_v38 = vld [vmem:[#allocation12 + $0x18] sm:$0xff]   ;;  %v11576_v27 = vld [vmem:[#allocation12] sm:$0xff]  }
 0x608   :  { %v11577_v6 = vld [vmem:[#allocation15 + $0x38] sm:$0xff]   ;;  %v11578_v42 = vld [vmem:[#allocation15 + $0x30] sm:$0xff]   ;;  %v11580_v22 = vld [vmem:[#allocation15 + $0x20] sm:$0xff]  }
 0x609   :  { %10621 = vmatpush3.bf16.msra.mxu1 %v11536_v24  ;;  %v11581_v52 = vld [vmem:[#allocation15 + $0x18] sm:$0xff]   ;;  %v11582_v4 = vld [vmem:[#allocation15 + $0x10] sm:$0xff]  }
 0x60a   :  { %10622 = vmatprep.subr.bf16.mxu1 %v11538_v8  ;;  %10601 = vmatpush3.bf16.msra.mxu0 %v11539_v29 }
 0x60b   :  { %10602 = vmatprep.subr.bf16.mxu0 %v11541_v34 }
 0x60d   :  { %10623 = vmatpush3.bf16.msra.mxu1 %v11540_v61  ;;  %v10457_v61 = vld [vmem:[#allocation10] ss:$0 sm:$0xff] }
 0x60e   :  { %10624 = vmatprep.subr.bf16.mxu1 %v11542_v41  ;;  %10603 = vmatpush3.bf16.msra.mxu0 %v11543_v35 }
 0x60f   :  { %10604 = vmatprep.subr.bf16.mxu0 %v11545_v11 }
 0x611   :  { %10625 = vmatpush3.bf16.msra.mxu1 %v11544_v62 }
 0x612   :  { %10626 = vmatprep.subr.bf16.mxu1 %v11546_v57  ;;  %10605 = vmatpush3.bf16.msra.mxu0 %v11547_v1 }
 0x613   :  { %10606 = vmatprep.subr.bf16.mxu0 %v11549_v10 }
 0x615   :  { %10627 = vmatpush3.bf16.msra.mxu1 %v11548_v30 }
 0x616   :  { %10628 = vmatprep.subr.bf16.mxu1 %v11550_v7  ;;  %10607 = vmatpush3.bf16.msra.mxu0 %v11551_v37 }
 0x617   :  { %10636 = vmatprep.subr.bf16.mxu0 %v11553_v47 }
 0x619   :  { %10629 = vmatpush3.bf16.msra.mxu1 %v11552_v20  ;;  %9172 = vmatmul.mubr.bf16.vlgmr.msra.gmra.mxu0 %v9039_v43 }
 0x61a   :  { %10637 = vmatpush3.bf16.msra.mxu0 %v11554_v3  ;;  %9623 = vmatprep.mubr.bf16.mxu0 %v9492_v60  ;;  %v11583_v60 = vld [vmem:[#allocation15 + $0x8] sm:$0xff]  }
 0x61b   :  { %10638 = vmatprep.subr.bf16.mxu0 %v11555_v50  ;;  %10676 = vmatprep.subr.bf16.mxu1 %v11822_v15 }
 0x61c   :  { %9374 = vmatmul.mubr.bf16.vlgmr.msra.gmra.mxu1 %v9241_v26  ;;  %v11584_v26 = vld [vmem:[#allocation15] sm:$0xff]  }
 0x61d   :  { %10677 = vmatpush3.bf16.msra.mxu1 %v11569_v16  ;;  %10692 = vmatprep.mubr.msk.bf16.mxu1 %vm11823_vm13, %v11822_v15 }
 0x61e   :  { %10639 = vmatpush3.bf16.msra.mxu0 %v11556_v33  ;;  %10678 = vmatprep.subr.bf16.mxu1 %v11822_v15  ;;  %v10522_v33 = vld [vmem:[#allocation13] ss:$0 sm:$0xff] }
 0x61f   :  { %10640 = vmatprep.subr.bf16.mxu0 %v11557_v40 }
 0x621   :  { %10679 = vmatpush3.bf16.msra.mxu1 %v11570_v5 }
 0x622   :  { %10641 = vmatpush3.bf16.msra.mxu0 %v11558_v63  ;;  %10680 = vmatprep.subr.bf16.mxu1 %v11822_v15 }
 0x623   :  { %10642 = vmatprep.subr.bf16.mxu0 %v11559_v53 }
 0x625   :  { %10681 = vmatpush3.bf16.msra.mxu1 %v11571_v56 }
 0x626   :  { %10643 = vmatpush3.bf16.msra.mxu0 %v11560_v13  ;;  %10682 = vmatprep.subr.bf16.mxu1 %v11822_v15 }
 0x627   :  { %10644 = vmatprep.subr.bf16.mxu0 %v11561_v17 }
 0x629   :  { %10683 = vmatpush3.bf16.msra.mxu1 %v11572_v18 }
 0x62a   :  { %10645 = vmatpush3.bf16.msra.mxu0 %v11562_v59  ;;  %10684 = vmatprep.subr.bf16.mxu1 %v11822_v15 }
 0x62b   :  { %10646 = vmatprep.subr.bf16.mxu0 %v11563_v45 }
 0x62d   :  { %10685 = vmatpush3.bf16.msra.mxu1 %v11573_v38 }
 0x62e   :  { %10647 = vmatpush3.bf16.msra.mxu0 %v11564_v48  ;;  %10686 = vmatprep.subr.bf16.mxu1 %v11822_v15  ;;  %v10531_v48 = vld [vmem:[#allocation16] ss:$0 sm:$0xff] }
 0x62f   :  { %10648 = vmatprep.subr.bf16.mxu0 %v11565_v58 }
 0x631   :  { %10687 = vmatpush3.bf16.msra.mxu1 %v11574_v2 }
 0x632   :  { %10649 = vmatpush3.bf16.msra.mxu0 %v11566_v31  ;;  %10688 = vmatprep.subr.bf16.mxu1 %v11822_v15 }
 0x633   :  { %10650 = vmatprep.subr.bf16.mxu0 %v11567_v54 }
 0x635   :  { %10689 = vmatpush3.bf16.msra.mxu1 %v11575_v49 }
 0x636   :  { %10651 = vmatpush3.bf16.msra.mxu0 %v11568_v39  ;;  %10690 = vmatprep.subr.bf16.mxu1 %v11822_v15 }
 0x637   :  { %10696 = vmatprep.subr.bf16.mxu0 %v11822_v15 }
 0x639   :  { %9624 = vmatmul.mubr.bf16.vlgmr.msra.gmra.mxu0 %v9491_v25  ;;  %10691 = vmatpush3.bf16.msra.mxu1 %v11576_v27 }
 0x63a   :  { %10712 = vmatprep.mubr.msk.bf16.mxu0 %vm11823_vm13, %v11822_v15  ;;  %10697 = vmatpush3.bf16.msra.mxu0 %v11577_v6 }
 0x63b   :  { %10698 = vmatprep.subr.bf16.mxu0 %v11822_v15 }
 0x63e   :  { %10699 = vmatpush3.bf16.msra.mxu0 %v11578_v42 }
 0x63f   :  { %10700 = vmatprep.subr.bf16.mxu0 %v11822_v15 }
 0x642   :  { %10701 = vmatpush3.bf16.msra.mxu0 %v11579_v51 }
 0x643   :  { %10702 = vmatprep.subr.bf16.mxu0 %v11822_v15 }
 0x646   :  { %10703 = vmatpush3.bf16.msra.mxu0 %v11580_v22 }
 0x647   :  { %10704 = vmatprep.subr.bf16.mxu0 %v11822_v15 }
 0x64a   :  { %10705 = vmatpush3.bf16.msra.mxu0 %v11581_v52 }
 0x64b   :  { %10706 = vmatprep.subr.bf16.mxu0 %v11822_v15 }
 0x64e   :  { %10707 = vmatpush3.bf16.msra.mxu0 %v11582_v4 }
 0x64f   :  { %10708 = vmatprep.subr.bf16.mxu0 %v11822_v15 }
 0x652   :  { %10709 = vmatpush3.bf16.msra.mxu0 %v11583_v60 }
 0x653   :  { %10710 = vmatprep.subr.bf16.mxu0 %v11822_v15 }
 0x656   :  { %10711 = vmatpush3.bf16.msra.mxu0 %v11584_v26 }
 0x6b8   :  { %v10564_v46 = vpop.f32.mrf.mxu0 }
 0x6ba   :  { %v10565_v14 = vpop.f32.mrf.mxu0 }
 0x6bb   :  { %v10566_v34 = vadd.f32 %v10565_v14, %v10564_v46 }
 0x6bc   :  { %v10586_v44 = vpop.f32.mrf.mxu1  ;;  %v10567_v55 = vpop.f32.mrf.mxu0 }
 0x6bd   :  { %v8727_v41 = vadd.f32 %v10566_v34, %v10457_v61 }
 0x6be   :  { %v10587_v12 = vpop.f32.mrf.mxu1  ;;  %v10568_v9 = vpop.f32.mrf.mxu0 }
 0x6bf   :  { %v10588_v35 = vadd.f32 %v10587_v12, %v10586_v44 }
 0x6c0   :  { %v10589_v36 = vpop.f32.mrf.mxu1 }
 0x6c1   :  { %v8929_v62 = vadd.f32 %v10588_v35, %v8727_v41 }
 0x6c2   :  { %v10590_v21 = vpop.f32.mrf.mxu1 }
 0x6d9   :  { %v10608_v19 = vpop.f32.mrf.mxu0 }
 0x6db   :  { %v10609_v32 = vpop.f32.mrf.mxu0 }
 0x6dc   :  { %v10630_v23 = vpop.f32.mrf.mxu1  ;;  %v10610_v11 = vadd.f32 %v10609_v32, %v10608_v19 }
 0x6dd   :  { %v10611_v28 = vpop.f32.mrf.mxu0 }
 0x6de   :  { %v10631_v0 = vpop.f32.mrf.mxu1  ;;  %v9179_v57 = vadd.f32 %v10610_v11, %v8929_v62 }
 0x6df   :  { %v10612_v24 = vpop.f32.mrf.mxu0  ;;  %v10632_v10 = vadd.f32 %v10631_v0, %v10630_v23 }
 0x6e0   :  { %v10633_v8 = vpop.f32.mrf.mxu1 }
 0x6e1   :  { %v9381_v7 = vadd.f32 %v10632_v10, %v9179_v57 }
 0x6e2   :  { %v10634_v29 = vpop.f32.mrf.mxu1 }
 0x6f9   :  { %v10652_v1 = vpop.f32.mrf.mxu0 }
 0x6fb   :  { %v10653_v30 = vpop.f32.mrf.mxu0 }
 0x6fc   :  { %v10654_v37 = vadd.f32 %v10653_v30, %v10652_v1 }
 0x6fd   :  { %v10655_v47 = vpop.f32.mrf.mxu0 }
 0x6fe   :  { %v9631_v20 = vadd.f32 %v10654_v37, %v9381_v7 }
 0x6ff   :  { %v10656_v3 = vpop.f32.mrf.mxu0 }
 0x700   :  { %v9632_v43 = vmax.f32 %v9631_v20, 0.0 }
 0x702   :  { %v9633_v50 = vpack.c.bf16 %v9632_v43, %v9632_v43 }
 0x704   :  { %10693 = vmatmul.mubr.bf16.vlgmr.msra.gmra.mxu1 %v9633_v50 }
 0x7c4   :  { %v9739_v40 = vpop.f32.mrf.mxu1 }
 0x7c5   :  { %v9740_v63 = vadd.f32 %v10522_v33, %v9739_v40 }
 0x7c6   :  { %v10694_v53 = vpop.f32.mrf.mxu1 }
 0x7c7   :  { %v9745_v13 = vmax.f32 %v9740_v63, 0.0 }
 0x7c8   :  { %v9742_v17 = vpop.f32.mrf.mxu1 }
 0x7c9   :  { %v9746_v59 = vpack.c.bf16 %v9745_v13, %v9745_v13 }
 0x7ca   :  { %v10695_v45 = vpop.f32.mrf.mxu1 }
 0x7cb   :  { %10713 = vmatmul.mubr.bf16.vlgmr.msra.gmra.mxu0 %v9746_v59 }
 0x88b   :  { %v9852_v58 = vpop.f32.mrf.mxu0 }
 0x88c   :  { %v9853_v31 = vadd.f32 %v10531_v48, %v9852_v58 }
 0x88d   :  { %v10714_v54 = vpop.f32.mrf.mxu0 }
 0x88e   :  { %9858 = vst [vmem:[%s16524_s11] sm:$0xff] %v9853_v31 }
 0x88f   :  { %v9855_v39 = vpop.f32.mrf.mxu0 }
 0x891   :  { %v10715_v25 = vpop.f32.mrf.mxu0 }
 0x892   :  { %9863 = vsyncpa [#allocation3], 1 }
 0x893   :  { %9864 = vsyncpa [#allocation5], 1 }
 0x894   :  { %9865 = vsyncpa [#allocation8], 1 }
 0x895   :  { %9866 = vsyncpa [#allocation11], 1 }
 0x896   :  { %9867 = vsyncpa [#allocation14], 1 }
 0x897   :  { %9868 = vsyncpa [#allocation17], 1 }

</bundles_post_ra>
